<compile_context>
chip_gen: v7x
topology: tpu7x:2x2x1
jax: 0.10.0
libtpu: 0.0.40
codegen_flags: <defaults>
</compile_context>

<pallas_src>
import jax
import jax.numpy as jnp
import numpy as np
from jax.experimental import pallas as pl
from jax.experimental.pallas import tpu as pltpu

GLOB_N = 2048  # hidden width, matches the module's global `glob_n`


def _round_up(x, m):
    return ((x + m - 1) // m) * m


def _ffn_kernel(x_ref, w1_ref, b1_ref, w2_ref, b2_ref, o_ref):
    # fc1 on the MXU (operands may be bf16), f32 accumulation.
    h = jnp.dot(x_ref[...], w1_ref[...], preferred_element_type=jnp.float32)
    # bias + ReLU in f32 on the VPU (fast path on all generations incl. v5e)
    h = jnp.maximum(h + b1_ref[...], 0.0)
    # fc2: cast activation to the MXU operand dtype, accumulate in f32.
    y = jnp.dot(h.astype(w2_ref.dtype), w2_ref[...],
                preferred_element_type=jnp.float32)
    o_ref[...] = (y + b2_ref[...]).astype(o_ref.dtype)


def b1e_pred_ffn_forward(x, w1, b1, w2, b2, *, tile_b=256,
                         mxu_dtype=jnp.bfloat16):
    """relu(x @ W1 + b1) @ W2 + b2, applied over the last axis of x.

    w1: (embedding_dim, n_h)   b1: (n_h,)
    w2: (n_h, output_dim)      b2: (output_dim,)
    """
    emb = x.shape[-1]
    lead_shape = x.shape[:-1]
    n_h = w1.shape[1]
    out_dim = w2.shape[1]

    x2 = x.reshape(-1, emb)
    batch = x2.shape[0]

    # --- lane-dense output: pad the narrow output dim up to 128 lanes -------
    out_pad = _round_up(out_dim, 128)
    if out_pad != out_dim:
        w2 = jnp.pad(w2, ((0, 0), (0, out_pad - out_dim)))
        b2 = jnp.pad(b2, ((0, out_pad - out_dim),))

    # --- batch tiling: large M tile for the MXU, pad instead of asserting ---
    sub = 8 * (4 // jnp.dtype(mxu_dtype).itemsize)   # 8 for f32, 16 for bf16
    tile_b = max(sub, min(int(tile_b), _round_up(batch, sub)))
    tile_b = _round_up(tile_b, sub)
    batch_pad = _round_up(batch, tile_b)
    if batch_pad != batch:
        x2 = jnp.pad(x2, ((0, batch_pad - batch), (0, 0)))

    # MXU operands (x, W1, W2) in mxu_dtype; biases & accumulation stay f32.
    x2 = x2.astype(mxu_dtype)
    w1c = w1.astype(mxu_dtype)
    w2c = w2.astype(mxu_dtype)
    b1_2d = b1.reshape(1, n_h).astype(jnp.float32)
    b2_2d = b2.reshape(1, out_pad).astype(jnp.float32)

    grid = (batch_pad // tile_b,)
    isz = jnp.dtype(mxu_dtype).itemsize
    cost = pl.CostEstimate(
        flops=2 * batch_pad * (emb * n_h + n_h * out_pad),
        transcendentals=0,
        bytes_accessed=(batch_pad * emb * isz          # x
                        + emb * n_h * isz              # W1
                        + n_h * out_pad * isz          # W2
                        + (n_h + out_pad) * 4          # biases
                        + batch_pad * out_pad * 4),    # output
    )

    y = pl.pallas_call(
        _ffn_kernel,
        out_shape=jax.ShapeDtypeStruct((batch_pad, out_pad), jnp.float32),
        grid_spec=pltpu.PrefetchScalarGridSpec(
            num_scalar_prefetch=0,
            grid=grid,
            in_specs=[
                pl.BlockSpec((tile_b, emb), lambda i: (i, 0)),      # x tile
                pl.BlockSpec((emb, n_h), lambda i: (0, 0)),         # W1 (resident)
                pl.BlockSpec((1, n_h), lambda i: (0, 0)),           # b1
                pl.BlockSpec((n_h, out_pad), lambda i: (0, 0)),     # W2 (resident)
                pl.BlockSpec((1, out_pad), lambda i: (0, 0)),       # b2
            ],
            out_specs=pl.BlockSpec((tile_b, out_pad), lambda i: (i, 0)),
        ),
        compiler_params=pltpu.CompilerParams(
            dimension_semantics=("parallel",),
            vmem_limit_bytes=48 * 1024 * 1024,   # fits v7x's 64 MiB VMEM
        ),
        cost_estimate=cost,
    )(x2, w1c, b1_2d, w2c, b2_2d)

    y = y[:batch, :out_dim]
    return y.reshape(lead_shape + (out_dim,))


def _torch_linear_init(key, fan_in, fan_out):
    """nn.Linear default init U(-1/sqrt(fan_in), 1/sqrt(fan_in)).
    Returns W already transposed to (fan_in, fan_out) plus bias (fan_out,)."""
    kw, kb = jax.random.split(key)
    bound = 1.0 / np.sqrt(fan_in)
    w = jax.random.uniform(kw, (fan_in, fan_out), jnp.float32, -bound, bound)
    b = jax.random.uniform(kb, (fan_out,), jnp.float32, -bound, bound)
    return w, b


if __name__ == "__main__":
    # Small demo shapes consistent with the module (hidden = glob_n = 2048,
    # output_dim = 16); batch=512 with tile_b=256 -> 2 grid steps (both v7x TCs).
    batch = 512
    embedding_dim = 256
    output_dim = 16

    key = jax.random.PRNGKey(0)
    kx, k1, k2 = jax.random.split(key, 3)

    x = jax.random.normal(kx, (batch, embedding_dim), jnp.float32)
    w1, b1 = _torch_linear_init(k1, embedding_dim, GLOB_N)   # fc1
    w2, b2 = _torch_linear_init(k2, GLOB_N, output_dim)      # fc2

    # Pure-JAX reference of the PyTorch forward.
    ref = jnp.maximum(x @ w1 + b1, 0.0) @ w2 + b2

    # f32-operand path: tight structural correctness check.
    y32 = jax.block_until_ready(
        b1e_pred_ffn_forward(x, w1, b1, w2, b2, mxu_dtype=jnp.float32))
    np.testing.assert_allclose(np.asarray(y32), np.asarray(ref),
                               rtol=1e-4, atol=1e-4)

    # bf16-operand fast path (f32 accumulation): looser tolerance.
    y16 = jax.block_until_ready(b1e_pred_ffn_forward(x, w1, b1, w2, b2))
    np.testing.assert_allclose(np.asarray(y16), np.asarray(ref),
                               rtol=2e-2, atol=2e-2)

    assert y16.shape == (batch, output_dim)
    print("KERNEL_OK")
</pallas_src>

<mosaic_0001>
module attributes {stable_mosaic.version = 11 : i64} {
  func.func @_ffn_kernel(%arg0: i32, %arg1: memref<256x256xf32, #tpu.memory_space<vmem>>, %arg2: memref<256x2048xf32, #tpu.memory_space<vmem>>, %arg3: memref<1x2048xf32, #tpu.memory_space<vmem>>, %arg4: memref<2048x128xf32, #tpu.memory_space<vmem>>, %arg5: memref<1x128xf32, #tpu.memory_space<vmem>>, %arg6: memref<256x128xf32, #tpu.memory_space<vmem>>) attributes {dimension_semantics = [#tpu.dimension_semantics<parallel>], iteration_bounds = array<i64: 2>, scalar_prefetch = 0 : i64, scratch_operands = 0 : i64, tpu.core_type = #tpu.core_type<tc>, window_params = [{transform_indices = @transform_0, window_bounds = array<i64: 256, 256>}, {pipeline_mode = #tpu.pipeline_mode<synchronous>, transform_indices = @transform_1, window_bounds = array<i64: 256, 2048>}, {pipeline_mode = #tpu.pipeline_mode<synchronous>, transform_indices = @transform_2, window_bounds = array<i64: 1, 2048>}, {pipeline_mode = #tpu.pipeline_mode<synchronous>, transform_indices = @transform_3, window_bounds = array<i64: 2048, 128>}, {pipeline_mode = #tpu.pipeline_mode<synchronous>, transform_indices = @transform_4, window_bounds = array<i64: 1, 128>}, {transform_indices = @transform_5, window_bounds = array<i64: 256, 128>}]} {
    %c0 = arith.constant 0 : index
    %c0_0 = arith.constant 0 : index
    %0 = vector.load %arg1[%c0, %c0_0] : memref<256x256xf32, #tpu.memory_space<vmem>>, vector<256x256xf32>
    %c0_1 = arith.constant 0 : index
    %c0_2 = arith.constant 0 : index
    %1 = vector.load %arg2[%c0_1, %c0_2] : memref<256x2048xf32, #tpu.memory_space<vmem>>, vector<256x2048xf32>
    %cst = arith.constant dense<0.000000e+00> : vector<256x2048xf32>
    %2 = tpu.matmul %0, %1, %cst {dimension_numbers = #tpu.dot_dimension_numbers<[1], [0], [0], [1], [0, 0, 1, 1], [], []>} : vector<256x256xf32>, vector<256x2048xf32>, vector<256x2048xf32> -> vector<256x2048xf32>
    %c0_3 = arith.constant 0 : index
    %c0_4 = arith.constant 0 : index
    %3 = vector.load %arg3[%c0_3, %c0_4] : memref<1x2048xf32, #tpu.memory_space<vmem>>, vector<1x2048xf32>
    %4 = vector.broadcast %3 : vector<1x2048xf32> to vector<256x2048xf32>
    %5 = arith.addf %2, %4 : vector<256x2048xf32>
    %cst_5 = arith.constant 0.000000e+00 : f32
    %6 = vector.broadcast %cst_5 : f32 to vector<256x2048xf32>
    %7 = arith.maximumf %5, %6 : vector<256x2048xf32>
    %c0_6 = arith.constant 0 : index
    %c0_7 = arith.constant 0 : index
    %8 = vector.load %arg4[%c0_6, %c0_7] : memref<2048x128xf32, #tpu.memory_space<vmem>>, vector<2048x128xf32>
    %cst_8 = arith.constant dense<0.000000e+00> : vector<256x128xf32>
    %9 = tpu.matmul %7, %8, %cst_8 {dimension_numbers = #tpu.dot_dimension_numbers<[1], [0], [0], [1], [0, 0, 1, 1], [], []>} : vector<256x2048xf32>, vector<2048x128xf32>, vector<256x128xf32> -> vector<256x128xf32>
    %c0_9 = arith.constant 0 : index
    %c0_10 = arith.constant 0 : index
    %10 = vector.load %arg5[%c0_9, %c0_10] : memref<1x128xf32, #tpu.memory_space<vmem>>, vector<1x128xf32>
    %11 = vector.broadcast %10 : vector<1x128xf32> to vector<256x128xf32>
    %12 = arith.addf %9, %11 : vector<256x128xf32>
    %c0_11 = arith.constant 0 : index
    %c0_12 = arith.constant 0 : index
    %13 = vector.load %arg6[%c0_11, %c0_12] : memref<256x128xf32, #tpu.memory_space<vmem>>, vector<256x128xf32>
    tpu.vector_store %arg6[%c0_11, %c0_12], %12 {strides = array<i32>} : memref<256x128xf32, #tpu.memory_space<vmem>>, vector<256x128xf32>,
    return
  }
  func.func @transform_0(%arg0: i32) -> (i32, i32) {
    %c0_i32 = arith.constant 0 : i32
    %c0_i32_0 = arith.constant 0 : i32
    return %arg0, %c0_i32 : i32, i32
  }
  func.func @transform_1(%arg0: i32) -> (i32, i32) {
    %c0_i32 = arith.constant 0 : i32
    %c0_i32_0 = arith.constant 0 : i32
    %c0_i32_1 = arith.constant 0 : i32
    return %c0_i32, %c0_i32_0 : i32, i32
  }
  func.func @transform_2(%arg0: i32) -> (i32, i32) {
    %c0_i32 = arith.constant 0 : i32
    %c0_i32_0 = arith.constant 0 : i32
    %c0_i32_1 = arith.constant 0 : i32
    return %c0_i32, %c0_i32_0 : i32, i32
  }
  func.func @transform_3(%arg0: i32) -> (i32, i32) {
    %c0_i32 = arith.constant 0 : i32
    %c0_i32_0 = arith.constant 0 : i32
    %c0_i32_1 = arith.constant 0 : i32
    return %c0_i32, %c0_i32_0 : i32, i32
  }
  func.func @transform_4(%arg0: i32) -> (i32, i32) {
    %c0_i32 = arith.constant 0 : i32
    %c0_i32_0 = arith.constant 0 : i32
    %c0_i32_1 = arith.constant 0 : i32
    return %c0_i32, %c0_i32_0 : i32, i32
  }
  func.func @transform_5(%arg0: i32) -> (i32, i32) {
    %c0_i32 = arith.constant 0 : i32
    %c0_i32_0 = arith.constant 0 : i32
    return %arg0, %c0_i32 : i32, i32
  }
}

</mosaic_0001>

<bundles_post_ra>
// kernel: tpu_custom_call.1
= control target key start
LH: loop header
LB: loop body
LE: loop exit
PB: predicated region body
PF: predicated region fallthrough
CT: control target
= control target key end

     0   :  { %10 = vsyncpa [#allocation3], 0  ;;  %s9789_s0 = inlined_call_operand.hbm [shape: f32[512,256], index: 0, kind: input, shape index: {}]   ;;  %s9790_s1 = inlined_call_operand.hbm [shape: f32[256,2048], index: 1, kind: input, shape index: {}]   ;;  %s9791_s2 = inlined_call_operand.hbm [shape: f32[1,2048], index: 2, kind: input, shape index: {}]   ;;  %s9792_s3 = inlined_call_operand.hbm [shape: f32[2048,128], index: 3, kind: input, shape index: {}]   ;;  %s9793_s4 = inlined_call_operand.hbm [shape: f32[1,128], index: 4, kind: input, shape index: {}]   ;;  %s9794_s5 = inlined_call_operand.hbm [shape: f32[512,128], index: 5, kind: output, shape index: {}]  }
   0x1   :  { %12 = vsyncpa [#allocation3 + $0x1], 0 }
   0x2   :  { %13 = vsyncpa [#allocation6], 0 }
   0x3   :  { %14 = vsyncpa [#allocation9], 0 }
   0x4   :  { %15 = vsyncpa [#allocation4], 0 }
   0x5   :  { %17 = vsyncpa [#allocation4 + $0x1], 0  ;;  %s7836_s18 = smov 0   ;;  %s7838_s19 = smov 0  }
   0x6   :  { %s7840_s20 = smov 0   ;;  %s7842_s21 = smov 0  }
   0x7 LB: > { %s7857_s22 = sadd.s32 4294967295, %s7790_s21   ;;  %s5748_s23 = sadd.s32 4294967294, %s7790_s21   ;;  %s7790_s21 = sphi %s7842_s21, %s9936_s21   ;;  %s7786_s20 = sphi %s7840_s20, %s9935_s20   ;;  %s7782_s19 = sphi %s7838_s19, %s9934_s19   ;;  %s7778_s18 = sphi %s7836_s18, %s9933_s18  }
   0x8   : > { %p43_p0 = scmp.ne.s32.totalorder %s7782_s19, %s7778_s18  ;;  %p9795_p1 = scmp.eq.s32.totalorder %s7857_s22, 0 }
   0x9   : > { %p157_p3 = scmp.eq.s32.totalorder %s5748_s23, 1  ;;  %p5749_p5 = scmp.ge.s32.totalorder %s7790_s21, 1 }
   0xa   : > { %p7866_p4 = por %p9795_p1, %p43_p0  ;;  %p164_p7 = scmp.lt.s32.totalorder %s7790_s21, 3 }
   0xb   : > { %p7871_p6 = por %p157_p3, %p43_p0  ;;  %s7792_s27 = smov [#allocation5]  }
   0xc   : > { %s9840_s24 = scalar_select %p7866_p4, 1, 0 }
   0xd   : > { %s9841_s25 = scalar_select %p7871_p6, 1, 0 }
   0xe   : > { %p7876_p8 = pnand %p5749_p5, %p164_p7  ;;  %s176_s28 = sshll.u32 %s7792_s27, 4  ;;  %s7880_s28 = int_to_ptr.vmem [resolvable:$true] %s176_s28 }
   0xf   : > { %s7793_s30 = smov [#allocation8]   ;;  %s7574_s9 = scalar_lea.hbm %s9790_s1, 65536 }
  0x10   : > { %s9842_s26 = scalar_select %p7876_p8, 1, 0 }
  0x11   : > { %p7171_p9 = pneg %p7876_p8  ;;  %s200_s6 = sshll.u32 %s7793_s30, 4  ;;  %s7891_s6 = int_to_ptr.vmem [resolvable:$true] %s200_s6 }
  0x12   : > { %p7575_p12 = scmp.ne.s32.totalorder %s9790_s1, %s7574_s9  ;;  %p7581_p5 = scmp.lt.u32.totalorder %s7574_s9, %s9790_s1 }
  0x13   : > { %p7887_p11 = pnand %p7171_p9, %p9795_p1 }
  0x15   : > { %p7901_p13 = pneg %p7887_p11 }
  0x17   : > { %p7577_p0 = pnand %p7901_p13, %p7575_p12 }
  0x19   : > { %p7578_p3 = pneg %p7577_p0 }
  0x1b   : > { %p7583_p7 = pnand %p7581_p5, %p7578_p3 }
  0x1d   : > { %7586 = shalt.err (!%p7583_p7)
}
  0x1e   : > { %s7587_s15 = scalar_lea.vmem %s7880_s28, 65536  ;;  %p7595_p2 = scmp.lt.s32.totalorder %s7880_s28, %s7880_s28 }
  0x1f   : > { %p7588_p9 = scmp.ne.s32.totalorder %s7880_s28, %s7587_s15  ;;  %p7596_p6 = scmp.lt.s32.totalorder %s7587_s15, %s7587_s15 }
  0x21   : > { %p7590_p10 = pnand %p7588_p9, %p7901_p13  ;;  %p7597_p12 = por %p7596_p6, %p7595_p2 }
  0x23   : > { %p7591_p1 = pneg %p7590_p10 }
  0x25   : > { %p7598_p0 = pnand %p7597_p12, %p7591_p1 }
  0x27   : > { %7601 = shalt.err (!%p7598_p0)
}
  0x28   : > { %s7794_s16 = smov 2048   ;;  %s7795_s17 = smov 128  }
  0x29   : > { %7174 = dma.hbm_to_vmem [thread:$0]  (!%p7887_p11), %s9790_s1, 65536, %s7880_s28, [#allocation6], %s7794_s16, %s7794_s16, %s7795_s17  }
  0x2a   : > { %s7602_s8 = scalar_lea.hbm %s9792_s3, 32768 }
  0x2b   : > { %p7603_p2 = scmp.ne.s32.totalorder %s9792_s3, %s7602_s8  ;;  %p7609_p10 = scmp.lt.u32.totalorder %s7602_s8, %s9792_s3 }
  0x2d   : > { %p7605_p1 = pnand %p7603_p2, %p7901_p13 }
  0x2f   : > { %p7606_p6 = pneg %p7605_p1 }
  0x31   : > { %p7611_p3 = pnand %p7609_p10, %p7606_p6 }
  0x33   : > { %7614 = shalt.err (!%p7611_p3)
}
  0x34   : > { %s7615_s28 = scalar_lea.vmem %s7891_s6, 32768  ;;  %p7623_p12 = scmp.lt.s32.totalorder %s7891_s6, %s7891_s6 }
  0x35   : > { %p7616_p5 = scmp.ne.s32.totalorder %s7891_s6, %s7615_s28  ;;  %p7624_p0 = scmp.lt.s32.totalorder %s7615_s28, %s7615_s28 }
  0x37   : > { %p7618_p7 = pnand %p7616_p5, %p7901_p13  ;;  %p7625_p2 = por %p7624_p0, %p7623_p12 }
  0x39   : > { %p7619_p9 = pneg %p7618_p7 }
  0x3b   : > { %p7626_p1 = pnand %p7625_p2, %p7619_p9 }
  0x3d   : > { %7629 = shalt.err (!%p7626_p1)
}
  0x3e   : > { %s7796_s14 = smov 8   ;;  %s7797_s23 = smov [#allocation7]  }
  0x3f   : > { %7180 = dma.hbm_to_vmem [thread:$0]  (!%p7887_p11), %s9792_s3, 32768, %s7891_s6, [#allocation9], %s7795_s17, %s7795_s17, %s7796_s14  }
  0x40   : > { %s190_s27 = sshll.u32 %s7797_s23, 4  ;;  %s7798_s30 = smov [#allocation10]   ;;  %s191_s27 = int_to_ptr.vmem [resolvable:$true] %s190_s27 }
  0x41   : > { %s214_s7 = sshll.u32 %s7798_s30, 4  ;;  %s7630_s10 = scalar_lea.hbm %s9791_s2, 256  ;;  %s215_s7 = int_to_ptr.vmem [resolvable:$true] %s214_s7 }
  0x42   : > { %p7631_p6 = scmp.ne.s32.totalorder %s9791_s2, %s7630_s10  ;;  %p7637_p5 = scmp.lt.u32.totalorder %s7630_s10, %s9791_s2 }
  0x44   : > { %p7633_p10 = pnand %p7631_p6, %p7901_p13 }
  0x46   : > { %p7634_p3 = pneg %p7633_p10 }
  0x48   : > { %p7639_p7 = pnand %p7637_p5, %p7634_p3 }
  0x4a   : > { %7642 = shalt.err (!%p7639_p7)
}
  0x4b   : > { %s7643_s6 = scalar_lea.vmem %s191_s27, 256  ;;  %p7651_p2 = scmp.lt.s32.totalorder %s191_s27, %s191_s27 }
  0x4c   : > { %p7644_p9 = scmp.ne.s32.totalorder %s191_s27, %s7643_s6  ;;  %p7652_p1 = scmp.lt.s32.totalorder %s7643_s6, %s7643_s6 }
  0x4e   : > { %p7646_p12 = pnand %p7644_p9, %p7901_p13  ;;  %p7653_p4 = por %p7652_p1, %p7651_p2 }
  0x50   : > { %p7647_p0 = pneg %p7646_p12 }
  0x52   : > { %p7654_p8 = pnand %p7653_p4, %p7647_p0 }
  0x54   : > { %7657 = shalt.err (!%p7654_p8)
}
  0x55   : > { %7177 = dma.hbm_to_vmem [thread:$0]  (!%p7887_p11), %s9791_s2, 256, %s191_s27, [#allocation6]  }
  0x56   : > { %s7658_s30 = scalar_lea.hbm %s9793_s4, 16 }
  0x57   : > { %p7659_p6 = scmp.ne.s32.totalorder %s9793_s4, %s7658_s30  ;;  %p7665_p8 = scmp.lt.u32.totalorder %s7658_s30, %s9793_s4 }
  0x59   : > { %p7661_p10 = pnand %p7659_p6, %p7901_p13 }
  0x5b   : > { %p7662_p4 = pneg %p7661_p10 }
  0x5d   : > { %p7667_p3 = pnand %p7665_p8, %p7662_p4 }
  0x5f   : > { %7670 = shalt.err (!%p7667_p3)
}
  0x60   : > { %s7671_s13 = scalar_lea.vmem %s215_s7, 16  ;;  %s7678_s27 = scalar_lea.vmem %s215_s7, 32 }
  0x61   : > { %p7672_p5 = scmp.ne.s32.totalorder %s215_s7, %s7671_s13  ;;  %p7679_p12 = scmp.lt.s32.totalorder %s215_s7, %s215_s7 }
  0x62   : > { %p7680_p0 = scmp.lt.s32.totalorder %s7678_s27, %s7671_s13 }
  0x63   : > { %p7674_p7 = pnand %p7672_p5, %p7901_p13 }
  0x64   : > { %p7681_p2 = por %p7680_p0, %p7679_p12 }
  0x65   : > { %p7675_p9 = pneg %p7674_p7 }
  0x67   : > { %p7682_p1 = pnand %p7681_p2, %p7675_p9 }
  0x69   : > { %7685 = shalt.err (!%p7682_p1)
}
  0x6a   : > { %7183 = dma.hbm_to_vmem [thread:$0]  (!%p7887_p11), %s9793_s4, 16, %s215_s7, [#allocation9]  }
  0x6b   : > { %s7982_s12 = sadd.s32 1, %s7790_s21   ;;  %s30_s29 = sadd.s32 1, %s7786_s20 }
  0x6c   : > { %s27_s6 = ssub.s32 %s7790_s21, %s7982_s12  ;;  %p37_p6 = scmp.ne.s32.totalorder %s7786_s20, %s7782_s19 }
  0x6d   : > { %p28_p13 = scmp.eq.s32.totalorder %s27_s6, 0  ;;  %p38_p10 = scmp.eq.s32.totalorder %s7790_s21, 0 }
  0x6e   : > { %p7196_p4 = scmp.lt.s32.totalorder %s7790_s21, 2  ;;  %p9845_p3 = scmp.eq.s32.totalorder %s7857_s22, 1 }
  0x6f   : > { %s7992_s17 = scalar_select %p28_p13, %s7786_s20, %s30_s29  }
  0x70   : > { %p39_p8 = por %p38_p10, %p37_p6  ;;  %p7996_p5 = por %p9845_p3, %p37_p6 }
  0x71   : > { %s225_s16 = sand.u32 1, %s7786_s20   ;;  %s5773_s23 = sshll.u32 %s7790_s21, 13 }
  0x72   : > { %s5755_s7 = sshll.u32 %s225_s16, 9  ;;  %s8005_s9 = scalar_lea.hbm %s9789_s0, %s5773_s23 }
  0x73   : > { %s229_s10 = scalar_lea.vmem [#allocation2], %s5755_s7  ;;  %p8007_p11 = pnand %p7196_p4, %p39_p8 }
  0x74   : > { %s237_s11 = sshll.u32 %s229_s10, 4  ;;  %s8013_s27 = scalar_lea.sflag [#allocation3], %s225_s16  ;;  %s8011_s11 = int_to_ptr.vmem [resolvable:$true] %s237_s11 }
  0x75   : > { %s7686_s28 = scalar_lea.hbm %s8005_s9, 8192  ;;  %p7688_p9 = pneg %p8007_p11 }
  0x76   : > { %p7687_p7 = scmp.ne.s32.totalorder %s8005_s9, %s7686_s28  ;;  %s7691_s29 = scalar_lea.hbm %s9789_s0, 16384 }
  0x77   : > { %p7692_p2 = scmp.lt.u32.totalorder %s8005_s9, %s9789_s0  ;;  %p7693_p1 = scmp.lt.u32.totalorder %s7691_s29, %s7686_s28 }
  0x78   : > { %p7689_p12 = pnand %p7688_p9, %p7687_p7  ;;  %p7695_p6 = scmp.lt.u32.totalorder %s7686_s28, %s8005_s9 }
  0x79   : > { %p7694_p13 = por %p7693_p1, %p7692_p2 }
  0x7a   : > { %p7690_p0 = pneg %p7689_p12 }
  0x7b   : > { %p7696_p10 = por %p7695_p6, %p7694_p13 }
  0x7d   : > { %p7697_p4 = pnand %p7696_p10, %p7690_p0 }
  0x7f   : > { %7700 = shalt.err (!%p7697_p4)
}
  0x80   : > { %s7701_s16 = scalar_lea.vmem %s8011_s11, 8192  ;;  %s7799_s30 = smov [#allocation2]  }
  0x81   : > { %p7702_p8 = scmp.ne.s32.totalorder %s8011_s11, %s7701_s16  ;;  %s7706_s8 = sshll.u32 %s7799_s30, 4  ;;  %s7707_s8 = int_to_ptr.vmem [resolvable:$false] %s7706_s8 }
  0x82   : > { %s7708_s10 = scalar_lea.vmem %s7707_s8, 16384  ;;  %p7709_p12 = scmp.lt.s32.totalorder %s8011_s11, %s7707_s8 }
  0x83   : > { %p7704_p3 = pnand %p7702_p8, %p7688_p9  ;;  %p7710_p2 = scmp.lt.s32.totalorder %s7708_s10, %s7701_s16 }
  0x85   : > { %p7705_p7 = pneg %p7704_p3  ;;  %p7711_p1 = por %p7710_p2, %p7709_p12 }
  0x87   : > { %p7712_p13 = pnand %p7711_p1, %p7705_p7 }
  0x89   : > { %7715 = shalt.err (!%p7712_p13)
}
  0x8a   : > { %s7800_s28 = smov 256   ;;  %s7801_s15 = smov 16  }
  0x8b   : > { %7187 = dma.hbm_to_vmem [thread:$0]  (!%p8007_p11), %s8005_s9, 8192, %s8011_s11, %s8013_s27, %s7800_s28, %s7800_s28, %s7801_s15  }
  0x8c   : > { %p9848_p9 = scmp.ne.s32.totalorder %s9842_s26, 0 }
  0x8e   : > { %249 = sbr.rel (%p9848_p9) target bundleno = 1695 (0x69f), region = 40 }
  0x95   : > { %s8044_s6 = sand.u32 1, %s7782_s19   ;;  %p9849_p0 = scmp.ne.s32.totalorder %s9840_s24, 0 }
  0x96   : > { %s5760_s29 = sshll.u32 %s8044_s6, 9  ;;  %s252_s23 = scalar_lea.sflag [#allocation3], %s8044_s6 }
  0x97   : > { %s8048_s7 = scalar_lea.vmem [#allocation2], %s5760_s29 }
  0x98   : > { %7761 = dma.done.wait (%p9849_p0), %s252_s23, 8192  }
  0x99   : > { %7763 = vsyncadd (%p9849_p0), %s252_s23, 4294959104  ;;  %p9850_p11 = scmp.eq.s32.totalorder %s7857_s22, 0 }
  0x9b   : > { %7765 = dma.done.wait (%p9850_p11), [#allocation6], 65792   ;;  %p9851_p6 = pmov %p9850_p11 }
  0x9d   : > { %7767 = vsyncadd (%p9851_p6), [#allocation6], 4294901504  ;;  %p9852_p10 = pmov %p9851_p6 }
  0x9e   : > { %p9853_p4 = pmov %p9851_p6 }
  0x9f   : > { %7769 = dma.done.wait (%p9852_p10), [#allocation9], 32784  }
  0xa0   : > { %7771 = vsyncadd (%p9853_p4), [#allocation9], 4294934512  ;;  %v365_v0 = vld [vmem:[#allocation5 + $0x8] sm:$0xff]  ;;  %v364_v2 = vld [vmem:[#allocation5] sm:$0xff]  ;;  %s5765_s24 = sshll.u32 %s8044_s6, 8  ;;  %s5774_s9 = sshll.u32 %s7857_s22, 12 }
  0xa1   : > { %v381_v1 = vld [vmem:[#allocation5 + $0x88] sm:$0xff]  ;;  %v380_v4 = vld [vmem:[#allocation5 + $0x80] sm:$0xff]  ;;  %s9673_s26 = scalar_lea.vmem [#allocation11], %s5765_s24  ;;  %s9741_s16 = scalar_lea.hbm %s9794_s5, %s5774_s9 }
  0xa2   : > { %v5775_v3 = vpack.c.bf16 %v381_v1, %v365_v0  ;;  %v397_v5 = vld [vmem:[#allocation5 + $0x108] sm:$0xff]  ;;  %v5777_v7 = vpack.c.bf16 %v380_v4, %v364_v2  ;;  %v396_v9 = vld [vmem:[#allocation5 + $0x100] sm:$0xff]  ;;  %s5637_s11 = sshll.u32 %s9673_s26, 4  ;;  %s5624_s30 = scalar_lea.sflag [#allocation4], %s8044_s6  ;;  %s9743_s11 = int_to_ptr.vmem [resolvable:$true] %s5637_s11 }
  0xa3   : > { %v413_v6 = vld [vmem:[#allocation5 + $0x188] sm:$0xff]  ;;  %v412_v10 = vld [vmem:[#allocation5 + $0x180] sm:$0xff]  ;;  %s7716_s8 = scalar_lea.vmem %s9743_s11, 4096  ;;  %s7803_s22 = smov [#allocation11]  }
  0xa4   : > { %v5779_v8 = vpack.c.bf16 %v413_v6, %v397_v5  ;;  %v429_v11 = vld [vmem:[#allocation5 + $0x208] sm:$0xff]  ;;  %5776 = vmatprep.subr.bf16.mxu1 %v5775_v3  ;;  %v5781_v13 = vpack.c.bf16 %v412_v10, %v396_v9  ;;  %v428_v15 = vld [vmem:[#allocation5 + $0x200] sm:$0xff]  ;;  %p7717_p8 = scmp.ne.s32.totalorder %s9743_s11, %s7716_s8  ;;  %s7720_s10 = sshll.u32 %s7803_s22, 4  ;;  %s7721_s10 = int_to_ptr.vmem [resolvable:$false] %s7720_s10 }
  0xa5   : > { %v445_v12 = vld [vmem:[#allocation5 + $0x288] sm:$0xff]  ;;  %5778 = vmatpush1.bf16.msra.mxu1 %v5777_v7  ;;  %v444_v16 = vld [vmem:[#allocation5 + $0x280] sm:$0xff]  ;;  %s7722_s28 = scalar_lea.vmem %s7721_s10, 8192  ;;  %p7723_p12 = scmp.lt.s32.totalorder %s9743_s11, %s7721_s10 }
  0xa6   : > { %5780 = vmatprep.subr.bf16.mxu1 %v5779_v8  ;;  %v5783_v14 = vpack.c.bf16 %v445_v12, %v429_v11  ;;  %v461_v17 = vld [vmem:[#allocation5 + $0x308] sm:$0xff]  ;;  %v5785_v19 = vpack.c.bf16 %v444_v16, %v428_v15  ;;  %v460_v21 = vld [vmem:[#allocation5 + $0x300] sm:$0xff]  ;;  %p7718_p3 = pnand %p7717_p8, %p7996_p5  ;;  %p7724_p2 = scmp.lt.s32.totalorder %s7722_s28, %s7716_s8 }
  0xa7   : > { %v477_v18 = vld [vmem:[#allocation5 + $0x388] sm:$0xff]  ;;  %v476_v22 = vld [vmem:[#allocation5 + $0x380] sm:$0xff] }
  0xa8   : > { %v5787_v20 = vpack.c.bf16 %v477_v18, %v461_v17  ;;  %v493_v23 = vld [vmem:[#allocation5 + $0x408] sm:$0xff]  ;;  %v5789_v25 = vpack.c.bf16 %v476_v22, %v460_v21  ;;  %v492_v27 = vld [vmem:[#allocation5 + $0x400] sm:$0xff]  ;;  %p7719_p7 = pneg %p7718_p3  ;;  %p7725_p1 = por %p7724_p2, %p7723_p12 }
  0xa9   : > { %5782 = vmatpush1.bf16.msra.mxu1 %v5781_v13  ;;  %v509_v24 = vld [vmem:[#allocation5 + $0x488] sm:$0xff]  ;;  %v508_v28 = vld [vmem:[#allocation5 + $0x480] sm:$0xff] }
  0xaa   : > { %5784 = vmatprep.subr.bf16.mxu1 %v5783_v14  ;;  %v5791_v26 = vpack.c.bf16 %v509_v24, %v493_v23  ;;  %v525_v29 = vld [vmem:[#allocation5 + $0x508] sm:$0xff]  ;;  %v5793_v31 = vpack.c.bf16 %v508_v28, %v492_v27  ;;  %v524_v33 = vld [vmem:[#allocation5 + $0x500] sm:$0xff]  ;;  %p7726_p13 = pnand %p7725_p1, %p7719_p7 }
  0xab   : > { %v541_v30 = vld [vmem:[#allocation5 + $0x588] sm:$0xff]  ;;  %v540_v34 = vld [vmem:[#allocation5 + $0x580] sm:$0xff] }
  0xac   : > { %v5795_v32 = vpack.c.bf16 %v541_v30, %v525_v29  ;;  %v557_v35 = vld [vmem:[#allocation5 + $0x608] sm:$0xff]  ;;  %v5797_v37 = vpack.c.bf16 %v540_v34, %v524_v33  ;;  %v556_v39 = vld [vmem:[#allocation5 + $0x600] sm:$0xff]  ;;  %v383_v33 = vld [vmem:[#allocation5 + $0x98] sm:$0xff] }
  0xad   : > { %5786 = vmatpush1.bf16.msra.mxu1 %v5785_v19  ;;  %v573_v36 = vld [vmem:[#allocation5 + $0x688] sm:$0xff]  ;;  %v572_v40 = vld [vmem:[#allocation5 + $0x680] sm:$0xff] }
  0xae   : > { %5788 = vmatprep.subr.bf16.mxu1 %v5787_v20  ;;  %v5799_v38 = vpack.c.bf16 %v573_v36, %v557_v35  ;;  %v8063_v41 = vld [vmem:[%s8048_s7 + $0x8] sm:$0xff]  ;;  %v5801_v44 = vpack.c.bf16 %v572_v40, %v556_v39  ;;  %v588_v46 = vld [vmem:[#allocation5 + $0x700] sm:$0xff]  ;;  %v366_v36 = vld [vmem:[#allocation5 + $0x10] sm:$0xff] }
  0xaf   : > { %v589_v42 = vld [vmem:[#allocation5 + $0x708] sm:$0xff]  ;;  %1024 = vmatprep.mubr.f32.mxu1 %v8063_v41  ;;  %v604_v47 = vld [vmem:[#allocation5 + $0x780] sm:$0xff]  ;;  %v415_v39 = vld [vmem:[#allocation5 + $0x198] sm:$0xff] }
  0xb0   : > { %v605_v43 = vld [vmem:[#allocation5 + $0x788] sm:$0xff]  ;;  %v5805_v50 = vpack.c.bf16 %v604_v47, %v588_v46  ;;  %v620_v52 = vld [vmem:[#allocation5 + $0x800] sm:$0xff]  ;;  %v414_v46 = vld [vmem:[#allocation5 + $0x190] sm:$0xff] }
  0xb1   : > { %5790 = vmatpush1.bf16.msra.mxu1 %v5789_v25  ;;  %v5803_v45 = vpack.c.bf16 %v605_v43, %v589_v42  ;;  %v621_v48 = vld [vmem:[#allocation5 + $0x808] sm:$0xff]  ;;  %v636_v53 = vld [vmem:[#allocation5 + $0x880] sm:$0xff]  ;;  %v8070_v43 = vld [vmem:[%s8048_s7 + $0x18] sm:$0xff] }
  0xb2   : > { %5792 = vmatprep.subr.bf16.mxu1 %v5791_v26  ;;  %v637_v49 = vld [vmem:[#allocation5 + $0x888] sm:$0xff]  ;;  %v5809_v56 = vpack.c.bf16 %v636_v53, %v620_v52  ;;  %v652_v58 = vld [vmem:[#allocation5 + $0x900] sm:$0xff]  ;;  %v431_v47 = vld [vmem:[#allocation5 + $0x218] sm:$0xff] }
  0xb3   : > { %v5807_v51 = vpack.c.bf16 %v637_v49, %v621_v48  ;;  %v653_v54 = vld [vmem:[#allocation5 + $0x908] sm:$0xff]  ;;  %v668_v59 = vld [vmem:[#allocation5 + $0x980] sm:$0xff]  ;;  %v447_v48 = vld [vmem:[#allocation5 + $0x298] sm:$0xff] }
  0xb4   : > { %v669_v55 = vld [vmem:[#allocation5 + $0x988] sm:$0xff]  ;;  %v5813_v62 = vpack.c.bf16 %v668_v59, %v652_v58  ;;  %v684_v0 = vld [vmem:[#allocation5 + $0xa00] sm:$0xff]  ;;  %v8075_v49 = vld [vmem:[%s8048_s7 + $0x10] sm:$0xff]  ;;  %v5847_v52 = vpack.c.bf16 %v447_v48, %v431_v47 }
  0xb5   : > { %5794 = vmatpush1.bf16.msra.mxu1 %v5793_v31  ;;  %v5811_v57 = vpack.c.bf16 %v669_v55, %v653_v54  ;;  %v685_v60 = vld [vmem:[#allocation5 + $0xa08] sm:$0xff]  ;;  %v700_v1 = vld [vmem:[#allocation5 + $0xa80] sm:$0xff]  ;;  %v430_v53 = vld [vmem:[#allocation5 + $0x210] sm:$0xff] }
  0xb6   : > { %5796 = vmatprep.subr.bf16.mxu1 %v5795_v32  ;;  %v701_v61 = vld [vmem:[#allocation5 + $0xa88] sm:$0xff]  ;;  %v5817_v4 = vpack.c.bf16 %v700_v1, %v684_v0  ;;  %v716_v6 = vld [vmem:[#allocation5 + $0xb00] sm:$0xff]  ;;  %v367_v32 = vld [vmem:[#allocation5 + $0x18] sm:$0xff] }
  0xb7   : > { %v5815_v63 = vpack.c.bf16 %v701_v61, %v685_v60  ;;  %v717_v2 = vld [vmem:[#allocation5 + $0xb08] sm:$0xff]  ;;  %v732_v7 = vld [vmem:[#allocation5 + $0xb80] sm:$0xff]  ;;  %v5839_v35 = vpack.c.bf16 %v383_v33, %v367_v32  ;;  %v446_v54 = vld [vmem:[#allocation5 + $0x290] sm:$0xff] }
  0xb8   : > { %v733_v3 = vld [vmem:[#allocation5 + $0xb88] sm:$0xff]  ;;  %v5821_v10 = vpack.c.bf16 %v732_v7, %v716_v6  ;;  %v748_v12 = vld [vmem:[#allocation5 + $0xc00] sm:$0xff]  ;;  %v463_v55 = vld [vmem:[#allocation5 + $0x318] sm:$0xff]  ;;  %v5849_v58 = vpack.c.bf16 %v446_v54, %v430_v53 }
  0xb9   : > { %5798 = vmatpush1.bf16.msra.mxu1 %v5797_v37  ;;  %v5819_v5 = vpack.c.bf16 %v733_v3, %v717_v2  ;;  %v749_v8 = vld [vmem:[#allocation5 + $0xc08] sm:$0xff]  ;;  %v764_v13 = vld [vmem:[#allocation5 + $0xc80] sm:$0xff]  ;;  %v382_v37 = vld [vmem:[#allocation5 + $0x90] sm:$0xff] }
  0xba   : > { %5800 = vmatprep.subr.bf16.mxu1 %v5799_v38  ;;  %v765_v9 = vld [vmem:[#allocation5 + $0xc88] sm:$0xff]  ;;  %v5825_v16 = vpack.c.bf16 %v764_v13, %v748_v12  ;;  %v780_v18 = vld [vmem:[#allocation5 + $0xd00] sm:$0xff]  ;;  %v399_v38 = vld [vmem:[#allocation5 + $0x118] sm:$0xff]  ;;  %v5841_v42 = vpack.c.bf16 %v382_v37, %v366_v36 }
  0xbb   : > { %v5823_v11 = vpack.c.bf16 %v765_v9, %v749_v8  ;;  %v781_v14 = vld [vmem:[#allocation5 + $0xd08] sm:$0xff]  ;;  %v796_v19 = vld [vmem:[#allocation5 + $0xd80] sm:$0xff]  ;;  %v8086_v59 = vld [vmem:[%s8048_s7 + $0x38] sm:$0xff] }
  0xbc   : > { %v797_v15 = vld [vmem:[#allocation5 + $0xd88] sm:$0xff]  ;;  %v5829_v22 = vpack.c.bf16 %v796_v19, %v780_v18  ;;  %v812_v24 = vld [vmem:[#allocation5 + $0xe00] sm:$0xff]  ;;  %v462_v61 = vld [vmem:[#allocation5 + $0x310] sm:$0xff] }
  0xbd   : > { %5802 = vmatpush1.bf16.msra.mxu1 %v5801_v44  ;;  %v5827_v17 = vpack.c.bf16 %v797_v15, %v781_v14  ;;  %v813_v20 = vld [vmem:[#allocation5 + $0xe08] sm:$0xff]  ;;  %v828_v25 = vld [vmem:[#allocation5 + $0xe80] sm:$0xff]  ;;  %v5843_v44 = vpack.c.bf16 %v415_v39, %v399_v38  ;;  %v511_v0 = vld [vmem:[#allocation5 + $0x498] sm:$0xff] }
  0xbe   : > { %5804 = vmatprep.subr.bf16.mxu1 %v5803_v45  ;;  %v829_v21 = vld [vmem:[#allocation5 + $0xe88] sm:$0xff]  ;;  %v5833_v28 = vpack.c.bf16 %v828_v25, %v812_v24  ;;  %v844_v30 = vld [vmem:[#allocation5 + $0xf00] sm:$0xff]  ;;  %v398_v45 = vld [vmem:[#allocation5 + $0x110] sm:$0xff] }
  0xbf   : > { %v5831_v23 = vpack.c.bf16 %v829_v21, %v813_v20  ;;  %v845_v26 = vld [vmem:[#allocation5 + $0xf08] sm:$0xff]  ;;  %v860_v31 = vld [vmem:[#allocation5 + $0xf80] sm:$0xff]  ;;  %v8091_v1 = vld [vmem:[%s8048_s7 + $0x30] sm:$0xff] }
  0xc0   : > { %v861_v27 = vld [vmem:[#allocation5 + $0xf88] sm:$0xff]  ;;  %v5837_v34 = vpack.c.bf16 %v860_v31, %v844_v30  ;;  %v8067_v40 = vld [vmem:[%s8048_s7] sm:$0xff]  ;;  %v510_v6 = vld [vmem:[#allocation5 + $0x490] sm:$0xff] }
  0xc1   : > { %5806 = vmatpush1.bf16.msra.mxu1 %v5805_v50  ;;  %v5835_v29 = vpack.c.bf16 %v861_v27, %v845_v26  ;;  %v5845_v50 = vpack.c.bf16 %v414_v46, %v398_v45  ;;  %v8094_v3 = vld [vmem:[%s8048_s7 + $0x48] sm:$0xff]  ;;  %v527_v7 = vld [vmem:[#allocation5 + $0x518] sm:$0xff]  ;;  %v8099_v9 = vld [vmem:[%s8048_s7 + $0x40] sm:$0xff] }
  0xc2   : > { %5808 = vmatprep.subr.bf16.mxu1 %v5807_v51  ;;  %v8078_v51 = vld [vmem:[%s8048_s7 + $0x28] sm:$0xff]  ;;  %v543_v8 = vld [vmem:[#allocation5 + $0x598] sm:$0xff]  ;;  %v526_v13 = vld [vmem:[#allocation5 + $0x510] sm:$0xff] }
  0xc3   : > { %v5859_v12 = vpack.c.bf16 %v543_v8, %v527_v7  ;;  %v542_v14 = vld [vmem:[#allocation5 + $0x590] sm:$0xff]  ;;  %v559_v15 = vld [vmem:[#allocation5 + $0x618] sm:$0xff]  ;;  %v8110_v19 = vld [vmem:[%s8048_s7 + $0x68] sm:$0xff] }
  0xc4   : > { %v5861_v18 = vpack.c.bf16 %v542_v14, %v526_v13  ;;  %v558_v21 = vld [vmem:[#allocation5 + $0x610] sm:$0xff]  ;;  %v607_v24 = vld [vmem:[#allocation5 + $0x798] sm:$0xff]  ;;  %v8115_v25 = vld [vmem:[%s8048_s7 + $0x60] sm:$0xff] }
  0xc5   : > { %5810 = vmatpush1.bf16.msra.mxu1 %v5809_v56  ;;  %v479_v56 = vld [vmem:[#allocation5 + $0x398] sm:$0xff]  ;;  %v606_v30 = vld [vmem:[#allocation5 + $0x790] sm:$0xff]  ;;  %v8126_v37 = vld [vmem:[%s8048_s7 + $0x88] sm:$0xff] }
  0xc6   : > { %5812 = vmatprep.subr.bf16.mxu1 %v5811_v57  ;;  %v8083_v57 = vld [vmem:[%s8048_s7 + $0x20] sm:$0xff]  ;;  %v5851_v60 = vpack.c.bf16 %v479_v56, %v463_v55  ;;  %v8118_v27 = vld [vmem:[%s8048_s7 + $0x78] sm:$0xff]  ;;  %v8123_v33 = vld [vmem:[%s8048_s7 + $0x70] sm:$0xff] }
  0xc7   : > { %v623_v31 = vld [vmem:[#allocation5 + $0x818] sm:$0xff]  ;;  %v622_v39 = vld [vmem:[#allocation5 + $0x810] sm:$0xff]  ;;  %v3530_v48 = vld [vmem:[#allocation8 + $0x10] sm:$0xff] }
  0xc8   : > { %v639_v32 = vld [vmem:[#allocation5 + $0x898] sm:$0xff]  ;;  %v686_v7 = vld [vmem:[#allocation5 + $0xa10] sm:$0xff]  ;;  %v3534_v14 = vld [vmem:[#allocation8 + $0x30] sm:$0xff] }
  0xc9   : > { %5814 = vmatpush1.bf16.msra.mxu1 %v5813_v62  ;;  %v478_v62 = vld [vmem:[#allocation5 + $0x390] sm:$0xff]  ;;  %v3529_v36 = vld [vmem:[#allocation8 + $0x8] sm:$0xff]  ;;  %v5871_v38 = vpack.c.bf16 %v639_v32, %v623_v31 }
  0xca   : > { %5816 = vmatprep.subr.bf16.mxu1 %v5815_v63  ;;  %v495_v63 = vld [vmem:[#allocation5 + $0x418] sm:$0xff]  ;;  %v5853_v2 = vpack.c.bf16 %v478_v62, %v462_v61  ;;  %v702_v8 = vld [vmem:[#allocation5 + $0xa90] sm:$0xff] }
  0xcb   : > { %v655_v46 = vld [vmem:[#allocation5 + $0x918] sm:$0xff]  ;;  %v3536_v31 = vld [vmem:[#allocation8 + $0x40] sm:$0xff] }
  0xcc   : > { %v671_v47 = vld [vmem:[#allocation5 + $0x998] sm:$0xff] }
  0xcd   : > { %5818 = vmatpush1.bf16.msra.mxu1 %v5817_v4  ;;  %v5855_v4 = vpack.c.bf16 %v511_v0, %v495_v63  ;;  %v8135_v55 = vld [vmem:[%s8048_s7 + $0x98] sm:$0xff]  ;;  %v5875_v56 = vpack.c.bf16 %v671_v47, %v655_v46  ;;  %v8141_v63 = vld [vmem:[%s8048_s7 + $0x90] sm:$0xff]  ;;  %v3538_v46 = vld [vmem:[#allocation8 + $0x50] sm:$0xff] }
  0xce   : > { %5820 = vmatprep.subr.bf16.mxu1 %v5819_v5  ;;  %v494_v5 = vld [vmem:[#allocation5 + $0x410] sm:$0xff]  ;;  %v687_v61 = vld [vmem:[#allocation5 + $0xa18] sm:$0xff]  ;;  %v3539_v47 = vld [vmem:[#allocation8 + $0x58] sm:$0xff] }
  0xcf   : > { %v703_v62 = vld [vmem:[#allocation5 + $0xa98] sm:$0xff] }
  0xd0   : > { %v735_v13 = vld [vmem:[#allocation5 + $0xb98] sm:$0xff] }
  0xd1   : > { %5822 = vmatpush1.bf16.msra.mxu1 %v5821_v10  ;;  %v5857_v10 = vpack.c.bf16 %v510_v6, %v494_v5  ;;  %v8144_v5 = vld [vmem:[%s8048_s7 + $0xa8] sm:$0xff]  ;;  %v5879_v6 = vpack.c.bf16 %v703_v62, %v687_v61  ;;  %v3537_v32 = vld [vmem:[#allocation8 + $0x48] sm:$0xff] }
  0xd2   : > { %5824 = vmatprep.subr.bf16.mxu1 %v5823_v11  ;;  %v8102_v11 = vld [vmem:[%s8048_s7 + $0x58] sm:$0xff] }
  0xd3   : > { %v815_v61 = vld [vmem:[#allocation5 + $0xe18] sm:$0xff] }
  0xd4   : > { %v831_v62 = vld [vmem:[#allocation5 + $0xe98] sm:$0xff] }
  0xd5   : > { %5826 = vmatpush1.bf16.msra.mxu1 %v5825_v16  ;;  %v575_v16 = vld [vmem:[#allocation5 + $0x698] sm:$0xff] }
  0xd6   : > { %5828 = vmatprep.subr.bf16.mxu1 %v5827_v17  ;;  %v8107_v17 = vld [vmem:[%s8048_s7 + $0x50] sm:$0xff]  ;;  %v5863_v20 = vpack.c.bf16 %v575_v16, %v559_v15  ;;  %v3535_v15 = vld [vmem:[#allocation8 + $0x38] sm:$0xff]  ;;  %v8150_v16 = vld [vmem:[%s8048_s7 + $0xa0] sm:$0xff] }
  0xd9   : > { %5830 = vmatpush1.bf16.msra.mxu1 %v5829_v22  ;;  %v574_v22 = vld [vmem:[#allocation5 + $0x690] sm:$0xff] }
  0xda   : > { %5832 = vmatprep.subr.bf16.mxu1 %v5831_v23  ;;  %v591_v23 = vld [vmem:[#allocation5 + $0x718] sm:$0xff]  ;;  %v5865_v26 = vpack.c.bf16 %v574_v22, %v558_v21 }
  0xdb   : > { %v8153_v21 = vld [vmem:[%s8048_s7 + $0xb8] sm:$0xff] }
  0xdd   : > { %5834 = vmatpush1.bf16.msra.mxu1 %v5833_v28  ;;  %v5867_v28 = vpack.c.bf16 %v607_v24, %v591_v23  ;;  %v718_v23 = vld [vmem:[#allocation5 + $0xb10] sm:$0xff] }
  0xde   : > { %5836 = vmatprep.subr.bf16.mxu1 %v5835_v29  ;;  %v590_v29 = vld [vmem:[#allocation5 + $0x710] sm:$0xff] }
  0xdf   : > { %v734_v24 = vld [vmem:[#allocation5 + $0xb90] sm:$0xff] }
  0xe1   : > { %5838 = vmatpush1.bf16.msra.mxu1 %v5837_v34  ;;  %v5869_v34 = vpack.c.bf16 %v606_v30, %v590_v29  ;;  %v8159_v29 = vld [vmem:[%s8048_s7 + $0xb0] sm:$0xff]  ;;  %v5885_v30 = vpack.c.bf16 %v734_v24, %v718_v23 }
  0xe2   : > { %5840 = vmatprep.subr.bf16.mxu1 %v5839_v35  ;;  %v3528_v35 = vld [vmem:[#allocation8] sm:$0xff] }
  0xe3   : > { %v6288_v45 = vpack.c.bf16 %v3529_v36, %v3528_v35  ;;  %v750_v36 = vld [vmem:[#allocation5 + $0xc10] sm:$0xff] }
  0xe4   : > { %1025 = vmatmul.mubr.f32.vlgmr.msra.gmra.mrb[0].mxu1 %v8067_v40 }
  0xe5   : > { %5842 = vmatpush1.bf16.msra.mxu1 %v5841_v42  ;;  %1030 = vmatprep.mubr.f32.mxu1 %v8070_v43  ;;  %v638_v42 = vld [vmem:[#allocation5 + $0x890] sm:$0xff] }
  0xe6   : > { %5844 = vmatprep.subr.bf16.mxu1 %v5843_v44  ;;  %v9798_v44 = vmov 0.0|0.0   ;;  %v5873_v53 = vpack.c.bf16 %v638_v42, %v622_v39  ;;  %v6300_v39 = vpack.c.bf16 %v3537_v32, %v3536_v31  ;;  %v783_v42 = vld [vmem:[#allocation5 + $0xd18] sm:$0xff]  ;;  %v862_v31 = vld [vmem:[#allocation5 + $0xf90] sm:$0xff]  ;;  %v369_v32 = vld [vmem:[#allocation5 + $0x28] sm:$0xff] }
  0xe7   : > { %6287 = vmatprep.subr.bf16.mxu0 %v9798_v44 }
  0xe8   : > { %1031 = vmatmul.mubr.f32.gmra.mrb[2].mxu1 %v8075_v49  ;;  %6289 = vmatpush1.bf16.msra.mxu0 %v6288_v45  ;;  %v799_v45 = vld [vmem:[#allocation5 + $0xd98] sm:$0xff] }
  0xe9   : > { %1036 = vmatprep.mubr.f32.mxu1 %v8078_v51  ;;  %5846 = vmatpush1.bf16.msra.mxu1 %v5845_v50  ;;  %v3531_v50 = vld [vmem:[#allocation8 + $0x18] sm:$0xff] }
  0xea   : > { %5848 = vmatprep.subr.bf16.mxu1 %v5847_v52  ;;  %v8132_v52 = vld [vmem:[%s8048_s7 + $0x80] sm:$0xff]  ;;  %v6291_v54 = vpack.c.bf16 %v3531_v50, %v3530_v48  ;;  %6290 = vmatprep.subr.bf16.mxu0 %v9798_v44 }
  0xeb   : > { %v8168_v48 = vld [vmem:[%s8048_s7 + $0xc0] sm:$0xff] }
  0xec   : > { %1037 = vmatmul.mubr.f32.gmra.mrb[4].mxu1 %v8083_v57  ;;  %6292 = vmatpush1.bf16.msra.mxu0 %v6291_v54  ;;  %v8171_v54 = vld [vmem:[%s8048_s7 + $0xd8] sm:$0xff] }
  0xed   : > { %1042 = vmatprep.mubr.f32.mxu1 %v8086_v59  ;;  %5850 = vmatpush1.bf16.msra.mxu1 %v5849_v58  ;;  %v654_v58 = vld [vmem:[#allocation5 + $0x910] sm:$0xff] }
  0xee   : > { %5852 = vmatprep.subr.bf16.mxu1 %v5851_v60  ;;  %v670_v60 = vld [vmem:[#allocation5 + $0x990] sm:$0xff]  ;;  %6293 = vmatprep.subr.bf16.mxu0 %v9798_v44 }
  0xef   : > { %v5877_v0 = vpack.c.bf16 %v670_v60, %v654_v58  ;;  %v782_v58 = vld [vmem:[#allocation5 + $0xd10] sm:$0xff] }
  0xf0   : > { %1043 = vmatmul.mubr.f32.gmra.mrb[6].mxu1 %v8091_v1  ;;  %v798_v60 = vld [vmem:[#allocation5 + $0xd90] sm:$0xff] }
  0xf1   : > { %1048 = vmatprep.mubr.f32.mxu1 %v8094_v3  ;;  %5854 = vmatpush1.bf16.msra.mxu1 %v5853_v2  ;;  %v3532_v2 = vld [vmem:[#allocation8 + $0x20] sm:$0xff] }
  0xf2   : > { %5856 = vmatprep.subr.bf16.mxu1 %v5855_v4  ;;  %v3533_v4 = vld [vmem:[#allocation8 + $0x28] sm:$0xff] }
  0xf4   : > { %1049 = vmatmul.mubr.f32.gmra.mrb[8].mxu1 %v8099_v9 }
  0xf5   : > { %1054 = vmatprep.mubr.f32.mxu1 %v8102_v11  ;;  %5858 = vmatpush1.bf16.msra.mxu1 %v5857_v10  ;;  %v6294_v10 = vpack.c.bf16 %v3533_v4, %v3532_v2  ;;  %v5893_v2 = vpack.c.bf16 %v798_v60, %v782_v58  ;;  %v3540_v4 = vld [vmem:[#allocation8 + $0x60] sm:$0xff]  ;;  %v8207_v60 = vld [vmem:[%s8048_s7 + $0x118] sm:$0xff] }
  0xf6   : > { %5860 = vmatprep.subr.bf16.mxu1 %v5859_v12  ;;  %v719_v12 = vld [vmem:[#allocation5 + $0xb18] sm:$0xff] }
  0xf7   : > { %6295 = vmatpush1.bf16.msra.mxu0 %v6294_v10  ;;  %v5883_v22 = vpack.c.bf16 %v735_v13, %v719_v12  ;;  %v814_v10 = vld [vmem:[#allocation5 + $0xe10] sm:$0xff] }
  0xf8   : > { %1055 = vmatmul.mubr.f32.gmra.mrb[10].mxu1 %v8107_v17  ;;  %6296 = vmatprep.subr.bf16.mxu0 %v9798_v44  ;;  %v830_v12 = vld [vmem:[#allocation5 + $0xe90] sm:$0xff] }
  0xf9   : > { %1060 = vmatprep.mubr.f32.mxu1 %v8110_v19  ;;  %5862 = vmatpush1.bf16.msra.mxu1 %v5861_v18  ;;  %v5881_v18 = vpack.c.bf16 %v702_v8, %v686_v7  ;;  %v8180_v7 = vld [vmem:[%s8048_s7 + $0xe8] sm:$0xff]  ;;  %v5895_v8 = vpack.c.bf16 %v831_v62, %v815_v61  ;;  %v5897_v23 = vpack.c.bf16 %v830_v12, %v814_v10  ;;  %v8213_v61 = vld [vmem:[%s8048_s7 + $0x110] sm:$0xff]  ;;  %v8222_v12 = vld [vmem:[%s8048_s7 + $0x120] sm:$0xff] }
  0xfa   : > { %5864 = vmatprep.subr.bf16.mxu1 %v5863_v20  ;;  %v6297_v20 = vpack.c.bf16 %v3535_v15, %v3534_v14  ;;  %v847_v14 = vld [vmem:[#allocation5 + $0xf18] sm:$0xff]  ;;  %v3548_v62 = vld [vmem:[#allocation8 + $0xa0] sm:$0xff]  ;;  %v3551_v10 = vld [vmem:[#allocation8 + $0xb8] sm:$0xff] }
  0xfb   : > { %v863_v15 = vld [vmem:[#allocation5 + $0xf98] sm:$0xff] }
  0xfc   : > { %1061 = vmatmul.mubr.f32.gmra.mrb[12].mxu1 %v8115_v25  ;;  %6298 = vmatpush1.bf16.msra.mxu0 %v6297_v20  ;;  %v3543_v20 = vld [vmem:[#allocation8 + $0x78] sm:$0xff] }
  0xfd   : > { %1066 = vmatprep.mubr.f32.mxu1 %v8118_v27  ;;  %5866 = vmatpush1.bf16.msra.mxu1 %v5865_v26  ;;  %v751_v26 = vld [vmem:[#allocation5 + $0xc18] sm:$0xff] }
  0xfe   : > { %5868 = vmatprep.subr.bf16.mxu1 %v5867_v28  ;;  %v767_v28 = vld [vmem:[#allocation5 + $0xc98] sm:$0xff]  ;;  %6299 = vmatprep.subr.bf16.mxu0 %v9798_v44 }
  0xff   : > { %v5887_v35 = vpack.c.bf16 %v767_v28, %v751_v26  ;;  %v8189_v26 = vld [vmem:[%s8048_s7 + $0xf8] sm:$0xff]  ;;  %v5899_v28 = vpack.c.bf16 %v863_v15, %v847_v14  ;;  %v8231_v15 = vld [vmem:[%s8048_s7 + $0x130] sm:$0xff] }
 0x100   : > { %1067 = vmatmul.mubr.f32.gmra.mrb[14].mxu1 %v8123_v33  ;;  %6301 = vmatpush1.bf16.msra.mxu0 %v6300_v39  ;;  %v3544_v39 = vld [vmem:[#allocation8 + $0x80] sm:$0xff]  ;;  %v8226_v14 = vld [vmem:[%s8048_s7 + $0x138] sm:$0xff] }
 0x101   : > { %1072 = vmatprep.mubr.f32.mxu1 %v8126_v37  ;;  %5870 = vmatpush1.bf16.msra.mxu1 %v5869_v34  ;;  %v8162_v34 = vld [vmem:[%s8048_s7 + $0xc8] sm:$0xff] }
 0x102   : > { %5872 = vmatprep.subr.bf16.mxu1 %v5871_v38  ;;  %v766_v38 = vld [vmem:[#allocation5 + $0xc90] sm:$0xff]  ;;  %6302 = vmatprep.subr.bf16.mxu0 %v9798_v44 }
 0x103   : > { %v5889_v50 = vpack.c.bf16 %v766_v38, %v750_v36  ;;  %v8195_v36 = vld [vmem:[%s8048_s7 + $0xf0] sm:$0xff] }
 0x104   : > { %1073 = vmatmul.mubr.f32.gmra.mrb[16].mxu1 %v8132_v52 }
 0x105   : > { %1078 = vmatprep.mubr.f32.mxu1 %v8135_v55  ;;  %5874 = vmatpush1.bf16.msra.mxu1 %v5873_v53  ;;  %v6303_v53 = vpack.c.bf16 %v3539_v47, %v3538_v46 }
 0x106   : > { %5876 = vmatprep.subr.bf16.mxu1 %v5875_v56  ;;  %v5891_v56 = vpack.c.bf16 %v799_v45, %v783_v42  ;;  %v3545_v42 = vld [vmem:[#allocation8 + $0x88] sm:$0xff]  ;;  %v8198_v45 = vld [vmem:[%s8048_s7 + $0x108] sm:$0xff] }
 0x107   : > { %6304 = vmatpush1.bf16.msra.mxu0 %v6303_v53  ;;  %v6312_v47 = vpack.c.bf16 %v3545_v42, %v3544_v39  ;;  %v3547_v53 = vld [vmem:[#allocation8 + $0x98] sm:$0xff]  ;;  %v3556_v39 = vld [vmem:[#allocation8 + $0xe0] sm:$0xff] }
 0x108   : > { %1079 = vmatmul.mubr.f32.gmra.mrb[18].mxu1 %v8141_v63  ;;  %6305 = vmatprep.subr.bf16.mxu0 %v9798_v44  ;;  %v8253_v42 = vld [vmem:[%s8048_s7 + $0x168] sm:$0xff] }
 0x109   : > { %1084 = vmatprep.mubr.f32.mxu1 %v8144_v5  ;;  %5878 = vmatpush1.bf16.msra.mxu1 %v5877_v0  ;;  %v8177_v0 = vld [vmem:[%s8048_s7 + $0xd0] sm:$0xff] }
 0x10a   : > { %5880 = vmatprep.subr.bf16.mxu1 %v5879_v6  ;;  %v3541_v6 = vld [vmem:[#allocation8 + $0x68] sm:$0xff] }
 0x10b   : > { %v6306_v13 = vpack.c.bf16 %v3541_v6, %v3540_v4  ;;  %v8217_v4 = vld [vmem:[%s8048_s7 + $0x128] sm:$0xff] }
 0x10c   : > { %1085 = vmatmul.mubr.f32.gmra.mrb[20].mxu1 %v8150_v16 }
 0x10d   : > { %1090 = vmatprep.mubr.f32.mxu1 %v8153_v21  ;;  %5882 = vmatpush1.bf16.msra.mxu1 %v5881_v18  ;;  %v3542_v18 = vld [vmem:[#allocation8 + $0x70] sm:$0xff] }
 0x10e   : > { %5884 = vmatprep.subr.bf16.mxu1 %v5883_v22  ;;  %6307 = vmatpush1.bf16.msra.mxu0 %v6306_v13  ;;  %v8186_v22 = vld [vmem:[%s8048_s7 + $0xe0] sm:$0xff]  ;;  %v6309_v24 = vpack.c.bf16 %v3543_v20, %v3542_v18  ;;  %v3552_v18 = vld [vmem:[#allocation8 + $0xc0] sm:$0xff]  ;;  %v3553_v20 = vld [vmem:[#allocation8 + $0xc8] sm:$0xff] }
 0x10f   : > { %6308 = vmatprep.subr.bf16.mxu0 %v9798_v44 }
 0x110   : > { %1091 = vmatmul.mubr.f32.gmra.mrb[22].mxu1 %v8159_v29 }
 0x111   : > { %1096 = vmatprep.mubr.f32.mxu1 %v8162_v34  ;;  %5886 = vmatpush1.bf16.msra.mxu1 %v5885_v30  ;;  %v846_v30 = vld [vmem:[#allocation5 + $0xf10] sm:$0xff] }
 0x112   : > { %5888 = vmatprep.subr.bf16.mxu1 %v5887_v35  ;;  %v385_v35 = vld [vmem:[#allocation5 + $0xa8] sm:$0xff]  ;;  %6310 = vmatpush1.bf16.msra.mxu0 %v6309_v24  ;;  %v5901_v38 = vpack.c.bf16 %v862_v31, %v846_v30  ;;  %v6324_v24 = vpack.c.bf16 %v3553_v20, %v3552_v18  ;;  %v8240_v31 = vld [vmem:[%s8048_s7 + $0x140] sm:$0xff]  ;;  %v8284_v18 = vld [vmem:[%s8048_s7 + $0x190] sm:$0xff] }
 0x113   : > { %v5903_v46 = vpack.c.bf16 %v385_v35, %v369_v32  ;;  %6311 = vmatprep.subr.bf16.mxu0 %v9798_v44  ;;  %v3555_v30 = vld [vmem:[#allocation8 + $0xd8] sm:$0xff]  ;;  %v8244_v35 = vld [vmem:[%s8048_s7 + $0x158] sm:$0xff]  ;;  %9857 = vst [vmem:[#allocation19_spill] sm:$0xff] %v8284_v18 }
 0x114   : > { %1097 = vmatmul.mubr.f32.gmra.mrb[24].mxu1 %v8168_v48  ;;  %v8287_v20 = vld [vmem:[%s8048_s7 + $0x1a8] sm:$0xff] }
 0x115   : > { %1102 = vmatprep.mubr.f32.mxu1 %v8171_v54  ;;  %5890 = vmatpush1.bf16.msra.mxu1 %v5889_v50  ;;  %v3546_v50 = vld [vmem:[#allocation8 + $0x90] sm:$0xff]  ;;  %9858 = vst [vmem:[#allocation20_spill] sm:$0xff] %v8287_v20 }
 0x116   : > { %5892 = vmatprep.subr.bf16.mxu1 %v5891_v56  ;;  %6313 = vmatpush1.bf16.msra.mxu0 %v6312_v47  ;;  %v8204_v56 = vld [vmem:[%s8048_s7 + $0x100] sm:$0xff]  ;;  %v6315_v58 = vpack.c.bf16 %v3547_v53, %v3546_v50  ;;  %v3559_v53 = vld [vmem:[#allocation8 + $0xf8] sm:$0xff] }
 0x117   : > { %6314 = vmatprep.subr.bf16.mxu0 %v9798_v44  ;;  %v3558_v50 = vld [vmem:[#allocation8 + $0xf0] sm:$0xff] }
 0x118   : > { %1103 = vmatmul.mubr.f32.gmra.mrb[26].mxu1 %v8177_v0 }
 0x119   : > { %1108 = vmatprep.mubr.f32.mxu1 %v8180_v7  ;;  %5894 = vmatpush1.bf16.msra.mxu1 %v5893_v2  ;;  %v3549_v2 = vld [vmem:[#allocation8 + $0xa8] sm:$0xff] }
 0x11a   : > { %5896 = vmatprep.subr.bf16.mxu1 %v5895_v8  ;;  %6316 = vmatpush1.bf16.msra.mxu0 %v6315_v58  ;;  %v6318_v6 = vpack.c.bf16 %v3549_v2, %v3548_v62  ;;  %v3550_v8 = vld [vmem:[#allocation8 + $0xb0] sm:$0xff]  ;;  %v6333_v62 = vpack.c.bf16 %v3559_v53, %v3558_v50  ;;  %v8261_v2 = vld [vmem:[%s8048_s7 + $0x178] sm:$0xff]  ;;  %v8319_v50 = vld [vmem:[%s8048_s7 + $0x1e8] sm:$0xff] }
 0x11b   : > { %6317 = vmatprep.subr.bf16.mxu0 %v9798_v44  ;;  %v6321_v13 = vpack.c.bf16 %v3551_v10, %v3550_v8  ;;  %v8258_v58 = vld [vmem:[%s8048_s7 + $0x160] sm:$0xff]  ;;  %v8270_v8 = vld [vmem:[%s8048_s7 + $0x188] sm:$0xff]  ;;  %9866 = vst [vmem:[#allocation28_spill] sm:$0xff] %v8319_v50 }
 0x11c   : > { %1109 = vmatmul.mubr.f32.gmra.mrb[28].mxu1 %v8186_v22  ;;  %9854 = vst [vmem:[#allocation16_spill] sm:$0xff] %v8270_v8  ;;  %v8276_v10 = vld [vmem:[%s8048_s7 + $0x180] sm:$0xff] }
 0x11d   : > { %1114 = vmatprep.mubr.f32.mxu1 %v8189_v26  ;;  %5898 = vmatpush1.bf16.msra.mxu1 %v5897_v23  ;;  %v8235_v23 = vld [vmem:[%s8048_s7 + $0x148] sm:$0xff]  ;;  %9855 = vst [vmem:[#allocation17_spill] sm:$0xff] %v8276_v10  ;;  %v8324_v53 = vld [vmem:[%s8048_s7 + $0x1e0] sm:$0xff] }
 0x11e   : > { %5900 = vmatprep.subr.bf16.mxu1 %v5899_v28  ;;  %6319 = vmatpush1.bf16.msra.mxu0 %v6318_v6  ;;  %v3554_v28 = vld [vmem:[#allocation8 + $0xd0] sm:$0xff]  ;;  %v8267_v6 = vld [vmem:[%s8048_s7 + $0x170] sm:$0xff]  ;;  %9867 = vst [vmem:[#allocation29_spill] sm:$0xff] %v8324_v53 }
 0x11f   : > { %6320 = vmatprep.subr.bf16.mxu0 %v9798_v44  ;;  %v6327_v32 = vpack.c.bf16 %v3555_v30, %v3554_v28  ;;  %v8295_v28 = vld [vmem:[%s8048_s7 + $0x1b8] sm:$0xff]  ;;  %v8300_v30 = vld [vmem:[%s8048_s7 + $0x1b0] sm:$0xff] }
 0x120   : > { %1115 = vmatmul.mubr.f32.gmra.mrb[30].mxu1 %v8195_v36  ;;  %9860 = vst [vmem:[#allocation22_spill] sm:$0xff] %v8295_v28  ;;  %9861 = vst [vmem:[#allocation23_spill] sm:$0xff] %v8300_v30 }
 0x121   : > { %1120 = vmatprep.mubr.f32.mxu1 %v8198_v45  ;;  %5902 = vmatpush1.bf16.msra.mxu1 %v5901_v38  ;;  %v8249_v38 = vld [vmem:[%s8048_s7 + $0x150] sm:$0xff] }
 0x122   : > { %5904 = vmatprep.subr.bf16.mxu1 %v5903_v46  ;;  %6322 = vmatpush1.bf16.msra.mxu0 %v6321_v13  ;;  %v3557_v46 = vld [vmem:[#allocation8 + $0xe8] sm:$0xff] }
 0x123   : > { %6323 = vmatprep.subr.bf16.mxu0 %v9798_v44  ;;  %v6330_v47 = vpack.c.bf16 %v3557_v46, %v3556_v39  ;;  %v8279_v13 = vld [vmem:[%s8048_s7 + $0x198] sm:$0xff]  ;;  %v8308_v39 = vld [vmem:[%s8048_s7 + $0x1c0] sm:$0xff] }
 0x124   : > { %1121 = vmatmul.mubr.f32.gmra.mrb[32].mxu1 %v8204_v56  ;;  %9856 = vst [vmem:[#allocation18_spill] sm:$0xff] %v8279_v13  ;;  %9863 = vst [vmem:[#allocation25_spill] sm:$0xff] %v8308_v39  ;;  %v8311_v46 = vld [vmem:[%s8048_s7 + $0x1d8] sm:$0xff] }
 0x125   : > { %1126 = vmatprep.mubr.f32.mxu1 %v8207_v60  ;;  %9864 = vst [vmem:[#allocation26_spill] sm:$0xff] %v8311_v46 }
 0x126   : > { %6325 = vmatpush1.bf16.msra.mxu0 %v6324_v24  ;;  %v8292_v24 = vld [vmem:[%s8048_s7 + $0x1a0] sm:$0xff] }
 0x127   : > { %6326 = vmatprep.subr.bf16.mxu0 %v9798_v44  ;;  %9859 = vst [vmem:[#allocation21_spill] sm:$0xff] %v8292_v24 }
 0x128   : > { %1127 = vmatmul.mubr.f32.gmra.mrb[34].mxu1 %v8213_v61 }
 0x129   : > { %1132 = vmatprep.mubr.f32.mxu1 %v8217_v4 }
 0x12a   : > { %6328 = vmatpush1.bf16.msra.mxu0 %v6327_v32  ;;  %v8303_v32 = vld [vmem:[%s8048_s7 + $0x1c8] sm:$0xff] }
 0x12b   : > { %6329 = vmatprep.subr.bf16.mxu0 %v9798_v44  ;;  %9862 = vst [vmem:[#allocation24_spill] sm:$0xff] %v8303_v32 }
 0x12c   : > { %1133 = vmatmul.mubr.f32.gmra.mrb[36].mxu1 %v8222_v12 }
 0x12d   : > { %1138 = vmatprep.mubr.f32.mxu1 %v8226_v14 }
 0x12e   : > { %6331 = vmatpush1.bf16.msra.mxu0 %v6330_v47  ;;  %v8316_v47 = vld [vmem:[%s8048_s7 + $0x1d0] sm:$0xff] }
 0x12f   : > { %6332 = vmatprep.subr.bf16.mxu0 %v9798_v44  ;;  %9865 = vst [vmem:[#allocation27_spill] sm:$0xff] %v8316_v47 }
 0x130   : > { %1139 = vmatmul.mubr.f32.gmra.mrb[38].mxu1 %v8231_v15 }
 0x131   : > { %1144 = vmatprep.mubr.f32.mxu1 %v8235_v23 }
 0x132   : > { %6334 = vmatpush1.bf16.msra.mxu0 %v6333_v62  ;;  %v8327_v62 = vld [vmem:[%s8048_s7 + $0x1f8] sm:$0xff] }
 0x133   : > { %6335 = vmatprep.subr.bf16.mxu0 %v9798_v44  ;;  %9868 = vst [vmem:[#allocation30_spill] sm:$0xff] %v8327_v62  ;;  %v8332_v44 = vld [vmem:[%s8048_s7 + $0x1f0] sm:$0xff] }
 0x134   : > { %1145 = vmatmul.mubr.f32.gmra.mrb[40].mxu1 %v8240_v31  ;;  %9869 = vst [vmem:[#allocation31_spill] sm:$0xff] %v8332_v44 }
 0x135   : > { %1150 = vmatprep.mubr.f32.mxu1 %v8244_v35 }
 0x138   : > { %1151 = vmatmul.mubr.f32.gmra.mrb[42].mxu1 %v8249_v38 }
 0x139   : > { %1156 = vmatprep.mubr.f32.mxu1 %v8253_v42 }
 0x13c   : > { %1157 = vmatmul.mubr.f32.gmra.mrb[44].mxu1 %v8258_v58 }
 0x13d   : > { %1162 = vmatprep.mubr.f32.mxu1 %v8261_v2 }
 0x140   : > { %1163 = vmatmul.mubr.f32.gmra.mrb[46].mxu1 %v8267_v6 }
 0x141   : > { %1168 = vmatprep.mubr.f32.mxu1 %v8270_v8  ;;  %v465_v8 = vld [vmem:[#allocation5 + $0x328] sm:$0xff] }
 0x144   : > { %1169 = vmatmul.mubr.f32.gmra.mrb[48].mxu1 %v8276_v10  ;;  %v448_v10 = vld [vmem:[#allocation5 + $0x2a0] sm:$0xff] }
 0x145   : > { %1174 = vmatprep.mubr.f32.mxu1 %v8279_v13  ;;  %v432_v13 = vld [vmem:[#allocation5 + $0x220] sm:$0xff] }
 0x148   : > { %1175 = vmatmul.mubr.f32.gmra.mrb[50].mxu1 %v8284_v18  ;;  %v449_v18 = vld [vmem:[#allocation5 + $0x2a8] sm:$0xff] }
 0x149   : > { %1180 = vmatprep.mubr.f32.mxu1 %v8287_v20  ;;  %v433_v20 = vld [vmem:[#allocation5 + $0x228] sm:$0xff] }
 0x14c   : > { %1181 = vmatmul.mubr.f32.gmra.mrb[52].mxu1 %v8292_v24  ;;  %v416_v24 = vld [vmem:[#allocation5 + $0x1a0] sm:$0xff] }
 0x14d   : > { %1186 = vmatprep.mubr.f32.mxu1 %v8295_v28  ;;  %v400_v28 = vld [vmem:[#allocation5 + $0x120] sm:$0xff] }
 0x150   : > { %1187 = vmatmul.mubr.f32.gmra.mrb[54].mxu1 %v8300_v30  ;;  %v417_v30 = vld [vmem:[#allocation5 + $0x1a8] sm:$0xff] }
 0x151   : > { %1192 = vmatprep.mubr.f32.mxu1 %v8303_v32  ;;  %v401_v32 = vld [vmem:[#allocation5 + $0x128] sm:$0xff] }
 0x154   : > { %1193 = vmatmul.mubr.f32.gmra.mrb[56].mxu1 %v8308_v39  ;;  %v368_v39 = vld [vmem:[#allocation5 + $0x20] sm:$0xff] }
 0x155   : > { %1198 = vmatprep.mubr.f32.mxu1 %v8311_v46  ;;  %v384_v46 = vld [vmem:[#allocation5 + $0xa0] sm:$0xff] }
 0x158   : > { %1199 = vmatmul.mubr.f32.gmra.mrb[58].mxu1 %v8316_v47  ;;  %v5905_v47 = vpack.c.bf16 %v384_v46, %v368_v39  ;;  %v497_v39 = vld [vmem:[#allocation5 + $0x428] sm:$0xff] }
 0x159   : > { %1204 = vmatprep.mubr.f32.mxu1 %v8319_v50  ;;  %v5907_v50 = vpack.c.bf16 %v417_v30, %v401_v32  ;;  %v464_v32 = vld [vmem:[#allocation5 + $0x320] sm:$0xff]  ;;  %v513_v46 = vld [vmem:[#allocation5 + $0x4a8] sm:$0xff] }
 0x15c   : > { %1205 = vmatmul.mubr.f32.gmra.mrb[60].mxu1 %v8324_v53  ;;  %v5911_v53 = vpack.c.bf16 %v449_v18, %v433_v20  ;;  %v5919_v18 = vpack.c.bf16 %v513_v46, %v497_v39  ;;  %v496_v20 = vld [vmem:[#allocation5 + $0x420] sm:$0xff] }
 0x15d   : > { %1210 = vmatprep.mubr.f32.mxu1 %v8327_v62  ;;  %v5909_v62 = vpack.c.bf16 %v416_v24, %v400_v28  ;;  %v529_v24 = vld [vmem:[#allocation5 + $0x528] sm:$0xff]  ;;  %v624_v46 = vld [vmem:[#allocation5 + $0x820] sm:$0xff] }
 0x160   : > { %1211 = vmatmul.mubr.f32.gmra.mrb[62].mxu1 %v8332_v44  ;;  %v481_v44 = vld [vmem:[#allocation5 + $0x3a8] sm:$0xff] }
 0x161   : > { %1281 = vmatprep.mubr.f32.mxu1 %v8063_v41  ;;  %v5913_v41 = vpack.c.bf16 %v448_v10, %v432_v13  ;;  %v5915_v30 = vpack.c.bf16 %v481_v44, %v465_v8  ;;  %v528_v10 = vld [vmem:[#allocation5 + $0x520] sm:$0xff]  ;;  %v561_v13 = vld [vmem:[#allocation5 + $0x628] sm:$0xff] }
 0x164   : > { %1282 = vmatmul.mubr.f32.vlgmr.msra.gmra.mrb[64].mxu1 %v8067_v40  ;;  %v480_v40 = vld [vmem:[#allocation5 + $0x3a0] sm:$0xff] }
 0x165   : > { %5906 = vmatpush1.bf16.msra.mxu1 %v5905_v47  ;;  %1287 = vmatprep.mubr.f32.mxu1 %v8070_v43  ;;  %v5917_v43 = vpack.c.bf16 %v480_v40, %v464_v32  ;;  %v625_v32 = vld [vmem:[#allocation5 + $0x828] sm:$0xff] }
 0x166   : > { %5908 = vmatprep.subr.bf16.mxu1 %v5907_v50  ;;  %v560_v50 = vld [vmem:[#allocation5 + $0x620] sm:$0xff] }
 0x168   : > { %1288 = vmatmul.mubr.f32.gmra.mrb[66].mxu1 %v8075_v49  ;;  %v512_v49 = vld [vmem:[#allocation5 + $0x4a0] sm:$0xff] }
 0x169   : > { %1293 = vmatprep.mubr.f32.mxu1 %v8078_v51  ;;  %5910 = vmatpush1.bf16.msra.mxu1 %v5909_v62  ;;  %v545_v51 = vld [vmem:[#allocation5 + $0x5a8] sm:$0xff]  ;;  %v5921_v44 = vpack.c.bf16 %v512_v49, %v496_v20  ;;  %v656_v49 = vld [vmem:[#allocation5 + $0x920] sm:$0xff] }
 0x16a   : > { %5912 = vmatprep.subr.bf16.mxu1 %v5911_v53  ;;  %v5923_v8 = vpack.c.bf16 %v545_v51, %v529_v24  ;;  %v593_v53 = vld [vmem:[#allocation5 + $0x728] sm:$0xff] }
 0x16b   : > { %v689_v24 = vld [vmem:[#allocation5 + $0xa28] sm:$0xff] }
 0x16c   : > { %1294 = vmatmul.mubr.f32.gmra.mrb[68].mxu1 %v8083_v57  ;;  %v544_v57 = vld [vmem:[#allocation5 + $0x5a0] sm:$0xff] }
 0x16d   : > { %1299 = vmatprep.mubr.f32.mxu1 %v8086_v59  ;;  %5914 = vmatpush1.bf16.msra.mxu1 %v5913_v41  ;;  %v577_v59 = vld [vmem:[#allocation5 + $0x6a8] sm:$0xff]  ;;  %v5925_v28 = vpack.c.bf16 %v544_v57, %v528_v10 }
 0x16e   : > { %5916 = vmatprep.subr.bf16.mxu1 %v5915_v30  ;;  %v5927_v47 = vpack.c.bf16 %v577_v59, %v561_v13  ;;  %v592_v30 = vld [vmem:[#allocation5 + $0x720] sm:$0xff]  ;;  %v721_v10 = vld [vmem:[#allocation5 + $0xb28] sm:$0xff] }
 0x16f   : > { %v720_v59 = vld [vmem:[#allocation5 + $0xb20] sm:$0xff] }
 0x170   : > { %1300 = vmatmul.mubr.f32.gmra.mrb[70].mxu1 %v8091_v1  ;;  %v576_v1 = vld [vmem:[#allocation5 + $0x6a0] sm:$0xff] }
 0x171   : > { %1305 = vmatprep.mubr.f32.mxu1 %v8094_v3  ;;  %5918 = vmatpush1.bf16.msra.mxu1 %v5917_v43  ;;  %v609_v3 = vld [vmem:[#allocation5 + $0x7a8] sm:$0xff]  ;;  %v5929_v62 = vpack.c.bf16 %v576_v1, %v560_v50  ;;  %v752_v1 = vld [vmem:[#allocation5 + $0xc20] sm:$0xff] }
 0x172   : > { %5920 = vmatprep.subr.bf16.mxu1 %v5919_v18  ;;  %v5931_v41 = vpack.c.bf16 %v609_v3, %v593_v53  ;;  %v657_v43 = vld [vmem:[#allocation5 + $0x928] sm:$0xff] }
 0x173   : > { %v785_v53 = vld [vmem:[#allocation5 + $0xd28] sm:$0xff] }
 0x174   : > { %1306 = vmatmul.mubr.f32.gmra.mrb[72].mxu1 %v8099_v9  ;;  %v608_v9 = vld [vmem:[#allocation5 + $0x7a0] sm:$0xff] }
 0x175   : > { %1311 = vmatprep.mubr.f32.mxu1 %v8102_v11  ;;  %5922 = vmatpush1.bf16.msra.mxu1 %v5921_v44  ;;  %v641_v11 = vld [vmem:[#allocation5 + $0x8a8] sm:$0xff]  ;;  %v5933_v40 = vpack.c.bf16 %v608_v9, %v592_v30 }
 0x176   : > { %5924 = vmatprep.subr.bf16.mxu1 %v5923_v8  ;;  %v5935_v39 = vpack.c.bf16 %v641_v11, %v625_v32  ;;  %v688_v8 = vld [vmem:[#allocation5 + $0xa20] sm:$0xff]  ;;  %v817_v30 = vld [vmem:[#allocation5 + $0xe28] sm:$0xff] }
 0x177   : > { %v816_v11 = vld [vmem:[#allocation5 + $0xe20] sm:$0xff] }
 0x178   : > { %1312 = vmatmul.mubr.f32.gmra.mrb[74].mxu1 %v8107_v17  ;;  %v640_v17 = vld [vmem:[#allocation5 + $0x8a0] sm:$0xff] }
 0x179   : > { %1317 = vmatprep.mubr.f32.mxu1 %v8110_v19  ;;  %5926 = vmatpush1.bf16.msra.mxu1 %v5925_v28  ;;  %v673_v19 = vld [vmem:[#allocation5 + $0x9a8] sm:$0xff]  ;;  %v5937_v18 = vpack.c.bf16 %v640_v17, %v624_v46  ;;  %v848_v17 = vld [vmem:[#allocation5 + $0xf20] sm:$0xff] }
 0x17a   : > { %5928 = vmatprep.subr.bf16.mxu1 %v5927_v47  ;;  %v5939_v20 = vpack.c.bf16 %v673_v19, %v657_v43  ;;  %v753_v28 = vld [vmem:[#allocation5 + $0xc28] sm:$0xff]  ;;  %v371_v43 = vld [vmem:[#allocation5 + $0x38] sm:$0xff] }
 0x17c   : > { %1318 = vmatmul.mubr.f32.gmra.mrb[76].mxu1 %v8115_v25  ;;  %v672_v25 = vld [vmem:[#allocation5 + $0x9a0] sm:$0xff] }
 0x17d   : > { %1323 = vmatprep.mubr.f32.mxu1 %v8118_v27  ;;  %5930 = vmatpush1.bf16.msra.mxu1 %v5929_v62  ;;  %v705_v27 = vld [vmem:[#allocation5 + $0xaa8] sm:$0xff]  ;;  %v5941_v51 = vpack.c.bf16 %v672_v25, %v656_v49 }
 0x17e   : > { %5932 = vmatprep.subr.bf16.mxu1 %v5931_v41  ;;  %v5943_v44 = vpack.c.bf16 %v705_v27, %v689_v24  ;;  %v784_v41 = vld [vmem:[#allocation5 + $0xd20] sm:$0xff]  ;;  %v3563_v27 = vld [vmem:[#allocation8 + $0x118] sm:$0xff] }
 0x17f   : > { %v3562_v24 = vld [vmem:[#allocation8 + $0x110] sm:$0xff] }
 0x180   : > { %1324 = vmatmul.mubr.f32.gmra.mrb[78].mxu1 %v8123_v33  ;;  %v704_v33 = vld [vmem:[#allocation5 + $0xaa0] sm:$0xff] }
 0x181   : > { %1329 = vmatprep.mubr.f32.mxu1 %v8126_v37  ;;  %5934 = vmatpush1.bf16.msra.mxu1 %v5933_v40  ;;  %v737_v37 = vld [vmem:[#allocation5 + $0xba8] sm:$0xff]  ;;  %v5945_v57 = vpack.c.bf16 %v704_v33, %v688_v8 }
 0x182   : > { %5936 = vmatprep.subr.bf16.mxu1 %v5935_v39  ;;  %v5947_v13 = vpack.c.bf16 %v737_v37, %v721_v10  ;;  %v849_v40 = vld [vmem:[#allocation5 + $0xf28] sm:$0xff]  ;;  %v3564_v37 = vld [vmem:[#allocation8 + $0x120] sm:$0xff] }
 0x184   : > { %1330 = vmatmul.mubr.f32.gmra.mrb[80].mxu1 %v8132_v52  ;;  %v736_v52 = vld [vmem:[#allocation5 + $0xba0] sm:$0xff] }
 0x185   : > { %1335 = vmatprep.mubr.f32.mxu1 %v8135_v55  ;;  %5938 = vmatpush1.bf16.msra.mxu1 %v5937_v18  ;;  %v769_v55 = vld [vmem:[#allocation5 + $0xca8] sm:$0xff]  ;;  %v5949_v47 = vpack.c.bf16 %v736_v52, %v720_v59  ;;  %v9871_v59 = vld [vmem:[#allocation16_spill] sm:$0xff] }
 0x186   : > { %5940 = vmatprep.subr.bf16.mxu1 %v5939_v20  ;;  %v5951_v50 = vpack.c.bf16 %v769_v55, %v753_v28 }
 0x188   : > { %1336 = vmatmul.mubr.f32.gmra.mrb[82].mxu1 %v8141_v63  ;;  %v768_v63 = vld [vmem:[#allocation5 + $0xca0] sm:$0xff] }
 0x189   : > { %1341 = vmatprep.mubr.f32.mxu1 %v8144_v5  ;;  %5942 = vmatpush1.bf16.msra.mxu1 %v5941_v51  ;;  %v801_v5 = vld [vmem:[#allocation5 + $0xda8] sm:$0xff]  ;;  %v5953_v3 = vpack.c.bf16 %v768_v63, %v752_v1  ;;  %v3566_v1 = vld [vmem:[#allocation8 + $0x130] sm:$0xff] }
 0x18a   : > { %5944 = vmatprep.subr.bf16.mxu1 %v5943_v44  ;;  %v5955_v62 = vpack.c.bf16 %v801_v5, %v785_v53  ;;  %v6339_v44 = vpack.c.bf16 %v3563_v27, %v3562_v24  ;;  %v3567_v63 = vld [vmem:[#allocation8 + $0x138] sm:$0xff] }
 0x18b   : > { %v9873_v5 = vld [vmem:[#allocation18_spill] sm:$0xff] }
 0x18c   : > { %1342 = vmatmul.mubr.f32.gmra.mrb[84].mxu1 %v8150_v16  ;;  %v800_v16 = vld [vmem:[#allocation5 + $0xda0] sm:$0xff] }
 0x18d   : > { %1347 = vmatprep.mubr.f32.mxu1 %v8153_v21  ;;  %5946 = vmatpush1.bf16.msra.mxu1 %v5945_v57  ;;  %v833_v21 = vld [vmem:[#allocation5 + $0xea8] sm:$0xff]  ;;  %v5957_v9 = vpack.c.bf16 %v800_v16, %v784_v41  ;;  %v3565_v57 = vld [vmem:[#allocation8 + $0x128] sm:$0xff]  ;;  %v6345_v41 = vpack.c.bf16 %v3567_v63, %v3566_v1 }
 0x18e   : > { %5948 = vmatprep.subr.bf16.mxu1 %v5947_v13  ;;  %v5959_v32 = vpack.c.bf16 %v833_v21, %v817_v30  ;;  %v6342_v28 = vpack.c.bf16 %v3565_v57, %v3564_v37  ;;  %v9874_v21 = vld [vmem:[#allocation19_spill] sm:$0xff]  ;;  %v9881_v37 = vld [vmem:[#allocation26_spill] sm:$0xff]  ;;  %v9883_v1 = vld [vmem:[#allocation28_spill] sm:$0xff] }
 0x190   : > { %1348 = vmatmul.mubr.f32.gmra.mrb[86].mxu1 %v8159_v29  ;;  %v832_v29 = vld [vmem:[#allocation5 + $0xea0] sm:$0xff] }
 0x191   : > { %1353 = vmatprep.mubr.f32.mxu1 %v8162_v34  ;;  %5950 = vmatpush1.bf16.msra.mxu1 %v5949_v47  ;;  %v865_v34 = vld [vmem:[#allocation5 + $0xfa8] sm:$0xff]  ;;  %v5961_v39 = vpack.c.bf16 %v832_v29, %v816_v11  ;;  %v3569_v11 = vld [vmem:[#allocation8 + $0x148] sm:$0xff] }
 0x192   : > { %5952 = vmatprep.subr.bf16.mxu1 %v5951_v50  ;;  %v5963_v46 = vpack.c.bf16 %v865_v34, %v849_v40  ;;  %v9872_v50 = vld [vmem:[#allocation17_spill] sm:$0xff]  ;;  %v9875_v40 = vld [vmem:[#allocation20_spill] sm:$0xff] }
 0x194   : > { %1354 = vmatmul.mubr.f32.gmra.mrb[88].mxu1 %v8168_v48  ;;  %v864_v48 = vld [vmem:[#allocation5 + $0xfa0] sm:$0xff] }
 0x195   : > { %1359 = vmatprep.mubr.f32.mxu1 %v8171_v54  ;;  %5954 = vmatpush1.bf16.msra.mxu1 %v5953_v3  ;;  %v387_v54 = vld [vmem:[#allocation5 + $0xb8] sm:$0xff]  ;;  %v5965_v19 = vpack.c.bf16 %v864_v48, %v848_v17 }
 0x196   : > { %5956 = vmatprep.subr.bf16.mxu1 %v5955_v62  ;;  %v5967_v18 = vpack.c.bf16 %v387_v54, %v371_v43  ;;  %v9876_v43 = vld [vmem:[#allocation21_spill] sm:$0xff] }
 0x198   : > { %1360 = vmatmul.mubr.f32.gmra.mrb[90].mxu1 %v8177_v0  ;;  %v880_v0 = vlaneseq }
 0x199   : > { %1365 = vmatprep.mubr.f32.mxu1 %v8180_v7  ;;  %5958 = vmatpush1.bf16.msra.mxu1 %v5957_v9 }
 0x19a   : > { %5960 = vmatprep.subr.bf16.mxu1 %v5959_v32  ;;  %v8373_v7 = vshrl.u32 %v880_v0, 7  ;;  %v3568_v32 = vld [vmem:[#allocation8 + $0x140] sm:$0xff] }
 0x19c   : > { %1366 = vmatmul.mubr.f32.gmra.mrb[92].mxu1 %v8186_v22  ;;  %v882_v22 = vsub.s32 0, %v8373_v7 }
 0x19d   : > { %1371 = vmatprep.mubr.f32.mxu1 %v8189_v26  ;;  %5962 = vmatpush1.bf16.msra.mxu1 %v5961_v39  ;;  %v876_v26 = vld [vmem:[#allocation7] sm:$0xff] }
 0x19e   : > { %5964 = vmatprep.subr.bf16.mxu1 %v5963_v46  ;;  %v6348_v46 = vpack.c.bf16 %v3569_v11, %v3568_v32  ;;  %v9885_v32 = vld [vmem:[#allocation30_spill] sm:$0xff]  ;;  %v370_v11 = vld [vmem:[#allocation5 + $0x30] sm:$0xff] }
 0x1a0   : > { %1372 = vmatmul.mubr.f32.gmra.mrb[94].mxu1 %v8195_v36  ;;  %v886_v36 = vsub.s32 1, %v8373_v7 }
 0x1a1   : > { %1377 = vmatprep.mubr.f32.mxu1 %v8198_v45  ;;  %5966 = vmatpush1.bf16.msra.mxu1 %v5965_v19  ;;  %v8383_v45 = vrot.slane %v876_v26, %v882_v22  ;;  %v3570_v19 = vld [vmem:[#allocation8 + $0x150] sm:$0xff] }
 0x1a2   : > { %5968 = vmatprep.subr.bf16.mxu1 %v5967_v18  ;;  %v3571_v18 = vld [vmem:[#allocation8 + $0x158] sm:$0xff] }
 0x1a4   : > { %1378 = vmatmul.mubr.f32.gmra.mrb[96].mxu1 %v8204_v56  ;;  %v8388_v56 = vrot.slane %v876_v26, %v886_v36  ;;  %v9877_v26 = vld [vmem:[#allocation22_spill] sm:$0xff] }
 0x1a5   : > { %1383 = vmatprep.mubr.f32.mxu1 %v8207_v60 }
 0x1a8   : > { %1384 = vmatmul.mubr.f32.gmra.mrb[98].mxu1 %v8213_v61 }
 0x1a9   : > { %1389 = vmatprep.mubr.f32.mxu1 %v8217_v4 }
 0x1ac   : > { %1390 = vmatmul.mubr.f32.gmra.mrb[100].mxu1 %v8222_v12  ;;  %v3560_v12 = vld [vmem:[#allocation8 + $0x100] sm:$0xff] }
 0x1ad   : > { %1395 = vmatprep.mubr.f32.mxu1 %v8226_v14  ;;  %v3561_v14 = vld [vmem:[#allocation8 + $0x108] sm:$0xff] }
 0x1ae   : > { %v6336_v20 = vpack.c.bf16 %v3561_v14, %v3560_v12 }
 0x1b0   : > { %1396 = vmatmul.mubr.f32.gmra.mrb[102].mxu1 %v8231_v15 }
 0x1b1   : > { %1401 = vmatprep.mubr.f32.mxu1 %v8235_v23 }
 0x1b4   : > { %1402 = vmatmul.mubr.f32.gmra.mrb[104].mxu1 %v8240_v31 }
 0x1b5   : > { %1407 = vmatprep.mubr.f32.mxu1 %v8244_v35 }
 0x1b7   : > { %v1026_v60 = vpop.f32.mrb[0].mxu1 }
 0x1b8   : > { %v1027_v61 = vadd.f32 %v1026_v60, %v8383_v45  ;;  %v1028_v4 = vpop.f32.mrb[1].mxu1  ;;  %1408 = vmatmul.mubr.f32.gmra.mrb[106].mxu1 %v8249_v38 }
 0x1b9   : > { %1413 = vmatprep.mubr.f32.mxu1 %v8253_v42  ;;  %v1029_v15 = vadd.f32 %v1028_v4, %v8388_v56  ;;  %v6351_v4 = vpack.c.bf16 %v3571_v18, %v3570_v19  ;;  %v419_v19 = vld [vmem:[#allocation5 + $0x1b8] sm:$0xff]  ;;  %v3580_v18 = vld [vmem:[#allocation8 + $0x1a0] sm:$0xff] }
 0x1ba   : > { %v3016_v25 = vmax.f32 %v1027_v61, 0.0 }
 0x1bb   : > { %v1032_v23 = vpop.f32.mrb[2].mxu1  ;;  %v3017_v31 = vmax.f32 %v1029_v15, 0.0  ;;  %v9878_v15 = vld [vmem:[#allocation23_spill] sm:$0xff] }
 0x1bc   : > { %v1033_v35 = vadd.f32 %v1032_v23, %v8383_v45  ;;  %v1034_v49 = vpop.f32.mrb[3].mxu1  ;;  %1414 = vmatmul.mubr.f32.gmra.mrb[108].mxu1 %v8258_v58  ;;  %v9870_v58 = vmov 0.0|0.0  }
 0x1bd   : > { %v1035_v51 = vadd.f32 %v1034_v49, %v8388_v56  ;;  %3855 = vmatprep.mubr.f32.mxu0 %v3017_v31  ;;  %1419 = vmatprep.mubr.f32.mxu1 %v8261_v2  ;;  %v3572_v31 = vld [vmem:[#allocation8 + $0x160] sm:$0xff] }
 0x1be   : > { %3856 = vmatmul.mubr.f32.vlgmr.msra.gmra.mrb[0].mxu0 %v3016_v25  ;;  %v3032_v10 = vmax.f32 %v1033_v35, 0.0  ;;  %v9879_v49 = vld [vmem:[#allocation24_spill] sm:$0xff] }
 0x1bf   : > { %v1038_v38 = vpop.f32.mrb[4].mxu1  ;;  %6337 = vmatpush1.bf16.msra.mxu0 %v6336_v20  ;;  %v3033_v42 = vmax.f32 %v1035_v51, 0.0  ;;  %v3573_v20 = vld [vmem:[#allocation8 + $0x168] sm:$0xff] }
 0x1c0   : > { %v1039_v8 = vadd.f32 %v1038_v38, %v8383_v45  ;;  %v1040_v33 = vpop.f32.mrb[5].mxu1  ;;  %1420 = vmatmul.mubr.f32.gmra.mrb[110].mxu1 %v8267_v6  ;;  %6338 = vmatprep.subr.bf16.mxu0 %v9870_v58  ;;  %v6354_v27 = vpack.c.bf16 %v3573_v20, %v3572_v31  ;;  %v435_v31 = vld [vmem:[#allocation5 + $0x238] sm:$0xff] }
 0x1c1   : > { %v1041_v13 = vadd.f32 %v1040_v33, %v8388_v56  ;;  %3860 = vmatprep.mubr.f32.mxu0 %v3033_v42  ;;  %1425 = vmatprep.mubr.f32.mxu1 %v9871_v59  ;;  %v9880_v42 = vld [vmem:[#allocation25_spill] sm:$0xff]  ;;  %v3575_v33 = vld [vmem:[#allocation8 + $0x178] sm:$0xff] }
 0x1c2   : > { %3861 = vmatmul.mubr.f32.gmra.mrb[2].mxu0 %v3032_v10  ;;  %v3048_v6 = vmax.f32 %v1039_v8, 0.0  ;;  %v3574_v8 = vld [vmem:[#allocation8 + $0x170] sm:$0xff] }
 0x1c3   : > { %v1044_v2 = vpop.f32.mrb[6].mxu1  ;;  %v3049_v52 = vmax.f32 %v1041_v13, 0.0  ;;  %6340 = vmatpush1.bf16.msra.mxu0 %v6339_v44  ;;  %v6357_v59 = vpack.c.bf16 %v3575_v33, %v3574_v8 }
 0x1c4   : > { %v1045_v55 = vadd.f32 %v1044_v2, %v8383_v45  ;;  %v1046_v47 = vpop.f32.mrb[7].mxu1  ;;  %1426 = vmatmul.mubr.f32.gmra.mrb[112].mxu1 %v9872_v50  ;;  %6341 = vmatprep.subr.bf16.mxu0 %v9870_v58  ;;  %v3577_v50 = vld [vmem:[#allocation8 + $0x188] sm:$0xff] }
 0x1c5   : > { %v1047_v53 = vadd.f32 %v1046_v47, %v8388_v56  ;;  %3865 = vmatprep.mubr.f32.mxu0 %v3049_v52  ;;  %1431 = vmatprep.mubr.f32.mxu1 %v9873_v5  ;;  %v3576_v47 = vld [vmem:[#allocation8 + $0x180] sm:$0xff] }
 0x1c6   : > { %3866 = vmatmul.mubr.f32.gmra.mrb[4].mxu0 %v3048_v6  ;;  %v3064_v9 = vmax.f32 %v1045_v55, 0.0  ;;  %v6360_v5 = vpack.c.bf16 %v3577_v50, %v3576_v47  ;;  %v483_v50 = vld [vmem:[#allocation5 + $0x3b8] sm:$0xff] }
 0x1c7   : > { %v1050_v3 = vpop.f32.mrb[8].mxu1  ;;  %v3065_v62 = vmax.f32 %v1047_v53, 0.0  ;;  %6343 = vmatpush1.bf16.msra.mxu0 %v6342_v28  ;;  %v9882_v28 = vld [vmem:[#allocation27_spill] sm:$0xff] }
 0x1c8   : > { %v1051_v16 = vadd.f32 %v1050_v3, %v8383_v45  ;;  %v1052_v30 = vpop.f32.mrb[9].mxu1  ;;  %1432 = vmatmul.mubr.f32.gmra.mrb[114].mxu1 %v9874_v21  ;;  %6344 = vmatprep.subr.bf16.mxu0 %v9870_v58  ;;  %v3579_v21 = vld [vmem:[#allocation8 + $0x198] sm:$0xff] }
 0x1c9   : > { %v1053_v29 = vadd.f32 %v1052_v30, %v8388_v56  ;;  %3870 = vmatprep.mubr.f32.mxu0 %v3065_v62  ;;  %1437 = vmatprep.mubr.f32.mxu1 %v9875_v40  ;;  %v3578_v30 = vld [vmem:[#allocation8 + $0x190] sm:$0xff] }
 0x1ca   : > { %3871 = vmatmul.mubr.f32.gmra.mrb[6].mxu0 %v3064_v9  ;;  %v3080_v54 = vmax.f32 %v1051_v16, 0.0 }
 0x1cb   : > { %v1056_v34 = vpop.f32.mrb[10].mxu1  ;;  %v3081_v39 = vmax.f32 %v1053_v29, 0.0  ;;  %6346 = vmatpush1.bf16.msra.mxu0 %v6345_v41  ;;  %v9884_v41 = vld [vmem:[#allocation29_spill] sm:$0xff]  ;;  %v386_v29 = vld [vmem:[#allocation5 + $0xb0] sm:$0xff] }
 0x1cc   : > { %v1057_v17 = vadd.f32 %v1056_v34, %v8383_v45  ;;  %v1058_v48 = vpop.f32.mrb[11].mxu1  ;;  %1438 = vmatmul.mubr.f32.gmra.mrb[116].mxu1 %v9876_v43  ;;  %6347 = vmatprep.subr.bf16.mxu0 %v9870_v58  ;;  %v9886_v43 = vld [vmem:[#allocation31_spill] sm:$0xff] }
 0x1cd   : > { %v1059_v0 = vadd.f32 %v1058_v48, %v8388_v56  ;;  %3875 = vmatprep.mubr.f32.mxu0 %v3081_v39  ;;  %1443 = vmatprep.mubr.f32.mxu1 %v9877_v26  ;;  %v403_v39 = vld [vmem:[#allocation5 + $0x138] sm:$0xff] }
 0x1ce   : > { %3876 = vmatmul.mubr.f32.gmra.mrb[8].mxu0 %v3080_v54  ;;  %v3096_v23 = vmax.f32 %v1057_v17, 0.0 }
 0x1cf   : > { %v1062_v60 = vpop.f32.mrb[12].mxu1  ;;  %v3097_v61 = vmax.f32 %v1059_v0, 0.0  ;;  %6349 = vmatpush1.bf16.msra.mxu0 %v6348_v46  ;;  %v6363_v46 = vpack.c.bf16 %v3579_v21, %v3578_v30  ;;  %v3581_v0 = vld [vmem:[#allocation8 + $0x1a8] sm:$0xff]  ;;  %v482_v30 = vld [vmem:[#allocation5 + $0x3b0] sm:$0xff] }
 0x1d0   : > { %v1063_v12 = vadd.f32 %v1062_v60, %v8383_v45  ;;  %v1064_v14 = vpop.f32.mrb[13].mxu1  ;;  %1444 = vmatmul.mubr.f32.gmra.mrb[118].mxu1 %v9878_v15  ;;  %6350 = vmatprep.subr.bf16.mxu0 %v9870_v58  ;;  %v7246_v60 = vld [vmem:[%s8048_s7 + $0x8] sm:$0xff]  ;;  %v402_v15 = vld [vmem:[#allocation5 + $0x130] sm:$0xff]  ;;  %v6366_v20 = vpack.c.bf16 %v3581_v0, %v3580_v18  ;;  %v499_v21 = vld [vmem:[#allocation5 + $0x438] sm:$0xff] }
 0x1d1   : > { %v1065_v35 = vadd.f32 %v1064_v14, %v8388_v56  ;;  %3880 = vmatprep.mubr.f32.mxu0 %v3097_v61  ;;  %1449 = vmatprep.mubr.f32.mxu1 %v9879_v49  ;;  %v5969_v61 = vpack.c.bf16 %v386_v29, %v370_v11  ;;  %v5971_v14 = vpack.c.bf16 %v419_v19, %v403_v39  ;;  %v7251_v29 = vld [vmem:[%s8048_s7 + $0x20] sm:$0xff]  ;;  %v498_v0 = vld [vmem:[#allocation5 + $0x430] sm:$0xff] }
 0x1d2   : > { %3881 = vmatmul.mubr.f32.gmra.mrb[10].mxu0 %v3096_v23  ;;  %v3112_v44 = vmax.f32 %v1063_v12, 0.0  ;;  %v418_v23 = vld [vmem:[#allocation5 + $0x1b0] sm:$0xff]  ;;  %v3586_v39 = vld [vmem:[#allocation8 + $0x1d0] sm:$0xff] }
 0x1d3   : > { %v1068_v25 = vpop.f32.mrb[14].mxu1  ;;  %v3113_v24 = vmax.f32 %v1065_v35, 0.0  ;;  %6352 = vmatpush1.bf16.msra.mxu0 %v6351_v4  ;;  %v5973_v8 = vpack.c.bf16 %v418_v23, %v402_v15  ;;  %v547_v23 = vld [vmem:[#allocation5 + $0x5b8] sm:$0xff] }
 0x1d4   : > { %v1069_v51 = vadd.f32 %v1068_v25, %v8383_v45  ;;  %v1070_v38 = vpop.f32.mrb[15].mxu1  ;;  %1450 = vmatmul.mubr.f32.gmra.mrb[120].mxu1 %v9880_v42  ;;  %6353 = vmatprep.subr.bf16.mxu0 %v9870_v58  ;;  %v7247_v25 = vld [vmem:[%s8048_s7] sm:$0xff] }
 0x1d5   : > { %v1071_v10 = vadd.f32 %v1070_v38, %v8388_v56  ;;  %3885 = vmatprep.mubr.f32.mxu0 %v3113_v24  ;;  %1455 = vmatprep.mubr.f32.mxu1 %v9881_v37  ;;  %v3583_v38 = vld [vmem:[#allocation8 + $0x1b8] sm:$0xff] }
 0x1d6   : > { %3886 = vmatmul.mubr.f32.gmra.mrb[12].mxu0 %v3112_v44  ;;  %v3128_v55 = vmax.f32 %v1069_v51, 0.0  ;;  %v3582_v51 = vld [vmem:[#allocation8 + $0x1b0] sm:$0xff]  ;;  %v7248_v44 = vld [vmem:[%s8048_s7 + $0x18] sm:$0xff] }
 0x1d7   : > { %v1074_v57 = vpop.f32.mrb[16].mxu1  ;;  %v3129_v13 = vmax.f32 %v1071_v10, 0.0  ;;  %6355 = vmatpush1.bf16.msra.mxu0 %v6354_v27  ;;  %v451_v27 = vld [vmem:[#allocation5 + $0x2b8] sm:$0xff] }
 0x1d8   : > { %v1075_v2 = vadd.f32 %v1074_v57, %v8383_v45  ;;  %v1076_v52 = vpop.f32.mrb[17].mxu1  ;;  %1456 = vmatmul.mubr.f32.gmra.mrb[122].mxu1 %v9882_v28  ;;  %6356 = vmatprep.subr.bf16.mxu0 %v9870_v58  ;;  %v5975_v37 = vpack.c.bf16 %v451_v27, %v435_v31  ;;  %v434_v57 = vld [vmem:[#allocation5 + $0x230] sm:$0xff] }
 0x1d9   : > { %v1077_v6 = vadd.f32 %v1076_v52, %v8388_v56  ;;  %3890 = vmatprep.mubr.f32.mxu0 %v3129_v13  ;;  %1461 = vmatprep.mubr.f32.mxu1 %v9883_v1  ;;  %v450_v13 = vld [vmem:[#allocation5 + $0x2b0] sm:$0xff]  ;;  %v3585_v1 = vld [vmem:[#allocation8 + $0x1c8] sm:$0xff] }
 0x1da   : > { %3891 = vmatmul.mubr.f32.gmra.mrb[14].mxu0 %v3128_v55  ;;  %v3144_v16 = vmax.f32 %v1075_v2, 0.0  ;;  %v6369_v2 = vpack.c.bf16 %v3583_v38, %v3582_v51  ;;  %v7249_v55 = vld [vmem:[%s8048_s7 + $0x10] sm:$0xff] }
 0x1db   : > { %v1080_v63 = vpop.f32.mrb[18].mxu1  ;;  %v3145_v53 = vmax.f32 %v1077_v6, 0.0  ;;  %6358 = vmatpush1.bf16.msra.mxu0 %v6357_v59  ;;  %v467_v59 = vld [vmem:[#allocation5 + $0x338] sm:$0xff]  ;;  %v3584_v6 = vld [vmem:[#allocation8 + $0x1c0] sm:$0xff] }
 0x1dc   : > { %v1081_v3 = vadd.f32 %v1080_v63, %v8383_v45  ;;  %v1082_v62 = vpop.f32.mrb[19].mxu1  ;;  %1462 = vmatmul.mubr.f32.gmra.mrb[124].mxu1 %v9884_v41  ;;  %6359 = vmatprep.subr.bf16.mxu0 %v9870_v58  ;;  %v5979_v41 = vpack.c.bf16 %v483_v50, %v467_v59  ;;  %v3588_v31 = vld [vmem:[#allocation8 + $0x1e0] sm:$0xff]  ;;  %v3590_v59 = vld [vmem:[#allocation8 + $0x1f0] sm:$0xff] }
 0x1dd   : > { %v1083_v9 = vadd.f32 %v1082_v62, %v8388_v56  ;;  %3895 = vmatprep.mubr.f32.mxu0 %v3145_v53  ;;  %1467 = vmatprep.mubr.f32.mxu1 %v9885_v32  ;;  %v7250_v53 = vld [vmem:[%s8048_s7 + $0x28] sm:$0xff]  ;;  %v530_v38 = vld [vmem:[#allocation5 + $0x530] sm:$0xff] }
 0x1de   : > { %3896 = vmatmul.mubr.f32.gmra.mrb[16].mxu0 %v3144_v16  ;;  %v3160_v54 = vmax.f32 %v1081_v3, 0.0  ;;  %v466_v16 = vld [vmem:[#allocation5 + $0x330] sm:$0xff] }
 0x1df   : > { %v1086_v40 = vpop.f32.mrb[20].mxu1  ;;  %v3161_v34 = vmax.f32 %v1083_v9, 0.0  ;;  %6361 = vmatpush1.bf16.msra.mxu0 %v6360_v5  ;;  %v5977_v5 = vpack.c.bf16 %v450_v13, %v434_v57  ;;  %v6372_v9 = vpack.c.bf16 %v3585_v1, %v3584_v6  ;;  %v579_v13 = vld [vmem:[#allocation5 + $0x6b8] sm:$0xff]  ;;  %v562_v1 = vld [vmem:[#allocation5 + $0x630] sm:$0xff] }
 0x1e0   : > { %v1087_v17 = vadd.f32 %v1086_v40, %v8383_v45  ;;  %v1088_v48 = vpop.f32.mrb[21].mxu1  ;;  %1468 = vmatmul.mubr.f32.gmra.mrb[126].mxu1 %v9886_v43  ;;  %6362 = vmatprep.subr.bf16.mxu0 %v9870_v58  ;;  %v5981_v43 = vpack.c.bf16 %v482_v30, %v466_v16  ;;  %v595_v16 = vld [vmem:[#allocation5 + $0x738] sm:$0xff] }
 0x1e1   : > { %v1089_v26 = vadd.f32 %v1088_v48, %v8388_v56  ;;  %3900 = vmatprep.mubr.f32.mxu0 %v3161_v34  ;;  %1538 = vmatprep.mubr.f32.mxu1 %v7246_v60  ;;  %v515_v34 = vld [vmem:[#allocation5 + $0x4b8] sm:$0xff] }
 0x1e2   : > { %3901 = vmatmul.mubr.f32.gmra.mrb[18].mxu0 %v3160_v54  ;;  %v3176_v24 = vmax.f32 %v1087_v17, 0.0  ;;  %v7252_v48 = vld [vmem:[%s8048_s7 + $0x38] sm:$0xff]  ;;  %v5983_v18 = vpack.c.bf16 %v515_v34, %v499_v21  ;;  %v594_v34 = vld [vmem:[#allocation5 + $0x730] sm:$0xff] }
 0x1e3   : > { %v1092_v4 = vpop.f32.mrb[22].mxu1  ;;  %v3177_v12 = vmax.f32 %v1089_v26, 0.0  ;;  %6364 = vmatpush1.bf16.msra.mxu0 %v6363_v46  ;;  %v3587_v46 = vld [vmem:[#allocation8 + $0x1d8] sm:$0xff]  ;;  %v514_v26 = vld [vmem:[#allocation5 + $0x4b0] sm:$0xff]  ;;  %v531_v60 = vld [vmem:[#allocation5 + $0x538] sm:$0xff] }
 0x1e4   : > { %v1093_v35 = vadd.f32 %v1092_v4, %v8383_v45  ;;  %v1094_v49 = vpop.f32.mrb[23].mxu1  ;;  %1539 = vmatmul.mubr.f32.vlgmr.msra.gmra.mrb[128].mxu1 %v7247_v25  ;;  %6365 = vmatprep.subr.bf16.mxu0 %v9870_v58  ;;  %v5985_v25 = vpack.c.bf16 %v514_v26, %v498_v0  ;;  %v5987_v51 = vpack.c.bf16 %v547_v23, %v531_v60  ;;  %v611_v30 = vld [vmem:[#allocation5 + $0x7b8] sm:$0xff] }
 0x1e5   : > { %v1095_v42 = vadd.f32 %v1094_v49, %v8388_v56  ;;  %5970 = vmatpush1.bf16.msra.mxu1 %v5969_v61  ;;  %3905 = vmatprep.mubr.f32.mxu0 %v3177_v12  ;;  %v6375_v61 = vpack.c.bf16 %v3587_v46, %v3586_v39  ;;  %v7254_v49 = vld [vmem:[%s8048_s7 + $0x48] sm:$0xff]  ;;  %v610_v39 = vld [vmem:[#allocation5 + $0x7b0] sm:$0xff]  ;;  %v7260_v0 = vld [vmem:[%s8048_s7 + $0x78] sm:$0xff] }
 0x1e6   : > { %3906 = vmatmul.mubr.f32.gmra.mrb[20].mxu0 %v3176_v24  ;;  %1544 = vmatprep.mubr.f32.mxu1 %v7248_v44  ;;  %v3192_v47 = vmax.f32 %v1093_v35, 0.0  ;;  %v563_v44 = vld [vmem:[#allocation5 + $0x638] sm:$0xff]  ;;  %v5997_v26 = vpack.c.bf16 %v610_v39, %v594_v34 }
 0x1e7   : > { %v1098_v33 = vpop.f32.mrb[24].mxu1  ;;  %v3193_v10 = vmax.f32 %v1095_v42, 0.0  ;;  %5972 = vmatprep.subr.bf16.mxu1 %v5971_v14  ;;  %6367 = vmatpush1.bf16.msra.mxu0 %v6366_v20  ;;  %v7253_v14 = vld [vmem:[%s8048_s7 + $0x30] sm:$0xff]  ;;  %v3589_v20 = vld [vmem:[#allocation8 + $0x1e8] sm:$0xff]  ;;  %v5991_v6 = vpack.c.bf16 %v579_v13, %v563_v44 }
 0x1e8   : > { %v1099_v52 = vadd.f32 %v1098_v33, %v8383_v45  ;;  %v1100_v28 = vpop.f32.mrb[25].mxu1  ;;  %1545 = vmatmul.mubr.f32.gmra.mrb[130].mxu1 %v7249_v55  ;;  %6368 = vmatprep.subr.bf16.mxu0 %v9870_v58  ;;  %v546_v42 = vld [vmem:[#allocation5 + $0x5b0] sm:$0xff]  ;;  %v691_v13 = vld [vmem:[#allocation5 + $0xa38] sm:$0xff] }
 0x1e9   : > { %v1101_v63 = vadd.f32 %v1100_v28, %v8388_v56  ;;  %3910 = vmatprep.mubr.f32.mxu0 %v3193_v10  ;;  %1550 = vmatprep.mubr.f32.mxu1 %v7250_v53  ;;  %v7256_v28 = vld [vmem:[%s8048_s7 + $0x58] sm:$0xff]  ;;  %v5989_v55 = vpack.c.bf16 %v546_v42, %v530_v38  ;;  %v658_v44 = vld [vmem:[#allocation5 + $0x930] sm:$0xff] }
 0x1ea   : > { %3911 = vmatmul.mubr.f32.gmra.mrb[22].mxu0 %v3192_v47  ;;  %5974 = vmatpush1.bf16.msra.mxu1 %v5973_v8  ;;  %v3208_v40 = vmax.f32 %v1099_v52, 0.0  ;;  %v6378_v8 = vpack.c.bf16 %v3589_v20, %v3588_v31  ;;  %v7261_v31 = vld [vmem:[%s8048_s7 + $0x70] sm:$0xff] }
 0x1eb   : > { %v1104_v3 = vpop.f32.mrb[26].mxu1  ;;  %v3209_v62 = vmax.f32 %v1101_v63, 0.0  ;;  %5976 = vmatprep.subr.bf16.mxu1 %v5975_v37  ;;  %6370 = vmatpush1.bf16.msra.mxu0 %v6369_v2  ;;  %v7255_v37 = vld [vmem:[%s8048_s7 + $0x40] sm:$0xff]  ;;  %v3591_v2 = vld [vmem:[#allocation8 + $0x1f8] sm:$0xff]  ;;  %v578_v63 = vld [vmem:[#allocation5 + $0x6b0] sm:$0xff] }
 0x1ec   : > { %v1105_v32 = vadd.f32 %v1104_v3, %v8383_v45  ;;  %v1106_v11 = vpop.f32.mrb[27].mxu1  ;;  %1551 = vmatmul.mubr.f32.gmra.mrb[132].mxu1 %v7251_v29  ;;  %6371 = vmatprep.subr.bf16.mxu0 %v9870_v58  ;;  %v6381_v53 = vpack.c.bf16 %v3591_v2, %v3590_v59  ;;  %v707_v59 = vld [vmem:[#allocation5 + $0xab8] sm:$0xff] }
 0x1ed   : > { %v1107_v17 = vadd.f32 %v1106_v11, %v8388_v56  ;;  %3915 = vmatprep.mubr.f32.mxu0 %v3209_v62  ;;  %1556 = vmatprep.mubr.f32.mxu1 %v7252_v48  ;;  %v7257_v62 = vld [vmem:[%s8048_s7 + $0x50] sm:$0xff]  ;;  %v7259_v48 = vld [vmem:[%s8048_s7 + $0x60] sm:$0xff] }
 0x1ee   : > { %3916 = vmatmul.mubr.f32.gmra.mrb[24].mxu0 %v3208_v40  ;;  %5978 = vmatpush1.bf16.msra.mxu1 %v5977_v5  ;;  %v3224_v15 = vmax.f32 %v1105_v32, 0.0  ;;  %v5993_v32 = vpack.c.bf16 %v578_v63, %v562_v1  ;;  %v5995_v40 = vpack.c.bf16 %v611_v30, %v595_v16  ;;  %v706_v1 = vld [vmem:[#allocation5 + $0xab0] sm:$0xff]  ;;  %v7266_v30 = vld [vmem:[%s8048_s7 + $0xa8] sm:$0xff] }
 0x1ef   : > { %v1110_v54 = vpop.f32.mrb[28].mxu1  ;;  %v3225_v19 = vmax.f32 %v1107_v17, 0.0  ;;  %5980 = vmatprep.subr.bf16.mxu1 %v5979_v41  ;;  %6373 = vmatpush1.bf16.msra.mxu0 %v6372_v9  ;;  %v7258_v9 = vld [vmem:[%s8048_s7 + $0x68] sm:$0xff] }
 0x1f0   : > { %v1111_v4 = vadd.f32 %v1110_v54, %v8383_v45  ;;  %v1112_v12 = vpop.f32.mrb[29].mxu1  ;;  %1557 = vmatmul.mubr.f32.gmra.mrb[134].mxu1 %v7253_v14  ;;  %6374 = vmatprep.subr.bf16.mxu0 %v9870_v58  ;;  %v627_v54 = vld [vmem:[#allocation5 + $0x838] sm:$0xff]  ;;  %v642_v14 = vld [vmem:[#allocation5 + $0x8b0] sm:$0xff] }
 0x1f1   : > { %v1113_v35 = vadd.f32 %v1112_v12, %v8388_v56  ;;  %3920 = vmatprep.mubr.f32.mxu0 %v3225_v19  ;;  %1562 = vmatprep.mubr.f32.mxu1 %v7254_v49  ;;  %v643_v19 = vld [vmem:[#allocation5 + $0x8b8] sm:$0xff]  ;;  %v626_v12 = vld [vmem:[#allocation5 + $0x830] sm:$0xff] }
 0x1f2   : > { %3921 = vmatmul.mubr.f32.gmra.mrb[26].mxu0 %v3224_v15  ;;  %5982 = vmatpush1.bf16.msra.mxu1 %v5981_v43  ;;  %v3240_v57 = vmax.f32 %v1111_v4, 0.0  ;;  %v5999_v4 = vpack.c.bf16 %v643_v19, %v627_v54  ;;  %v675_v49 = vld [vmem:[#allocation5 + $0x9b8] sm:$0xff] }
 0x1f3   : > { %v1116_v24 = vpop.f32.mrb[30].mxu1  ;;  %v3241_v27 = vmax.f32 %v1113_v35, 0.0  ;;  %5984 = vmatprep.subr.bf16.mxu1 %v5983_v18  ;;  %6376 = vmatpush1.bf16.msra.mxu0 %v6375_v61  ;;  %v659_v35 = vld [vmem:[#allocation5 + $0x938] sm:$0xff] }
 0x1f4   : > { %v1117_v33 = vadd.f32 %v1116_v24, %v8383_v45  ;;  %v1118_v10 = vpop.f32.mrb[31].mxu1  ;;  %1563 = vmatmul.mubr.f32.gmra.mrb[136].mxu1 %v7255_v37  ;;  %6377 = vmatprep.subr.bf16.mxu0 %v9870_v58  ;;  %v7262_v24 = vld [vmem:[%s8048_s7 + $0x88] sm:$0xff]  ;;  %v6003_v42 = vpack.c.bf16 %v675_v49, %v659_v35  ;;  %v7263_v37 = vld [vmem:[%s8048_s7 + $0x80] sm:$0xff]  ;;  %v7268_v19 = vld [vmem:[%s8048_s7 + $0xb8] sm:$0xff] }
 0x1f5   : > { %v1119_v52 = vadd.f32 %v1118_v10, %v8388_v56  ;;  %3925 = vmatprep.mubr.f32.mxu0 %v3241_v27  ;;  %1568 = vmatprep.mubr.f32.mxu1 %v7256_v28  ;;  %v6001_v27 = vpack.c.bf16 %v642_v14, %v626_v12  ;;  %v7270_v49 = vld [vmem:[%s8048_s7 + $0xc8] sm:$0xff] }
 0x1f6   : > { %3926 = vmatmul.mubr.f32.gmra.mrb[28].mxu0 %v3240_v57  ;;  %5986 = vmatpush1.bf16.msra.mxu1 %v5985_v25  ;;  %v3256_v41 = vmax.f32 %v1117_v33, 0.0 }
 0x1f7   : > { %v1122_v47 = vpop.f32.mrb[32].mxu1  ;;  %v3257_v50 = vmax.f32 %v1119_v52, 0.0  ;;  %5988 = vmatprep.subr.bf16.mxu1 %v5987_v51  ;;  %6379 = vmatpush1.bf16.msra.mxu0 %v6378_v8  ;;  %v674_v8 = vld [vmem:[#allocation5 + $0x9b0] sm:$0xff]  ;;  %v7264_v52 = vld [vmem:[%s8048_s7 + $0x98] sm:$0xff] }
 0x1f8   : > { %v1123_v5 = vadd.f32 %v1122_v47, %v8383_v45  ;;  %v1124_v3 = vpop.f32.mrb[33].mxu1  ;;  %1569 = vmatmul.mubr.f32.gmra.mrb[138].mxu1 %v7257_v62  ;;  %6380 = vmatprep.subr.bf16.mxu0 %v9870_v58  ;;  %v6005_v28 = vpack.c.bf16 %v674_v8, %v658_v44  ;;  %v723_v62 = vld [vmem:[#allocation5 + $0xb38] sm:$0xff] }
 0x1f9   : > { %v1125_v21 = vadd.f32 %v1124_v3, %v8388_v56  ;;  %3930 = vmatprep.mubr.f32.mxu0 %v3257_v50  ;;  %1574 = vmatprep.mubr.f32.mxu1 %v7258_v9  ;;  %v6007_v50 = vpack.c.bf16 %v707_v59, %v691_v13  ;;  %v7272_v59 = vld [vmem:[%s8048_s7 + $0xd8] sm:$0xff] }
 0x1fa   : > { %3931 = vmatmul.mubr.f32.gmra.mrb[30].mxu0 %v3256_v41  ;;  %5990 = vmatpush1.bf16.msra.mxu1 %v5989_v55  ;;  %v3272_v43 = vmax.f32 %v1123_v5, 0.0  ;;  %v7265_v5 = vld [vmem:[%s8048_s7 + $0x90] sm:$0xff]  ;;  %v739_v41 = vld [vmem:[#allocation5 + $0xbb8] sm:$0xff] }
 0x1fb   : > { %v1128_v11 = vpop.f32.mrb[34].mxu1  ;;  %v3273_v29 = vmax.f32 %v1125_v21, 0.0  ;;  %5992 = vmatprep.subr.bf16.mxu1 %v5991_v6  ;;  %6382 = vmatpush1.bf16.msra.mxu0 %v6381_v53  ;;  %v690_v6 = vld [vmem:[#allocation5 + $0xa30] sm:$0xff] }
 0x1fc   : > { %v1129_v46 = vadd.f32 %v1128_v11, %v8383_v45  ;;  %v1130_v17 = vpop.f32.mrb[35].mxu1  ;;  %1575 = vmatmul.mubr.f32.gmra.mrb[140].mxu1 %v7259_v48  ;;  %6383 = vmatprep.subr.bf16.mxu0 %v9870_v58  ;;  %v6009_v21 = vpack.c.bf16 %v706_v1, %v690_v6  ;;  %v6011_v11 = vpack.c.bf16 %v739_v41, %v723_v62  ;;  %v755_v48 = vld [vmem:[#allocation5 + $0xc38] sm:$0xff]  ;;  %v7274_v41 = vld [vmem:[%s8048_s7 + $0xe8] sm:$0xff] }
 0x1fd   : > { %v1131_v18 = vadd.f32 %v1130_v17, %v8388_v56  ;;  %3935 = vmatprep.mubr.f32.mxu0 %v3273_v29  ;;  %1580 = vmatprep.mubr.f32.mxu1 %v7260_v0  ;;  %v722_v29 = vld [vmem:[#allocation5 + $0xb30] sm:$0xff] }
 0x1fe   : > { %3936 = vmatmul.mubr.f32.gmra.mrb[32].mxu0 %v3272_v43  ;;  %5994 = vmatpush1.bf16.msra.mxu1 %v5993_v32  ;;  %v3288_v20 = vmax.f32 %v1129_v46, 0.0  ;;  %v7267_v46 = vld [vmem:[%s8048_s7 + $0xa0] sm:$0xff]  ;;  %v771_v43 = vld [vmem:[#allocation5 + $0xcb8] sm:$0xff] }
 0x1ff   : > { %v1134_v60 = vpop.f32.mrb[36].mxu1  ;;  %v3289_v61 = vmax.f32 %v1131_v18, 0.0  ;;  %5996 = vmatprep.subr.bf16.mxu1 %v5995_v40  ;;  %v738_v40 = vld [vmem:[#allocation5 + $0xbb0] sm:$0xff] }
 0x200   : > { %v1135_v15 = vadd.f32 %v1134_v60, %v8383_v45  ;;  %v1136_v23 = vpop.f32.mrb[37].mxu1  ;;  %1581 = vmatmul.mubr.f32.gmra.mrb[142].mxu1 %v7261_v31  ;;  %v6013_v18 = vpack.c.bf16 %v738_v40, %v722_v29  ;;  %v6015_v60 = vpack.c.bf16 %v771_v43, %v755_v48  ;;  %v787_v31 = vld [vmem:[#allocation5 + $0xd38] sm:$0xff] }
 0x201   : > { %v1137_v25 = vadd.f32 %v1136_v23, %v8388_v56  ;;  %3940 = vmatprep.mubr.f32.mxu0 %v3289_v61  ;;  %1586 = vmatprep.mubr.f32.mxu1 %v7262_v24  ;;  %v754_v61 = vld [vmem:[#allocation5 + $0xc30] sm:$0xff]  ;;  %v7276_v43 = vld [vmem:[%s8048_s7 + $0xf8] sm:$0xff] }
 0x202   : > { %3941 = vmatmul.mubr.f32.gmra.mrb[34].mxu0 %v3288_v20  ;;  %5998 = vmatpush1.bf16.msra.mxu1 %v5997_v26  ;;  %v3304_v57 = vmax.f32 %v1135_v15, 0.0  ;;  %v7269_v15 = vld [vmem:[%s8048_s7 + $0xb0] sm:$0xff]  ;;  %v803_v20 = vld [vmem:[#allocation5 + $0xdb8] sm:$0xff] }
 0x203   : > { %v1140_v51 = vpop.f32.mrb[38].mxu1  ;;  %v3305_v38 = vmax.f32 %v1137_v25, 0.0  ;;  %6000 = vmatprep.subr.bf16.mxu1 %v5999_v4  ;;  %v770_v4 = vld [vmem:[#allocation5 + $0xcb0] sm:$0xff] }
 0x204   : > { %v1141_v33 = vadd.f32 %v1140_v51, %v8383_v45  ;;  %v1142_v10 = vpop.f32.mrb[39].mxu1  ;;  %1587 = vmatmul.mubr.f32.gmra.mrb[144].mxu1 %v7263_v37  ;;  %v6017_v25 = vpack.c.bf16 %v770_v4, %v754_v61  ;;  %v6019_v51 = vpack.c.bf16 %v803_v20, %v787_v31  ;;  %v819_v37 = vld [vmem:[#allocation5 + $0xe38] sm:$0xff]  ;;  %v7277_v61 = vld [vmem:[%s8048_s7 + $0xf0] sm:$0xff] }
 0x205   : > { %v1143_v2 = vadd.f32 %v1142_v10, %v8388_v56  ;;  %3945 = vmatprep.mubr.f32.mxu0 %v3305_v38  ;;  %1592 = vmatprep.mubr.f32.mxu1 %v7264_v52  ;;  %v786_v38 = vld [vmem:[#allocation5 + $0xd30] sm:$0xff] }
 0x206   : > { %3946 = vmatmul.mubr.f32.gmra.mrb[36].mxu0 %v3304_v57  ;;  %6002 = vmatpush1.bf16.msra.mxu1 %v6001_v27  ;;  %v3320_v3 = vmax.f32 %v1141_v33, 0.0  ;;  %v7271_v33 = vld [vmem:[%s8048_s7 + $0xc0] sm:$0xff]  ;;  %v835_v57 = vld [vmem:[#allocation5 + $0xeb8] sm:$0xff] }
 0x207   : > { %v1146_v55 = vpop.f32.mrb[40].mxu1  ;;  %v3321_v47 = vmax.f32 %v1143_v2, 0.0  ;;  %6004 = vmatprep.subr.bf16.mxu1 %v6003_v42  ;;  %v802_v42 = vld [vmem:[#allocation5 + $0xdb0] sm:$0xff] }
 0x208   : > { %v1147_v63 = vadd.f32 %v1146_v55, %v8383_v45  ;;  %v1148_v53 = vpop.f32.mrb[41].mxu1  ;;  %1593 = vmatmul.mubr.f32.gmra.mrb[146].mxu1 %v7265_v5  ;;  %v6021_v2 = vpack.c.bf16 %v802_v42, %v786_v38  ;;  %v6023_v55 = vpack.c.bf16 %v835_v57, %v819_v37  ;;  %v851_v5 = vld [vmem:[#allocation5 + $0xf38] sm:$0xff] }
 0x209   : > { %v1149_v16 = vadd.f32 %v1148_v53, %v8388_v56  ;;  %3950 = vmatprep.mubr.f32.mxu0 %v3321_v47  ;;  %1598 = vmatprep.mubr.f32.mxu1 %v7266_v30  ;;  %v818_v47 = vld [vmem:[#allocation5 + $0xe30] sm:$0xff] }
 0x20a   : > { %3951 = vmatmul.mubr.f32.gmra.mrb[38].mxu0 %v3320_v3  ;;  %6006 = vmatpush1.bf16.msra.mxu1 %v6005_v28  ;;  %v3336_v17 = vmax.f32 %v1147_v63, 0.0  ;;  %v7273_v63 = vld [vmem:[%s8048_s7 + $0xd0] sm:$0xff]  ;;  %v867_v3 = vld [vmem:[#allocation5 + $0xfb8] sm:$0xff] }
 0x20b   : > { %v1152_v9 = vpop.f32.mrb[42].mxu1  ;;  %v3337_v32 = vmax.f32 %v1149_v16, 0.0  ;;  %6008 = vmatprep.subr.bf16.mxu1 %v6007_v50  ;;  %v834_v50 = vld [vmem:[#allocation5 + $0xeb0] sm:$0xff] }
 0x20c   : > { %v1153_v34 = vadd.f32 %v1152_v9, %v8383_v45  ;;  %v1154_v39 = vpop.f32.mrb[43].mxu1  ;;  %1599 = vmatmul.mubr.f32.gmra.mrb[148].mxu1 %v7267_v46  ;;  %v6025_v16 = vpack.c.bf16 %v834_v50, %v818_v47  ;;  %v6027_v9 = vpack.c.bf16 %v867_v3, %v851_v5  ;;  %v373_v46 = vld [vmem:[#allocation5 + $0x48] sm:$0xff]  ;;  %v890_v5 = vsub.s32 2, %v8373_v7 }
 0x20d   : > { %v1155_v54 = vadd.f32 %v1154_v39, %v8388_v56  ;;  %3955 = vmatprep.mubr.f32.mxu0 %v3337_v32  ;;  %1604 = vmatprep.mubr.f32.mxu1 %v7268_v19  ;;  %v850_v32 = vld [vmem:[#allocation5 + $0xf30] sm:$0xff] }
 0x20e   : > { %3956 = vmatmul.mubr.f32.gmra.mrb[40].mxu0 %v3336_v17  ;;  %6010 = vmatpush1.bf16.msra.mxu1 %v6009_v21  ;;  %v3352_v23 = vmax.f32 %v1153_v34, 0.0  ;;  %v7275_v34 = vld [vmem:[%s8048_s7 + $0xe0] sm:$0xff]  ;;  %v389_v17 = vld [vmem:[#allocation5 + $0xc8] sm:$0xff] }
 0x20f   : > { %v1158_v0 = vpop.f32.mrb[44].mxu1  ;;  %v3353_v26 = vmax.f32 %v1155_v54, 0.0  ;;  %6012 = vmatprep.subr.bf16.mxu1 %v6011_v11  ;;  %v866_v11 = vld [vmem:[#allocation5 + $0xfb0] sm:$0xff] }
 0x210   : > { %v1159_v12 = vadd.f32 %v1158_v0, %v8383_v45  ;;  %v1160_v14 = vpop.f32.mrb[45].mxu1  ;;  %1605 = vmatmul.mubr.f32.gmra.mrb[150].mxu1 %v7269_v15  ;;  %v6029_v54 = vpack.c.bf16 %v866_v11, %v850_v32  ;;  %v6031_v0 = vpack.c.bf16 %v389_v17, %v373_v46  ;;  %v7287_v32 = vld [vmem:[%s8048_s7 + $0x140] sm:$0xff] }
 0x211   : > { %v1161_v35 = vadd.f32 %v1160_v14, %v8388_v56  ;;  %3960 = vmatprep.mubr.f32.mxu0 %v3353_v26  ;;  %1610 = vmatprep.mubr.f32.mxu1 %v7270_v49  ;;  %v7278_v14 = vld [vmem:[%s8048_s7 + $0x108] sm:$0xff] }
 0x212   : > { %3961 = vmatmul.mubr.f32.gmra.mrb[42].mxu0 %v3352_v23  ;;  %6014 = vmatpush1.bf16.msra.mxu1 %v6013_v18  ;;  %v3368_v10 = vmax.f32 %v1159_v12, 0.0 }
 0x213   : > { %v1164_v24 = vpop.f32.mrb[46].mxu1  ;;  %v3369_v27 = vmax.f32 %v1161_v35, 0.0  ;;  %6016 = vmatprep.subr.bf16.mxu1 %v6015_v60  ;;  %v7279_v35 = vld [vmem:[%s8048_s7 + $0x100] sm:$0xff] }
 0x214   : > { %v1165_v44 = vadd.f32 %v1164_v24, %v8383_v45  ;;  %v1166_v8 = vpop.f32.mrb[47].mxu1  ;;  %1611 = vmatmul.mubr.f32.gmra.mrb[152].mxu1 %v7271_v33  ;;  %v7280_v24 = vld [vmem:[%s8048_s7 + $0x118] sm:$0xff] }
 0x215   : > { %v1167_v13 = vadd.f32 %v1166_v8, %v8388_v56  ;;  %3965 = vmatprep.mubr.f32.mxu0 %v3369_v27  ;;  %1616 = vmatprep.mubr.f32.mxu1 %v7272_v59 }
 0x216   : > { %3966 = vmatmul.mubr.f32.gmra.mrb[44].mxu0 %v3368_v10  ;;  %6018 = vmatpush1.bf16.msra.mxu1 %v6017_v25  ;;  %v3384_v53 = vmax.f32 %v1165_v44, 0.0  ;;  %v7281_v44 = vld [vmem:[%s8048_s7 + $0x110] sm:$0xff]  ;;  %v7282_v10 = vld [vmem:[%s8048_s7 + $0x128] sm:$0xff] }
 0x217   : > { %v1170_v52 = vpop.f32.mrb[48].mxu1  ;;  %v3385_v28 = vmax.f32 %v1167_v13, 0.0  ;;  %6020 = vmatprep.subr.bf16.mxu1 %v6019_v51 }
 0x218   : > { %v1171_v6 = vadd.f32 %v1170_v52, %v8383_v45  ;;  %v1172_v1 = vpop.f32.mrb[49].mxu1  ;;  %1617 = vmatmul.mubr.f32.gmra.mrb[154].mxu1 %v7273_v63  ;;  %v7285_v63 = vld [vmem:[%s8048_s7 + $0x130] sm:$0xff] }
 0x219   : > { %v1173_v62 = vadd.f32 %v1172_v1, %v8388_v56  ;;  %3970 = vmatprep.mubr.f32.mxu0 %v3385_v28  ;;  %1622 = vmatprep.mubr.f32.mxu1 %v7274_v41  ;;  %v894_v41 = vsub.s32 3, %v8373_v7 }
 0x21a   : > { %3971 = vmatmul.mubr.f32.gmra.mrb[46].mxu0 %v3384_v53  ;;  %6022 = vmatpush1.bf16.msra.mxu1 %v6021_v2  ;;  %v3400_v39 = vmax.f32 %v1171_v6, 0.0  ;;  %v7283_v2 = vld [vmem:[%s8048_s7 + $0x120] sm:$0xff] }
 0x21b   : > { %v1176_v30 = vpop.f32.mrb[50].mxu1  ;;  %v3401_v21 = vmax.f32 %v1173_v62, 0.0  ;;  %6024 = vmatprep.subr.bf16.mxu1 %v6023_v55  ;;  %v7284_v55 = vld [vmem:[%s8048_s7 + $0x138] sm:$0xff]  ;;  %v7286_v62 = vld [vmem:[%s8048_s7 + $0x148] sm:$0xff] }
 0x21c   : > { %v1177_v29 = vadd.f32 %v1176_v30, %v8383_v45  ;;  %v1178_v40 = vpop.f32.mrb[51].mxu1  ;;  %1623 = vmatmul.mubr.f32.gmra.mrb[156].mxu1 %v7275_v34 }
 0x21d   : > { %v1179_v48 = vadd.f32 %v1178_v40, %v8388_v56  ;;  %3975 = vmatprep.mubr.f32.mxu0 %v3401_v21  ;;  %1628 = vmatprep.mubr.f32.mxu1 %v7276_v43 }
 0x21e   : > { %3976 = vmatmul.mubr.f32.gmra.mrb[48].mxu0 %v3400_v39  ;;  %6026 = vmatpush1.bf16.msra.mxu1 %v6025_v16  ;;  %v3416_v4 = vmax.f32 %v1177_v29, 0.0  ;;  %v7288_v29 = vld [vmem:[#allocation7] sm:$0xff]  ;;  %v7289_v39 = vld [vmem:[%s8048_s7 + $0x158] sm:$0xff] }
 0x21f   : > { %v1182_v19 = vpop.f32.mrb[52].mxu1  ;;  %v3417_v18 = vmax.f32 %v1179_v48, 0.0  ;;  %6028 = vmatprep.subr.bf16.mxu1 %v6027_v9  ;;  %v8536_v40 = vrot.slane %v7288_v29, %v890_v5  ;;  %v8542_v46 = vrot.slane %v7288_v29, %v894_v41  ;;  %v7299_v29 = vld [vmem:[%s8048_s7 + $0x1a8] sm:$0xff] }
 0x220   : > { %v1183_v26 = vadd.f32 %v1182_v19, %v8383_v45  ;;  %v1184_v60 = vpop.f32.mrb[53].mxu1  ;;  %1629 = vmatmul.mubr.f32.gmra.mrb[158].mxu1 %v7277_v61 }
 0x221   : > { %v1185_v12 = vadd.f32 %v1184_v60, %v8388_v56  ;;  %3980 = vmatprep.mubr.f32.mxu0 %v3417_v18  ;;  %1634 = vmatprep.mubr.f32.mxu1 %v7278_v14  ;;  %v3592_v18 = vld [vmem:[#allocation8 + $0x200] sm:$0xff] }
 0x222   : > { %3981 = vmatmul.mubr.f32.gmra.mrb[50].mxu0 %v3416_v4  ;;  %6030 = vmatpush1.bf16.msra.mxu1 %v6029_v54  ;;  %v3432_v49 = vmax.f32 %v1183_v26, 0.0  ;;  %v7290_v54 = vld [vmem:[%s8048_s7 + $0x150] sm:$0xff]  ;;  %v7291_v26 = vld [vmem:[%s8048_s7 + $0x168] sm:$0xff] }
 0x223   : > { %v1188_v15 = vpop.f32.mrb[54].mxu1  ;;  %v3433_v23 = vmax.f32 %v1185_v12, 0.0  ;;  %6032 = vmatprep.subr.bf16.mxu1 %v6031_v0 }
 0x224   : > { %v1189_v31 = vadd.f32 %v1188_v15, %v8383_v45  ;;  %v1190_v20 = vpop.f32.mrb[55].mxu1  ;;  %1635 = vmatmul.mubr.f32.gmra.mrb[160].mxu1 %v7279_v35 }
 0x225   : > { %v1191_v25 = vadd.f32 %v1190_v20, %v8388_v56  ;;  %3985 = vmatprep.mubr.f32.mxu0 %v3433_v23  ;;  %1640 = vmatprep.mubr.f32.mxu1 %v7280_v24  ;;  %v7292_v23 = vld [vmem:[%s8048_s7 + $0x160] sm:$0xff]  ;;  %v3595_v20 = vld [vmem:[#allocation8 + $0x218] sm:$0xff] }
 0x226   : > { %3986 = vmatmul.mubr.f32.gmra.mrb[52].mxu0 %v3432_v49  ;;  %v3448_v8 = vmax.f32 %v1189_v31, 0.0  ;;  %v3594_v31 = vld [vmem:[#allocation8 + $0x210] sm:$0xff]  ;;  %v7293_v49 = vld [vmem:[%s8048_s7 + $0x178] sm:$0xff] }
 0x227   : > { %v1194_v27 = vpop.f32.mrb[56].mxu1  ;;  %v3449_v51 = vmax.f32 %v1191_v25, 0.0 }
 0x228   : > { %v1195_v38 = vadd.f32 %v1194_v27, %v8383_v45  ;;  %v1196_v42 = vpop.f32.mrb[57].mxu1  ;;  %1641 = vmatmul.mubr.f32.gmra.mrb[162].mxu1 %v7281_v44  ;;  %v6387_v27 = vpack.c.bf16 %v3595_v20, %v3594_v31  ;;  %v3605_v31 = vld [vmem:[#allocation8 + $0x268] sm:$0xff] }
 0x229   : > { %v1197_v33 = vadd.f32 %v1196_v42, %v8388_v56  ;;  %3990 = vmatprep.mubr.f32.mxu0 %v3449_v51  ;;  %1646 = vmatprep.mubr.f32.mxu1 %v7282_v10  ;;  %v7294_v42 = vld [vmem:[%s8048_s7 + $0x170] sm:$0xff] }
 0x22a   : > { %3991 = vmatmul.mubr.f32.gmra.mrb[54].mxu0 %v3448_v8  ;;  %v3464_v52 = vmax.f32 %v1195_v38, 0.0  ;;  %v3596_v8 = vld [vmem:[#allocation8 + $0x220] sm:$0xff] }
 0x22b   : > { %v1200_v37 = vpop.f32.mrb[58].mxu1  ;;  %v3465_v57 = vmax.f32 %v1197_v33, 0.0  ;;  %v3597_v33 = vld [vmem:[#allocation8 + $0x228] sm:$0xff] }
 0x22c   : > { %v1201_v13 = vadd.f32 %v1200_v37, %v8383_v45  ;;  %v1202_v59 = vpop.f32.mrb[59].mxu1  ;;  %1647 = vmatmul.mubr.f32.gmra.mrb[164].mxu1 %v7283_v2  ;;  %v7295_v37 = vld [vmem:[%s8048_s7 + $0x188] sm:$0xff] }
 0x22d   : > { %v1203_v28 = vadd.f32 %v1202_v59, %v8388_v56  ;;  %3995 = vmatprep.mubr.f32.mxu0 %v3465_v57  ;;  %1652 = vmatprep.mubr.f32.mxu1 %v7284_v55  ;;  %v6390_v59 = vpack.c.bf16 %v3597_v33, %v3596_v8  ;;  %v3607_v8 = vld [vmem:[#allocation8 + $0x278] sm:$0xff] }
 0x22e   : > { %3996 = vmatmul.mubr.f32.gmra.mrb[56].mxu0 %v3464_v52  ;;  %v3480_v53 = vmax.f32 %v1201_v13, 0.0 }
 0x22f   : > { %v1206_v47 = vpop.f32.mrb[60].mxu1  ;;  %v3481_v50 = vmax.f32 %v1203_v28, 0.0  ;;  %v7296_v28 = vld [vmem:[%s8048_s7 + $0x180] sm:$0xff] }
 0x230   : > { %v1207_v6 = vadd.f32 %v1206_v47, %v8383_v45  ;;  %v1208_v1 = vpop.f32.mrb[61].mxu1  ;;  %1653 = vmatmul.mubr.f32.gmra.mrb[166].mxu1 %v7285_v63  ;;  %v3598_v47 = vld [vmem:[#allocation8 + $0x230] sm:$0xff] }
 0x231   : > { %v1209_v3 = vadd.f32 %v1208_v1, %v8388_v56  ;;  %4000 = vmatprep.mubr.f32.mxu0 %v3481_v50  ;;  %1658 = vmatprep.mubr.f32.mxu1 %v7286_v62  ;;  %v3599_v50 = vld [vmem:[#allocation8 + $0x238] sm:$0xff]  ;;  %v7297_v1 = vld [vmem:[%s8048_s7 + $0x198] sm:$0xff] }
 0x232   : > { %4001 = vmatmul.mubr.f32.gmra.mrb[58].mxu0 %v3480_v53  ;;  %v3496_v11 = vmax.f32 %v1207_v6, 0.0 }
 0x233   : > { %v1212_v16 = vpop.f32.mrb[62].mxu1  ;;  %v3497_v30 = vmax.f32 %v1209_v3, 0.0  ;;  %v6393_v3 = vpack.c.bf16 %v3599_v50, %v3598_v47  ;;  %v3609_v47 = vld [vmem:[#allocation8 + $0x288] sm:$0xff] }
 0x234   : > { %v1213_v21 = vadd.f32 %v1212_v16, %v8383_v45  ;;  %v1214_v9 = vpop.f32.mrb[63].mxu1  ;;  %1659 = vmatmul.mubr.f32.gmra.mrb[168].mxu1 %v7287_v32  ;;  %v3601_v32 = vld [vmem:[#allocation8 + $0x248] sm:$0xff] }
 0x235   : > { %v1215_v34 = vadd.f32 %v1214_v9, %v8388_v56  ;;  %4005 = vmatprep.mubr.f32.mxu0 %v3497_v30  ;;  %1664 = vmatprep.mubr.f32.mxu1 %v7289_v39  ;;  %v3593_v56 = vld [vmem:[#allocation8 + $0x208] sm:$0xff]  ;;  %v7298_v30 = vld [vmem:[%s8048_s7 + $0x190] sm:$0xff] }
 0x236   : > { %4006 = vmatmul.mubr.f32.gmra.mrb[60].mxu0 %v3496_v11  ;;  %v3512_v19 = vmax.f32 %v1213_v21, 0.0  ;;  %v6384_v4 = vpack.c.bf16 %v3593_v56, %v3592_v18  ;;  %v3600_v9 = vld [vmem:[#allocation8 + $0x240] sm:$0xff]  ;;  %v3603_v18 = vld [vmem:[#allocation8 + $0x258] sm:$0xff] }
 0x237   : > { %v1283_v45 = vpop.f32.mrb[64].mxu1  ;;  %v3513_v17 = vmax.f32 %v1215_v34, 0.0 }
 0x238   : > { %v1284_v48 = vadd.f32 %v1283_v45, %v8536_v40  ;;  %v1285_v43 = vpop.f32.mrb[65].mxu1  ;;  %1665 = vmatmul.mubr.f32.gmra.mrb[170].mxu1 %v7290_v54  ;;  %v6396_v45 = vpack.c.bf16 %v3601_v32, %v3600_v9  ;;  %v3611_v9 = vld [vmem:[#allocation8 + $0x298] sm:$0xff] }
 0x239   : > { %v1286_v0 = vadd.f32 %v1285_v43, %v8542_v46  ;;  %4010 = vmatprep.mubr.f32.mxu0 %v3513_v17  ;;  %1670 = vmatprep.mubr.f32.mxu1 %v7291_v26  ;;  %v7300_v43 = vld [vmem:[%s8048_s7 + $0x1a0] sm:$0xff] }
 0x23a   : > { %4011 = vmatmul.mubr.f32.gmra.mrb[62].mxu0 %v3512_v19  ;;  %v3018_v12 = vmax.f32 %v1284_v48, 0.0  ;;  %v3602_v19 = vld [vmem:[#allocation8 + $0x250] sm:$0xff] }
 0x23b   : > { %v1289_v60 = vpop.f32.mrb[66].mxu1  ;;  %v3019_v61 = vmax.f32 %v1286_v0, 0.0  ;;  %v7301_v0 = vld [vmem:[%s8048_s7 + $0x1b8] sm:$0xff] }
 0x23c   : > { %v1290_v14 = vadd.f32 %v1289_v60, %v8536_v40  ;;  %v1291_v15 = vpop.f32.mrb[67].mxu1  ;;  %1671 = vmatmul.mubr.f32.gmra.mrb[172].mxu1 %v7292_v23  ;;  %v3604_v23 = vld [vmem:[#allocation8 + $0x260] sm:$0xff] }
 0x23d   : > { %v1292_v35 = vadd.f32 %v1291_v15, %v8542_v46  ;;  %4080 = vmatprep.mubr.f32.mxu0 %v3019_v61  ;;  %1676 = vmatprep.mubr.f32.mxu1 %v7293_v49  ;;  %v6399_v61 = vpack.c.bf16 %v3603_v18, %v3602_v19  ;;  %v7310_v19 = vld [vmem:[%s8048_s7 + $0x1f0] sm:$0xff] }
 0x23e   : > { %4081 = vmatmul.mubr.f32.vlgmr.msra.gmra.mrb[0].mxu0 %v3018_v12  ;;  %v3034_v44 = vmax.f32 %v1290_v14, 0.0  ;;  %v7302_v14 = vld [vmem:[%s8048_s7 + $0x1b0] sm:$0xff] }
 0x23f   : > { %v1295_v25 = vpop.f32.mrb[68].mxu1  ;;  %6385 = vmatpush1.bf16.msra.mxu0 %v6384_v4  ;;  %v3035_v24 = vmax.f32 %v1292_v35, 0.0  ;;  %v7303_v35 = vld [vmem:[%s8048_s7 + $0x1c8] sm:$0xff] }
 0x240   : > { %v1296_v51 = vadd.f32 %v1295_v25, %v8536_v40  ;;  %v1297_v38 = vpop.f32.mrb[69].mxu1  ;;  %1677 = vmatmul.mubr.f32.gmra.mrb[174].mxu1 %v7294_v42  ;;  %6386 = vmatprep.subr.bf16.mxu0 %v9870_v58 }
 0x241   : > { %v1298_v10 = vadd.f32 %v1297_v38, %v8542_v46  ;;  %4085 = vmatprep.mubr.f32.mxu0 %v3035_v24  ;;  %1682 = vmatprep.mubr.f32.mxu1 %v7295_v37  ;;  %v6402_v24 = vpack.c.bf16 %v3605_v31, %v3604_v23  ;;  %v7304_v38 = vld [vmem:[%s8048_s7 + $0x1c0] sm:$0xff] }
 0x242   : > { %4086 = vmatmul.mubr.f32.gmra.mrb[2].mxu0 %v3034_v44  ;;  %v3050_v55 = vmax.f32 %v1296_v51, 0.0  ;;  %v3606_v44 = vld [vmem:[#allocation8 + $0x270] sm:$0xff] }
 0x243   : > { %v1301_v57 = vpop.f32.mrb[70].mxu1  ;;  %v3051_v13 = vmax.f32 %v1298_v10, 0.0  ;;  %6388 = vmatpush1.bf16.msra.mxu0 %v6387_v27  ;;  %v7305_v10 = vld [vmem:[%s8048_s7 + $0x1d8] sm:$0xff]  ;;  %v404_v23 = vld [vmem:[#allocation5 + $0x140] sm:$0xff] }
 0x244   : > { %v1302_v2 = vadd.f32 %v1301_v57, %v8536_v40  ;;  %v1303_v52 = vpop.f32.mrb[71].mxu1  ;;  %1683 = vmatmul.mubr.f32.gmra.mrb[176].mxu1 %v7296_v28  ;;  %6389 = vmatprep.subr.bf16.mxu0 %v9870_v58  ;;  %v420_v31 = vld [vmem:[#allocation5 + $0x1c0] sm:$0xff] }
 0x245   : > { %v1304_v6 = vadd.f32 %v1303_v52, %v8542_v46  ;;  %4090 = vmatprep.mubr.f32.mxu0 %v3051_v13  ;;  %1688 = vmatprep.mubr.f32.mxu1 %v7297_v1  ;;  %v6405_v13 = vpack.c.bf16 %v3607_v8, %v3606_v44  ;;  %v7306_v52 = vld [vmem:[%s8048_s7 + $0x1d0] sm:$0xff]  ;;  %v7313_v8 = vld [vmem:[%s8048_s7 + $0x18] sm:$0xff] }
 0x246   : > { %4091 = vmatmul.mubr.f32.gmra.mrb[4].mxu0 %v3050_v55  ;;  %v3066_v21 = vmax.f32 %v1302_v2, 0.0  ;;  %v3608_v55 = vld [vmem:[#allocation8 + $0x280] sm:$0xff] }
 0x247   : > { %v1307_v63 = vpop.f32.mrb[72].mxu1  ;;  %v3067_v53 = vmax.f32 %v1304_v6, 0.0  ;;  %6391 = vmatpush1.bf16.msra.mxu0 %v6390_v59  ;;  %v7307_v6 = vld [vmem:[%s8048_s7 + $0x1e8] sm:$0xff] }
 0x248   : > { %v1308_v62 = vadd.f32 %v1307_v63, %v8536_v40  ;;  %v1309_v16 = vpop.f32.mrb[73].mxu1  ;;  %1689 = vmatmul.mubr.f32.gmra.mrb[178].mxu1 %v7298_v30  ;;  %6392 = vmatprep.subr.bf16.mxu0 %v9870_v58 }
 0x249   : > { %v1310_v11 = vadd.f32 %v1309_v16, %v8542_v46  ;;  %4095 = vmatprep.mubr.f32.mxu0 %v3067_v53  ;;  %1694 = vmatprep.mubr.f32.mxu1 %v7299_v29  ;;  %v6408_v53 = vpack.c.bf16 %v3609_v47, %v3608_v55  ;;  %v7308_v16 = vld [vmem:[%s8048_s7 + $0x1e0] sm:$0xff]  ;;  %v7314_v47 = vld [vmem:[%s8048_s7 + $0x10] sm:$0xff] }
 0x24a   : > { %4096 = vmatmul.mubr.f32.gmra.mrb[6].mxu0 %v3066_v21  ;;  %v3082_v54 = vmax.f32 %v1308_v62, 0.0  ;;  %v3610_v21 = vld [vmem:[#allocation8 + $0x290] sm:$0xff] }
 0x24b   : > { %v1313_v34 = vpop.f32.mrb[74].mxu1  ;;  %v3083_v39 = vmax.f32 %v1310_v11, 0.0  ;;  %6394 = vmatpush1.bf16.msra.mxu0 %v6393_v3  ;;  %v7309_v11 = vld [vmem:[%s8048_s7 + $0x1f8] sm:$0xff]  ;;  %v372_v29 = vld [vmem:[#allocation5 + $0x40] sm:$0xff] }
 0x24c   : > { %v1314_v17 = vadd.f32 %v1313_v34, %v8536_v40  ;;  %v1315_v48 = vpop.f32.mrb[75].mxu1  ;;  %1695 = vmatmul.mubr.f32.gmra.mrb[180].mxu1 %v7300_v43  ;;  %6395 = vmatprep.subr.bf16.mxu0 %v9870_v58  ;;  %v388_v34 = vld [vmem:[#allocation5 + $0xc0] sm:$0xff] }
 0x24d   : > { %v1316_v56 = vadd.f32 %v1315_v48, %v8542_v46  ;;  %4100 = vmatprep.mubr.f32.mxu0 %v3083_v39  ;;  %1700 = vmatprep.mubr.f32.mxu1 %v7301_v0  ;;  %v6411_v48 = vpack.c.bf16 %v3611_v9, %v3610_v21  ;;  %v3612_v0 = vld [vmem:[#allocation8 + $0x2a0] sm:$0xff]  ;;  %v468_v9 = vld [vmem:[#allocation5 + $0x340] sm:$0xff] }
 0x24e   : > { %4101 = vmatmul.mubr.f32.gmra.mrb[8].mxu0 %v3082_v54  ;;  %v3098_v15 = vmax.f32 %v1314_v17, 0.0  ;;  %v405_v17 = vld [vmem:[#allocation5 + $0x148] sm:$0xff] }
 0x24f   : > { %v1319_v26 = vpop.f32.mrb[76].mxu1  ;;  %v3099_v60 = vmax.f32 %v1316_v56, 0.0  ;;  %6397 = vmatpush1.bf16.msra.mxu0 %v6396_v45  ;;  %v421_v56 = vld [vmem:[#allocation5 + $0x1c8] sm:$0xff] }
 0x250   : > { %v1320_v4 = vadd.f32 %v1319_v26, %v8536_v40  ;;  %v1321_v12 = vpop.f32.mrb[77].mxu1  ;;  %1701 = vmatmul.mubr.f32.gmra.mrb[182].mxu1 %v7302_v14  ;;  %6398 = vmatprep.subr.bf16.mxu0 %v9870_v58  ;;  %v3613_v26 = vld [vmem:[#allocation8 + $0x2a8] sm:$0xff] }
 0x251   : > { %v1322_v20 = vadd.f32 %v1321_v12, %v8542_v46  ;;  %4105 = vmatprep.mubr.f32.mxu0 %v3099_v60  ;;  %1706 = vmatprep.mubr.f32.mxu1 %v7303_v35  ;;  %v6414_v35 = vpack.c.bf16 %v3613_v26, %v3612_v0 }
 0x252   : > { %4106 = vmatmul.mubr.f32.gmra.mrb[10].mxu0 %v3098_v15  ;;  %v3114_v42 = vmax.f32 %v1320_v4, 0.0  ;;  %v6033_v4 = vpack.c.bf16 %v388_v34, %v372_v29  ;;  %v6035_v15 = vpack.c.bf16 %v421_v56, %v405_v17 }
 0x253   : > { %v1325_v49 = vpop.f32.mrb[78].mxu1  ;;  %v3115_v25 = vmax.f32 %v1322_v20, 0.0  ;;  %6400 = vmatpush1.bf16.msra.mxu0 %v6399_v61  ;;  %v7311_v61 = vld [vmem:[%s8048_s7 + $0x8] sm:$0xff] }
 0x254   : > { %v1326_v27 = vadd.f32 %v1325_v49, %v8536_v40  ;;  %v1327_v51 = vpop.f32.mrb[79].mxu1  ;;  %1707 = vmatmul.mubr.f32.gmra.mrb[184].mxu1 %v7304_v38  ;;  %6401 = vmatprep.subr.bf16.mxu0 %v9870_v58  ;;  %v437_v20 = vld [vmem:[#allocation5 + $0x248] sm:$0xff]  ;;  %v3614_v38 = vld [vmem:[#allocation8 + $0x2b0] sm:$0xff] }
 0x255   : > { %v1328_v33 = vadd.f32 %v1327_v51, %v8542_v46  ;;  %4110 = vmatprep.mubr.f32.mxu0 %v3115_v25  ;;  %1712 = vmatprep.mubr.f32.mxu1 %v7305_v10  ;;  %v453_v51 = vld [vmem:[#allocation5 + $0x2c8] sm:$0xff] }
 0x256   : > { %4111 = vmatmul.mubr.f32.gmra.mrb[12].mxu0 %v3114_v42  ;;  %v3130_v28 = vmax.f32 %v1326_v27, 0.0  ;;  %v3615_v42 = vld [vmem:[#allocation8 + $0x2b8] sm:$0xff] }
 0x257   : > { %v1331_v37 = vpop.f32.mrb[80].mxu1  ;;  %v3131_v57 = vmax.f32 %v1328_v33, 0.0  ;;  %6403 = vmatpush1.bf16.msra.mxu0 %v6402_v24  ;;  %v7312_v24 = vld [vmem:[%s8048_s7] sm:$0xff]  ;;  %v6037_v33 = vpack.c.bf16 %v420_v31, %v404_v23  ;;  %v7318_v31 = vld [vmem:[%s8048_s7 + $0x30] sm:$0xff] }
 0x258   : > { %v1332_v59 = vadd.f32 %v1331_v37, %v8536_v40  ;;  %v1333_v2 = vpop.f32.mrb[81].mxu1  ;;  %1713 = vmatmul.mubr.f32.gmra.mrb[186].mxu1 %v7306_v52  ;;  %6404 = vmatprep.subr.bf16.mxu0 %v9870_v58  ;;  %v6417_v52 = vpack.c.bf16 %v3615_v42, %v3614_v38 }
 0x259   : > { %v1334_v50 = vadd.f32 %v1333_v2, %v8542_v46  ;;  %4115 = vmatprep.mubr.f32.mxu0 %v3131_v57  ;;  %1718 = vmatprep.mubr.f32.mxu1 %v7307_v6  ;;  %v6039_v57 = vpack.c.bf16 %v453_v51, %v437_v20  ;;  %v469_v2 = vld [vmem:[#allocation5 + $0x348] sm:$0xff] }
 0x25a   : > { %4116 = vmatmul.mubr.f32.gmra.mrb[14].mxu0 %v3130_v28  ;;  %v3146_v30 = vmax.f32 %v1332_v59, 0.0  ;;  %v452_v59 = vld [vmem:[#allocation5 + $0x2c0] sm:$0xff]  ;;  %v485_v6 = vld [vmem:[#allocation5 + $0x3c8] sm:$0xff] }
 0x25b   : > { %v1337_v1 = vpop.f32.mrb[82].mxu1  ;;  %v3147_v63 = vmax.f32 %v1334_v50, 0.0  ;;  %6406 = vmatpush1.bf16.msra.mxu0 %v6405_v13  ;;  %v436_v13 = vld [vmem:[#allocation5 + $0x240] sm:$0xff]  ;;  %v6043_v21 = vpack.c.bf16 %v485_v6, %v469_v2 }
 0x25c   : > { %v1338_v3 = vadd.f32 %v1337_v1, %v8536_v40  ;;  %v1339_v62 = vpop.f32.mrb[83].mxu1  ;;  %1719 = vmatmul.mubr.f32.gmra.mrb[188].mxu1 %v7308_v16  ;;  %6407 = vmatprep.subr.bf16.mxu0 %v9870_v58  ;;  %v3616_v1 = vld [vmem:[#allocation8 + $0x2c0] sm:$0xff] }
 0x25d   : > { %v1340_v32 = vadd.f32 %v1339_v62, %v8542_v46  ;;  %4120 = vmatprep.mubr.f32.mxu0 %v3147_v63  ;;  %1724 = vmatprep.mubr.f32.mxu1 %v7309_v11  ;;  %v3617_v63 = vld [vmem:[#allocation8 + $0x2c8] sm:$0xff]  ;;  %v6041_v62 = vpack.c.bf16 %v452_v59, %v436_v13  ;;  %v501_v11 = vld [vmem:[#allocation5 + $0x448] sm:$0xff]  ;;  %v7320_v59 = vld [vmem:[%s8048_s7 + $0x40] sm:$0xff] }
 0x25e   : > { %4121 = vmatmul.mubr.f32.gmra.mrb[16].mxu0 %v3146_v30  ;;  %v3162_v18 = vmax.f32 %v1338_v3, 0.0  ;;  %v7315_v3 = vld [vmem:[%s8048_s7 + $0x28] sm:$0xff]  ;;  %v6420_v29 = vpack.c.bf16 %v3617_v63, %v3616_v1 }
 0x25f   : > { %v1343_v39 = vpop.f32.mrb[84].mxu1  ;;  %v3163_v45 = vmax.f32 %v1340_v32, 0.0  ;;  %6409 = vmatpush1.bf16.msra.mxu0 %v6408_v53  ;;  %v484_v32 = vld [vmem:[#allocation5 + $0x3c0] sm:$0xff] }
 0x260   : > { %v1344_v43 = vadd.f32 %v1343_v39, %v8536_v40  ;;  %v1345_v54 = vpop.f32.mrb[85].mxu1  ;;  %1725 = vmatmul.mubr.f32.gmra.mrb[190].mxu1 %v7310_v19  ;;  %6410 = vmatprep.subr.bf16.mxu0 %v9870_v58  ;;  %v6045_v56 = vpack.c.bf16 %v484_v32, %v468_v9  ;;  %v7322_v9 = vld [vmem:[%s8048_s7 + $0x50] sm:$0xff] }
 0x261   : > { %v1346_v60 = vadd.f32 %v1345_v54, %v8542_v46  ;;  %4125 = vmatprep.mubr.f32.mxu0 %v3163_v45  ;;  %1795 = vmatprep.mubr.f32.mxu1 %v7311_v61  ;;  %v7316_v45 = vld [vmem:[%s8048_s7 + $0x20] sm:$0xff]  ;;  %v3619_v54 = vld [vmem:[#allocation8 + $0x2d8] sm:$0xff] }
 0x262   : > { %4126 = vmatmul.mubr.f32.gmra.mrb[18].mxu0 %v3162_v18  ;;  %v3178_v27 = vmax.f32 %v1344_v43, 0.0  ;;  %v3618_v43 = vld [vmem:[#allocation8 + $0x2d0] sm:$0xff]  ;;  %v7317_v18 = vld [vmem:[%s8048_s7 + $0x38] sm:$0xff] }
 0x263   : > { %v1349_v12 = vpop.f32.mrb[86].mxu1  ;;  %v3179_v14 = vmax.f32 %v1346_v60, 0.0  ;;  %6412 = vmatpush1.bf16.msra.mxu0 %v6411_v48  ;;  %v517_v48 = vld [vmem:[#allocation5 + $0x4c8] sm:$0xff]  ;;  %v500_v61 = vld [vmem:[#allocation5 + $0x440] sm:$0xff] }
 0x264   : > { %v1350_v49 = vadd.f32 %v1349_v12, %v8536_v40  ;;  %v1351_v25 = vpop.f32.mrb[87].mxu1  ;;  %1796 = vmatmul.mubr.f32.vlgmr.msra.gmra.mrb[192].mxu1 %v7312_v24  ;;  %6413 = vmatprep.subr.bf16.mxu0 %v9870_v58  ;;  %v6047_v60 = vpack.c.bf16 %v517_v48, %v501_v11  ;;  %v533_v12 = vld [vmem:[#allocation5 + $0x548] sm:$0xff] }
 0x265   : > { %v1352_v44 = vadd.f32 %v1351_v25, %v8542_v46  ;;  %6034 = vmatpush1.bf16.msra.mxu1 %v6033_v4  ;;  %4130 = vmatprep.mubr.f32.mxu0 %v3179_v14  ;;  %v516_v4 = vld [vmem:[#allocation5 + $0x4c0] sm:$0xff]  ;;  %v6423_v14 = vpack.c.bf16 %v3619_v54, %v3618_v43  ;;  %v3621_v25 = vld [vmem:[#allocation8 + $0x2e8] sm:$0xff]  ;;  %v597_v11 = vld [vmem:[#allocation5 + $0x748] sm:$0xff] }
 0x266   : > { %4131 = vmatmul.mubr.f32.gmra.mrb[20].mxu0 %v3178_v27  ;;  %1801 = vmatprep.mubr.f32.mxu1 %v7313_v8  ;;  %v3194_v50 = vmax.f32 %v1350_v49, 0.0  ;;  %v3620_v49 = vld [vmem:[#allocation8 + $0x2e0] sm:$0xff]  ;;  %v7319_v27 = vld [vmem:[%s8048_s7 + $0x48] sm:$0xff]  ;;  %v6049_v51 = vpack.c.bf16 %v516_v4, %v500_v61  ;;  %v532_v8 = vld [vmem:[#allocation5 + $0x540] sm:$0xff] }
 0x267   : > { %v1355_v10 = vpop.f32.mrb[88].mxu1  ;;  %v3195_v37 = vmax.f32 %v1352_v44, 0.0  ;;  %6036 = vmatprep.subr.bf16.mxu1 %v6035_v15  ;;  %6415 = vmatpush1.bf16.msra.mxu0 %v6414_v35  ;;  %v549_v35 = vld [vmem:[#allocation5 + $0x5c8] sm:$0xff]  ;;  %v596_v54 = vld [vmem:[#allocation5 + $0x740] sm:$0xff] }
 0x268   : > { %v1356_v28 = vadd.f32 %v1355_v10, %v8536_v40  ;;  %v1357_v55 = vpop.f32.mrb[89].mxu1  ;;  %1802 = vmatmul.mubr.f32.gmra.mrb[194].mxu1 %v7314_v47  ;;  %6416 = vmatprep.subr.bf16.mxu0 %v9870_v58  ;;  %v6051_v44 = vpack.c.bf16 %v549_v35, %v533_v12  ;;  %v565_v10 = vld [vmem:[#allocation5 + $0x648] sm:$0xff]  ;;  %v7325_v12 = vld [vmem:[%s8048_s7 + $0x78] sm:$0xff]  ;;  %v644_v35 = vld [vmem:[#allocation5 + $0x8c0] sm:$0xff] }
 0x269   : > { %v1358_v53 = vadd.f32 %v1357_v55, %v8542_v46  ;;  %4135 = vmatprep.mubr.f32.mxu0 %v3195_v37  ;;  %1807 = vmatprep.mubr.f32.mxu1 %v7315_v3  ;;  %v6426_v37 = vpack.c.bf16 %v3621_v25, %v3620_v49  ;;  %v3623_v55 = vld [vmem:[#allocation8 + $0x2f8] sm:$0xff]  ;;  %v564_v3 = vld [vmem:[#allocation5 + $0x640] sm:$0xff] }
 0x26a   : > { %4136 = vmatmul.mubr.f32.gmra.mrb[22].mxu0 %v3194_v50  ;;  %6038 = vmatpush1.bf16.msra.mxu1 %v6037_v33  ;;  %v3210_v17 = vmax.f32 %v1356_v28, 0.0  ;;  %v548_v33 = vld [vmem:[#allocation5 + $0x5c0] sm:$0xff]  ;;  %v7321_v50 = vld [vmem:[%s8048_s7 + $0x58] sm:$0xff]  ;;  %v645_v61 = vld [vmem:[#allocation5 + $0x8c8] sm:$0xff] }
 0x26b   : > { %v1361_v16 = vpop.f32.mrb[90].mxu1  ;;  %v3211_v30 = vmax.f32 %v1358_v53, 0.0  ;;  %6040 = vmatprep.subr.bf16.mxu1 %v6039_v57  ;;  %6418 = vmatpush1.bf16.msra.mxu0 %v6417_v52  ;;  %v581_v52 = vld [vmem:[#allocation5 + $0x6c8] sm:$0xff]  ;;  %v3622_v28 = vld [vmem:[#allocation8 + $0x2f0] sm:$0xff]  ;;  %v6053_v6 = vpack.c.bf16 %v548_v33, %v532_v8 }
 0x26c   : > { %v1362_v34 = vadd.f32 %v1361_v16, %v8536_v40  ;;  %v1363_v39 = vpop.f32.mrb[91].mxu1  ;;  %1808 = vmatmul.mubr.f32.gmra.mrb[196].mxu1 %v7316_v45  ;;  %6419 = vmatprep.subr.bf16.mxu0 %v9870_v58  ;;  %v6055_v53 = vpack.c.bf16 %v581_v52, %v565_v10  ;;  %v6429_v16 = vpack.c.bf16 %v3623_v55, %v3622_v28  ;;  %v7328_v52 = vld [vmem:[%s8048_s7 + $0x80] sm:$0xff]  ;;  %v693_v55 = vld [vmem:[#allocation5 + $0xa48] sm:$0xff] }
 0x26d   : > { %v1364_v19 = vadd.f32 %v1363_v39, %v8542_v46  ;;  %4140 = vmatprep.mubr.f32.mxu0 %v3211_v30  ;;  %1813 = vmatprep.mubr.f32.mxu1 %v7317_v18  ;;  %v7323_v39 = vld [vmem:[%s8048_s7 + $0x68] sm:$0xff] }
 0x26e   : > { %4141 = vmatmul.mubr.f32.gmra.mrb[24].mxu0 %v3210_v17  ;;  %6042 = vmatpush1.bf16.msra.mxu1 %v6041_v62  ;;  %v3226_v20 = vmax.f32 %v1362_v34, 0.0  ;;  %v580_v62 = vld [vmem:[#allocation5 + $0x6c0] sm:$0xff] }
 0x26f   : > { %v1367_v0 = vpop.f32.mrb[92].mxu1  ;;  %v3227_v26 = vmax.f32 %v1364_v19, 0.0  ;;  %6044 = vmatprep.subr.bf16.mxu1 %v6043_v21  ;;  %6421 = vmatpush1.bf16.msra.mxu0 %v6420_v29  ;;  %v613_v29 = vld [vmem:[#allocation5 + $0x7c8] sm:$0xff]  ;;  %v6057_v45 = vpack.c.bf16 %v580_v62, %v564_v3  ;;  %v612_v19 = vld [vmem:[#allocation5 + $0x7c0] sm:$0xff] }
 0x270   : > { %v1368_v15 = vadd.f32 %v1367_v0, %v8536_v40  ;;  %v1369_v23 = vpop.f32.mrb[93].mxu1  ;;  %1814 = vmatmul.mubr.f32.gmra.mrb[198].mxu1 %v7318_v31  ;;  %6422 = vmatprep.subr.bf16.mxu0 %v9870_v58  ;;  %v6059_v43 = vpack.c.bf16 %v613_v29, %v597_v11  ;;  %v7324_v0 = vld [vmem:[%s8048_s7 + $0x60] sm:$0xff]  ;;  %v725_v11 = vld [vmem:[#allocation5 + $0xb48] sm:$0xff] }
 0x271   : > { %v1370_v24 = vadd.f32 %v1369_v23, %v8542_v46  ;;  %4145 = vmatprep.mubr.f32.mxu0 %v3227_v26  ;;  %1819 = vmatprep.mubr.f32.mxu1 %v7319_v27  ;;  %v692_v62 = vld [vmem:[#allocation5 + $0xa40] sm:$0xff]  ;;  %v741_v29 = vld [vmem:[#allocation5 + $0xbc8] sm:$0xff] }
 0x272   : > { %4146 = vmatmul.mubr.f32.gmra.mrb[26].mxu0 %v3226_v20  ;;  %6046 = vmatpush1.bf16.msra.mxu1 %v6045_v56  ;;  %v3242_v2 = vmax.f32 %v1368_v15, 0.0  ;;  %v628_v20 = vld [vmem:[#allocation5 + $0x840] sm:$0xff] }
 0x273   : > { %v1373_v38 = vpop.f32.mrb[94].mxu1  ;;  %v3243_v42 = vmax.f32 %v1370_v24, 0.0  ;;  %6048 = vmatprep.subr.bf16.mxu1 %v6047_v60  ;;  %6424 = vmatpush1.bf16.msra.mxu0 %v6423_v14  ;;  %v629_v60 = vld [vmem:[#allocation5 + $0x848] sm:$0xff]  ;;  %v6061_v14 = vpack.c.bf16 %v612_v19, %v596_v54  ;;  %v7326_v24 = vld [vmem:[%s8048_s7 + $0x70] sm:$0xff]  ;;  %v6065_v8 = vpack.c.bf16 %v644_v35, %v628_v20  ;;  %v724_v54 = vld [vmem:[#allocation5 + $0xb40] sm:$0xff] }
 0x274   : > { %v1374_v57 = vadd.f32 %v1373_v38, %v8536_v40  ;;  %v1375_v13 = vpop.f32.mrb[95].mxu1  ;;  %1820 = vmatmul.mubr.f32.gmra.mrb[200].mxu1 %v7320_v59  ;;  %6425 = vmatprep.subr.bf16.mxu0 %v9870_v58  ;;  %v6063_v31 = vpack.c.bf16 %v645_v61, %v629_v60  ;;  %v677_v38 = vld [vmem:[#allocation5 + $0x9c8] sm:$0xff]  ;;  %v740_v19 = vld [vmem:[#allocation5 + $0xbc0] sm:$0xff] }
 0x275   : > { %v1376_v47 = vadd.f32 %v1375_v13, %v8542_v46  ;;  %4150 = vmatprep.mubr.f32.mxu0 %v3243_v42  ;;  %1825 = vmatprep.mubr.f32.mxu1 %v7321_v50  ;;  %v676_v13 = vld [vmem:[#allocation5 + $0x9c0] sm:$0xff]  ;;  %v757_v60 = vld [vmem:[#allocation5 + $0xc48] sm:$0xff] }
 0x276   : > { %4151 = vmatmul.mubr.f32.gmra.mrb[28].mxu0 %v3242_v2  ;;  %6050 = vmatpush1.bf16.msra.mxu1 %v6049_v51  ;;  %v3258_v32 = vmax.f32 %v1374_v57, 0.0  ;;  %v661_v51 = vld [vmem:[#allocation5 + $0x948] sm:$0xff]  ;;  %v660_v57 = vld [vmem:[#allocation5 + $0x940] sm:$0xff] }
 0x277   : > { %v1379_v1 = vpop.f32.mrb[96].mxu1  ;;  %v3259_v63 = vmax.f32 %v1376_v47, 0.0  ;;  %6052 = vmatprep.subr.bf16.mxu1 %v6051_v44  ;;  %6427 = vmatpush1.bf16.msra.mxu0 %v6426_v37  ;;  %v7327_v44 = vld [vmem:[%s8048_s7 + $0x88] sm:$0xff]  ;;  %v6067_v37 = vpack.c.bf16 %v677_v38, %v661_v51  ;;  %v756_v20 = vld [vmem:[#allocation5 + $0xc40] sm:$0xff] }
 0x278   : > { %v1380_v30 = vadd.f32 %v1379_v1, %v8536_v40  ;;  %v1381_v21 = vpop.f32.mrb[97].mxu1  ;;  %1826 = vmatmul.mubr.f32.gmra.mrb[202].mxu1 %v7322_v9  ;;  %6428 = vmatprep.subr.bf16.mxu0 %v9870_v58  ;;  %v709_v47 = vld [vmem:[#allocation5 + $0xac8] sm:$0xff]  ;;  %v6069_v1 = vpack.c.bf16 %v676_v13, %v660_v57  ;;  %v7330_v9 = vld [vmem:[%s8048_s7 + $0x90] sm:$0xff]  ;;  %v772_v35 = vld [vmem:[#allocation5 + $0xcc0] sm:$0xff] }
 0x279   : > { %v1382_v34 = vadd.f32 %v1381_v21, %v8542_v46  ;;  %4155 = vmatprep.mubr.f32.mxu0 %v3259_v63  ;;  %1831 = vmatprep.mubr.f32.mxu1 %v7323_v39  ;;  %v6071_v3 = vpack.c.bf16 %v709_v47, %v693_v55  ;;  %v7331_v39 = vld [vmem:[%s8048_s7 + $0xa8] sm:$0xff]  ;;  %v788_v57 = vld [vmem:[#allocation5 + $0xd40] sm:$0xff] }
 0x27a   : > { %4156 = vmatmul.mubr.f32.gmra.mrb[30].mxu0 %v3258_v32  ;;  %6054 = vmatpush1.bf16.msra.mxu1 %v6053_v6  ;;  %v3274_v26 = vmax.f32 %v1380_v30, 0.0  ;;  %v7329_v6 = vld [vmem:[%s8048_s7 + $0x98] sm:$0xff]  ;;  %v773_v61 = vld [vmem:[#allocation5 + $0xcc8] sm:$0xff]  ;;  %v804_v13 = vld [vmem:[#allocation5 + $0xdc0] sm:$0xff] }
 0x27b   : > { %v1385_v17 = vpop.f32.mrb[98].mxu1  ;;  %v3275_v48 = vmax.f32 %v1382_v34, 0.0  ;;  %6056 = vmatprep.subr.bf16.mxu1 %v6055_v53  ;;  %6430 = vmatpush1.bf16.msra.mxu0 %v6429_v16  ;;  %v708_v16 = vld [vmem:[#allocation5 + $0xac0] sm:$0xff]  ;;  %v789_v51 = vld [vmem:[#allocation5 + $0xd48] sm:$0xff] }
 0x27c   : > { %v1386_v18 = vadd.f32 %v1385_v17, %v8536_v40  ;;  %v1387_v56 = vpop.f32.mrb[99].mxu1  ;;  %1832 = vmatmul.mubr.f32.gmra.mrb[204].mxu1 %v7324_v0  ;;  %6431 = vmatprep.subr.bf16.mxu0 %v9870_v58  ;;  %v7332_v0 = vld [vmem:[%s8048_s7 + $0xa0] sm:$0xff]  ;;  %v805_v38 = vld [vmem:[#allocation5 + $0xdc8] sm:$0xff] }
 0x27d   : > { %v1388_v4 = vadd.f32 %v1387_v56, %v8542_v46  ;;  %4160 = vmatprep.mubr.f32.mxu0 %v3275_v48  ;;  %1837 = vmatprep.mubr.f32.mxu1 %v7325_v12  ;;  %v7333_v12 = vld [vmem:[%s8048_s7 + $0xb8] sm:$0xff]  ;;  %v821_v55 = vld [vmem:[#allocation5 + $0xe48] sm:$0xff] }
 0x27e   : > { %4161 = vmatmul.mubr.f32.gmra.mrb[32].mxu0 %v3274_v26  ;;  %6058 = vmatpush1.bf16.msra.mxu1 %v6057_v45  ;;  %v3290_v27 = vmax.f32 %v1386_v18, 0.0  ;;  %v6073_v45 = vpack.c.bf16 %v708_v16, %v692_v62  ;;  %v837_v47 = vld [vmem:[#allocation5 + $0xec8] sm:$0xff]  ;;  %v820_v62 = vld [vmem:[#allocation5 + $0xe40] sm:$0xff] }
 0x27f   : > { %v1391_v15 = vpop.f32.mrb[100].mxu1  ;;  %v3291_v23 = vmax.f32 %v1388_v4, 0.0  ;;  %6060 = vmatprep.subr.bf16.mxu1 %v6059_v43  ;;  %v6075_v43 = vpack.c.bf16 %v741_v29, %v725_v11  ;;  %v836_v16 = vld [vmem:[#allocation5 + $0xec0] sm:$0xff]  ;;  %v853_v11 = vld [vmem:[#allocation5 + $0xf48] sm:$0xff] }
 0x280   : > { %v1392_v49 = vadd.f32 %v1391_v15, %v8536_v40  ;;  %v1393_v25 = vpop.f32.mrb[101].mxu1  ;;  %1838 = vmatmul.mubr.f32.gmra.mrb[206].mxu1 %v7326_v24  ;;  %v7334_v24 = vld [vmem:[%s8048_s7 + $0xb0] sm:$0xff]  ;;  %v869_v29 = vld [vmem:[#allocation5 + $0xfc8] sm:$0xff] }
 0x281   : > { %v1394_v42 = vadd.f32 %v1393_v25, %v8542_v46  ;;  %4165 = vmatprep.mubr.f32.mxu0 %v3291_v23  ;;  %1843 = vmatprep.mubr.f32.mxu1 %v7327_v44  ;;  %v7335_v44 = vld [vmem:[%s8048_s7 + $0xc8] sm:$0xff] }
 0x282   : > { %4166 = vmatmul.mubr.f32.gmra.mrb[34].mxu0 %v3290_v27  ;;  %6062 = vmatpush1.bf16.msra.mxu1 %v6061_v14  ;;  %v3306_v28 = vmax.f32 %v1392_v49, 0.0  ;;  %v6077_v14 = vpack.c.bf16 %v740_v19, %v724_v54  ;;  %v852_v54 = vld [vmem:[#allocation5 + $0xf40] sm:$0xff] }
 0x283   : > { %v1397_v33 = vpop.f32.mrb[102].mxu1  ;;  %v3307_v10 = vmax.f32 %v1394_v42, 0.0  ;;  %6064 = vmatprep.subr.bf16.mxu1 %v6063_v31  ;;  %v6079_v31 = vpack.c.bf16 %v773_v61, %v757_v60  ;;  %v868_v19 = vld [vmem:[#allocation5 + $0xfc0] sm:$0xff]  ;;  %v375_v60 = vld [vmem:[#allocation5 + $0x58] sm:$0xff] }
 0x284   : > { %v1398_v59 = vadd.f32 %v1397_v33, %v8536_v40  ;;  %v1399_v2 = vpop.f32.mrb[103].mxu1  ;;  %1844 = vmatmul.mubr.f32.gmra.mrb[208].mxu1 %v7328_v52  ;;  %v7336_v52 = vld [vmem:[%s8048_s7 + $0xc0] sm:$0xff]  ;;  %v391_v61 = vld [vmem:[#allocation5 + $0xd8] sm:$0xff] }
 0x285   : > { %v1400_v50 = vadd.f32 %v1399_v2, %v8542_v46  ;;  %4170 = vmatprep.mubr.f32.mxu0 %v3307_v10  ;;  %1849 = vmatprep.mubr.f32.mxu1 %v7329_v6  ;;  %v7337_v6 = vld [vmem:[%s8048_s7 + $0xd8] sm:$0xff] }
 0x286   : > { %4171 = vmatmul.mubr.f32.gmra.mrb[36].mxu0 %v3306_v28  ;;  %6066 = vmatpush1.bf16.msra.mxu1 %v6065_v8  ;;  %v3322_v32 = vmax.f32 %v1398_v59, 0.0  ;;  %v6081_v8 = vpack.c.bf16 %v772_v35, %v756_v20 }
 0x287   : > { %v1403_v63 = vpop.f32.mrb[104].mxu1  ;;  %v3323_v53 = vmax.f32 %v1400_v50, 0.0  ;;  %6068 = vmatprep.subr.bf16.mxu1 %v6067_v37  ;;  %v6083_v37 = vpack.c.bf16 %v805_v38, %v789_v51 }
 0x288   : > { %v1404_v30 = vadd.f32 %v1403_v63, %v8536_v40  ;;  %v1405_v21 = vpop.f32.mrb[105].mxu1  ;;  %1850 = vmatmul.mubr.f32.gmra.mrb[210].mxu1 %v7330_v9  ;;  %v7338_v9 = vld [vmem:[%s8048_s7 + $0xd0] sm:$0xff] }
 0x289   : > { %v1406_v34 = vadd.f32 %v1405_v21, %v8542_v46  ;;  %4175 = vmatprep.mubr.f32.mxu0 %v3323_v53  ;;  %1855 = vmatprep.mubr.f32.mxu1 %v7331_v39  ;;  %v7339_v39 = vld [vmem:[%s8048_s7 + $0xe8] sm:$0xff] }
 0x28a   : > { %4176 = vmatmul.mubr.f32.gmra.mrb[38].mxu0 %v3322_v32  ;;  %6070 = vmatpush1.bf16.msra.mxu1 %v6069_v1  ;;  %v3338_v26 = vmax.f32 %v1404_v30, 0.0  ;;  %v6085_v1 = vpack.c.bf16 %v804_v13, %v788_v57 }
 0x28b   : > { %v1409_v17 = vpop.f32.mrb[106].mxu1  ;;  %v3339_v48 = vmax.f32 %v1406_v34, 0.0  ;;  %6072 = vmatprep.subr.bf16.mxu1 %v6071_v3  ;;  %v6087_v3 = vpack.c.bf16 %v837_v47, %v821_v55  ;;  %v7347_v47 = vld [vmem:[%s8048_s7 + $0x128] sm:$0xff] }
 0x28c   : > { %v1410_v18 = vadd.f32 %v1409_v17, %v8536_v40  ;;  %v1411_v56 = vpop.f32.mrb[107].mxu1  ;;  %1856 = vmatmul.mubr.f32.gmra.mrb[212].mxu1 %v7332_v0  ;;  %v7340_v0 = vld [vmem:[%s8048_s7 + $0xe0] sm:$0xff] }
 0x28d   : > { %v1412_v4 = vadd.f32 %v1411_v56, %v8542_v46  ;;  %4180 = vmatprep.mubr.f32.mxu0 %v3339_v48  ;;  %1861 = vmatprep.mubr.f32.mxu1 %v7333_v12  ;;  %v7341_v12 = vld [vmem:[%s8048_s7 + $0xf8] sm:$0xff] }
 0x28e   : > { %4181 = vmatmul.mubr.f32.gmra.mrb[40].mxu0 %v3338_v26  ;;  %6074 = vmatpush1.bf16.msra.mxu1 %v6073_v45  ;;  %v3354_v27 = vmax.f32 %v1410_v18, 0.0  ;;  %v6089_v45 = vpack.c.bf16 %v836_v16, %v820_v62  ;;  %v7349_v16 = vld [vmem:[%s8048_s7 + $0x138] sm:$0xff] }
 0x28f   : > { %v1415_v15 = vpop.f32.mrb[108].mxu1  ;;  %v3355_v23 = vmax.f32 %v1412_v4, 0.0  ;;  %6076 = vmatprep.subr.bf16.mxu1 %v6075_v43  ;;  %v6091_v43 = vpack.c.bf16 %v869_v29, %v853_v11  ;;  %v7350_v11 = vld [vmem:[%s8048_s7 + $0x130] sm:$0xff] }
 0x290   : > { %v1416_v49 = vadd.f32 %v1415_v15, %v8536_v40  ;;  %v1417_v25 = vpop.f32.mrb[109].mxu1  ;;  %1862 = vmatmul.mubr.f32.gmra.mrb[214].mxu1 %v7334_v24 }
 0x291   : > { %v1418_v42 = vadd.f32 %v1417_v25, %v8542_v46  ;;  %4185 = vmatprep.mubr.f32.mxu0 %v3355_v23  ;;  %1867 = vmatprep.mubr.f32.mxu1 %v7335_v44 }
 0x292   : > { %4186 = vmatmul.mubr.f32.gmra.mrb[42].mxu0 %v3354_v27  ;;  %6078 = vmatpush1.bf16.msra.mxu1 %v6077_v14  ;;  %v3370_v28 = vmax.f32 %v1416_v49, 0.0  ;;  %v6093_v14 = vpack.c.bf16 %v868_v19, %v852_v54  ;;  %v7342_v49 = vld [vmem:[%s8048_s7 + $0xf0] sm:$0xff]  ;;  %v7343_v27 = vld [vmem:[%s8048_s7 + $0x108] sm:$0xff] }
 0x293   : > { %v1421_v33 = vpop.f32.mrb[110].mxu1  ;;  %v3371_v10 = vmax.f32 %v1418_v42, 0.0  ;;  %6080 = vmatprep.subr.bf16.mxu1 %v6079_v31  ;;  %v6095_v31 = vpack.c.bf16 %v391_v61, %v375_v60  ;;  %v7354_v61 = vld [vmem:[%s8048_s7 + $0x158] sm:$0xff] }
 0x294   : > { %v1422_v59 = vadd.f32 %v1421_v33, %v8536_v40  ;;  %v1423_v2 = vpop.f32.mrb[111].mxu1  ;;  %1868 = vmatmul.mubr.f32.gmra.mrb[216].mxu1 %v7336_v52  ;;  %v7346_v52 = vld [vmem:[%s8048_s7 + $0x110] sm:$0xff] }
 0x295   : > { %v1424_v50 = vadd.f32 %v1423_v2, %v8542_v46  ;;  %4190 = vmatprep.mubr.f32.mxu0 %v3371_v10  ;;  %1873 = vmatprep.mubr.f32.mxu1 %v7337_v6 }
 0x296   : > { %4191 = vmatmul.mubr.f32.gmra.mrb[44].mxu0 %v3370_v28  ;;  %6082 = vmatpush1.bf16.msra.mxu1 %v6081_v8  ;;  %v3386_v32 = vmax.f32 %v1422_v59, 0.0  ;;  %v7344_v8 = vld [vmem:[%s8048_s7 + $0x100] sm:$0xff] }
 0x297   : > { %v1427_v63 = vpop.f32.mrb[112].mxu1  ;;  %v3387_v53 = vmax.f32 %v1424_v50, 0.0  ;;  %6084 = vmatprep.subr.bf16.mxu1 %v6083_v37  ;;  %v7345_v37 = vld [vmem:[%s8048_s7 + $0x118] sm:$0xff] }
 0x298   : > { %v1428_v30 = vadd.f32 %v1427_v63, %v8536_v40  ;;  %v1429_v21 = vpop.f32.mrb[113].mxu1  ;;  %1874 = vmatmul.mubr.f32.gmra.mrb[218].mxu1 %v7338_v9 }
 0x299   : > { %v1430_v34 = vadd.f32 %v1429_v21, %v8542_v46  ;;  %4195 = vmatprep.mubr.f32.mxu0 %v3387_v53  ;;  %1879 = vmatprep.mubr.f32.mxu1 %v7339_v39  ;;  %v7348_v53 = vld [vmem:[%s8048_s7 + $0x120] sm:$0xff] }
 0x29a   : > { %4196 = vmatmul.mubr.f32.gmra.mrb[46].mxu0 %v3386_v32  ;;  %6086 = vmatpush1.bf16.msra.mxu1 %v6085_v1  ;;  %v3402_v26 = vmax.f32 %v1428_v30, 0.0 }
 0x29b   : > { %v1433_v17 = vpop.f32.mrb[114].mxu1  ;;  %v3403_v48 = vmax.f32 %v1430_v34, 0.0  ;;  %6088 = vmatprep.subr.bf16.mxu1 %v6087_v3  ;;  %v9819_v34 = vsub.s32 4, %v8373_v7 }
 0x29c   : > { %v1434_v18 = vadd.f32 %v1433_v17, %v8536_v40  ;;  %v1435_v56 = vpop.f32.mrb[115].mxu1  ;;  %1880 = vmatmul.mubr.f32.gmra.mrb[220].mxu1 %v7340_v0  ;;  %v9818_v17 = vsub.s32 5, %v8373_v7  ;;  %v7353_v0 = vld [vmem:[#allocation7] sm:$0xff] }
 0x29d   : > { %v1436_v4 = vadd.f32 %v1435_v56, %v8542_v46  ;;  %4200 = vmatprep.mubr.f32.mxu0 %v3403_v48  ;;  %1885 = vmatprep.mubr.f32.mxu1 %v7341_v12 }
 0x29e   : > { %4201 = vmatmul.mubr.f32.gmra.mrb[48].mxu0 %v3402_v26  ;;  %6090 = vmatpush1.bf16.msra.mxu1 %v6089_v45  ;;  %v3418_v25 = vmax.f32 %v1434_v18, 0.0  ;;  %v7351_v45 = vld [vmem:[%s8048_s7 + $0x148] sm:$0xff]  ;;  %v7352_v18 = vld [vmem:[%s8048_s7 + $0x140] sm:$0xff]  ;;  %v8690_v26 = vrot.slane %v7353_v0, %v9819_v34  ;;  %v9302_v34 = vld [vmem:[%s8048_s7 + $0x170] sm:$0xff] }
 0x29f   : > { %v1439_v15 = vpop.f32.mrb[116].mxu1  ;;  %v3419_v23 = vmax.f32 %v1436_v4, 0.0  ;;  %6092 = vmatprep.subr.bf16.mxu1 %v6091_v43  ;;  %v8696_v4 = vrot.slane %v7353_v0, %v9818_v17  ;;  %v3633_v0 = vld [vmem:[#allocation8 + $0x348] sm:$0xff]  ;;  %9890 = vst [vmem:[#allocation19_spill] sm:$0xff] %v9302_v34 }
 0x2a0   : > { %v1440_v20 = vadd.f32 %v1439_v15, %v8536_v40  ;;  %v1441_v35 = vpop.f32.mrb[117].mxu1  ;;  %1886 = vmatmul.mubr.f32.gmra.mrb[222].mxu1 %v7342_v49  ;;  %v7356_v49 = vld [vmem:[%s8048_s7 + $0x168] sm:$0xff]  ;;  %v9297_v17 = vld [vmem:[%s8048_s7 + $0x178] sm:$0xff] }
 0x2a1   : > { %v1442_v24 = vadd.f32 %v1441_v35, %v8542_v46  ;;  %4205 = vmatprep.mubr.f32.mxu0 %v3419_v23  ;;  %1891 = vmatprep.mubr.f32.mxu1 %v7343_v27  ;;  %v7355_v23 = vld [vmem:[%s8048_s7 + $0x150] sm:$0xff]  ;;  %9889 = vst [vmem:[#allocation18_spill] sm:$0xff] %v9297_v17 }
 0x2a2   : > { %4206 = vmatmul.mubr.f32.gmra.mrb[50].mxu0 %v3418_v25  ;;  %6094 = vmatpush1.bf16.msra.mxu1 %v6093_v14  ;;  %v3434_v33 = vmax.f32 %v1440_v20, 0.0  ;;  %v3624_v20 = vld [vmem:[#allocation8 + $0x300] sm:$0xff] }
 0x2a3   : > { %v1445_v51 = vpop.f32.mrb[118].mxu1  ;;  %v3435_v38 = vmax.f32 %v1442_v24, 0.0  ;;  %6096 = vmatprep.subr.bf16.mxu1 %v6095_v31 }
 0x2a4   : > { %v1446_v42 = vadd.f32 %v1445_v51, %v8536_v40  ;;  %v1447_v44 = vpop.f32.mrb[119].mxu1  ;;  %1892 = vmatmul.mubr.f32.gmra.mrb[224].mxu1 %v7344_v8  ;;  %v3626_v8 = vld [vmem:[#allocation8 + $0x310] sm:$0xff] }
 0x2a5   : > { %v1448_v10 = vadd.f32 %v1447_v44, %v8542_v46  ;;  %4210 = vmatprep.mubr.f32.mxu0 %v3435_v38  ;;  %1897 = vmatprep.mubr.f32.mxu1 %v7345_v37  ;;  %v7357_v44 = vld [vmem:[%s8048_s7 + $0x160] sm:$0xff]  ;;  %v7358_v37 = vld [vmem:[%s8048_s7 + $0x178] sm:$0xff] }
 0x2a6   : > { %4211 = vmatmul.mubr.f32.gmra.mrb[52].mxu0 %v3434_v33  ;;  %v3450_v28 = vmax.f32 %v1446_v42, 0.0  ;;  %v3627_v33 = vld [vmem:[#allocation8 + $0x318] sm:$0xff] }
 0x2a7   : > { %v1451_v57 = vpop.f32.mrb[120].mxu1  ;;  %v3451_v13 = vmax.f32 %v1448_v10, 0.0 }
 0x2a8   : > { %v1452_v59 = vadd.f32 %v1451_v57, %v8536_v40  ;;  %v1453_v2 = vpop.f32.mrb[121].mxu1  ;;  %1898 = vmatmul.mubr.f32.gmra.mrb[226].mxu1 %v7346_v52 }
 0x2a9   : > { %v1454_v55 = vadd.f32 %v1453_v2, %v8542_v46  ;;  %4215 = vmatprep.mubr.f32.mxu0 %v3451_v13  ;;  %1903 = vmatprep.mubr.f32.mxu1 %v7347_v47  ;;  %v3628_v47 = vld [vmem:[#allocation8 + $0x320] sm:$0xff] }
 0x2aa   : > { %4216 = vmatmul.mubr.f32.gmra.mrb[54].mxu0 %v3450_v28  ;;  %v3466_v3 = vmax.f32 %v1452_v59, 0.0  ;;  %v6435_v59 = vpack.c.bf16 %v3627_v33, %v3626_v8  ;;  %v7359_v28 = vld [vmem:[%s8048_s7 + $0x170] sm:$0xff] }
 0x2ab   : > { %v1457_v50 = vpop.f32.mrb[122].mxu1  ;;  %v3467_v6 = vmax.f32 %v1454_v55, 0.0  ;;  %v3636_v33 = vld [vmem:[#allocation8 + $0x360] sm:$0xff] }
 0x2ac   : > { %v1458_v1 = vadd.f32 %v1457_v50, %v8536_v40  ;;  %v1459_v63 = vpop.f32.mrb[123].mxu1  ;;  %1904 = vmatmul.mubr.f32.gmra.mrb[228].mxu1 %v7348_v53  ;;  %v3629_v50 = vld [vmem:[#allocation8 + $0x328] sm:$0xff] }
 0x2ad   : > { %v1460_v62 = vadd.f32 %v1459_v63, %v8542_v46  ;;  %4220 = vmatprep.mubr.f32.mxu0 %v3467_v6  ;;  %1909 = vmatprep.mubr.f32.mxu1 %v7349_v16 }
 0x2ae   : > { %4221 = vmatmul.mubr.f32.gmra.mrb[56].mxu0 %v3466_v3  ;;  %v3482_v29 = vmax.f32 %v1458_v1, 0.0  ;;  %v7360_v1 = vld [vmem:[%s8048_s7 + $0x188] sm:$0xff]  ;;  %v6438_v3 = vpack.c.bf16 %v3629_v50, %v3628_v47  ;;  %v3638_v50 = vld [vmem:[#allocation8 + $0x370] sm:$0xff] }
 0x2af   : > { %v1463_v30 = vpop.f32.mrb[124].mxu1  ;;  %v3483_v21 = vmax.f32 %v1460_v62, 0.0 }
 0x2b0   : > { %v1464_v9 = vadd.f32 %v1463_v30, %v8536_v40  ;;  %v1465_v32 = vpop.f32.mrb[125].mxu1  ;;  %1910 = vmatmul.mubr.f32.gmra.mrb[230].mxu1 %v7350_v11  ;;  %v7361_v30 = vld [vmem:[%s8048_s7 + $0x180] sm:$0xff] }
 0x2b1   : > { %v1466_v39 = vadd.f32 %v1465_v32, %v8542_v46  ;;  %4225 = vmatprep.mubr.f32.mxu0 %v3483_v21  ;;  %1915 = vmatprep.mubr.f32.mxu1 %v7351_v45  ;;  %v3631_v32 = vld [vmem:[#allocation8 + $0x338] sm:$0xff] }
 0x2b2   : > { %4226 = vmatmul.mubr.f32.gmra.mrb[58].mxu0 %v3482_v29  ;;  %v3498_v56 = vmax.f32 %v1464_v9, 0.0  ;;  %v3630_v9 = vld [vmem:[#allocation8 + $0x330] sm:$0xff]  ;;  %v7362_v29 = vld [vmem:[%s8048_s7 + $0x198] sm:$0xff] }
 0x2b3   : > { %v1469_v48 = vpop.f32.mrb[126].mxu1  ;;  %v3499_v43 = vmax.f32 %v1466_v39, 0.0 }
 0x2b4   : > { %v1470_v54 = vadd.f32 %v1469_v48, %v8536_v40  ;;  %v1471_v19 = vpop.f32.mrb[127].mxu1  ;;  %1916 = vmatmul.mubr.f32.gmra.mrb[232].mxu1 %v7352_v18  ;;  %v6441_v48 = vpack.c.bf16 %v3631_v32, %v3630_v9  ;;  %v3640_v32 = vld [vmem:[#allocation8 + $0x380] sm:$0xff] }
 0x2b5   : > { %v1472_v60 = vadd.f32 %v1471_v19, %v8542_v46  ;;  %4230 = vmatprep.mubr.f32.mxu0 %v3499_v43  ;;  %1921 = vmatprep.mubr.f32.mxu1 %v7354_v61  ;;  %v3625_v46 = vld [vmem:[#allocation8 + $0x308] sm:$0xff]  ;;  %v7363_v19 = vld [vmem:[%s8048_s7 + $0x190] sm:$0xff]  ;;  %v7364_v61 = vld [vmem:[%s8048_s7 + $0x1a8] sm:$0xff] }
 0x2b6   : > { %4231 = vmatmul.mubr.f32.gmra.mrb[60].mxu0 %v3498_v56  ;;  %v3514_v31 = vmax.f32 %v1470_v54, 0.0  ;;  %v6432_v27 = vpack.c.bf16 %v3625_v46, %v3624_v20  ;;  %v3632_v56 = vld [vmem:[#allocation8 + $0x340] sm:$0xff]  ;;  %v3634_v46 = vld [vmem:[#allocation8 + $0x350] sm:$0xff] }
 0x2b7   : > { %v1540_v40 = vpop.f32.mrb[128].mxu1  ;;  %v3515_v12 = vmax.f32 %v1472_v60, 0.0 }
 0x2b8   : > { %v1541_v14 = vadd.f32 %v1540_v40, %v8690_v26  ;;  %v1542_v15 = vpop.f32.mrb[129].mxu1  ;;  %1922 = vmatmul.mubr.f32.gmra.mrb[234].mxu1 %v7355_v23 }
 0x2b9   : > { %v1543_v35 = vadd.f32 %v1542_v15, %v8696_v4  ;;  %4235 = vmatprep.mubr.f32.mxu0 %v3515_v12  ;;  %1927 = vmatprep.mubr.f32.mxu1 %v7356_v49 }
 0x2ba   : > { %4236 = vmatmul.mubr.f32.gmra.mrb[62].mxu0 %v3514_v31  ;;  %v3020_v51 = vmax.f32 %v1541_v14, 0.0  ;;  %v6444_v14 = vpack.c.bf16 %v3633_v0, %v3632_v56  ;;  %v7365_v31 = vld [vmem:[%s8048_s7 + $0x1a0] sm:$0xff] }
 0x2bb   : > { %v1546_v25 = vpop.f32.mrb[130].mxu1  ;;  %v3021_v24 = vmax.f32 %v1543_v35, 0.0  ;;  %v3635_v35 = vld [vmem:[#allocation8 + $0x358] sm:$0xff]  ;;  %v3642_v0 = vld [vmem:[#allocation8 + $0x390] sm:$0xff] }
 0x2bc   : > { %v1547_v38 = vadd.f32 %v1546_v25, %v8690_v26  ;;  %v1548_v42 = vpop.f32.mrb[131].mxu1  ;;  %1928 = vmatmul.mubr.f32.gmra.mrb[236].mxu1 %v7357_v44  ;;  %v7366_v25 = vld [vmem:[%s8048_s7 + $0x1b8] sm:$0xff]  ;;  %v7367_v44 = vld [vmem:[%s8048_s7 + $0x1b0] sm:$0xff] }
 0x2bd   : > { %v1549_v10 = vadd.f32 %v1548_v42, %v8696_v4  ;;  %4305 = vmatprep.mubr.f32.mxu0 %v3021_v24  ;;  %1933 = vmatprep.mubr.f32.mxu1 %v7358_v37 }
 0x2be   : > { %4306 = vmatmul.mubr.f32.vlgmr.msra.gmra.mrb[0].mxu0 %v3020_v51  ;;  %v3036_v55 = vmax.f32 %v1547_v38, 0.0  ;;  %v6447_v51 = vpack.c.bf16 %v3635_v35, %v3634_v46 }
 0x2bf   : > { %v1552_v57 = vpop.f32.mrb[132].mxu1  ;;  %6433 = vmatpush1.bf16.msra.mxu0 %v6432_v27  ;;  %v3037_v13 = vmax.f32 %v1549_v10, 0.0  ;;  %v3637_v10 = vld [vmem:[#allocation8 + $0x368] sm:$0xff] }
 0x2c0   : > { %v1553_v2 = vadd.f32 %v1552_v57, %v8690_v26  ;;  %v1554_v52 = vpop.f32.mrb[133].mxu1  ;;  %1934 = vmatmul.mubr.f32.gmra.mrb[238].mxu1 %v7359_v28  ;;  %6434 = vmatprep.subr.bf16.mxu0 %v9870_v58  ;;  %v7368_v57 = vld [vmem:[%s8048_s7 + $0x1c8] sm:$0xff] }
 0x2c1   : > { %v1555_v6 = vadd.f32 %v1554_v52, %v8696_v4  ;;  %4310 = vmatprep.mubr.f32.mxu0 %v3037_v13  ;;  %1939 = vmatprep.mubr.f32.mxu1 %v7360_v1 }
 0x2c2   : > { %4311 = vmatmul.mubr.f32.gmra.mrb[2].mxu0 %v3036_v55  ;;  %v3052_v21 = vmax.f32 %v1553_v2, 0.0  ;;  %v6450_v2 = vpack.c.bf16 %v3637_v10, %v3636_v33  ;;  %v7369_v55 = vld [vmem:[%s8048_s7 + $0x1c0] sm:$0xff] }
 0x2c3   : > { %v1558_v63 = vpop.f32.mrb[134].mxu1  ;;  %v3053_v53 = vmax.f32 %v1555_v6, 0.0  ;;  %6436 = vmatpush1.bf16.msra.mxu0 %v6435_v59  ;;  %v3639_v6 = vld [vmem:[#allocation8 + $0x378] sm:$0xff] }
 0x2c4   : > { %v1559_v62 = vadd.f32 %v1558_v63, %v8690_v26  ;;  %v1560_v16 = vpop.f32.mrb[135].mxu1  ;;  %1940 = vmatmul.mubr.f32.gmra.mrb[240].mxu1 %v7361_v30  ;;  %6437 = vmatprep.subr.bf16.mxu0 %v9870_v58  ;;  %v7370_v63 = vld [vmem:[%s8048_s7 + $0x1d8] sm:$0xff] }
 0x2c5   : > { %v1561_v11 = vadd.f32 %v1560_v16, %v8696_v4  ;;  %4315 = vmatprep.mubr.f32.mxu0 %v3053_v53  ;;  %1945 = vmatprep.mubr.f32.mxu1 %v7362_v29 }
 0x2c6   : > { %4316 = vmatmul.mubr.f32.gmra.mrb[4].mxu0 %v3052_v21  ;;  %v3068_v18 = vmax.f32 %v1559_v62, 0.0  ;;  %v6453_v62 = vpack.c.bf16 %v3639_v6, %v3638_v50  ;;  %v7371_v21 = vld [vmem:[%s8048_s7 + $0x1d0] sm:$0xff]  ;;  %v3646_v50 = vld [vmem:[#allocation8 + $0x3b0] sm:$0xff]  ;;  %v3647_v6 = vld [vmem:[#allocation8 + $0x3b8] sm:$0xff] }
 0x2c7   : > { %v1564_v39 = vpop.f32.mrb[136].mxu1  ;;  %v3069_v45 = vmax.f32 %v1561_v11, 0.0  ;;  %6439 = vmatpush1.bf16.msra.mxu0 %v6438_v3  ;;  %v3641_v11 = vld [vmem:[#allocation8 + $0x388] sm:$0xff] }
 0x2c8   : > { %v1565_v43 = vadd.f32 %v1564_v39, %v8690_v26  ;;  %v1566_v54 = vpop.f32.mrb[137].mxu1  ;;  %1946 = vmatmul.mubr.f32.gmra.mrb[242].mxu1 %v7363_v19  ;;  %6440 = vmatprep.subr.bf16.mxu0 %v9870_v58  ;;  %v7372_v39 = vld [vmem:[%s8048_s7 + $0x1e8] sm:$0xff] }
 0x2c9   : > { %v1567_v60 = vadd.f32 %v1566_v54, %v8696_v4  ;;  %4320 = vmatprep.mubr.f32.mxu0 %v3069_v45  ;;  %1951 = vmatprep.mubr.f32.mxu1 %v7364_v61 }
 0x2ca   : > { %4321 = vmatmul.mubr.f32.gmra.mrb[6].mxu0 %v3068_v18  ;;  %v3084_v20 = vmax.f32 %v1565_v43, 0.0  ;;  %v6456_v43 = vpack.c.bf16 %v3641_v11, %v3640_v32  ;;  %v7373_v18 = vld [vmem:[%s8048_s7 + $0x1e0] sm:$0xff]  ;;  %v6465_v32 = vpack.c.bf16 %v3647_v6, %v3646_v50  ;;  %v7384_v50 = vld [vmem:[%s8048_s7 + $0x48] sm:$0xff] }
 0x2cb   : > { %v1570_v40 = vpop.f32.mrb[138].mxu1  ;;  %v3085_v12 = vmax.f32 %v1567_v60, 0.0  ;;  %6442 = vmatpush1.bf16.msra.mxu0 %v6441_v48  ;;  %v3643_v60 = vld [vmem:[#allocation8 + $0x398] sm:$0xff] }
 0x2cc   : > { %v1571_v15 = vadd.f32 %v1570_v40, %v8690_v26  ;;  %v1572_v23 = vpop.f32.mrb[139].mxu1  ;;  %1952 = vmatmul.mubr.f32.gmra.mrb[244].mxu1 %v7365_v31  ;;  %6443 = vmatprep.subr.bf16.mxu0 %v9870_v58  ;;  %v7374_v40 = vld [vmem:[%s8048_s7 + $0x1f8] sm:$0xff] }
 0x2cd   : > { %v1573_v49 = vadd.f32 %v1572_v23, %v8696_v4  ;;  %4325 = vmatprep.mubr.f32.mxu0 %v3085_v12  ;;  %1957 = vmatprep.mubr.f32.mxu1 %v7366_v25  ;;  %v374_v12 = vld [vmem:[#allocation5 + $0x50] sm:$0xff]  ;;  %v407_v31 = vld [vmem:[#allocation5 + $0x158] sm:$0xff] }
 0x2ce   : > { %4326 = vmatmul.mubr.f32.gmra.mrb[8].mxu0 %v3084_v20  ;;  %v3100_v8 = vmax.f32 %v1571_v15, 0.0  ;;  %v6459_v20 = vpack.c.bf16 %v3643_v60, %v3642_v0 }
 0x2cf   : > { %v1576_v24 = vpop.f32.mrb[140].mxu1  ;;  %v3101_v27 = vmax.f32 %v1573_v49, 0.0  ;;  %6445 = vmatpush1.bf16.msra.mxu0 %v6444_v14  ;;  %v390_v14 = vld [vmem:[#allocation5 + $0xd0] sm:$0xff] }
 0x2d0   : > { %v1577_v38 = vadd.f32 %v1576_v24, %v8690_v26  ;;  %v1578_v42 = vpop.f32.mrb[141].mxu1  ;;  %1958 = vmatmul.mubr.f32.gmra.mrb[246].mxu1 %v7367_v44  ;;  %6446 = vmatprep.subr.bf16.mxu0 %v9870_v58  ;;  %v7375_v49 = vld [vmem:[%s8048_s7 + $0x1f0] sm:$0xff]  ;;  %v423_v24 = vld [vmem:[#allocation5 + $0x1d8] sm:$0xff]  ;;  %v6097_v44 = vpack.c.bf16 %v390_v14, %v374_v12 }
 0x2d1   : > { %v1579_v37 = vadd.f32 %v1578_v42, %v8696_v4  ;;  %4330 = vmatprep.mubr.f32.mxu0 %v3101_v27  ;;  %1963 = vmatprep.mubr.f32.mxu1 %v7368_v57  ;;  %v3644_v27 = vld [vmem:[#allocation8 + $0x3a0] sm:$0xff]  ;;  %v7376_v42 = vld [vmem:[%s8048_s7 + $0x8] sm:$0xff]  ;;  %v6099_v10 = vpack.c.bf16 %v423_v24, %v407_v31  ;;  %v503_v14 = vld [vmem:[#allocation5 + $0x458] sm:$0xff] }
 0x2d2   : > { %4331 = vmatmul.mubr.f32.gmra.mrb[10].mxu0 %v3100_v8  ;;  %v3116_v47 = vmax.f32 %v1577_v38, 0.0  ;;  %v422_v57 = vld [vmem:[#allocation5 + $0x1d0] sm:$0xff] }
 0x2d3   : > { %v1582_v13 = vpop.f32.mrb[142].mxu1  ;;  %v3117_v59 = vmax.f32 %v1579_v37, 0.0  ;;  %6448 = vmatpush1.bf16.msra.mxu0 %v6447_v51  ;;  %v3645_v51 = vld [vmem:[#allocation8 + $0x3a8] sm:$0xff]  ;;  %v406_v37 = vld [vmem:[#allocation5 + $0x150] sm:$0xff] }
 0x2d4   : > { %v1583_v52 = vadd.f32 %v1582_v13, %v8690_v26  ;;  %v1584_v28 = vpop.f32.mrb[143].mxu1  ;;  %1964 = vmatmul.mubr.f32.gmra.mrb[248].mxu1 %v7369_v55  ;;  %6449 = vmatprep.subr.bf16.mxu0 %v9870_v58  ;;  %v439_v13 = vld [vmem:[#allocation5 + $0x258] sm:$0xff]  ;;  %v486_v12 = vld [vmem:[#allocation5 + $0x3d0] sm:$0xff] }
 0x2d5   : > { %v1585_v1 = vadd.f32 %v1584_v28, %v8696_v4  ;;  %4335 = vmatprep.mubr.f32.mxu0 %v3117_v59  ;;  %1969 = vmatprep.mubr.f32.mxu1 %v7370_v63  ;;  %v6462_v59 = vpack.c.bf16 %v3645_v51, %v3644_v27  ;;  %v7377_v28 = vld [vmem:[%s8048_s7] sm:$0xff]  ;;  %v7378_v63 = vld [vmem:[%s8048_s7 + $0x18] sm:$0xff] }
 0x2d6   : > { %4336 = vmatmul.mubr.f32.gmra.mrb[12].mxu0 %v3116_v47  ;;  %v3132_v9 = vmax.f32 %v1583_v52, 0.0  ;;  %v455_v47 = vld [vmem:[#allocation5 + $0x2d8] sm:$0xff] }
 0x2d7   : > { %v1588_v53 = vpop.f32.mrb[144].mxu1  ;;  %v3133_v3 = vmax.f32 %v1585_v1, 0.0  ;;  %6451 = vmatpush1.bf16.msra.mxu0 %v6450_v2  ;;  %v7382_v27 = vld [vmem:[%s8048_s7 + $0x38] sm:$0xff] }
 0x2d8   : > { %v1589_v16 = vadd.f32 %v1588_v53, %v8690_v26  ;;  %v1590_v30 = vpop.f32.mrb[145].mxu1  ;;  %1970 = vmatmul.mubr.f32.gmra.mrb[250].mxu1 %v7371_v21  ;;  %6452 = vmatprep.subr.bf16.mxu0 %v9870_v58  ;;  %v6101_v53 = vpack.c.bf16 %v422_v57, %v406_v37  ;;  %v454_v21 = vld [vmem:[#allocation5 + $0x2d0] sm:$0xff] }
 0x2d9   : > { %v1591_v29 = vadd.f32 %v1590_v30, %v8696_v4  ;;  %4340 = vmatprep.mubr.f32.mxu0 %v3133_v3  ;;  %1975 = vmatprep.mubr.f32.mxu1 %v7372_v39  ;;  %v438_v30 = vld [vmem:[#allocation5 + $0x250] sm:$0xff] }
 0x2da   : > { %4341 = vmatmul.mubr.f32.gmra.mrb[14].mxu0 %v3132_v9  ;;  %v3148_v56 = vmax.f32 %v1589_v16, 0.0  ;;  %v6103_v16 = vpack.c.bf16 %v455_v47, %v439_v13  ;;  %v471_v9 = vld [vmem:[#allocation5 + $0x358] sm:$0xff]  ;;  %v7379_v39 = vld [vmem:[%s8048_s7 + $0x10] sm:$0xff] }
 0x2db   : > { %v1594_v45 = vpop.f32.mrb[146].mxu1  ;;  %v3149_v48 = vmax.f32 %v1591_v29, 0.0  ;;  %6454 = vmatpush1.bf16.msra.mxu0 %v6453_v62 }
 0x2dc   : > { %v1595_v54 = vadd.f32 %v1594_v45, %v8690_v26  ;;  %v1596_v19 = vpop.f32.mrb[147].mxu1  ;;  %1976 = vmatmul.mubr.f32.gmra.mrb[252].mxu1 %v7373_v18  ;;  %6455 = vmatprep.subr.bf16.mxu0 %v9870_v58  ;;  %v7380_v18 = vld [vmem:[%s8048_s7 + $0x28] sm:$0xff] }
 0x2dd   : > { %v1597_v61 = vadd.f32 %v1596_v19, %v8696_v4  ;;  %4345 = vmatprep.mubr.f32.mxu0 %v3149_v48  ;;  %1981 = vmatprep.mubr.f32.mxu1 %v7374_v40  ;;  %v487_v48 = vld [vmem:[#allocation5 + $0x3d8] sm:$0xff]  ;;  %v470_v40 = vld [vmem:[#allocation5 + $0x350] sm:$0xff] }
 0x2de   : > { %4346 = vmatmul.mubr.f32.gmra.mrb[16].mxu0 %v3148_v56  ;;  %v3164_v25 = vmax.f32 %v1595_v54, 0.0  ;;  %v3649_v54 = vld [vmem:[#allocation8 + $0x3c8] sm:$0xff]  ;;  %v6105_v56 = vpack.c.bf16 %v454_v21, %v438_v30  ;;  %v6109_v51 = vpack.c.bf16 %v486_v12, %v470_v40 }
 0x2df   : > { %v1600_v15 = vpop.f32.mrb[148].mxu1  ;;  %v3165_v23 = vmax.f32 %v1597_v61, 0.0  ;;  %6457 = vmatpush1.bf16.msra.mxu0 %v6456_v43  ;;  %v3648_v43 = vld [vmem:[#allocation8 + $0x3c0] sm:$0xff]  ;;  %v6107_v61 = vpack.c.bf16 %v487_v48, %v471_v9 }
 0x2e0   : > { %v1601_v46 = vadd.f32 %v1600_v15, %v8690_v26  ;;  %v1602_v35 = vpop.f32.mrb[149].mxu1  ;;  %1982 = vmatmul.mubr.f32.gmra.mrb[254].mxu1 %v7375_v49  ;;  %6458 = vmatprep.subr.bf16.mxu0 %v9870_v58  ;;  %v6468_v15 = vpack.c.bf16 %v3649_v54, %v3648_v43  ;;  %v3650_v49 = vld [vmem:[#allocation8 + $0x3d0] sm:$0xff]  ;;  %v7386_v43 = vld [vmem:[%s8048_s7 + $0x58] sm:$0xff] }
 0x2e1   : > { %v1603_v38 = vadd.f32 %v1602_v35, %v8696_v4  ;;  %4350 = vmatprep.mubr.f32.mxu0 %v3165_v23  ;;  %2052 = vmatprep.mubr.f32.mxu1 %v7376_v42  ;;  %v519_v35 = vld [vmem:[#allocation5 + $0x4d8] sm:$0xff] }
 0x2e2   : > { %4351 = vmatmul.mubr.f32.gmra.mrb[18].mxu0 %v3164_v25  ;;  %v3180_v55 = vmax.f32 %v1601_v46, 0.0  ;;  %v3651_v25 = vld [vmem:[#allocation8 + $0x3d8] sm:$0xff] }
 0x2e3   : > { %v1606_v8 = vpop.f32.mrb[150].mxu1  ;;  %v3181_v33 = vmax.f32 %v1603_v38, 0.0  ;;  %6460 = vmatpush1.bf16.msra.mxu0 %v6459_v20  ;;  %v7381_v20 = vld [vmem:[%s8048_s7 + $0x20] sm:$0xff]  ;;  %v6471_v37 = vpack.c.bf16 %v3651_v25, %v3650_v49 }
 0x2e4   : > { %v1607_v2 = vadd.f32 %v1606_v8, %v8690_v26  ;;  %v1608_v52 = vpop.f32.mrb[151].mxu1  ;;  %2053 = vmatmul.mubr.f32.vlgmr.msra.gmra.mrb[0].mxu1 %v7377_v28  ;;  %6461 = vmatprep.subr.bf16.mxu0 %v9870_v58  ;;  %v502_v8 = vld [vmem:[#allocation5 + $0x450] sm:$0xff] }
 0x2e5   : > { %v1609_v1 = vadd.f32 %v1608_v52, %v8696_v4  ;;  %6098 = vmatpush1.bf16.msra.mxu1 %v6097_v44  ;;  %4355 = vmatprep.mubr.f32.mxu0 %v3181_v33  ;;  %v6111_v44 = vpack.c.bf16 %v519_v35, %v503_v14  ;;  %v518_v33 = vld [vmem:[#allocation5 + $0x4d0] sm:$0xff]  ;;  %v551_v52 = vld [vmem:[#allocation5 + $0x5d8] sm:$0xff] }
 0x2e6   : > { %4356 = vmatmul.mubr.f32.gmra.mrb[20].mxu0 %v3180_v55  ;;  %2058 = vmatprep.mubr.f32.mxu1 %v7378_v63  ;;  %v3196_v45 = vmax.f32 %v1607_v2, 0.0  ;;  %v3652_v28 = vld [vmem:[#allocation8 + $0x3e0] sm:$0xff]  ;;  %v3653_v55 = vld [vmem:[#allocation8 + $0x3e8] sm:$0xff]  ;;  %v6113_v6 = vpack.c.bf16 %v518_v33, %v502_v8 }
 0x2e7   : > { %v1612_v3 = vpop.f32.mrb[152].mxu1  ;;  %v3197_v62 = vmax.f32 %v1609_v1, 0.0  ;;  %6100 = vmatprep.subr.bf16.mxu1 %v6099_v10  ;;  %6463 = vmatpush1.bf16.msra.mxu0 %v6462_v59  ;;  %v535_v10 = vld [vmem:[#allocation5 + $0x558] sm:$0xff]  ;;  %v7383_v59 = vld [vmem:[%s8048_s7 + $0x30] sm:$0xff]  ;;  %v6474_v30 = vpack.c.bf16 %v3653_v55, %v3652_v28 }
 0x2e8   : > { %v1613_v11 = vadd.f32 %v1612_v3, %v8690_v26  ;;  %v1614_v29 = vpop.f32.mrb[153].mxu1  ;;  %2059 = vmatmul.mubr.f32.gmra.mrb[2].mxu1 %v7379_v39  ;;  %6464 = vmatprep.subr.bf16.mxu0 %v9870_v58  ;;  %v534_v3 = vld [vmem:[#allocation5 + $0x550] sm:$0xff]  ;;  %v3654_v39 = vld [vmem:[#allocation8 + $0x3f0] sm:$0xff]  ;;  %v631_v33 = vld [vmem:[#allocation5 + $0x858] sm:$0xff] }
 0x2e9   : > { %v1615_v19 = vadd.f32 %v1614_v29, %v8696_v4  ;;  %4360 = vmatprep.mubr.f32.mxu0 %v3197_v62  ;;  %2064 = vmatprep.mubr.f32.mxu1 %v7380_v18  ;;  %v550_v62 = vld [vmem:[#allocation5 + $0x5d0] sm:$0xff]  ;;  %v583_v29 = vld [vmem:[#allocation5 + $0x6d8] sm:$0xff] }
 0x2ea   : > { %4361 = vmatmul.mubr.f32.gmra.mrb[22].mxu0 %v3196_v45  ;;  %6102 = vmatpush1.bf16.msra.mxu1 %v6101_v53  ;;  %v3212_v46 = vmax.f32 %v1613_v11, 0.0  ;;  %v6115_v53 = vpack.c.bf16 %v551_v52, %v535_v10  ;;  %v3655_v45 = vld [vmem:[#allocation8 + $0x3f8] sm:$0xff]  ;;  %v6117_v54 = vpack.c.bf16 %v550_v62, %v534_v3  ;;  %v7387_v14 = vld [vmem:[%s8048_s7 + $0x50] sm:$0xff]  ;;  %v647_v10 = vld [vmem:[#allocation5 + $0x8d8] sm:$0xff] }
 0x2eb   : > { %v1618_v0 = vpop.f32.mrb[154].mxu1  ;;  %v3213_v60 = vmax.f32 %v1615_v19, 0.0  ;;  %6104 = vmatprep.subr.bf16.mxu1 %v6103_v16  ;;  %6466 = vmatpush1.bf16.msra.mxu0 %v6465_v32  ;;  %v567_v16 = vld [vmem:[#allocation5 + $0x658] sm:$0xff]  ;;  %v7385_v32 = vld [vmem:[%s8048_s7 + $0x40] sm:$0xff]  ;;  %v6127_v52 = vpack.c.bf16 %v647_v10, %v631_v33  ;;  %v630_v28 = vld [vmem:[#allocation5 + $0x850] sm:$0xff] }
 0x2ec   : > { %v1619_v23 = vadd.f32 %v1618_v0, %v8690_v26  ;;  %v1620_v31 = vpop.f32.mrb[155].mxu1  ;;  %2065 = vmatmul.mubr.f32.gmra.mrb[4].mxu1 %v7381_v20  ;;  %6467 = vmatprep.subr.bf16.mxu0 %v9870_v58  ;;  %v566_v0 = vld [vmem:[#allocation5 + $0x650] sm:$0xff]  ;;  %v7392_v62 = vld [vmem:[%s8048_s7 + $0x88] sm:$0xff]  ;;  %v7397_v33 = vld [vmem:[%s8048_s7 + $0xa0] sm:$0xff] }
 0x2ed   : > { %v1621_v24 = vadd.f32 %v1620_v31, %v8696_v4  ;;  %4365 = vmatprep.mubr.f32.mxu0 %v3213_v60  ;;  %2070 = vmatprep.mubr.f32.mxu1 %v7382_v27  ;;  %v582_v60 = vld [vmem:[#allocation5 + $0x6d0] sm:$0xff]  ;;  %v615_v31 = vld [vmem:[#allocation5 + $0x7d8] sm:$0xff] }
 0x2ee   : > { %4366 = vmatmul.mubr.f32.gmra.mrb[24].mxu0 %v3212_v46  ;;  %6106 = vmatpush1.bf16.msra.mxu1 %v6105_v56  ;;  %v3228_v2 = vmax.f32 %v1619_v23, 0.0  ;;  %v6119_v56 = vpack.c.bf16 %v583_v29, %v567_v16  ;;  %v599_v23 = vld [vmem:[#allocation5 + $0x758] sm:$0xff]  ;;  %v7388_v46 = vld [vmem:[%s8048_s7 + $0x68] sm:$0xff]  ;;  %v6121_v35 = vpack.c.bf16 %v582_v60, %v566_v0  ;;  %v598_v27 = vld [vmem:[#allocation5 + $0x750] sm:$0xff] }
 0x2ef   : > { %v1624_v38 = vpop.f32.mrb[156].mxu1  ;;  %v3229_v42 = vmax.f32 %v1621_v24, 0.0  ;;  %6108 = vmatprep.subr.bf16.mxu1 %v6107_v61  ;;  %6469 = vmatpush1.bf16.msra.mxu0 %v6468_v15  ;;  %v6477_v61 = vpack.c.bf16 %v3655_v45, %v3654_v39  ;;  %v6123_v24 = vpack.c.bf16 %v615_v31, %v599_v23  ;;  %v646_v55 = vld [vmem:[#allocation5 + $0x8d0] sm:$0xff]  ;;  %v7393_v45 = vld [vmem:[%s8048_s7 + $0x80] sm:$0xff] }
 0x2f0   : > { %v1625_v57 = vadd.f32 %v1624_v38, %v8690_v26  ;;  %v1626_v13 = vpop.f32.mrb[157].mxu1  ;;  %2071 = vmatmul.mubr.f32.gmra.mrb[6].mxu1 %v7383_v59  ;;  %6470 = vmatprep.subr.bf16.mxu0 %v9870_v58  ;;  %v6129_v16 = vpack.c.bf16 %v646_v55, %v630_v28  ;;  %v7395_v23 = vld [vmem:[%s8048_s7 + $0x90] sm:$0xff] }
 0x2f1   : > { %v1627_v47 = vadd.f32 %v1626_v13, %v8696_v4  ;;  %4370 = vmatprep.mubr.f32.mxu0 %v3229_v42  ;;  %2076 = vmatprep.mubr.f32.mxu1 %v7384_v50 }
 0x2f2   : > { %4371 = vmatmul.mubr.f32.gmra.mrb[26].mxu0 %v3228_v2  ;;  %6110 = vmatpush1.bf16.msra.mxu1 %v6109_v51  ;;  %v3244_v11 = vmax.f32 %v1625_v57, 0.0  ;;  %v614_v51 = vld [vmem:[#allocation5 + $0x7d0] sm:$0xff]  ;;  %v7390_v57 = vld [vmem:[%s8048_s7 + $0x78] sm:$0xff] }
 0x2f3   : > { %v1630_v1 = vpop.f32.mrb[158].mxu1  ;;  %v3245_v63 = vmax.f32 %v1627_v47, 0.0  ;;  %6112 = vmatprep.subr.bf16.mxu1 %v6111_v44  ;;  %6472 = vmatpush1.bf16.msra.mxu0 %v6471_v37  ;;  %v7389_v44 = vld [vmem:[%s8048_s7 + $0x60] sm:$0xff]  ;;  %v6125_v13 = vpack.c.bf16 %v614_v51, %v598_v27 }
 0x2f4   : > { %v1631_v21 = vadd.f32 %v1630_v1, %v8690_v26  ;;  %v1632_v9 = vpop.f32.mrb[159].mxu1  ;;  %2077 = vmatmul.mubr.f32.gmra.mrb[8].mxu1 %v7385_v32  ;;  %6473 = vmatprep.subr.bf16.mxu0 %v9870_v58  ;;  %v662_v32 = vld [vmem:[#allocation5 + $0x950] sm:$0xff] }
 0x2f5   : > { %v1633_v48 = vadd.f32 %v1632_v9, %v8696_v4  ;;  %4375 = vmatprep.mubr.f32.mxu0 %v3245_v63  ;;  %2082 = vmatprep.mubr.f32.mxu1 %v7386_v43  ;;  %v663_v63 = vld [vmem:[#allocation5 + $0x958] sm:$0xff] }
 0x2f6   : > { %4376 = vmatmul.mubr.f32.gmra.mrb[28].mxu0 %v3244_v11  ;;  %6114 = vmatpush1.bf16.msra.mxu1 %v6113_v6  ;;  %v3260_v15 = vmax.f32 %v1631_v21, 0.0  ;;  %v7391_v6 = vld [vmem:[%s8048_s7 + $0x70] sm:$0xff]  ;;  %v695_v43 = vld [vmem:[#allocation5 + $0xa58] sm:$0xff] }
 0x2f7   : > { %v1636_v19 = vpop.f32.mrb[160].mxu1  ;;  %v3261_v18 = vmax.f32 %v1633_v48, 0.0  ;;  %6116 = vmatprep.subr.bf16.mxu1 %v6115_v53  ;;  %6475 = vmatpush1.bf16.msra.mxu0 %v6474_v30  ;;  %v679_v53 = vld [vmem:[#allocation5 + $0x9d8] sm:$0xff]  ;;  %v678_v11 = vld [vmem:[#allocation5 + $0x9d0] sm:$0xff] }
 0x2f8   : > { %v1637_v40 = vadd.f32 %v1636_v19, %v8690_v26  ;;  %v1638_v12 = vpop.f32.mrb[161].mxu1  ;;  %2083 = vmatmul.mubr.f32.gmra.mrb[10].mxu1 %v7387_v14  ;;  %6476 = vmatprep.subr.bf16.mxu0 %v9870_v58  ;;  %v6131_v9 = vpack.c.bf16 %v679_v53, %v663_v63  ;;  %v7399_v63 = vld [vmem:[%s8048_s7 + $0xb0] sm:$0xff] }
 0x2f9   : > { %v1639_v20 = vadd.f32 %v1638_v12, %v8696_v4  ;;  %4380 = vmatprep.mubr.f32.mxu0 %v3261_v18  ;;  %2088 = vmatprep.mubr.f32.mxu1 %v7388_v46  ;;  %v7394_v18 = vld [vmem:[%s8048_s7 + $0x98] sm:$0xff]  ;;  %v710_v12 = vld [vmem:[#allocation5 + $0xad0] sm:$0xff] }
 0x2fa   : > { %4381 = vmatmul.mubr.f32.gmra.mrb[30].mxu0 %v3260_v15  ;;  %6118 = vmatpush1.bf16.msra.mxu1 %v6117_v54  ;;  %v3276_v8 = vmax.f32 %v1637_v40, 0.0  ;;  %v711_v54 = vld [vmem:[#allocation5 + $0xad8] sm:$0xff]  ;;  %v694_v40 = vld [vmem:[#allocation5 + $0xa50] sm:$0xff] }
 0x2fb   : > { %v1642_v49 = vpop.f32.mrb[162].mxu1  ;;  %v3277_v25 = vmax.f32 %v1639_v20, 0.0  ;;  %6120 = vmatprep.subr.bf16.mxu1 %v6119_v56  ;;  %6478 = vmatpush1.bf16.msra.mxu0 %v6477_v61  ;;  %v6133_v56 = vpack.c.bf16 %v678_v11, %v662_v32  ;;  %v6135_v61 = vpack.c.bf16 %v711_v54, %v695_v43  ;;  %v727_v20 = vld [vmem:[#allocation5 + $0xb58] sm:$0xff]  ;;  %v7401_v43 = vld [vmem:[%s8048_s7 + $0xc0] sm:$0xff] }
 0x2fc   : > { %v1643_v38 = vadd.f32 %v1642_v49, %v8690_v26  ;;  %v1644_v42 = vpop.f32.mrb[163].mxu1  ;;  %2089 = vmatmul.mubr.f32.gmra.mrb[12].mxu1 %v7389_v44  ;;  %6479 = vmatprep.subr.bf16.mxu0 %v9870_v58  ;;  %v743_v46 = vld [vmem:[#allocation5 + $0xbd8] sm:$0xff]  ;;  %v7396_v49 = vld [vmem:[%s8048_s7 + $0xa8] sm:$0xff] }
 0x2fd   : > { %v1645_v37 = vadd.f32 %v1644_v42, %v8696_v4  ;;  %4385 = vmatprep.mubr.f32.mxu0 %v3277_v25  ;;  %2094 = vmatprep.mubr.f32.mxu1 %v7390_v57  ;;  %v6137_v25 = vpack.c.bf16 %v710_v12, %v694_v40  ;;  %v6139_v51 = vpack.c.bf16 %v743_v46, %v727_v20  ;;  %v742_v42 = vld [vmem:[#allocation5 + $0xbd0] sm:$0xff]  ;;  %v775_v57 = vld [vmem:[#allocation5 + $0xcd8] sm:$0xff] }
 0x2fe   : > { %4386 = vmatmul.mubr.f32.gmra.mrb[32].mxu0 %v3276_v8  ;;  %6122 = vmatpush1.bf16.msra.mxu1 %v6121_v35  ;;  %v3292_v1 = vmax.f32 %v1643_v38, 0.0  ;;  %v726_v38 = vld [vmem:[#allocation5 + $0xb50] sm:$0xff] }
 0x2ff   : > { %v1648_v59 = vpop.f32.mrb[164].mxu1  ;;  %v3293_v2 = vmax.f32 %v1645_v37, 0.0  ;;  %6124 = vmatprep.subr.bf16.mxu1 %v6123_v24  ;;  %v759_v37 = vld [vmem:[#allocation5 + $0xc58] sm:$0xff]  ;;  %v7403_v20 = vld [vmem:[%s8048_s7 + $0xd0] sm:$0xff] }
 0x300   : > { %v1649_v47 = vadd.f32 %v1648_v59, %v8690_v26  ;;  %v1650_v50 = vpop.f32.mrb[165].mxu1  ;;  %2095 = vmatmul.mubr.f32.gmra.mrb[14].mxu1 %v7391_v6  ;;  %v7398_v59 = vld [vmem:[%s8048_s7 + $0xb8] sm:$0xff]  ;;  %v6143_v55 = vpack.c.bf16 %v775_v57, %v759_v37  ;;  %v7405_v37 = vld [vmem:[%s8048_s7 + $0xe0] sm:$0xff] }
 0x301   : > { %v1651_v3 = vadd.f32 %v1650_v50, %v8696_v4  ;;  %4390 = vmatprep.mubr.f32.mxu0 %v3293_v2  ;;  %2100 = vmatprep.mubr.f32.mxu1 %v7392_v62  ;;  %v6141_v2 = vpack.c.bf16 %v742_v42, %v726_v38  ;;  %v774_v50 = vld [vmem:[#allocation5 + $0xcd0] sm:$0xff]  ;;  %v807_v62 = vld [vmem:[#allocation5 + $0xdd8] sm:$0xff] }
 0x302   : > { %4391 = vmatmul.mubr.f32.gmra.mrb[34].mxu0 %v3292_v1  ;;  %6126 = vmatpush1.bf16.msra.mxu1 %v6125_v13  ;;  %v3308_v48 = vmax.f32 %v1649_v47, 0.0  ;;  %v758_v47 = vld [vmem:[#allocation5 + $0xc50] sm:$0xff] }
 0x303   : > { %v1654_v30 = vpop.f32.mrb[166].mxu1  ;;  %v3309_v21 = vmax.f32 %v1651_v3, 0.0  ;;  %6128 = vmatprep.subr.bf16.mxu1 %v6127_v52  ;;  %v791_v3 = vld [vmem:[#allocation5 + $0xd58] sm:$0xff] }
 0x304   : > { %v1655_v29 = vadd.f32 %v1654_v30, %v8690_v26  ;;  %v1656_v39 = vpop.f32.mrb[167].mxu1  ;;  %2101 = vmatmul.mubr.f32.gmra.mrb[16].mxu1 %v7393_v45  ;;  %v7400_v30 = vld [vmem:[%s8048_s7 + $0xc8] sm:$0xff]  ;;  %v6147_v11 = vpack.c.bf16 %v807_v62, %v791_v3 }
 0x305   : > { %v1657_v19 = vadd.f32 %v1656_v39, %v8696_v4  ;;  %4395 = vmatprep.mubr.f32.mxu0 %v3309_v21  ;;  %2106 = vmatprep.mubr.f32.mxu1 %v7394_v18  ;;  %v6145_v21 = vpack.c.bf16 %v774_v50, %v758_v47  ;;  %v806_v39 = vld [vmem:[#allocation5 + $0xdd0] sm:$0xff]  ;;  %v839_v18 = vld [vmem:[#allocation5 + $0xed8] sm:$0xff]  ;;  %v7408_v62 = vld [vmem:[%s8048_s7 + $0x108] sm:$0xff] }
 0x306   : > { %4396 = vmatmul.mubr.f32.gmra.mrb[36].mxu0 %v3308_v48  ;;  %6130 = vmatpush1.bf16.msra.mxu1 %v6129_v16  ;;  %v3324_v31 = vmax.f32 %v1655_v29, 0.0  ;;  %v790_v29 = vld [vmem:[#allocation5 + $0xd50] sm:$0xff] }
 0x307   : > { %v1660_v0 = vpop.f32.mrb[168].mxu1  ;;  %v3325_v60 = vmax.f32 %v1657_v19, 0.0  ;;  %6132 = vmatprep.subr.bf16.mxu1 %v6131_v9  ;;  %v823_v19 = vld [vmem:[#allocation5 + $0xe58] sm:$0xff] }
 0x308   : > { %v1661_v14 = vadd.f32 %v1660_v0, %v8690_v26  ;;  %v1662_v15 = vpop.f32.mrb[169].mxu1  ;;  %2107 = vmatmul.mubr.f32.gmra.mrb[18].mxu1 %v7395_v23  ;;  %v7402_v0 = vld [vmem:[%s8048_s7 + $0xd8] sm:$0xff]  ;;  %v6151_v12 = vpack.c.bf16 %v839_v18, %v823_v19  ;;  %v7411_v19 = vld [vmem:[%s8048_s7 + $0x110] sm:$0xff] }
 0x309   : > { %v1663_v35 = vadd.f32 %v1662_v15, %v8696_v4  ;;  %4400 = vmatprep.mubr.f32.mxu0 %v3325_v60  ;;  %2112 = vmatprep.mubr.f32.mxu1 %v7396_v49  ;;  %v6149_v60 = vpack.c.bf16 %v806_v39, %v790_v29  ;;  %v838_v15 = vld [vmem:[#allocation5 + $0xed0] sm:$0xff]  ;;  %v871_v49 = vld [vmem:[#allocation5 + $0xfd8] sm:$0xff] }
 0x30a   : > { %4401 = vmatmul.mubr.f32.gmra.mrb[38].mxu0 %v3324_v31  ;;  %6134 = vmatpush1.bf16.msra.mxu1 %v6133_v56  ;;  %v3340_v10 = vmax.f32 %v1661_v14, 0.0  ;;  %v822_v14 = vld [vmem:[#allocation5 + $0xe50] sm:$0xff]  ;;  %v7410_v39 = vld [vmem:[%s8048_s7 + $0x118] sm:$0xff] }
 0x30b   : > { %v1666_v24 = vpop.f32.mrb[170].mxu1  ;;  %v3341_v27 = vmax.f32 %v1663_v35, 0.0  ;;  %6136 = vmatprep.subr.bf16.mxu1 %v6135_v61  ;;  %v855_v35 = vld [vmem:[#allocation5 + $0xf58] sm:$0xff] }
 0x30c   : > { %v1667_v44 = vadd.f32 %v1666_v24, %v8690_v26  ;;  %v1668_v8 = vpop.f32.mrb[171].mxu1  ;;  %2113 = vmatmul.mubr.f32.gmra.mrb[20].mxu1 %v7397_v33  ;;  %v7404_v24 = vld [vmem:[%s8048_s7 + $0xe8] sm:$0xff]  ;;  %v6155_v42 = vpack.c.bf16 %v871_v49, %v855_v35 }
 0x30d   : > { %v1669_v13 = vadd.f32 %v1668_v8, %v8696_v4  ;;  %4405 = vmatprep.mubr.f32.mxu0 %v3341_v27  ;;  %2118 = vmatprep.mubr.f32.mxu1 %v7398_v59  ;;  %v6153_v27 = vpack.c.bf16 %v838_v15, %v822_v14  ;;  %v870_v8 = vld [vmem:[#allocation5 + $0xfd0] sm:$0xff]  ;;  %v393_v59 = vld [vmem:[#allocation5 + $0xe8] sm:$0xff]  ;;  %v7413_v14 = vld [vmem:[%s8048_s7 + $0x120] sm:$0xff] }
 0x30e   : > { %4406 = vmatmul.mubr.f32.gmra.mrb[40].mxu0 %v3340_v10  ;;  %6138 = vmatpush1.bf16.msra.mxu1 %v6137_v25  ;;  %v3356_v53 = vmax.f32 %v1667_v44, 0.0  ;;  %v854_v44 = vld [vmem:[#allocation5 + $0xf50] sm:$0xff] }
 0x30f   : > { %v1672_v52 = vpop.f32.mrb[172].mxu1  ;;  %v3357_v28 = vmax.f32 %v1669_v13, 0.0  ;;  %6140 = vmatprep.subr.bf16.mxu1 %v6139_v51  ;;  %v377_v13 = vld [vmem:[#allocation5 + $0x68] sm:$0xff] }
 0x310   : > { %v1673_v6 = vadd.f32 %v1672_v52, %v8690_v26  ;;  %v1674_v1 = vpop.f32.mrb[173].mxu1  ;;  %2119 = vmatmul.mubr.f32.gmra.mrb[22].mxu1 %v7399_v63  ;;  %v7406_v52 = vld [vmem:[%s8048_s7 + $0xf8] sm:$0xff]  ;;  %v6159_v50 = vpack.c.bf16 %v393_v59, %v377_v13  ;;  %v7407_v63 = vld [vmem:[%s8048_s7 + $0xf0] sm:$0xff]  ;;  %v7418_v13 = vld [vmem:[#allocation7] sm:$0xff] }
 0x311   : > { %v1675_v16 = vadd.f32 %v1674_v1, %v8696_v4  ;;  %4410 = vmatprep.mubr.f32.mxu0 %v3357_v28  ;;  %2124 = vmatprep.mubr.f32.mxu1 %v7400_v30  ;;  %v6157_v28 = vpack.c.bf16 %v870_v8, %v854_v44 }
 0x312   : > { %4411 = vmatmul.mubr.f32.gmra.mrb[42].mxu0 %v3356_v53  ;;  %6142 = vmatpush1.bf16.msra.mxu1 %v6141_v2  ;;  %v3372_v54 = vmax.f32 %v1673_v6, 0.0 }
 0x313   : > { %v1678_v9 = vpop.f32.mrb[174].mxu1  ;;  %v3373_v32 = vmax.f32 %v1675_v16, 0.0  ;;  %6144 = vmatprep.subr.bf16.mxu1 %v6143_v55 }
 0x314   : > { %v1679_v45 = vadd.f32 %v1678_v9, %v8690_v26  ;;  %v1680_v48 = vpop.f32.mrb[175].mxu1  ;;  %2125 = vmatmul.mubr.f32.gmra.mrb[24].mxu1 %v7401_v43 }
 0x315   : > { %v1681_v56 = vadd.f32 %v1680_v48, %v8696_v4  ;;  %4415 = vmatprep.mubr.f32.mxu0 %v3373_v32  ;;  %2130 = vmatprep.mubr.f32.mxu1 %v7402_v0  ;;  %v7409_v32 = vld [vmem:[%s8048_s7 + $0x100] sm:$0xff]  ;;  %v7412_v0 = vld [vmem:[%s8048_s7 + $0x128] sm:$0xff] }
 0x316   : > { %4416 = vmatmul.mubr.f32.gmra.mrb[44].mxu0 %v3372_v54  ;;  %6146 = vmatpush1.bf16.msra.mxu1 %v6145_v21  ;;  %v3388_v46 = vmax.f32 %v1679_v45, 0.0 }
 0x317   : > { %v1684_v61 = vpop.f32.mrb[176].mxu1  ;;  %v3389_v40 = vmax.f32 %v1681_v56, 0.0  ;;  %6148 = vmatprep.subr.bf16.mxu1 %v6147_v11 }
 0x318   : > { %v1685_v23 = vadd.f32 %v1684_v61, %v8690_v26  ;;  %v1686_v31 = vpop.f32.mrb[177].mxu1  ;;  %2131 = vmatmul.mubr.f32.gmra.mrb[26].mxu1 %v7403_v20 }
 0x319   : > { %v1687_v25 = vadd.f32 %v1686_v31, %v8696_v4  ;;  %4420 = vmatprep.mubr.f32.mxu0 %v3389_v40  ;;  %2136 = vmatprep.mubr.f32.mxu1 %v7404_v24  ;;  %v7414_v31 = vld [vmem:[%s8048_s7 + $0x138] sm:$0xff] }
 0x31a   : > { %4421 = vmatmul.mubr.f32.gmra.mrb[46].mxu0 %v3388_v46  ;;  %6150 = vmatpush1.bf16.msra.mxu1 %v6149_v60  ;;  %v3404_v57 = vmax.f32 %v1685_v23, 0.0 }
 0x31b   : > { %v1690_v51 = vpop.f32.mrb[178].mxu1  ;;  %v3405_v38 = vmax.f32 %v1687_v25, 0.0  ;;  %6152 = vmatprep.subr.bf16.mxu1 %v6151_v12  ;;  %v7415_v25 = vld [vmem:[%s8048_s7 + $0x130] sm:$0xff] }
 0x31c   : > { %v1691_v33 = vadd.f32 %v1690_v51, %v8690_v26  ;;  %v1692_v10 = vpop.f32.mrb[179].mxu1  ;;  %2137 = vmatmul.mubr.f32.gmra.mrb[28].mxu1 %v7405_v37  ;;  %v7417_v37 = vld [vmem:[%s8048_s7 + $0x140] sm:$0xff] }
 0x31d   : > { %v1693_v2 = vadd.f32 %v1692_v10, %v8696_v4  ;;  %4425 = vmatprep.mubr.f32.mxu0 %v3405_v38  ;;  %2142 = vmatprep.mubr.f32.mxu1 %v7406_v52  ;;  %v7416_v38 = vld [vmem:[%s8048_s7 + $0x148] sm:$0xff]  ;;  %v7419_v52 = vld [vmem:[%s8048_s7 + $0x158] sm:$0xff] }
 0x31e   : > { %4426 = vmatmul.mubr.f32.gmra.mrb[48].mxu0 %v3404_v57  ;;  %6154 = vmatpush1.bf16.msra.mxu1 %v6153_v27  ;;  %v3420_v53 = vmax.f32 %v1691_v33, 0.0  ;;  %v9817_v27 = vsub.s32 6, %v8373_v7 }
 0x31f   : > { %v1696_v55 = vpop.f32.mrb[180].mxu1  ;;  %v3421_v47 = vmax.f32 %v1693_v2, 0.0  ;;  %6156 = vmatprep.subr.bf16.mxu1 %v6155_v42  ;;  %v9816_v42 = vsub.s32 7, %v8373_v7 }
 0x320   : > { %v1697_v6 = vadd.f32 %v1696_v55, %v8690_v26  ;;  %v1698_v1 = vpop.f32.mrb[181].mxu1  ;;  %2143 = vmatmul.mubr.f32.gmra.mrb[30].mxu1 %v7407_v63  ;;  %v8844_v59 = vrot.slane %v7418_v13, %v9817_v27  ;;  %v3656_v63 = vld [vmem:[#allocation8 + $0x400] sm:$0xff] }
 0x321   : > { %v1699_v3 = vadd.f32 %v1698_v1, %v8696_v4  ;;  %4430 = vmatprep.mubr.f32.mxu0 %v3421_v47  ;;  %2148 = vmatprep.mubr.f32.mxu1 %v7408_v62 }
 0x322   : > { %4431 = vmatmul.mubr.f32.gmra.mrb[50].mxu0 %v3420_v53  ;;  %6158 = vmatpush1.bf16.msra.mxu1 %v6157_v28  ;;  %v3436_v11 = vmax.f32 %v1697_v6, 0.0  ;;  %v8850_v28 = vrot.slane %v7418_v13, %v9816_v42  ;;  %v7420_v6 = vld [vmem:[%s8048_s7 + $0x150] sm:$0xff]  ;;  %v9292_v42 = vld [vmem:[%s8048_s7 + $0x160] sm:$0xff] }
 0x323   : > { %v1702_v16 = vpop.f32.mrb[182].mxu1  ;;  %v3437_v30 = vmax.f32 %v1699_v3, 0.0  ;;  %6160 = vmatprep.subr.bf16.mxu1 %v6159_v50  ;;  %v7421_v3 = vld [vmem:[%s8048_s7 + $0x168] sm:$0xff]  ;;  %9888 = vst [vmem:[#allocation17_spill] sm:$0xff] %v9292_v42 }
 0x324   : > { %v1703_v21 = vadd.f32 %v1702_v16, %v8690_v26  ;;  %v1704_v9 = vpop.f32.mrb[183].mxu1  ;;  %2149 = vmatmul.mubr.f32.gmra.mrb[32].mxu1 %v7409_v32 }
 0x325   : > { %v1705_v29 = vadd.f32 %v1704_v9, %v8696_v4  ;;  %4435 = vmatprep.mubr.f32.mxu0 %v3437_v30  ;;  %2154 = vmatprep.mubr.f32.mxu1 %v7410_v39  ;;  %v3659_v39 = vld [vmem:[#allocation8 + $0x418] sm:$0xff] }
 0x326   : > { %4436 = vmatmul.mubr.f32.gmra.mrb[52].mxu0 %v3436_v11  ;;  %v3452_v18 = vmax.f32 %v1703_v21, 0.0  ;;  %v7422_v11 = vld [vmem:[%s8048_s7 + $0x160] sm:$0xff] }
 0x327   : > { %v1708_v45 = vpop.f32.mrb[184].mxu1  ;;  %v3453_v48 = vmax.f32 %v1705_v29, 0.0  ;;  %v3658_v29 = vld [vmem:[#allocation8 + $0x410] sm:$0xff] }
 0x328   : > { %v1709_v43 = vadd.f32 %v1708_v45, %v8690_v26  ;;  %v1710_v54 = vpop.f32.mrb[185].mxu1  ;;  %2155 = vmatmul.mubr.f32.gmra.mrb[34].mxu1 %v7411_v19  ;;  %v6483_v19 = vpack.c.bf16 %v3659_v39, %v3658_v29  ;;  %v7432_v39 = vld [vmem:[%s8048_s7 + $0x1b0] sm:$0xff] }
 0x329   : > { %v1711_v56 = vadd.f32 %v1710_v54, %v8696_v4  ;;  %4440 = vmatprep.mubr.f32.mxu0 %v3453_v48  ;;  %2160 = vmatprep.mubr.f32.mxu1 %v7412_v0  ;;  %v7423_v48 = vld [vmem:[%s8048_s7 + $0x178] sm:$0xff]  ;;  %v7424_v0 = vld [vmem:[%s8048_s7 + $0x170] sm:$0xff] }
 0x32a   : > { %4441 = vmatmul.mubr.f32.gmra.mrb[54].mxu0 %v3452_v18  ;;  %v3468_v15 = vmax.f32 %v1709_v43, 0.0 }
 0x32b   : > { %v1714_v60 = vpop.f32.mrb[186].mxu1  ;;  %v3469_v61 = vmax.f32 %v1711_v56, 0.0 }
 0x32c   : > { %v1715_v40 = vadd.f32 %v1714_v60, %v8690_v26  ;;  %v1716_v12 = vpop.f32.mrb[187].mxu1  ;;  %2161 = vmatmul.mubr.f32.gmra.mrb[36].mxu1 %v7413_v14  ;;  %v7425_v14 = vld [vmem:[%s8048_s7 + $0x188] sm:$0xff] }
 0x32d   : > { %v1717_v23 = vadd.f32 %v1716_v12, %v8696_v4  ;;  %4445 = vmatprep.mubr.f32.mxu0 %v3469_v61  ;;  %2166 = vmatprep.mubr.f32.mxu1 %v7414_v31  ;;  %v3660_v61 = vld [vmem:[#allocation8 + $0x420] sm:$0xff] }
 0x32e   : > { %4446 = vmatmul.mubr.f32.gmra.mrb[56].mxu0 %v3468_v15  ;;  %v3484_v24 = vmax.f32 %v1715_v40, 0.0  ;;  %v3661_v40 = vld [vmem:[#allocation8 + $0x428] sm:$0xff] }
 0x32f   : > { %v1720_v20 = vpop.f32.mrb[188].mxu1  ;;  %v3485_v46 = vmax.f32 %v1717_v23, 0.0  ;;  %v6486_v31 = vpack.c.bf16 %v3661_v40, %v3660_v61  ;;  %v7434_v40 = vld [vmem:[%s8048_s7 + $0x1c0] sm:$0xff] }
 0x330   : > { %v1721_v35 = vadd.f32 %v1720_v20, %v8690_v26  ;;  %v1722_v49 = vpop.f32.mrb[189].mxu1  ;;  %2167 = vmatmul.mubr.f32.gmra.mrb[38].mxu1 %v7415_v25  ;;  %v3662_v25 = vld [vmem:[#allocation8 + $0x430] sm:$0xff] }
 0x331   : > { %v1723_v51 = vadd.f32 %v1722_v49, %v8696_v4  ;;  %4450 = vmatprep.mubr.f32.mxu0 %v3485_v46  ;;  %2172 = vmatprep.mubr.f32.mxu1 %v7416_v38  ;;  %v7427_v38 = vld [vmem:[%s8048_s7 + $0x198] sm:$0xff] }
 0x332   : > { %4451 = vmatmul.mubr.f32.gmra.mrb[58].mxu0 %v3484_v24  ;;  %v3500_v57 = vmax.f32 %v1721_v35, 0.0  ;;  %v7426_v35 = vld [vmem:[%s8048_s7 + $0x180] sm:$0xff]  ;;  %v3663_v24 = vld [vmem:[#allocation8 + $0x438] sm:$0xff] }
 0x333   : > { %v1726_v44 = vpop.f32.mrb[190].mxu1  ;;  %v3501_v8 = vmax.f32 %v1723_v51, 0.0 }
 0x334   : > { %v1727_v33 = vadd.f32 %v1726_v44, %v8690_v26  ;;  %v1728_v10 = vpop.f32.mrb[191].mxu1  ;;  %2173 = vmatmul.mubr.f32.gmra.mrb[40].mxu1 %v7417_v37 }
 0x335   : > { %v1729_v2 = vadd.f32 %v1728_v10, %v8696_v4  ;;  %4455 = vmatprep.mubr.f32.mxu0 %v3501_v8  ;;  %2178 = vmatprep.mubr.f32.mxu1 %v7419_v52  ;;  %v3657_v4 = vld [vmem:[#allocation8 + $0x408] sm:$0xff] }
 0x336   : > { %4456 = vmatmul.mubr.f32.gmra.mrb[60].mxu0 %v3500_v57  ;;  %v3516_v1 = vmax.f32 %v1727_v33, 0.0  ;;  %v6480_v30 = vpack.c.bf16 %v3657_v4, %v3656_v63  ;;  %v6489_v33 = vpack.c.bf16 %v3663_v24, %v3662_v25  ;;  %v7428_v57 = vld [vmem:[%s8048_s7 + $0x190] sm:$0xff]  ;;  %v3665_v52 = vld [vmem:[#allocation8 + $0x448] sm:$0xff]  ;;  %v7430_v4 = vld [vmem:[%s8048_s7 + $0x1a0] sm:$0xff] }
 0x337   : > { %v1797_v26 = vpop.f32.mrb[192].mxu1  ;;  %v3517_v55 = vmax.f32 %v1729_v2, 0.0  ;;  %v3664_v2 = vld [vmem:[#allocation8 + $0x440] sm:$0xff] }
 0x338   : > { %v1798_v47 = vadd.f32 %v1797_v26, %v8844_v59  ;;  %v1799_v50 = vpop.f32.mrb[193].mxu1  ;;  %2179 = vmatmul.mubr.f32.gmra.mrb[42].mxu1 %v7420_v6  ;;  %v6492_v6 = vpack.c.bf16 %v3665_v52, %v3664_v2  ;;  %v7436_v24 = vld [vmem:[%s8048_s7 + $0x1d0] sm:$0xff]  ;;  %v7438_v52 = vld [vmem:[%s8048_s7 + $0x1e0] sm:$0xff] }
 0x339   : > { %v1800_v53 = vadd.f32 %v1799_v50, %v8850_v28  ;;  %4460 = vmatprep.mubr.f32.mxu0 %v3517_v55  ;;  %2184 = vmatprep.mubr.f32.mxu1 %v7421_v3  ;;  %v7429_v55 = vld [vmem:[%s8048_s7 + $0x1a8] sm:$0xff]  ;;  %v3666_v3 = vld [vmem:[#allocation8 + $0x450] sm:$0xff] }
 0x33a   : > { %4461 = vmatmul.mubr.f32.gmra.mrb[62].mxu0 %v3516_v1  ;;  %v3022_v21 = vmax.f32 %v1798_v47, 0.0 }
 0x33b   : > { %v1803_v62 = vpop.f32.mrb[194].mxu1  ;;  %v3023_v16 = vmax.f32 %v1800_v53, 0.0 }
 0x33c   : > { %v1804_v9 = vadd.f32 %v1803_v62, %v8844_v59  ;;  %v1805_v32 = vpop.f32.mrb[195].mxu1  ;;  %2185 = vmatmul.mubr.f32.gmra.mrb[44].mxu1 %v7422_v11  ;;  %v3667_v62 = vld [vmem:[#allocation8 + $0x458] sm:$0xff] }
 0x33d   : > { %v1806_v45 = vadd.f32 %v1805_v32, %v8850_v28  ;;  %4530 = vmatprep.mubr.f32.mxu0 %v3023_v16  ;;  %2190 = vmatprep.mubr.f32.mxu1 %v7423_v48  ;;  %v6495_v32 = vpack.c.bf16 %v3667_v62, %v3666_v3  ;;  %v3668_v48 = vld [vmem:[#allocation8 + $0x460] sm:$0xff]  ;;  %v409_v3 = vld [vmem:[#allocation5 + $0x168] sm:$0xff] }
 0x33e   : > { %4531 = vmatmul.mubr.f32.vlgmr.msra.gmra.mrb[0].mxu0 %v3022_v21  ;;  %v3038_v60 = vmax.f32 %v1804_v9, 0.0 }
 0x33f   : > { %v1809_v43 = vpop.f32.mrb[196].mxu1  ;;  %6481 = vmatpush1.bf16.msra.mxu0 %v6480_v30  ;;  %v3039_v54 = vmax.f32 %v1806_v45, 0.0  ;;  %v7431_v30 = vld [vmem:[%s8048_s7 + $0x1b8] sm:$0xff] }
 0x340   : > { %v1810_v18 = vadd.f32 %v1809_v43, %v8844_v59  ;;  %v1811_v56 = vpop.f32.mrb[197].mxu1  ;;  %2191 = vmatmul.mubr.f32.gmra.mrb[46].mxu1 %v7424_v0  ;;  %6482 = vmatprep.subr.bf16.mxu0 %v9870_v58  ;;  %v3669_v43 = vld [vmem:[#allocation8 + $0x468] sm:$0xff] }
 0x341   : > { %v1812_v12 = vadd.f32 %v1811_v56, %v8850_v28  ;;  %4535 = vmatprep.mubr.f32.mxu0 %v3039_v54  ;;  %2196 = vmatprep.mubr.f32.mxu1 %v7425_v14  ;;  %v6498_v0 = vpack.c.bf16 %v3669_v43, %v3668_v48  ;;  %v3670_v14 = vld [vmem:[#allocation8 + $0x470] sm:$0xff] }
 0x342   : > { %4536 = vmatmul.mubr.f32.gmra.mrb[2].mxu0 %v3038_v60  ;;  %v3054_v49 = vmax.f32 %v1810_v18, 0.0 }
 0x343   : > { %v1815_v15 = vpop.f32.mrb[198].mxu1  ;;  %v3055_v23 = vmax.f32 %v1812_v12, 0.0  ;;  %6484 = vmatpush1.bf16.msra.mxu0 %v6483_v19  ;;  %v7433_v19 = vld [vmem:[%s8048_s7 + $0x1c8] sm:$0xff] }
 0x344   : > { %v1816_v20 = vadd.f32 %v1815_v15, %v8844_v59  ;;  %v1817_v46 = vpop.f32.mrb[199].mxu1  ;;  %2197 = vmatmul.mubr.f32.gmra.mrb[48].mxu1 %v7426_v35  ;;  %6485 = vmatprep.subr.bf16.mxu0 %v9870_v58  ;;  %v3671_v15 = vld [vmem:[#allocation8 + $0x478] sm:$0xff] }
 0x345   : > { %v1818_v51 = vadd.f32 %v1817_v46, %v8850_v28  ;;  %4540 = vmatprep.mubr.f32.mxu0 %v3055_v23  ;;  %2202 = vmatprep.mubr.f32.mxu1 %v7427_v38  ;;  %v6501_v35 = vpack.c.bf16 %v3671_v15, %v3670_v14  ;;  %v3672_v38 = vld [vmem:[#allocation8 + $0x480] sm:$0xff]  ;;  %v457_v15 = vld [vmem:[#allocation5 + $0x2e8] sm:$0xff] }
 0x346   : > { %4541 = vmatmul.mubr.f32.gmra.mrb[4].mxu0 %v3054_v49  ;;  %v3070_v13 = vmax.f32 %v1816_v20, 0.0 }
 0x347   : > { %v1821_v44 = vpop.f32.mrb[200].mxu1  ;;  %v3071_v8 = vmax.f32 %v1818_v51, 0.0  ;;  %6487 = vmatpush1.bf16.msra.mxu0 %v6486_v31  ;;  %v7435_v31 = vld [vmem:[%s8048_s7 + $0x1d8] sm:$0xff] }
 0x348   : > { %v1822_v10 = vadd.f32 %v1821_v44, %v8844_v59  ;;  %v1823_v37 = vpop.f32.mrb[201].mxu1  ;;  %2203 = vmatmul.mubr.f32.gmra.mrb[50].mxu1 %v7428_v57  ;;  %6488 = vmatprep.subr.bf16.mxu0 %v9870_v58  ;;  %v3673_v44 = vld [vmem:[#allocation8 + $0x488] sm:$0xff] }
 0x349   : > { %v1824_v26 = vadd.f32 %v1823_v37, %v8850_v28  ;;  %4545 = vmatprep.mubr.f32.mxu0 %v3071_v8  ;;  %2208 = vmatprep.mubr.f32.mxu1 %v7429_v55  ;;  %v6504_v57 = vpack.c.bf16 %v3673_v44, %v3672_v38  ;;  %v3674_v55 = vld [vmem:[#allocation8 + $0x490] sm:$0xff]  ;;  %v473_v44 = vld [vmem:[#allocation5 + $0x368] sm:$0xff] }
 0x34a   : > { %4546 = vmatmul.mubr.f32.gmra.mrb[6].mxu0 %v3070_v13  ;;  %v3086_v53 = vmax.f32 %v1822_v10, 0.0  ;;  %v456_v38 = vld [vmem:[#allocation5 + $0x2e0] sm:$0xff] }
 0x34b   : > { %v1827_v47 = vpop.f32.mrb[202].mxu1  ;;  %v3087_v50 = vmax.f32 %v1824_v26, 0.0  ;;  %6490 = vmatpush1.bf16.msra.mxu0 %v6489_v33  ;;  %v7437_v33 = vld [vmem:[%s8048_s7 + $0x1e8] sm:$0xff] }
 0x34c   : > { %v1828_v1 = vadd.f32 %v1827_v47, %v8844_v59  ;;  %v1829_v63 = vpop.f32.mrb[203].mxu1  ;;  %2209 = vmatmul.mubr.f32.gmra.mrb[52].mxu1 %v7430_v4  ;;  %6491 = vmatprep.subr.bf16.mxu0 %v9870_v58  ;;  %v3675_v47 = vld [vmem:[#allocation8 + $0x498] sm:$0xff] }
 0x34d   : > { %v1830_v16 = vadd.f32 %v1829_v63, %v8850_v28  ;;  %4550 = vmatprep.mubr.f32.mxu0 %v3087_v50  ;;  %2214 = vmatprep.mubr.f32.mxu1 %v7431_v30  ;;  %v392_v63 = vld [vmem:[#allocation5 + $0xe0] sm:$0xff]  ;;  %v6507_v62 = vpack.c.bf16 %v3675_v47, %v3674_v55  ;;  %v7445_v55 = vld [vmem:[%s8048_s7 + $0x28] sm:$0xff] }
 0x34e   : > { %4551 = vmatmul.mubr.f32.gmra.mrb[8].mxu0 %v3086_v53  ;;  %v3102_v45 = vmax.f32 %v1828_v1, 0.0  ;;  %v376_v1 = vld [vmem:[#allocation5 + $0x60] sm:$0xff] }
 0x34f   : > { %v1833_v21 = vpop.f32.mrb[204].mxu1  ;;  %v3103_v9 = vmax.f32 %v1830_v16, 0.0  ;;  %6493 = vmatpush1.bf16.msra.mxu0 %v6492_v6  ;;  %v7439_v6 = vld [vmem:[%s8048_s7 + $0x1f8] sm:$0xff]  ;;  %v6161_v48 = vpack.c.bf16 %v392_v63, %v376_v1  ;;  %v472_v63 = vld [vmem:[#allocation5 + $0x360] sm:$0xff] }
 0x350   : > { %v1834_v11 = vadd.f32 %v1833_v21, %v8844_v59  ;;  %v1835_v29 = vpop.f32.mrb[205].mxu1  ;;  %2215 = vmatmul.mubr.f32.gmra.mrb[54].mxu1 %v7432_v39  ;;  %6494 = vmatprep.subr.bf16.mxu0 %v9870_v58  ;;  %v7440_v21 = vld [vmem:[%s8048_s7 + $0x1f0] sm:$0xff] }
 0x351   : > { %v1836_v54 = vadd.f32 %v1835_v29, %v8850_v28  ;;  %4555 = vmatprep.mubr.f32.mxu0 %v3103_v9  ;;  %2220 = vmatprep.mubr.f32.mxu1 %v7433_v19  ;;  %v3677_v29 = vld [vmem:[#allocation8 + $0x4a8] sm:$0xff] }
 0x352   : > { %4556 = vmatmul.mubr.f32.gmra.mrb[10].mxu0 %v3102_v45  ;;  %v3118_v12 = vmax.f32 %v1834_v11, 0.0  ;;  %v3676_v11 = vld [vmem:[#allocation8 + $0x4a0] sm:$0xff]  ;;  %v7441_v45 = vld [vmem:[%s8048_s7 + $0x8] sm:$0xff] }
 0x353   : > { %v1839_v18 = vpop.f32.mrb[206].mxu1  ;;  %v3119_v56 = vmax.f32 %v1836_v54, 0.0  ;;  %6496 = vmatpush1.bf16.msra.mxu0 %v6495_v32  ;;  %v425_v32 = vld [vmem:[#allocation5 + $0x1e8] sm:$0xff] }
 0x354   : > { %v1840_v60 = vadd.f32 %v1839_v18, %v8844_v59  ;;  %v1841_v61 = vpop.f32.mrb[207].mxu1  ;;  %2221 = vmatmul.mubr.f32.gmra.mrb[56].mxu1 %v7434_v40  ;;  %6497 = vmatprep.subr.bf16.mxu0 %v9870_v58  ;;  %v6163_v19 = vpack.c.bf16 %v425_v32, %v409_v3  ;;  %v408_v18 = vld [vmem:[#allocation5 + $0x160] sm:$0xff] }
 0x355   : > { %v1842_v23 = vadd.f32 %v1841_v61, %v8850_v28  ;;  %4560 = vmatprep.mubr.f32.mxu0 %v3119_v56  ;;  %2226 = vmatprep.mubr.f32.mxu1 %v7435_v31  ;;  %v424_v56 = vld [vmem:[#allocation5 + $0x1e0] sm:$0xff]  ;;  %v3679_v31 = vld [vmem:[#allocation8 + $0x4b8] sm:$0xff] }
 0x356   : > { %4561 = vmatmul.mubr.f32.gmra.mrb[12].mxu0 %v3118_v12  ;;  %v3134_v51 = vmax.f32 %v1840_v60, 0.0  ;;  %v6510_v60 = vpack.c.bf16 %v3677_v29, %v3676_v11  ;;  %v7442_v12 = vld [vmem:[%s8048_s7] sm:$0xff]  ;;  %v3683_v11 = vld [vmem:[#allocation8 + $0x4d8] sm:$0xff] }
 0x357   : > { %v1845_v20 = vpop.f32.mrb[208].mxu1  ;;  %v3135_v46 = vmax.f32 %v1842_v23, 0.0  ;;  %6499 = vmatpush1.bf16.msra.mxu0 %v6498_v0  ;;  %v441_v0 = vld [vmem:[#allocation5 + $0x268] sm:$0xff]  ;;  %v3678_v23 = vld [vmem:[#allocation8 + $0x4b0] sm:$0xff] }
 0x358   : > { %v1846_v49 = vadd.f32 %v1845_v20, %v8844_v59  ;;  %v1847_v25 = vpop.f32.mrb[209].mxu1  ;;  %2227 = vmatmul.mubr.f32.gmra.mrb[58].mxu1 %v7436_v24  ;;  %6500 = vmatprep.subr.bf16.mxu0 %v9870_v58  ;;  %v6167_v24 = vpack.c.bf16 %v457_v15, %v441_v0  ;;  %v3682_v32 = vld [vmem:[#allocation8 + $0x4d0] sm:$0xff]  ;;  %v3684_v15 = vld [vmem:[#allocation8 + $0x4e0] sm:$0xff] }
 0x359   : > { %v1848_v8 = vadd.f32 %v1847_v25, %v8850_v28  ;;  %4565 = vmatprep.mubr.f32.mxu0 %v3135_v46  ;;  %2232 = vmatprep.mubr.f32.mxu1 %v7437_v33  ;;  %v7443_v46 = vld [vmem:[%s8048_s7 + $0x18] sm:$0xff]  ;;  %v6519_v0 = vpack.c.bf16 %v3683_v11, %v3682_v32  ;;  %v7453_v32 = vld [vmem:[%s8048_s7 + $0x68] sm:$0xff] }
 0x35a   : > { %4566 = vmatmul.mubr.f32.gmra.mrb[14].mxu0 %v3134_v51  ;;  %v3150_v26 = vmax.f32 %v1846_v49, 0.0  ;;  %v440_v51 = vld [vmem:[#allocation5 + $0x260] sm:$0xff] }
 0x35b   : > { %v1851_v10 = vpop.f32.mrb[210].mxu1  ;;  %v3151_v37 = vmax.f32 %v1848_v8, 0.0  ;;  %6502 = vmatpush1.bf16.msra.mxu0 %v6501_v35  ;;  %v6165_v35 = vpack.c.bf16 %v424_v56, %v408_v18  ;;  %v6513_v8 = vpack.c.bf16 %v3679_v31, %v3678_v23  ;;  %v6169_v47 = vpack.c.bf16 %v456_v38, %v440_v51  ;;  %v520_v18 = vld [vmem:[#allocation5 + $0x4e0] sm:$0xff]  ;;  %v537_v56 = vld [vmem:[#allocation5 + $0x568] sm:$0xff]  ;;  %v3685_v23 = vld [vmem:[#allocation8 + $0x4e8] sm:$0xff] }
 0x35c   : > { %v1852_v13 = vadd.f32 %v1851_v10, %v8844_v59  ;;  %v1853_v2 = vpop.f32.mrb[211].mxu1  ;;  %2233 = vmatmul.mubr.f32.gmra.mrb[60].mxu1 %v7438_v52  ;;  %6503 = vmatprep.subr.bf16.mxu0 %v9870_v58  ;;  %v3681_v52 = vld [vmem:[#allocation8 + $0x4c8] sm:$0xff]  ;;  %v552_v51 = vld [vmem:[#allocation5 + $0x5e0] sm:$0xff]  ;;  %v569_v38 = vld [vmem:[#allocation5 + $0x668] sm:$0xff] }
 0x35d   : > { %v1854_v50 = vadd.f32 %v1853_v2, %v8850_v28  ;;  %4570 = vmatprep.mubr.f32.mxu0 %v3151_v37  ;;  %2238 = vmatprep.mubr.f32.mxu1 %v7439_v6  ;;  %v7444_v37 = vld [vmem:[%s8048_s7 + $0x10] sm:$0xff] }
 0x35e   : > { %4571 = vmatmul.mubr.f32.gmra.mrb[16].mxu0 %v3150_v26  ;;  %v3166_v9 = vmax.f32 %v1852_v13, 0.0  ;;  %v489_v13 = vld [vmem:[#allocation5 + $0x3e8] sm:$0xff]  ;;  %v3680_v2 = vld [vmem:[#allocation8 + $0x4c0] sm:$0xff] }
 0x35f   : > { %v1857_v4 = vpop.f32.mrb[212].mxu1  ;;  %v3167_v53 = vmax.f32 %v1854_v50, 0.0  ;;  %6505 = vmatpush1.bf16.msra.mxu0 %v6504_v57  ;;  %v6171_v1 = vpack.c.bf16 %v489_v13, %v473_v44  ;;  %v6516_v3 = vpack.c.bf16 %v3681_v52, %v3680_v2  ;;  %v6522_v44 = vpack.c.bf16 %v3685_v23, %v3684_v15  ;;  %v3686_v13 = vld [vmem:[#allocation8 + $0x4f0] sm:$0xff]  ;;  %v3687_v2 = vld [vmem:[#allocation8 + $0x4f8] sm:$0xff] }
 0x360   : > { %v1858_v16 = vadd.f32 %v1857_v4, %v8844_v59  ;;  %v1859_v30 = vpop.f32.mrb[213].mxu1  ;;  %2239 = vmatmul.mubr.f32.gmra.mrb[62].mxu1 %v7440_v21  ;;  %6506 = vmatprep.subr.bf16.mxu0 %v9870_v58  ;;  %v488_v4 = vld [vmem:[#allocation5 + $0x3e0] sm:$0xff] }
 0x361   : > { %v1860_v39 = vadd.f32 %v1859_v30, %v8850_v28  ;;  %4575 = vmatprep.mubr.f32.mxu0 %v3167_v53  ;;  %2309 = vmatprep.mubr.f32.mxu1 %v7441_v45  ;;  %v505_v53 = vld [vmem:[#allocation5 + $0x468] sm:$0xff]  ;;  %v7446_v30 = vld [vmem:[%s8048_s7 + $0x20] sm:$0xff]  ;;  %v6173_v45 = vpack.c.bf16 %v488_v4, %v472_v63  ;;  %v6525_v4 = vpack.c.bf16 %v3687_v2, %v3686_v13 }
 0x362   : > { %4576 = vmatmul.mubr.f32.gmra.mrb[18].mxu0 %v3166_v9  ;;  %v3182_v14 = vmax.f32 %v1858_v16, 0.0  ;;  %v521_v9 = vld [vmem:[#allocation5 + $0x4e8] sm:$0xff]  ;;  %v584_v63 = vld [vmem:[#allocation5 + $0x6e0] sm:$0xff] }
 0x363   : > { %v1863_v43 = vpop.f32.mrb[214].mxu1  ;;  %v3183_v54 = vmax.f32 %v1860_v39, 0.0  ;;  %6508 = vmatpush1.bf16.msra.mxu0 %v6507_v62  ;;  %v7447_v39 = vld [vmem:[%s8048_s7 + $0x38] sm:$0xff]  ;;  %v680_v13 = vld [vmem:[#allocation5 + $0x9e0] sm:$0xff] }
 0x364   : > { %v1864_v61 = vadd.f32 %v1863_v43, %v8844_v59  ;;  %v1865_v40 = vpop.f32.mrb[215].mxu1  ;;  %2310 = vmatmul.mubr.f32.vlgmr.msra.gmra.mrb[64].mxu1 %v7442_v12  ;;  %6509 = vmatprep.subr.bf16.mxu0 %v9870_v58 }
 0x365   : > { %v1866_v20 = vadd.f32 %v1865_v40, %v8850_v28  ;;  %6162 = vmatpush1.bf16.msra.mxu1 %v6161_v48  ;;  %4580 = vmatprep.mubr.f32.mxu0 %v3183_v54  ;;  %v6175_v54 = vpack.c.bf16 %v521_v9, %v505_v53  ;;  %v7448_v40 = vld [vmem:[%s8048_s7 + $0x30] sm:$0xff] }
 0x366   : > { %4581 = vmatmul.mubr.f32.gmra.mrb[20].mxu0 %v3182_v14  ;;  %2315 = vmatprep.mubr.f32.mxu1 %v7443_v46  ;;  %v3198_v57 = vmax.f32 %v1864_v61, 0.0  ;;  %v553_v14 = vld [vmem:[#allocation5 + $0x5e8] sm:$0xff] }
 0x367   : > { %v1869_v49 = vpop.f32.mrb[216].mxu1  ;;  %v3199_v25 = vmax.f32 %v1866_v20, 0.0  ;;  %6164 = vmatprep.subr.bf16.mxu1 %v6163_v19  ;;  %6511 = vmatpush1.bf16.msra.mxu0 %v6510_v60  ;;  %v504_v19 = vld [vmem:[#allocation5 + $0x460] sm:$0xff]  ;;  %v7449_v20 = vld [vmem:[%s8048_s7 + $0x48] sm:$0xff] }
 0x368   : > { %v1870_v33 = vadd.f32 %v1869_v49, %v8844_v59  ;;  %v1871_v10 = vpop.f32.mrb[217].mxu1  ;;  %2316 = vmatmul.mubr.f32.gmra.mrb[66].mxu1 %v7444_v37  ;;  %6512 = vmatprep.subr.bf16.mxu0 %v9870_v58  ;;  %v6177_v46 = vpack.c.bf16 %v520_v18, %v504_v19  ;;  %v7454_v18 = vld [vmem:[%s8048_s7 + $0x60] sm:$0xff] }
 0x369   : > { %v1872_v26 = vadd.f32 %v1871_v10, %v8850_v28  ;;  %4585 = vmatprep.mubr.f32.mxu0 %v3199_v25  ;;  %2321 = vmatprep.mubr.f32.mxu1 %v7445_v55  ;;  %v6179_v25 = vpack.c.bf16 %v553_v14, %v537_v56  ;;  %v7450_v10 = vld [vmem:[%s8048_s7 + $0x40] sm:$0xff] }
 0x36a   : > { %4586 = vmatmul.mubr.f32.gmra.mrb[22].mxu0 %v3198_v57  ;;  %6166 = vmatpush1.bf16.msra.mxu1 %v6165_v35  ;;  %v3214_v21 = vmax.f32 %v1870_v33, 0.0  ;;  %v585_v57 = vld [vmem:[#allocation5 + $0x6e8] sm:$0xff] }
 0x36b   : > { %v1875_v50 = vpop.f32.mrb[218].mxu1  ;;  %v3215_v6 = vmax.f32 %v1872_v26, 0.0  ;;  %6168 = vmatprep.subr.bf16.mxu1 %v6167_v24  ;;  %6514 = vmatpush1.bf16.msra.mxu0 %v6513_v8  ;;  %v536_v24 = vld [vmem:[#allocation5 + $0x560] sm:$0xff]  ;;  %v7451_v26 = vld [vmem:[%s8048_s7 + $0x58] sm:$0xff] }
 0x36c   : > { %v1876_v62 = vadd.f32 %v1875_v50, %v8844_v59  ;;  %v1877_v16 = vpop.f32.mrb[219].mxu1  ;;  %2322 = vmatmul.mubr.f32.gmra.mrb[68].mxu1 %v7446_v30  ;;  %6515 = vmatprep.subr.bf16.mxu0 %v9870_v58  ;;  %v6181_v55 = vpack.c.bf16 %v552_v51, %v536_v24  ;;  %v601_v30 = vld [vmem:[#allocation5 + $0x768] sm:$0xff] }
 0x36d   : > { %v1878_v29 = vadd.f32 %v1877_v16, %v8850_v28  ;;  %4590 = vmatprep.mubr.f32.mxu0 %v3215_v6  ;;  %2327 = vmatprep.mubr.f32.mxu1 %v7447_v39  ;;  %v6183_v6 = vpack.c.bf16 %v585_v57, %v569_v38  ;;  %v665_v24 = vld [vmem:[#allocation5 + $0x968] sm:$0xff]  ;;  %v664_v57 = vld [vmem:[#allocation5 + $0x960] sm:$0xff] }
 0x36e   : > { %4591 = vmatmul.mubr.f32.gmra.mrb[24].mxu0 %v3214_v21  ;;  %6170 = vmatpush1.bf16.msra.mxu1 %v6169_v47  ;;  %v3230_v12 = vmax.f32 %v1876_v62, 0.0  ;;  %v7452_v62 = vld [vmem:[%s8048_s7 + $0x50] sm:$0xff]  ;;  %v617_v21 = vld [vmem:[#allocation5 + $0x7e8] sm:$0xff] }
 0x36f   : > { %v1881_v48 = vpop.f32.mrb[220].mxu1  ;;  %v3231_v43 = vmax.f32 %v1878_v29, 0.0  ;;  %6172 = vmatprep.subr.bf16.mxu1 %v6171_v1  ;;  %6517 = vmatpush1.bf16.msra.mxu0 %v6516_v3  ;;  %v568_v1 = vld [vmem:[#allocation5 + $0x660] sm:$0xff]  ;;  %v681_v51 = vld [vmem:[#allocation5 + $0x9e8] sm:$0xff] }
 0x370   : > { %v1882_v60 = vadd.f32 %v1881_v48, %v8844_v59  ;;  %v1883_v61 = vpop.f32.mrb[221].mxu1  ;;  %2328 = vmatmul.mubr.f32.gmra.mrb[70].mxu1 %v7448_v40  ;;  %6518 = vmatprep.subr.bf16.mxu0 %v9870_v58  ;;  %v6185_v11 = vpack.c.bf16 %v584_v63, %v568_v1  ;;  %v600_v48 = vld [vmem:[#allocation5 + $0x760] sm:$0xff]  ;;  %v7455_v40 = vld [vmem:[%s8048_s7 + $0x78] sm:$0xff]  ;;  %v6197_v63 = vpack.c.bf16 %v680_v13, %v664_v57 }
 0x371   : > { %v1884_v31 = vadd.f32 %v1883_v61, %v8850_v28  ;;  %4595 = vmatprep.mubr.f32.mxu0 %v3231_v43  ;;  %2333 = vmatprep.mubr.f32.mxu1 %v7449_v20  ;;  %v616_v43 = vld [vmem:[#allocation5 + $0x7e0] sm:$0xff]  ;;  %v7459_v1 = vld [vmem:[%s8048_s7 + $0x98] sm:$0xff] }
 0x372   : > { %4596 = vmatmul.mubr.f32.gmra.mrb[26].mxu0 %v3230_v12  ;;  %6174 = vmatpush1.bf16.msra.mxu1 %v6173_v45  ;;  %v3246_v37 = vmax.f32 %v1882_v60, 0.0  ;;  %v6187_v45 = vpack.c.bf16 %v617_v21, %v601_v30  ;;  %v649_v60 = vld [vmem:[#allocation5 + $0x8e8] sm:$0xff]  ;;  %v6189_v12 = vpack.c.bf16 %v616_v43, %v600_v48  ;;  %v648_v20 = vld [vmem:[#allocation5 + $0x8e0] sm:$0xff] }
 0x373   : > { %v1887_v35 = vpop.f32.mrb[222].mxu1  ;;  %v3247_v49 = vmax.f32 %v1884_v31, 0.0  ;;  %6176 = vmatprep.subr.bf16.mxu1 %v6175_v54  ;;  %6520 = vmatpush1.bf16.msra.mxu0 %v6519_v0  ;;  %v633_v0 = vld [vmem:[#allocation5 + $0x868] sm:$0xff]  ;;  %v632_v31 = vld [vmem:[#allocation5 + $0x860] sm:$0xff] }
 0x374   : > { %v1888_v8 = vadd.f32 %v1887_v35, %v8844_v59  ;;  %v1889_v33 = vpop.f32.mrb[223].mxu1  ;;  %2334 = vmatmul.mubr.f32.gmra.mrb[72].mxu1 %v7450_v10  ;;  %6521 = vmatprep.subr.bf16.mxu0 %v9870_v58  ;;  %v6191_v23 = vpack.c.bf16 %v649_v60, %v633_v0 }
 0x375   : > { %v1890_v52 = vadd.f32 %v1889_v33, %v8850_v28  ;;  %4600 = vmatprep.mubr.f32.mxu0 %v3247_v49  ;;  %2339 = vmatprep.mubr.f32.mxu1 %v7451_v26  ;;  %v7456_v49 = vld [vmem:[%s8048_s7 + $0x70] sm:$0xff]  ;;  %v7458_v26 = vld [vmem:[%s8048_s7 + $0x80] sm:$0xff] }
 0x376   : > { %4601 = vmatmul.mubr.f32.gmra.mrb[28].mxu0 %v3246_v37  ;;  %6178 = vmatpush1.bf16.msra.mxu1 %v6177_v46  ;;  %v3262_v16 = vmax.f32 %v1888_v8, 0.0  ;;  %v6193_v8 = vpack.c.bf16 %v648_v20, %v632_v31  ;;  %v6195_v37 = vpack.c.bf16 %v681_v51, %v665_v24 }
 0x377   : > { %v1893_v47 = vpop.f32.mrb[224].mxu1  ;;  %v3263_v50 = vmax.f32 %v1890_v52, 0.0  ;;  %6180 = vmatprep.subr.bf16.mxu1 %v6179_v25  ;;  %6523 = vmatpush1.bf16.msra.mxu0 %v6522_v44  ;;  %v7457_v44 = vld [vmem:[%s8048_s7 + $0x88] sm:$0xff] }
 0x378   : > { %v1894_v53 = vadd.f32 %v1893_v47, %v8844_v59  ;;  %v1895_v3 = vpop.f32.mrb[225].mxu1  ;;  %2340 = vmatmul.mubr.f32.gmra.mrb[74].mxu1 %v7452_v62  ;;  %6524 = vmatprep.subr.bf16.mxu0 %v9870_v58  ;;  %v697_v47 = vld [vmem:[#allocation5 + $0xa68] sm:$0xff]  ;;  %v696_v62 = vld [vmem:[#allocation5 + $0xa60] sm:$0xff] }
 0x379   : > { %v1896_v9 = vadd.f32 %v1895_v3, %v8850_v28  ;;  %4605 = vmatprep.mubr.f32.mxu0 %v3263_v50  ;;  %2345 = vmatprep.mubr.f32.mxu1 %v7453_v32  ;;  %v713_v50 = vld [vmem:[#allocation5 + $0xae8] sm:$0xff] }
 0x37a   : > { %4606 = vmatmul.mubr.f32.gmra.mrb[30].mxu0 %v3262_v16  ;;  %6182 = vmatpush1.bf16.msra.mxu1 %v6181_v55  ;;  %v3278_v56 = vmax.f32 %v1894_v53, 0.0  ;;  %v6199_v3 = vpack.c.bf16 %v713_v50, %v697_v47  ;;  %v712_v16 = vld [vmem:[#allocation5 + $0xae0] sm:$0xff] }
 0x37b   : > { %v1899_v29 = vpop.f32.mrb[226].mxu1  ;;  %v3279_v39 = vmax.f32 %v1896_v9, 0.0  ;;  %6184 = vmatprep.subr.bf16.mxu1 %v6183_v6  ;;  %6526 = vmatpush1.bf16.msra.mxu0 %v6525_v4  ;;  %v7460_v9 = vld [vmem:[%s8048_s7 + $0x90] sm:$0xff]  ;;  %v6201_v48 = vpack.c.bf16 %v712_v16, %v696_v62 }
 0x37c   : > { %v1900_v54 = vadd.f32 %v1899_v29, %v8844_v59  ;;  %v1901_v19 = vpop.f32.mrb[227].mxu1  ;;  %2346 = vmatmul.mubr.f32.gmra.mrb[76].mxu1 %v7454_v18  ;;  %6527 = vmatprep.subr.bf16.mxu0 %v9870_v58  ;;  %v745_v29 = vld [vmem:[#allocation5 + $0xbe8] sm:$0xff]  ;;  %v728_v18 = vld [vmem:[#allocation5 + $0xb60] sm:$0xff] }
 0x37d   : > { %v1902_v61 = vadd.f32 %v1901_v19, %v8850_v28  ;;  %4610 = vmatprep.mubr.f32.mxu0 %v3279_v39  ;;  %2351 = vmatprep.mubr.f32.mxu1 %v7455_v40 }
 0x37e   : > { %4611 = vmatmul.mubr.f32.gmra.mrb[32].mxu0 %v3278_v56  ;;  %6186 = vmatpush1.bf16.msra.mxu1 %v6185_v11  ;;  %v3294_v25 = vmax.f32 %v1900_v54, 0.0  ;;  %v729_v11 = vld [vmem:[#allocation5 + $0xb68] sm:$0xff]  ;;  %v744_v56 = vld [vmem:[#allocation5 + $0xbe0] sm:$0xff] }
 0x37f   : > { %v1905_v14 = vpop.f32.mrb[228].mxu1  ;;  %v3295_v15 = vmax.f32 %v1902_v61, 0.0  ;;  %6188 = vmatprep.subr.bf16.mxu1 %v6187_v45  ;;  %v7461_v45 = vld [vmem:[%s8048_s7 + $0xa8] sm:$0xff]  ;;  %v6203_v19 = vpack.c.bf16 %v745_v29, %v729_v11  ;;  %v7462_v61 = vld [vmem:[%s8048_s7 + $0xa0] sm:$0xff]  ;;  %v6205_v31 = vpack.c.bf16 %v744_v56, %v728_v18 }
 0x380   : > { %v1906_v46 = vadd.f32 %v1905_v14, %v8844_v59  ;;  %v1907_v35 = vpop.f32.mrb[229].mxu1  ;;  %2352 = vmatmul.mubr.f32.gmra.mrb[78].mxu1 %v7456_v49  ;;  %v777_v14 = vld [vmem:[#allocation5 + $0xce8] sm:$0xff]  ;;  %v760_v49 = vld [vmem:[#allocation5 + $0xc60] sm:$0xff] }
 0x381   : > { %v1908_v38 = vadd.f32 %v1907_v35, %v8850_v28  ;;  %4615 = vmatprep.mubr.f32.mxu0 %v3295_v15  ;;  %2357 = vmatprep.mubr.f32.mxu1 %v7457_v44 }
 0x382   : > { %4616 = vmatmul.mubr.f32.gmra.mrb[34].mxu0 %v3294_v25  ;;  %6190 = vmatpush1.bf16.msra.mxu1 %v6189_v12  ;;  %v3310_v55 = vmax.f32 %v1906_v46, 0.0  ;;  %v761_v12 = vld [vmem:[#allocation5 + $0xc68] sm:$0xff]  ;;  %v776_v25 = vld [vmem:[#allocation5 + $0xce0] sm:$0xff] }
 0x383   : > { %v1911_v33 = vpop.f32.mrb[230].mxu1  ;;  %v3311_v10 = vmax.f32 %v1908_v38, 0.0  ;;  %6192 = vmatprep.subr.bf16.mxu1 %v6191_v23  ;;  %v7463_v23 = vld [vmem:[%s8048_s7 + $0xb8] sm:$0xff]  ;;  %v6207_v35 = vpack.c.bf16 %v777_v14, %v761_v12  ;;  %v7464_v38 = vld [vmem:[%s8048_s7 + $0xb0] sm:$0xff]  ;;  %v6209_v57 = vpack.c.bf16 %v776_v25, %v760_v49 }
 0x384   : > { %v1912_v2 = vadd.f32 %v1911_v33, %v8844_v59  ;;  %v1913_v52 = vpop.f32.mrb[231].mxu1  ;;  %2358 = vmatmul.mubr.f32.gmra.mrb[80].mxu1 %v7458_v26  ;;  %v809_v33 = vld [vmem:[#allocation5 + $0xde8] sm:$0xff]  ;;  %v792_v26 = vld [vmem:[#allocation5 + $0xd60] sm:$0xff] }
 0x385   : > { %v1914_v6 = vadd.f32 %v1913_v52, %v8850_v28  ;;  %4620 = vmatprep.mubr.f32.mxu0 %v3311_v10  ;;  %2363 = vmatprep.mubr.f32.mxu1 %v7459_v1 }
 0x386   : > { %4621 = vmatmul.mubr.f32.gmra.mrb[36].mxu0 %v3310_v55  ;;  %6194 = vmatpush1.bf16.msra.mxu1 %v6193_v8  ;;  %v3326_v32 = vmax.f32 %v1912_v2, 0.0  ;;  %v793_v8 = vld [vmem:[#allocation5 + $0xd68] sm:$0xff]  ;;  %v808_v55 = vld [vmem:[#allocation5 + $0xde0] sm:$0xff] }
 0x387   : > { %v1917_v4 = vpop.f32.mrb[232].mxu1  ;;  %v3327_v53 = vmax.f32 %v1914_v6, 0.0  ;;  %6196 = vmatprep.subr.bf16.mxu1 %v6195_v37  ;;  %v7465_v37 = vld [vmem:[%s8048_s7 + $0xc8] sm:$0xff]  ;;  %v6211_v52 = vpack.c.bf16 %v809_v33, %v793_v8  ;;  %v7466_v6 = vld [vmem:[%s8048_s7 + $0xc0] sm:$0xff]  ;;  %v6213_v62 = vpack.c.bf16 %v808_v55, %v792_v26  ;;  %v7472_v8 = vld [vmem:[%s8048_s7 + $0xf0] sm:$0xff] }
 0x388   : > { %v1918_v30 = vadd.f32 %v1917_v4, %v8844_v59  ;;  %v1919_v21 = vpop.f32.mrb[233].mxu1  ;;  %2364 = vmatmul.mubr.f32.gmra.mrb[82].mxu1 %v7460_v9  ;;  %v841_v4 = vld [vmem:[#allocation5 + $0xee8] sm:$0xff]  ;;  %v824_v9 = vld [vmem:[#allocation5 + $0xe60] sm:$0xff] }
 0x389   : > { %v1920_v39 = vadd.f32 %v1919_v21, %v8850_v28  ;;  %4625 = vmatprep.mubr.f32.mxu0 %v3327_v53  ;;  %2369 = vmatprep.mubr.f32.mxu1 %v7461_v45  ;;  %v7474_v26 = vld [vmem:[%s8048_s7 + $0x100] sm:$0xff] }
 0x38a   : > { %4626 = vmatmul.mubr.f32.gmra.mrb[38].mxu0 %v3326_v32  ;;  %6198 = vmatpush1.bf16.msra.mxu1 %v6197_v63  ;;  %v3342_v40 = vmax.f32 %v1918_v30, 0.0  ;;  %v825_v63 = vld [vmem:[#allocation5 + $0xe68] sm:$0xff]  ;;  %v840_v32 = vld [vmem:[#allocation5 + $0xee0] sm:$0xff] }
 0x38b   : > { %v1923_v43 = vpop.f32.mrb[234].mxu1  ;;  %v3343_v54 = vmax.f32 %v1920_v39, 0.0  ;;  %6200 = vmatprep.subr.bf16.mxu1 %v6199_v3  ;;  %v7467_v3 = vld [vmem:[%s8048_s7 + $0xd8] sm:$0xff]  ;;  %v6215_v21 = vpack.c.bf16 %v841_v4, %v825_v63  ;;  %v7468_v39 = vld [vmem:[%s8048_s7 + $0xd0] sm:$0xff]  ;;  %v6217_v18 = vpack.c.bf16 %v840_v32, %v824_v9 }
 0x38c   : > { %v1924_v0 = vadd.f32 %v1923_v43, %v8844_v59  ;;  %v1925_v60 = vpop.f32.mrb[235].mxu1  ;;  %2370 = vmatmul.mubr.f32.gmra.mrb[84].mxu1 %v7462_v61  ;;  %v873_v43 = vld [vmem:[#allocation5 + $0xfe8] sm:$0xff]  ;;  %v856_v61 = vld [vmem:[#allocation5 + $0xf60] sm:$0xff] }
 0x38d   : > { %v1926_v15 = vadd.f32 %v1925_v60, %v8850_v28  ;;  %4630 = vmatprep.mubr.f32.mxu0 %v3343_v54  ;;  %2375 = vmatprep.mubr.f32.mxu1 %v7463_v23 }
 0x38e   : > { %4631 = vmatmul.mubr.f32.gmra.mrb[40].mxu0 %v3342_v40  ;;  %6202 = vmatpush1.bf16.msra.mxu1 %v6201_v48  ;;  %v3358_v44 = vmax.f32 %v1924_v0, 0.0  ;;  %v857_v48 = vld [vmem:[#allocation5 + $0xf68] sm:$0xff]  ;;  %v872_v40 = vld [vmem:[#allocation5 + $0xfe0] sm:$0xff] }
 0x38f   : > { %v1929_v20 = vpop.f32.mrb[236].mxu1  ;;  %v3359_v46 = vmax.f32 %v1926_v15, 0.0  ;;  %6204 = vmatprep.subr.bf16.mxu1 %v6203_v19  ;;  %v7469_v19 = vld [vmem:[%s8048_s7 + $0xe8] sm:$0xff]  ;;  %v6219_v60 = vpack.c.bf16 %v873_v43, %v857_v48  ;;  %v7470_v15 = vld [vmem:[%s8048_s7 + $0xe0] sm:$0xff]  ;;  %v6221_v49 = vpack.c.bf16 %v872_v40, %v856_v61 }
 0x390   : > { %v1930_v24 = vadd.f32 %v1929_v20, %v8844_v59  ;;  %v1931_v51 = vpop.f32.mrb[237].mxu1  ;;  %2376 = vmatmul.mubr.f32.gmra.mrb[86].mxu1 %v7464_v38  ;;  %v395_v20 = vld [vmem:[#allocation5 + $0xf8] sm:$0xff]  ;;  %v877_v61 = vld [vmem:[#allocation7 + $0x8] sm:$0xff] }
 0x391   : > { %v1932_v10 = vadd.f32 %v1931_v51, %v8850_v28  ;;  %4635 = vmatprep.mubr.f32.mxu0 %v3359_v46  ;;  %2381 = vmatprep.mubr.f32.mxu1 %v7465_v37  ;;  %v7473_v37 = vld [vmem:[%s8048_s7 + $0x108] sm:$0xff] }
 0x392   : > { %4636 = vmatmul.mubr.f32.gmra.mrb[42].mxu0 %v3358_v44  ;;  %6206 = vmatpush1.bf16.msra.mxu1 %v6205_v31  ;;  %v3374_v1 = vmax.f32 %v1930_v24, 0.0  ;;  %v379_v31 = vld [vmem:[#allocation5 + $0x78] sm:$0xff] }
 0x393   : > { %v1935_v13 = vpop.f32.mrb[238].mxu1  ;;  %v3375_v2 = vmax.f32 %v1932_v10, 0.0  ;;  %6208 = vmatprep.subr.bf16.mxu1 %v6207_v35  ;;  %v7471_v35 = vld [vmem:[%s8048_s7 + $0xf8] sm:$0xff]  ;;  %v6223_v51 = vpack.c.bf16 %v395_v20, %v379_v31  ;;  %v8996_v20 = vrot.slane %v877_v61, %v882_v22 }
 0x394   : > { %v1936_v47 = vadd.f32 %v1935_v13, %v8844_v59  ;;  %v1937_v50 = vpop.f32.mrb[239].mxu1  ;;  %2382 = vmatmul.mubr.f32.gmra.mrb[88].mxu1 %v7466_v6 }
 0x395   : > { %v1938_v53 = vadd.f32 %v1937_v50, %v8850_v28  ;;  %4640 = vmatprep.mubr.f32.mxu0 %v3375_v2  ;;  %2387 = vmatprep.mubr.f32.mxu1 %v7467_v3  ;;  %v7475_v50 = vld [vmem:[%s8048_s7 + $0x118] sm:$0xff] }
 0x396   : > { %4641 = vmatmul.mubr.f32.gmra.mrb[44].mxu0 %v3374_v1  ;;  %6210 = vmatpush1.bf16.msra.mxu1 %v6209_v57  ;;  %v3390_v45 = vmax.f32 %v1936_v47, 0.0 }
 0x397   : > { %v1941_v16 = vpop.f32.mrb[240].mxu1  ;;  %v3391_v30 = vmax.f32 %v1938_v53, 0.0  ;;  %6212 = vmatprep.subr.bf16.mxu1 %v6211_v52  ;;  %v7476_v53 = vld [vmem:[%s8048_s7 + $0x110] sm:$0xff] }
 0x398   : > { %v1942_v11 = vadd.f32 %v1941_v16, %v8844_v59  ;;  %v1943_v29 = vpop.f32.mrb[241].mxu1  ;;  %2388 = vmatmul.mubr.f32.gmra.mrb[90].mxu1 %v7468_v39  ;;  %v7477_v16 = vld [vmem:[%s8048_s7 + $0x128] sm:$0xff] }
 0x399   : > { %v1944_v54 = vadd.f32 %v1943_v29, %v8850_v28  ;;  %4645 = vmatprep.mubr.f32.mxu0 %v3391_v30  ;;  %2393 = vmatprep.mubr.f32.mxu1 %v7469_v19 }
 0x39a   : > { %4646 = vmatmul.mubr.f32.gmra.mrb[46].mxu0 %v3390_v45  ;;  %6214 = vmatpush1.bf16.msra.mxu1 %v6213_v62  ;;  %v3406_v23 = vmax.f32 %v1942_v11, 0.0  ;;  %v7478_v11 = vld [vmem:[%s8048_s7 + $0x120] sm:$0xff]  ;;  %v7479_v45 = vld [vmem:[%s8048_s7 + $0x138] sm:$0xff] }
 0x39b   : > { %v1947_v56 = vpop.f32.mrb[242].mxu1  ;;  %v3407_v0 = vmax.f32 %v1944_v54, 0.0  ;;  %6216 = vmatprep.subr.bf16.mxu1 %v6215_v21 }
 0x39c   : > { %v1948_v12 = vadd.f32 %v1947_v56, %v8844_v59  ;;  %v1949_v14 = vpop.f32.mrb[243].mxu1  ;;  %2394 = vmatmul.mubr.f32.gmra.mrb[92].mxu1 %v7470_v15 }
 0x39d   : > { %v1950_v46 = vadd.f32 %v1949_v14, %v8850_v28  ;;  %4650 = vmatprep.mubr.f32.mxu0 %v3407_v0  ;;  %2399 = vmatprep.mubr.f32.mxu1 %v7471_v35  ;;  %v7483_v35 = vld [vmem:[%s8048_s7 + $0x158] sm:$0xff] }
 0x39e   : > { %4651 = vmatmul.mubr.f32.gmra.mrb[48].mxu0 %v3406_v23  ;;  %6218 = vmatpush1.bf16.msra.mxu1 %v6217_v18  ;;  %v3422_v33 = vmax.f32 %v1948_v12, 0.0  ;;  %v7480_v18 = vld [vmem:[%s8048_s7 + $0x130] sm:$0xff]  ;;  %v7482_v23 = vld [vmem:[%s8048_s7 + $0x140] sm:$0xff] }
 0x39f   : > { %v1953_v25 = vpop.f32.mrb[244].mxu1  ;;  %v3423_v24 = vmax.f32 %v1950_v46, 0.0  ;;  %6220 = vmatprep.subr.bf16.mxu1 %v6219_v60  ;;  %v7481_v60 = vld [vmem:[%s8048_s7 + $0x148] sm:$0xff] }
 0x3a0   : > { %v1954_v38 = vadd.f32 %v1953_v25, %v8844_v59  ;;  %v1955_v44 = vpop.f32.mrb[245].mxu1  ;;  %2400 = vmatmul.mubr.f32.gmra.mrb[94].mxu1 %v7472_v8 }
 0x3a1   : > { %v1956_v10 = vadd.f32 %v1955_v44, %v8850_v28  ;;  %4655 = vmatprep.mubr.f32.mxu0 %v3423_v24  ;;  %2405 = vmatprep.mubr.f32.mxu1 %v7473_v37  ;;  %v3688_v44 = vld [vmem:[#allocation8 + $0x500] sm:$0xff] }
 0x3a2   : > { %4656 = vmatmul.mubr.f32.gmra.mrb[50].mxu0 %v3422_v33  ;;  %6222 = vmatpush1.bf16.msra.mxu1 %v6221_v49  ;;  %v3438_v55 = vmax.f32 %v1954_v38, 0.0  ;;  %v9002_v49 = vrot.slane %v877_v61, %v886_v36  ;;  %v7484_v38 = vld [vmem:[%s8048_s7 + $0x150] sm:$0xff]  ;;  %v7485_v33 = vld [vmem:[%s8048_s7 + $0x168] sm:$0xff] }
 0x3a3   : > { %v1959_v57 = vpop.f32.mrb[246].mxu1  ;;  %v3439_v13 = vmax.f32 %v1956_v10, 0.0  ;;  %6224 = vmatprep.subr.bf16.mxu1 %v6223_v51 }
 0x3a4   : > { %v1960_v2 = vadd.f32 %v1959_v57, %v8844_v59  ;;  %v1961_v52 = vpop.f32.mrb[247].mxu1  ;;  %2406 = vmatmul.mubr.f32.gmra.mrb[96].mxu1 %v7474_v26  ;;  %v3690_v26 = vld [vmem:[#allocation8 + $0x510] sm:$0xff] }
 0x3a5   : > { %v1962_v47 = vadd.f32 %v1961_v52, %v8850_v28  ;;  %4660 = vmatprep.mubr.f32.mxu0 %v3439_v13  ;;  %2411 = vmatprep.mubr.f32.mxu1 %v7475_v50  ;;  %v7486_v52 = vld [vmem:[%s8048_s7 + $0x160] sm:$0xff]  ;;  %v7487_v50 = vld [vmem:[%s8048_s7 + $0x178] sm:$0xff] }
 0x3a6   : > { %4661 = vmatmul.mubr.f32.gmra.mrb[52].mxu0 %v3438_v55  ;;  %v3454_v3 = vmax.f32 %v1960_v2, 0.0  ;;  %v3691_v55 = vld [vmem:[#allocation8 + $0x518] sm:$0xff] }
 0x3a7   : > { %v1965_v6 = vpop.f32.mrb[248].mxu1  ;;  %v3455_v1 = vmax.f32 %v1962_v47, 0.0 }
 0x3a8   : > { %v1966_v63 = vadd.f32 %v1965_v6, %v8844_v59  ;;  %v1967_v4 = vpop.f32.mrb[249].mxu1  ;;  %2412 = vmatmul.mubr.f32.gmra.mrb[98].mxu1 %v7476_v53 }
 0x3a9   : > { %v1968_v62 = vadd.f32 %v1967_v4, %v8850_v28  ;;  %4665 = vmatprep.mubr.f32.mxu0 %v3455_v1  ;;  %2417 = vmatprep.mubr.f32.mxu1 %v7477_v16  ;;  %v3692_v16 = vld [vmem:[#allocation8 + $0x520] sm:$0xff] }
 0x3aa   : > { %4666 = vmatmul.mubr.f32.gmra.mrb[54].mxu0 %v3454_v3  ;;  %v3470_v29 = vmax.f32 %v1966_v63, 0.0  ;;  %v6531_v63 = vpack.c.bf16 %v3691_v55, %v3690_v26  ;;  %v7496_v26 = vld [vmem:[%s8048_s7 + $0x1b0] sm:$0xff] }
 0x3ab   : > { %v1971_v30 = vpop.f32.mrb[250].mxu1  ;;  %v3471_v21 = vmax.f32 %v1968_v62, 0.0  ;;  %v7488_v62 = vld [vmem:[%s8048_s7 + $0x170] sm:$0xff] }
 0x3ac   : > { %v1972_v9 = vadd.f32 %v1971_v30, %v8844_v59  ;;  %v1973_v32 = vpop.f32.mrb[251].mxu1  ;;  %2418 = vmatmul.mubr.f32.gmra.mrb[100].mxu1 %v7478_v11  ;;  %v3693_v30 = vld [vmem:[#allocation8 + $0x528] sm:$0xff]  ;;  %v3700_v55 = vld [vmem:[#allocation8 + $0x560] sm:$0xff] }
 0x3ad   : > { %v1974_v39 = vadd.f32 %v1973_v32, %v8850_v28  ;;  %4670 = vmatprep.mubr.f32.mxu0 %v3471_v21  ;;  %2423 = vmatprep.mubr.f32.mxu1 %v7479_v45 }
 0x3ae   : > { %4671 = vmatmul.mubr.f32.gmra.mrb[56].mxu0 %v3470_v29  ;;  %v3486_v56 = vmax.f32 %v1972_v9, 0.0  ;;  %v7489_v9 = vld [vmem:[%s8048_s7 + $0x188] sm:$0xff]  ;;  %v6534_v29 = vpack.c.bf16 %v3693_v30, %v3692_v16  ;;  %v7498_v16 = vld [vmem:[%s8048_s7 + $0x1c0] sm:$0xff] }
 0x3af   : > { %v1977_v48 = vpop.f32.mrb[252].mxu1  ;;  %v3487_v43 = vmax.f32 %v1974_v39, 0.0  ;;  %v3702_v30 = vld [vmem:[#allocation8 + $0x570] sm:$0xff] }
 0x3b0   : > { %v1978_v54 = vadd.f32 %v1977_v48, %v8844_v59  ;;  %v1979_v19 = vpop.f32.mrb[253].mxu1  ;;  %2424 = vmatmul.mubr.f32.gmra.mrb[102].mxu1 %v7480_v18 }
 0x3b1   : > { %v1980_v0 = vadd.f32 %v1979_v19, %v8850_v28  ;;  %4675 = vmatprep.mubr.f32.mxu0 %v3487_v43  ;;  %2429 = vmatprep.mubr.f32.mxu1 %v7481_v60  ;;  %v7490_v43 = vld [vmem:[%s8048_s7 + $0x180] sm:$0xff]  ;;  %v3695_v19 = vld [vmem:[#allocation8 + $0x538] sm:$0xff] }
 0x3b2   : > { %4676 = vmatmul.mubr.f32.gmra.mrb[58].mxu0 %v3486_v56  ;;  %v3502_v31 = vmax.f32 %v1978_v54, 0.0  ;;  %v3694_v54 = vld [vmem:[#allocation8 + $0x530] sm:$0xff]  ;;  %v7491_v56 = vld [vmem:[%s8048_s7 + $0x198] sm:$0xff] }
 0x3b3   : > { %v1983_v40 = vpop.f32.mrb[254].mxu1  ;;  %v3503_v12 = vmax.f32 %v1980_v0, 0.0  ;;  %v6537_v61 = vpack.c.bf16 %v3695_v19, %v3694_v54  ;;  %v7500_v54 = vld [vmem:[%s8048_s7 + $0x1d0] sm:$0xff] }
 0x3b4   : > { %v1984_v14 = vadd.f32 %v1983_v40, %v8844_v59  ;;  %v1985_v15 = vpop.f32.mrb[255].mxu1  ;;  %2430 = vmatmul.mubr.f32.gmra.mrb[104].mxu1 %v7482_v23  ;;  %v3696_v23 = vld [vmem:[#allocation8 + $0x540] sm:$0xff] }
 0x3b5   : > { %v1986_v46 = vadd.f32 %v1985_v15, %v8850_v28  ;;  %4680 = vmatprep.mubr.f32.mxu0 %v3503_v12  ;;  %2435 = vmatprep.mubr.f32.mxu1 %v7483_v35  ;;  %v3689_v28 = vld [vmem:[#allocation8 + $0x508] sm:$0xff]  ;;  %v7492_v15 = vld [vmem:[%s8048_s7 + $0x190] sm:$0xff]  ;;  %v7493_v35 = vld [vmem:[%s8048_s7 + $0x1a8] sm:$0xff] }
 0x3b6   : > { %4681 = vmatmul.mubr.f32.gmra.mrb[60].mxu0 %v3502_v31  ;;  %v3518_v22 = vmax.f32 %v1984_v14, 0.0  ;;  %v6528_v37 = vpack.c.bf16 %v3689_v28, %v3688_v44  ;;  %v3697_v31 = vld [vmem:[#allocation8 + $0x548] sm:$0xff]  ;;  %v7494_v44 = vld [vmem:[%s8048_s7 + $0x1a0] sm:$0xff]  ;;  %v3704_v19 = vld [vmem:[#allocation8 + $0x580] sm:$0xff] }
 0x3b7   : > { %v2054_v59 = vpop.f32.mrb[0].mxu1  ;;  %v3519_v25 = vmax.f32 %v1986_v46, 0.0  ;;  %v3698_v28 = vld [vmem:[#allocation8 + $0x550] sm:$0xff] }
 0x3b8   : > { %v2055_v24 = vadd.f32 %v2054_v59, %v8996_v20  ;;  %v2056_v51 = vpop.f32.mrb[1].mxu1  ;;  %2436 = vmatmul.mubr.f32.gmra.mrb[106].mxu1 %v7484_v38 }
 0x3b9   : > { %v2057_v8 = vadd.f32 %v2056_v51, %v9002_v49  ;;  %4685 = vmatprep.mubr.f32.mxu0 %v3519_v25  ;;  %2441 = vmatprep.mubr.f32.mxu1 %v7485_v33 }
 0x3ba   : > { %4686 = vmatmul.mubr.f32.gmra.mrb[62].mxu0 %v3518_v22  ;;  %v3024_v57 = vmax.f32 %v2055_v24, 0.0  ;;  %v6540_v24 = vpack.c.bf16 %v3697_v31, %v3696_v23  ;;  %v7502_v23 = vld [vmem:[%s8048_s7 + $0x1e0] sm:$0xff] }
 0x3bb   : > { %v3025_v36 = vmax.f32 %v2057_v8, 0.0  ;;  %v2060_v10 = vpop.f32.mrb[2].mxu1  ;;  %v3699_v8 = vld [vmem:[#allocation8 + $0x558] sm:$0xff]  ;;  %v3706_v31 = vld [vmem:[#allocation8 + $0x590] sm:$0xff] }
 0x3bc   : > { %v2061_v13 = vadd.f32 %v2060_v10, %v8996_v20  ;;  %v2062_v2 = vpop.f32.mrb[3].mxu1  ;;  %2442 = vmatmul.mubr.f32.gmra.mrb[108].mxu1 %v7486_v52 }
 0x3bd   : > { %v2063_v47 = vadd.f32 %v2062_v2, %v9002_v49  ;;  %4755 = vmatprep.mubr.f32.mxu0 %v3025_v36  ;;  %2447 = vmatprep.mubr.f32.mxu1 %v7487_v50  ;;  %v7495_v36 = vld [vmem:[%s8048_s7 + $0x1b8] sm:$0xff] }
 0x3be   : > { %4756 = vmatmul.mubr.f32.vlgmr.msra.gmra.mrb[0].mxu0 %v3024_v57  ;;  %v3040_v4 = vmax.f32 %v2061_v13, 0.0  ;;  %v6543_v57 = vpack.c.bf16 %v3699_v8, %v3698_v28 }
 0x3bf   : > { %v3041_v6 = vmax.f32 %v2063_v47, 0.0  ;;  %v2066_v1 = vpop.f32.mrb[4].mxu1  ;;  %6529 = vmatpush1.bf16.msra.mxu0 %v6528_v37  ;;  %v3701_v47 = vld [vmem:[#allocation8 + $0x568] sm:$0xff] }
 0x3c0   : > { %v2067_v53 = vadd.f32 %v2066_v1, %v8996_v20  ;;  %v2068_v3 = vpop.f32.mrb[5].mxu1  ;;  %2448 = vmatmul.mubr.f32.gmra.mrb[110].mxu1 %v7488_v62  ;;  %6530 = vmatprep.subr.bf16.mxu0 %v9870_v58 }
 0x3c1   : > { %v2069_v21 = vadd.f32 %v2068_v3, %v9002_v49  ;;  %4760 = vmatprep.mubr.f32.mxu0 %v3041_v6  ;;  %2453 = vmatprep.mubr.f32.mxu1 %v7489_v9  ;;  %v7497_v6 = vld [vmem:[%s8048_s7 + $0x1c8] sm:$0xff] }
 0x3c2   : > { %4761 = vmatmul.mubr.f32.gmra.mrb[2].mxu0 %v3040_v4  ;;  %v3056_v39 = vmax.f32 %v2067_v53, 0.0  ;;  %v6546_v4 = vpack.c.bf16 %v3701_v47, %v3700_v55 }
 0x3c3   : > { %v3057_v32 = vmax.f32 %v2069_v21, 0.0  ;;  %v2072_v11 = vpop.f32.mrb[6].mxu1  ;;  %6532 = vmatpush1.bf16.msra.mxu0 %v6531_v63  ;;  %v3703_v21 = vld [vmem:[#allocation8 + $0x578] sm:$0xff] }
 0x3c4   : > { %v2073_v45 = vadd.f32 %v2072_v11, %v8996_v20  ;;  %v2074_v48 = vpop.f32.mrb[7].mxu1  ;;  %2454 = vmatmul.mubr.f32.gmra.mrb[112].mxu1 %v7490_v43  ;;  %6533 = vmatprep.subr.bf16.mxu0 %v9870_v58 }
 0x3c5   : > { %v2075_v18 = vadd.f32 %v2074_v48, %v9002_v49  ;;  %4765 = vmatprep.mubr.f32.mxu0 %v3057_v32  ;;  %2459 = vmatprep.mubr.f32.mxu1 %v7491_v56  ;;  %v7499_v32 = vld [vmem:[%s8048_s7 + $0x1d8] sm:$0xff] }
 0x3c6   : > { %4766 = vmatmul.mubr.f32.gmra.mrb[4].mxu0 %v3056_v39  ;;  %v3072_v40 = vmax.f32 %v2073_v45, 0.0  ;;  %v6549_v39 = vpack.c.bf16 %v3703_v21, %v3702_v30  ;;  %v3710_v30 = vld [vmem:[#allocation8 + $0x5b0] sm:$0xff]  ;;  %v3711_v21 = vld [vmem:[#allocation8 + $0x5b8] sm:$0xff] }
 0x3c7   : > { %v3073_v0 = vmax.f32 %v2075_v18, 0.0  ;;  %v2078_v60 = vpop.f32.mrb[8].mxu1  ;;  %6535 = vmatpush1.bf16.msra.mxu0 %v6534_v29  ;;  %v3705_v18 = vld [vmem:[#allocation8 + $0x588] sm:$0xff] }
 0x3c8   : > { %v2079_v12 = vadd.f32 %v2078_v60, %v8996_v20  ;;  %v2080_v14 = vpop.f32.mrb[9].mxu1  ;;  %2460 = vmatmul.mubr.f32.gmra.mrb[114].mxu1 %v7492_v15  ;;  %6536 = vmatprep.subr.bf16.mxu0 %v9870_v58 }
 0x3c9   : > { %v2081_v46 = vadd.f32 %v2080_v14, %v9002_v49  ;;  %4770 = vmatprep.mubr.f32.mxu0 %v3073_v0  ;;  %2465 = vmatprep.mubr.f32.mxu1 %v7493_v35  ;;  %v7501_v0 = vld [vmem:[%s8048_s7 + $0x1e8] sm:$0xff] }
 0x3ca   : > { %4771 = vmatmul.mubr.f32.gmra.mrb[6].mxu0 %v3072_v40  ;;  %v3088_v51 = vmax.f32 %v2079_v12, 0.0  ;;  %v6552_v40 = vpack.c.bf16 %v3705_v18, %v3704_v19  ;;  %v6561_v19 = vpack.c.bf16 %v3711_v21, %v3710_v30  ;;  %v9092_v30 = vld [vmem:[%s8048_s7 + $0x48] sm:$0xff] }
 0x3cb   : > { %v3089_v59 = vmax.f32 %v2081_v46, 0.0  ;;  %v2084_v25 = vpop.f32.mrb[10].mxu1  ;;  %6538 = vmatpush1.bf16.msra.mxu0 %v6537_v61  ;;  %v3707_v46 = vld [vmem:[#allocation8 + $0x598] sm:$0xff] }
 0x3cc   : > { %v2085_v38 = vadd.f32 %v2084_v25, %v8996_v20  ;;  %v2086_v22 = vpop.f32.mrb[11].mxu1  ;;  %2466 = vmatmul.mubr.f32.gmra.mrb[116].mxu1 %v7494_v44  ;;  %6539 = vmatprep.subr.bf16.mxu0 %v9870_v58  ;;  %v378_v25 = vld [vmem:[#allocation5 + $0x70] sm:$0xff]  ;;  %v6555_v44 = vpack.c.bf16 %v3707_v46, %v3706_v31 }
 0x3cd   : > { %v2087_v33 = vadd.f32 %v2086_v22, %v9002_v49  ;;  %4775 = vmatprep.mubr.f32.mxu0 %v3089_v59  ;;  %2471 = vmatprep.mubr.f32.mxu1 %v7495_v36  ;;  %v7503_v59 = vld [vmem:[%s8048_s7 + $0x1f8] sm:$0xff]  ;;  %v7504_v36 = vld [vmem:[%s8048_s7 + $0x1f0] sm:$0xff] }
 0x3ce   : > { %4776 = vmatmul.mubr.f32.gmra.mrb[8].mxu0 %v3088_v51  ;;  %v3104_v13 = vmax.f32 %v2085_v38, 0.0  ;;  %v411_v22 = vld [vmem:[#allocation5 + $0x178] sm:$0xff] }
 0x3cf   : > { %v3105_v10 = vmax.f32 %v2087_v33, 0.0  ;;  %v2090_v37 = vpop.f32.mrb[12].mxu1  ;;  %6541 = vmatpush1.bf16.msra.mxu0 %v6540_v24  ;;  %v394_v24 = vld [vmem:[#allocation5 + $0xf0] sm:$0xff] }
 0x3d0   : > { %v2091_v2 = vadd.f32 %v2090_v37, %v8996_v20  ;;  %v2092_v52 = vpop.f32.mrb[13].mxu1  ;;  %2472 = vmatmul.mubr.f32.gmra.mrb[118].mxu1 %v7496_v26  ;;  %6542 = vmatprep.subr.bf16.mxu0 %v9870_v58  ;;  %v3708_v37 = vld [vmem:[#allocation8 + $0x5a0] sm:$0xff] }
 0x3d1   : > { %v2093_v50 = vadd.f32 %v2092_v52, %v9002_v49  ;;  %4780 = vmatprep.mubr.f32.mxu0 %v3105_v10  ;;  %2477 = vmatprep.mubr.f32.mxu1 %v7497_v6  ;;  %v427_v10 = vld [vmem:[#allocation5 + $0x1f8] sm:$0xff]  ;;  %v6225_v52 = vpack.c.bf16 %v394_v24, %v378_v25  ;;  %v426_v6 = vld [vmem:[#allocation5 + $0x1f0] sm:$0xff] }
 0x3d2   : > { %4781 = vmatmul.mubr.f32.gmra.mrb[10].mxu0 %v3104_v13  ;;  %v3120_v53 = vmax.f32 %v2091_v2, 0.0  ;;  %v7505_v2 = vld [vmem:[%s8048_s7 + $0x8] sm:$0xff]  ;;  %v6227_v47 = vpack.c.bf16 %v427_v10, %v411_v22  ;;  %v490_v25 = vld [vmem:[#allocation5 + $0x3f0] sm:$0xff]  ;;  %v507_v24 = vld [vmem:[#allocation5 + $0x478] sm:$0xff] }
 0x3d3   : > { %v3121_v1 = vmax.f32 %v2093_v50, 0.0  ;;  %v2096_v63 = vpop.f32.mrb[14].mxu1  ;;  %6544 = vmatpush1.bf16.msra.mxu0 %v6543_v57  ;;  %v3709_v57 = vld [vmem:[#allocation8 + $0x5a8] sm:$0xff]  ;;  %v410_v50 = vld [vmem:[#allocation5 + $0x170] sm:$0xff] }
 0x3d4   : > { %v2097_v3 = vadd.f32 %v2096_v63, %v8996_v20  ;;  %v2098_v62 = vpop.f32.mrb[15].mxu1  ;;  %2478 = vmatmul.mubr.f32.gmra.mrb[120].mxu1 %v7498_v16  ;;  %6545 = vmatprep.subr.bf16.mxu0 %v9870_v58  ;;  %v6558_v63 = vpack.c.bf16 %v3709_v57, %v3708_v37  ;;  %v459_v16 = vld [vmem:[#allocation5 + $0x2f8] sm:$0xff] }
 0x3d5   : > { %v2099_v9 = vadd.f32 %v2098_v62, %v9002_v49  ;;  %4785 = vmatprep.mubr.f32.mxu0 %v3121_v1  ;;  %2483 = vmatprep.mubr.f32.mxu1 %v7499_v32  ;;  %v443_v1 = vld [vmem:[#allocation5 + $0x278] sm:$0xff]  ;;  %v7506_v62 = vld [vmem:[%s8048_s7] sm:$0xff] }
 0x3d6   : > { %4786 = vmatmul.mubr.f32.gmra.mrb[12].mxu0 %v3120_v53  ;;  %v3136_v45 = vmax.f32 %v2097_v3, 0.0  ;;  %v7507_v32 = vld [vmem:[%s8048_s7 + $0x18] sm:$0xff] }
 0x3d7   : > { %v3137_v11 = vmax.f32 %v2099_v9, 0.0  ;;  %v2102_v29 = vpop.f32.mrb[16].mxu1  ;;  %6547 = vmatpush1.bf16.msra.mxu0 %v6546_v4  ;;  %v9081_v37 = vld [vmem:[%s8048_s7 + $0x38] sm:$0xff] }
 0x3d8   : > { %v2103_v48 = vadd.f32 %v2102_v29, %v8996_v20  ;;  %v2104_v43 = vpop.f32.mrb[17].mxu1  ;;  %2484 = vmatmul.mubr.f32.gmra.mrb[122].mxu1 %v7500_v54  ;;  %6548 = vmatprep.subr.bf16.mxu0 %v9870_v58  ;;  %v475_v54 = vld [vmem:[#allocation5 + $0x378] sm:$0xff] }
 0x3d9   : > { %v2105_v56 = vadd.f32 %v2104_v43, %v9002_v49  ;;  %4790 = vmatprep.mubr.f32.mxu0 %v3137_v11  ;;  %2489 = vmatprep.mubr.f32.mxu1 %v7501_v0  ;;  %v6229_v11 = vpack.c.bf16 %v426_v6, %v410_v50  ;;  %v458_v43 = vld [vmem:[#allocation5 + $0x2f0] sm:$0xff] }
 0x3da   : > { %4791 = vmatmul.mubr.f32.gmra.mrb[14].mxu0 %v3136_v45  ;;  %v3152_v12 = vmax.f32 %v2103_v48, 0.0  ;;  %v6231_v45 = vpack.c.bf16 %v459_v16, %v443_v1  ;;  %v442_v48 = vld [vmem:[#allocation5 + $0x270] sm:$0xff] }
 0x3db   : > { %v3153_v60 = vmax.f32 %v2105_v56, 0.0  ;;  %v2108_v61 = vpop.f32.mrb[18].mxu1  ;;  %6550 = vmatpush1.bf16.msra.mxu0 %v6549_v39 }
 0x3dc   : > { %v2109_v14 = vadd.f32 %v2108_v61, %v8996_v20  ;;  %v2110_v15 = vpop.f32.mrb[19].mxu1  ;;  %2490 = vmatmul.mubr.f32.gmra.mrb[124].mxu1 %v7502_v23  ;;  %6551 = vmatprep.subr.bf16.mxu0 %v9870_v58  ;;  %v491_v61 = vld [vmem:[#allocation5 + $0x3f8] sm:$0xff]  ;;  %v6233_v23 = vpack.c.bf16 %v458_v43, %v442_v48 }
 0x3dd   : > { %v2111_v35 = vadd.f32 %v2110_v15, %v9002_v49  ;;  %4795 = vmatprep.mubr.f32.mxu0 %v3153_v60  ;;  %2495 = vmatprep.mubr.f32.mxu1 %v7503_v59  ;;  %v9064_v60 = vld [vmem:[%s8048_s7 + $0x10] sm:$0xff]  ;;  %v9070_v15 = vld [vmem:[%s8048_s7 + $0x28] sm:$0xff] }
 0x3de   : > { %4796 = vmatmul.mubr.f32.gmra.mrb[16].mxu0 %v3152_v12  ;;  %v3168_v28 = vmax.f32 %v2109_v14, 0.0  ;;  %v3713_v12 = vld [vmem:[#allocation8 + $0x5c8] sm:$0xff]  ;;  %v474_v59 = vld [vmem:[#allocation5 + $0x370] sm:$0xff] }
 0x3df   : > { %v3169_v51 = vmax.f32 %v2111_v35, 0.0  ;;  %v2114_v38 = vpop.f32.mrb[20].mxu1  ;;  %6553 = vmatpush1.bf16.msra.mxu0 %v6552_v40  ;;  %v3712_v40 = vld [vmem:[#allocation8 + $0x5c0] sm:$0xff]  ;;  %v6235_v35 = vpack.c.bf16 %v491_v61, %v475_v54  ;;  %v6237_v57 = vpack.c.bf16 %v490_v25, %v474_v59  ;;  %v3719_v61 = vld [vmem:[#allocation8 + $0x5f8] sm:$0xff] }
 0x3e0   : > { %v2115_v8 = vadd.f32 %v2114_v38, %v8996_v20  ;;  %v2116_v33 = vpop.f32.mrb[21].mxu1  ;;  %2496 = vmatmul.mubr.f32.gmra.mrb[126].mxu1 %v7504_v36  ;;  %6554 = vmatprep.subr.bf16.mxu0 %v9870_v58  ;;  %v3715_v36 = vld [vmem:[#allocation8 + $0x5d8] sm:$0xff]  ;;  %v586_v59 = vld [vmem:[#allocation5 + $0x6f0] sm:$0xff] }
 0x3e1   : > { %v2117_v13 = vadd.f32 %v2116_v33, %v9002_v49  ;;  %4800 = vmatprep.mubr.f32.mxu0 %v3169_v51  ;;  %2566 = vmatprep.mubr.f32.mxu1 %v7505_v2  ;;  %v6564_v51 = vpack.c.bf16 %v3713_v12, %v3712_v40  ;;  %v3714_v33 = vld [vmem:[#allocation8 + $0x5d0] sm:$0xff]  ;;  %v9103_v12 = vld [vmem:[%s8048_s7 + $0x58] sm:$0xff] }
 0x3e2   : > { %4801 = vmatmul.mubr.f32.gmra.mrb[18].mxu0 %v3168_v28  ;;  %v3184_v4 = vmax.f32 %v2115_v8, 0.0  ;;  %v9075_v28 = vld [vmem:[%s8048_s7 + $0x20] sm:$0xff]  ;;  %v523_v8 = vld [vmem:[#allocation5 + $0x4f8] sm:$0xff]  ;;  %v6567_v50 = vpack.c.bf16 %v3715_v36, %v3714_v33  ;;  %v9114_v36 = vld [vmem:[%s8048_s7 + $0x68] sm:$0xff] }
 0x3e3   : > { %v3185_v26 = vmax.f32 %v2117_v13, 0.0  ;;  %v2120_v55 = vpop.f32.mrb[22].mxu1  ;;  %6556 = vmatpush1.bf16.msra.mxu0 %v6555_v44 }
 0x3e4   : > { %v2121_v53 = vadd.f32 %v2120_v55, %v8996_v20  ;;  %v2122_v3 = vpop.f32.mrb[23].mxu1  ;;  %2567 = vmatmul.mubr.f32.vlgmr.msra.gmra.mrb[128].mxu1 %v7506_v62  ;;  %6557 = vmatprep.subr.bf16.mxu0 %v9870_v58  ;;  %v522_v55 = vld [vmem:[#allocation5 + $0x4f0] sm:$0xff]  ;;  %v3717_v62 = vld [vmem:[#allocation8 + $0x5e8] sm:$0xff] }
 0x3e5   : > { %v2123_v9 = vadd.f32 %v2122_v3, %v9002_v49  ;;  %6226 = vmatpush1.bf16.msra.mxu1 %v6225_v52  ;;  %4805 = vmatprep.mubr.f32.mxu0 %v3185_v26  ;;  %v6239_v52 = vpack.c.bf16 %v523_v8, %v507_v24  ;;  %v506_v26 = vld [vmem:[#allocation5 + $0x470] sm:$0xff]  ;;  %v619_v8 = vld [vmem:[#allocation5 + $0x7f8] sm:$0xff] }
 0x3e6   : > { %4806 = vmatmul.mubr.f32.gmra.mrb[20].mxu0 %v3184_v4  ;;  %2572 = vmatprep.mubr.f32.mxu1 %v7507_v32  ;;  %v3200_v18 = vmax.f32 %v2121_v53, 0.0  ;;  %v9086_v4 = vld [vmem:[%s8048_s7 + $0x30] sm:$0xff]  ;;  %v555_v53 = vld [vmem:[#allocation5 + $0x5f8] sm:$0xff]  ;;  %v6241_v21 = vpack.c.bf16 %v522_v55, %v506_v26 }
 0x3e7   : > { %v3201_v29 = vmax.f32 %v2123_v9, 0.0  ;;  %v2126_v39 = vpop.f32.mrb[24].mxu1  ;;  %6228 = vmatprep.subr.bf16.mxu1 %v6227_v47  ;;  %6559 = vmatpush1.bf16.msra.mxu0 %v6558_v63  ;;  %v539_v47 = vld [vmem:[#allocation5 + $0x578] sm:$0xff]  ;;  %v3716_v3 = vld [vmem:[#allocation8 + $0x5e0] sm:$0xff] }
 0x3e8   : > { %v2127_v56 = vadd.f32 %v2126_v39, %v8996_v20  ;;  %v2128_v0 = vpop.f32.mrb[25].mxu1  ;;  %2573 = vmatmul.mubr.f32.gmra.mrb[130].mxu1 %v9064_v60  ;;  %6560 = vmatprep.subr.bf16.mxu0 %v9870_v58  ;;  %v554_v39 = vld [vmem:[#allocation5 + $0x5f0] sm:$0xff]  ;;  %v6570_v48 = vpack.c.bf16 %v3717_v62, %v3716_v3  ;;  %v9125_v3 = vld [vmem:[%s8048_s7 + $0x78] sm:$0xff] }
 0x3e9   : > { %v2129_v14 = vadd.f32 %v2128_v0, %v9002_v49  ;;  %4810 = vmatprep.mubr.f32.mxu0 %v3201_v29  ;;  %2578 = vmatprep.mubr.f32.mxu1 %v9070_v15  ;;  %v538_v29 = vld [vmem:[#allocation5 + $0x570] sm:$0xff]  ;;  %v3718_v0 = vld [vmem:[#allocation8 + $0x5f0] sm:$0xff] }
 0x3ea   : > { %4811 = vmatmul.mubr.f32.gmra.mrb[22].mxu0 %v3200_v18  ;;  %6230 = vmatpush1.bf16.msra.mxu1 %v6229_v11  ;;  %v3216_v38 = vmax.f32 %v2127_v56, 0.0  ;;  %v6243_v11 = vpack.c.bf16 %v555_v53, %v539_v47  ;;  %v9097_v18 = vld [vmem:[%s8048_s7 + $0x40] sm:$0xff]  ;;  %v587_v56 = vld [vmem:[#allocation5 + $0x6f8] sm:$0xff]  ;;  %v6573_v25 = vpack.c.bf16 %v3719_v61, %v3718_v0  ;;  %v618_v26 = vld [vmem:[#allocation5 + $0x7f0] sm:$0xff] }
 0x3eb   : > { %v3217_v31 = vmax.f32 %v2129_v14, 0.0  ;;  %v2132_v46 = vpop.f32.mrb[26].mxu1  ;;  %6232 = vmatprep.subr.bf16.mxu1 %v6231_v45  ;;  %6562 = vmatpush1.bf16.msra.mxu0 %v6561_v19  ;;  %v571_v45 = vld [vmem:[#allocation5 + $0x678] sm:$0xff]  ;;  %v6245_v14 = vpack.c.bf16 %v554_v39, %v538_v29 }
 0x3ec   : > { %v2133_v22 = vadd.f32 %v2132_v46, %v8996_v20  ;;  %v2134_v44 = vpop.f32.mrb[27].mxu1  ;;  %2579 = vmatmul.mubr.f32.gmra.mrb[132].mxu1 %v9075_v28  ;;  %6563 = vmatprep.subr.bf16.mxu0 %v9870_v58  ;;  %v6247_v46 = vpack.c.bf16 %v587_v56, %v571_v45  ;;  %v9135_v56 = vld [vmem:[%s8048_s7 + $0x88] sm:$0xff] }
 0x3ed   : > { %v2135_v10 = vadd.f32 %v2134_v44, %v9002_v49  ;;  %4815 = vmatprep.mubr.f32.mxu0 %v3217_v31  ;;  %2584 = vmatprep.mubr.f32.mxu1 %v9081_v37  ;;  %v603_v44 = vld [vmem:[#allocation5 + $0x778] sm:$0xff] }
 0x3ee   : > { %4816 = vmatmul.mubr.f32.gmra.mrb[24].mxu0 %v3216_v38  ;;  %6234 = vmatpush1.bf16.msra.mxu1 %v6233_v23  ;;  %v3232_v6 = vmax.f32 %v2133_v22, 0.0  ;;  %v9108_v22 = vld [vmem:[%s8048_s7 + $0x50] sm:$0xff] }
 0x3ef   : > { %v3233_v13 = vmax.f32 %v2135_v10, 0.0  ;;  %v2138_v2 = vpop.f32.mrb[28].mxu1  ;;  %6236 = vmatprep.subr.bf16.mxu1 %v6235_v35  ;;  %6565 = vmatpush1.bf16.msra.mxu0 %v6564_v51  ;;  %v570_v35 = vld [vmem:[#allocation5 + $0x670] sm:$0xff] }
 0x3f0   : > { %v2139_v1 = vadd.f32 %v2138_v2, %v8996_v20  ;;  %v2140_v63 = vpop.f32.mrb[29].mxu1  ;;  %2585 = vmatmul.mubr.f32.gmra.mrb[134].mxu1 %v9086_v4  ;;  %6566 = vmatprep.subr.bf16.mxu0 %v9870_v58  ;;  %v6249_v10 = vpack.c.bf16 %v586_v59, %v570_v35  ;;  %v6251_v2 = vpack.c.bf16 %v619_v8, %v603_v44  ;;  %v9145_v44 = vld [vmem:[%s8048_s7 + $0x98] sm:$0xff] }
 0x3f1   : > { %v2141_v16 = vadd.f32 %v2140_v63, %v9002_v49  ;;  %4820 = vmatprep.mubr.f32.mxu0 %v3233_v13  ;;  %2590 = vmatprep.mubr.f32.mxu1 %v9092_v30  ;;  %v651_v63 = vld [vmem:[#allocation5 + $0x8f8] sm:$0xff] }
 0x3f2   : > { %4821 = vmatmul.mubr.f32.gmra.mrb[26].mxu0 %v3232_v6  ;;  %6238 = vmatpush1.bf16.msra.mxu1 %v6237_v57  ;;  %v3248_v43 = vmax.f32 %v2139_v1, 0.0  ;;  %v9119_v6 = vld [vmem:[%s8048_s7 + $0x60] sm:$0xff]  ;;  %v635_v1 = vld [vmem:[#allocation5 + $0x878] sm:$0xff] }
 0x3f3   : > { %v3249_v9 = vmax.f32 %v2141_v16, 0.0  ;;  %v2144_v32 = vpop.f32.mrb[30].mxu1  ;;  %6240 = vmatprep.subr.bf16.mxu1 %v6239_v52  ;;  %6568 = vmatpush1.bf16.msra.mxu0 %v6567_v50  ;;  %v602_v52 = vld [vmem:[#allocation5 + $0x770] sm:$0xff] }
 0x3f4   : > { %v2145_v54 = vadd.f32 %v2144_v32, %v8996_v20  ;;  %v2146_v19 = vpop.f32.mrb[31].mxu1  ;;  %2591 = vmatmul.mubr.f32.gmra.mrb[136].mxu1 %v9097_v18  ;;  %6569 = vmatprep.subr.bf16.mxu0 %v9870_v58  ;;  %v6253_v62 = vpack.c.bf16 %v618_v26, %v602_v52  ;;  %v634_v32 = vld [vmem:[#allocation5 + $0x870] sm:$0xff] }
 0x3f5   : > { %v2147_v40 = vadd.f32 %v2146_v19, %v9002_v49  ;;  %4825 = vmatprep.mubr.f32.mxu0 %v3249_v9  ;;  %2596 = vmatprep.mubr.f32.mxu1 %v9103_v12  ;;  %v6255_v9 = vpack.c.bf16 %v651_v63, %v635_v1  ;;  %v747_v1 = vld [vmem:[#allocation5 + $0xbf8] sm:$0xff] }
 0x3f6   : > { %4826 = vmatmul.mubr.f32.gmra.mrb[28].mxu0 %v3248_v43  ;;  %6242 = vmatpush1.bf16.msra.mxu1 %v6241_v21  ;;  %v3264_v24 = vmax.f32 %v2145_v54, 0.0  ;;  %v667_v43 = vld [vmem:[#allocation5 + $0x978] sm:$0xff] }
 0x3f7   : > { %v3265_v23 = vmax.f32 %v2147_v40, 0.0  ;;  %v2150_v31 = vpop.f32.mrb[32].mxu1  ;;  %6244 = vmatprep.subr.bf16.mxu1 %v6243_v11  ;;  %6571 = vmatpush1.bf16.msra.mxu0 %v6570_v48  ;;  %v650_v11 = vld [vmem:[#allocation5 + $0x8f0] sm:$0xff]  ;;  %v683_v54 = vld [vmem:[#allocation5 + $0x9f8] sm:$0xff] }
 0x3f8   : > { %v2151_v51 = vadd.f32 %v2150_v31, %v8996_v20  ;;  %v2152_v38 = vpop.f32.mrb[33].mxu1  ;;  %2597 = vmatmul.mubr.f32.gmra.mrb[138].mxu1 %v9108_v22  ;;  %6572 = vmatprep.subr.bf16.mxu0 %v9870_v58  ;;  %v9130_v48 = vld [vmem:[%s8048_s7 + $0x70] sm:$0xff]  ;;  %v6257_v0 = vpack.c.bf16 %v650_v11, %v634_v32 }
 0x3f9   : > { %v2153_v33 = vadd.f32 %v2152_v38, %v9002_v49  ;;  %4830 = vmatprep.mubr.f32.mxu0 %v3265_v23  ;;  %2602 = vmatprep.mubr.f32.mxu1 %v9114_v36  ;;  %v666_v23 = vld [vmem:[#allocation5 + $0x970] sm:$0xff] }
 0x3fa   : > { %4831 = vmatmul.mubr.f32.gmra.mrb[30].mxu0 %v3264_v24  ;;  %6246 = vmatpush1.bf16.msra.mxu1 %v6245_v14  ;;  %v3280_v55 = vmax.f32 %v2151_v51, 0.0  ;;  %v6259_v14 = vpack.c.bf16 %v683_v54, %v667_v43  ;;  %v682_v31 = vld [vmem:[#allocation5 + $0x9f0] sm:$0xff]  ;;  %v699_v24 = vld [vmem:[#allocation5 + $0xa78] sm:$0xff]  ;;  %v9160_v43 = vld [vmem:[%s8048_s7 + $0xa0] sm:$0xff] }
 0x3fb   : > { %v3281_v57 = vmax.f32 %v2153_v33, 0.0  ;;  %v2156_v13 = vpop.f32.mrb[34].mxu1  ;;  %6248 = vmatprep.subr.bf16.mxu1 %v6247_v46  ;;  %6574 = vmatpush1.bf16.msra.mxu0 %v6573_v25  ;;  %v9140_v25 = vld [vmem:[%s8048_s7 + $0x80] sm:$0xff]  ;;  %v715_v51 = vld [vmem:[#allocation5 + $0xaf8] sm:$0xff]  ;;  %v6261_v8 = vpack.c.bf16 %v682_v31, %v666_v23  ;;  %v730_v32 = vld [vmem:[#allocation5 + $0xb70] sm:$0xff] }
 0x3fc   : > { %v2157_v47 = vadd.f32 %v2156_v13, %v8996_v20  ;;  %v2158_v50 = vpop.f32.mrb[35].mxu1  ;;  %2603 = vmatmul.mubr.f32.gmra.mrb[140].mxu1 %v9119_v6  ;;  %6575 = vmatprep.subr.bf16.mxu0 %v9870_v58  ;;  %v698_v13 = vld [vmem:[#allocation5 + $0xa70] sm:$0xff]  ;;  %v763_v54 = vld [vmem:[#allocation5 + $0xc78] sm:$0xff] }
 0x3fd   : > { %v2159_v53 = vadd.f32 %v2158_v50, %v9002_v49  ;;  %4835 = vmatprep.mubr.f32.mxu0 %v3281_v57  ;;  %2608 = vmatprep.mubr.f32.mxu1 %v9125_v3  ;;  %v6263_v57 = vpack.c.bf16 %v715_v51, %v699_v24  ;;  %v731_v50 = vld [vmem:[#allocation5 + $0xb78] sm:$0xff]  ;;  %v746_v11 = vld [vmem:[#allocation5 + $0xbf0] sm:$0xff] }
 0x3fe   : > { %4836 = vmatmul.mubr.f32.gmra.mrb[32].mxu0 %v3280_v55  ;;  %6250 = vmatpush1.bf16.msra.mxu1 %v6249_v10  ;;  %v3296_v29 = vmax.f32 %v2157_v47, 0.0  ;;  %v9150_v47 = vld [vmem:[%s8048_s7 + $0x90] sm:$0xff] }
 0x3ff   : > { %v3297_v16 = vmax.f32 %v2159_v53, 0.0  ;;  %v2162_v21 = vpop.f32.mrb[36].mxu1  ;;  %6252 = vmatprep.subr.bf16.mxu1 %v6251_v2  ;;  %v714_v2 = vld [vmem:[#allocation5 + $0xaf0] sm:$0xff]  ;;  %v9155_v53 = vld [vmem:[%s8048_s7 + $0xa8] sm:$0xff] }
 0x400   : > { %v2163_v39 = vadd.f32 %v2162_v21, %v8996_v20  ;;  %v2164_v45 = vpop.f32.mrb[37].mxu1  ;;  %2609 = vmatmul.mubr.f32.gmra.mrb[142].mxu1 %v9130_v48 }
 0x401   : > { %v2165_v19 = vadd.f32 %v2164_v45, %v9002_v49  ;;  %4840 = vmatprep.mubr.f32.mxu0 %v3297_v16  ;;  %2614 = vmatprep.mubr.f32.mxu1 %v9135_v56 }
 0x402   : > { %4841 = vmatmul.mubr.f32.gmra.mrb[34].mxu0 %v3296_v29  ;;  %6254 = vmatpush1.bf16.msra.mxu1 %v6253_v62  ;;  %v3312_v46 = vmax.f32 %v2163_v39, 0.0  ;;  %v6265_v62 = vpack.c.bf16 %v714_v2, %v698_v13 }
 0x403   : > { %v3313_v61 = vmax.f32 %v2165_v19, 0.0  ;;  %v2168_v40 = vpop.f32.mrb[38].mxu1  ;;  %6256 = vmatprep.subr.bf16.mxu1 %v6255_v9  ;;  %v6267_v9 = vpack.c.bf16 %v747_v1, %v731_v50  ;;  %v779_v19 = vld [vmem:[#allocation5 + $0xcf8] sm:$0xff]  ;;  %v810_v50 = vld [vmem:[#allocation5 + $0xdf0] sm:$0xff] }
 0x404   : > { %v2169_v35 = vadd.f32 %v2168_v40, %v8996_v20  ;;  %v2170_v59 = vpop.f32.mrb[39].mxu1  ;;  %2615 = vmatmul.mubr.f32.gmra.mrb[144].mxu1 %v9140_v25  ;;  %v6269_v40 = vpack.c.bf16 %v746_v11, %v730_v32  ;;  %v6271_v31 = vpack.c.bf16 %v779_v19, %v763_v54  ;;  %v9185_v11 = vld [vmem:[%s8048_s7 + $0xd8] sm:$0xff]  ;;  %v826_v19 = vld [vmem:[#allocation5 + $0xe70] sm:$0xff] }
 0x405   : > { %v2171_v38 = vadd.f32 %v2170_v59, %v9002_v49  ;;  %4845 = vmatprep.mubr.f32.mxu0 %v3313_v61  ;;  %2620 = vmatprep.mubr.f32.mxu1 %v9145_v44  ;;  %v9165_v61 = vld [vmem:[%s8048_s7 + $0xb8] sm:$0xff] }
 0x406   : > { %4846 = vmatmul.mubr.f32.gmra.mrb[36].mxu0 %v3312_v46  ;;  %6258 = vmatpush1.bf16.msra.mxu1 %v6257_v0  ;;  %v3328_v52 = vmax.f32 %v2169_v35, 0.0  ;;  %v762_v46 = vld [vmem:[#allocation5 + $0xc70] sm:$0xff] }
 0x407   : > { %v3329_v33 = vmax.f32 %v2171_v38, 0.0  ;;  %v2174_v10 = vpop.f32.mrb[40].mxu1  ;;  %6260 = vmatprep.subr.bf16.mxu1 %v6259_v14  ;;  %v778_v35 = vld [vmem:[#allocation5 + $0xcf0] sm:$0xff] }
 0x408   : > { %v2175_v26 = vadd.f32 %v2174_v10, %v8996_v20  ;;  %v2176_v55 = vpop.f32.mrb[41].mxu1  ;;  %2621 = vmatmul.mubr.f32.gmra.mrb[146].mxu1 %v9150_v47  ;;  %v9170_v38 = vld [vmem:[%s8048_s7 + $0xb0] sm:$0xff]  ;;  %v6273_v13 = vpack.c.bf16 %v778_v35, %v762_v46  ;;  %v859_v46 = vld [vmem:[#allocation5 + $0xf78] sm:$0xff] }
 0x409   : > { %v2177_v63 = vadd.f32 %v2176_v55, %v9002_v49  ;;  %4850 = vmatprep.mubr.f32.mxu0 %v3329_v33  ;;  %2626 = vmatprep.mubr.f32.mxu1 %v9155_v53  ;;  %v811_v33 = vld [vmem:[#allocation5 + $0xdf8] sm:$0xff]  ;;  %v794_v55 = vld [vmem:[#allocation5 + $0xd70] sm:$0xff] }
 0x40a   : > { %4851 = vmatmul.mubr.f32.gmra.mrb[38].mxu0 %v3328_v52  ;;  %6262 = vmatpush1.bf16.msra.mxu1 %v6261_v8  ;;  %v3344_v29 = vmax.f32 %v2175_v26, 0.0  ;;  %v795_v8 = vld [vmem:[#allocation5 + $0xd78] sm:$0xff] }
 0x40b   : > { %v3345_v16 = vmax.f32 %v2177_v63, 0.0  ;;  %v2180_v21 = vpop.f32.mrb[42].mxu1  ;;  %6264 = vmatprep.subr.bf16.mxu1 %v6263_v57  ;;  %v9175_v57 = vld [vmem:[%s8048_s7 + $0xc8] sm:$0xff]  ;;  %v6275_v26 = vpack.c.bf16 %v811_v33, %v795_v8  ;;  %v875_v35 = vld [vmem:[#allocation5 + $0xff8] sm:$0xff] }
 0x40c   : > { %v2181_v39 = vadd.f32 %v2180_v21, %v8996_v20  ;;  %v2182_v45 = vpop.f32.mrb[43].mxu1  ;;  %2627 = vmatmul.mubr.f32.gmra.mrb[148].mxu1 %v9160_v43  ;;  %v827_v21 = vld [vmem:[#allocation5 + $0xe78] sm:$0xff] }
 0x40d   : > { %v2183_v0 = vadd.f32 %v2182_v45, %v9002_v49  ;;  %4855 = vmatprep.mubr.f32.mxu0 %v3345_v16  ;;  %2632 = vmatprep.mubr.f32.mxu1 %v9165_v61  ;;  %v9180_v16 = vld [vmem:[%s8048_s7 + $0xc0] sm:$0xff] }
 0x40e   : > { %4856 = vmatmul.mubr.f32.gmra.mrb[40].mxu0 %v3344_v29  ;;  %6266 = vmatpush1.bf16.msra.mxu1 %v6265_v62  ;;  %v3360_v59 = vmax.f32 %v2181_v39, 0.0  ;;  %v6277_v29 = vpack.c.bf16 %v810_v50, %v794_v55  ;;  %v9200_v50 = vld [vmem:[%s8048_s7 + $0xe0] sm:$0xff] }
 0x40f   : > { %v3361_v14 = vmax.f32 %v2183_v0, 0.0  ;;  %v2186_v23 = vpop.f32.mrb[44].mxu1  ;;  %6268 = vmatprep.subr.bf16.mxu1 %v6267_v9  ;;  %v843_v9 = vld [vmem:[#allocation5 + $0xef8] sm:$0xff]  ;;  %v842_v0 = vld [vmem:[#allocation5 + $0xef0] sm:$0xff] }
 0x410   : > { %v2187_v24 = vadd.f32 %v2186_v23, %v8996_v20  ;;  %v2188_v51 = vpop.f32.mrb[45].mxu1  ;;  %2633 = vmatmul.mubr.f32.gmra.mrb[150].mxu1 %v9170_v38  ;;  %v6279_v54 = vpack.c.bf16 %v843_v9, %v827_v21 }
 0x411   : > { %v2189_v10 = vadd.f32 %v2188_v51, %v9002_v49  ;;  %4860 = vmatprep.mubr.f32.mxu0 %v3361_v14  ;;  %2638 = vmatprep.mubr.f32.mxu1 %v9175_v57  ;;  %v6281_v51 = vpack.c.bf16 %v842_v0, %v826_v19  ;;  %v9215_v19 = vld [vmem:[%s8048_s7 + $0x108] sm:$0xff] }
 0x412   : > { %4861 = vmatmul.mubr.f32.gmra.mrb[42].mxu0 %v3360_v59  ;;  %6270 = vmatpush1.bf16.msra.mxu1 %v6269_v40  ;;  %v3376_v1 = vmax.f32 %v2187_v24, 0.0  ;;  %v9195_v24 = vld [vmem:[%s8048_s7 + $0xe8] sm:$0xff] }
 0x413   : > { %v3377_v2 = vmax.f32 %v2189_v10, 0.0  ;;  %v2192_v52 = vpop.f32.mrb[46].mxu1  ;;  %6272 = vmatprep.subr.bf16.mxu1 %v6271_v31  ;;  %v9190_v31 = vld [vmem:[%s8048_s7 + $0xd0] sm:$0xff]  ;;  %v6283_v10 = vpack.c.bf16 %v875_v35, %v859_v46  ;;  %v9220_v35 = vld [vmem:[%s8048_s7 + $0x100] sm:$0xff] }
 0x414   : > { %v2193_v63 = vadd.f32 %v2192_v52, %v8996_v20  ;;  %v2194_v62 = vpop.f32.mrb[47].mxu1  ;;  %2639 = vmatmul.mubr.f32.gmra.mrb[152].mxu1 %v9180_v16 }
 0x415   : > { %v2195_v32 = vadd.f32 %v2194_v62, %v9002_v49  ;;  %4865 = vmatprep.mubr.f32.mxu0 %v3377_v2  ;;  %2644 = vmatprep.mubr.f32.mxu1 %v9185_v11  ;;  %v874_v2 = vld [vmem:[#allocation5 + $0xff0] sm:$0xff] }
 0x416   : > { %4866 = vmatmul.mubr.f32.gmra.mrb[44].mxu0 %v3376_v1  ;;  %6274 = vmatpush1.bf16.msra.mxu1 %v6273_v13  ;;  %v3392_v40 = vmax.f32 %v2193_v63, 0.0  ;;  %v858_v13 = vld [vmem:[#allocation5 + $0xf70] sm:$0xff]  ;;  %v9205_v63 = vld [vmem:[%s8048_s7 + $0xf8] sm:$0xff] }
 0x417   : > { %v3393_v39 = vmax.f32 %v2195_v32, 0.0  ;;  %v2198_v45 = vpop.f32.mrb[48].mxu1  ;;  %6276 = vmatprep.subr.bf16.mxu1 %v6275_v26  ;;  %v6285_v62 = vpack.c.bf16 %v874_v2, %v858_v13 }
 0x418   : > { %v2199_v14 = vadd.f32 %v2198_v45, %v8996_v20  ;;  %v2200_v23 = vpop.f32.mrb[49].mxu1  ;;  %2645 = vmatmul.mubr.f32.gmra.mrb[154].mxu1 %v9190_v31  ;;  %v9210_v45 = vld [vmem:[%s8048_s7 + $0xf0] sm:$0xff] }
 0x419   : > { %v2201_v59 = vadd.f32 %v2200_v23, %v9002_v49  ;;  %4870 = vmatprep.mubr.f32.mxu0 %v3393_v39  ;;  %2650 = vmatprep.mubr.f32.mxu1 %v9195_v24 }
 0x41a   : > { %4871 = vmatmul.mubr.f32.gmra.mrb[46].mxu0 %v3392_v40  ;;  %6278 = vmatpush1.bf16.msra.mxu1 %v6277_v29  ;;  %v3408_v52 = vmax.f32 %v2199_v14, 0.0 }
 0x41b   : > { %v3409_v8 = vmax.f32 %v2201_v59, 0.0  ;;  %v2204_v33 = vpop.f32.mrb[50].mxu1  ;;  %6280 = vmatprep.subr.bf16.mxu1 %v6279_v54 }
 0x41c   : > { %v2205_v26 = vadd.f32 %v2204_v33, %v8996_v20  ;;  %v2206_v55 = vpop.f32.mrb[51].mxu1  ;;  %2651 = vmatmul.mubr.f32.gmra.mrb[156].mxu1 %v9200_v50 }
 0x41d   : > { %v2207_v1 = vadd.f32 %v2206_v55, %v9002_v49  ;;  %4875 = vmatprep.mubr.f32.mxu0 %v3409_v8  ;;  %2656 = vmatprep.mubr.f32.mxu1 %v9205_v63  ;;  %v9235_v55 = vld [vmem:[%s8048_s7 + $0x128] sm:$0xff] }
 0x41e   : > { %4876 = vmatmul.mubr.f32.gmra.mrb[48].mxu0 %v3408_v52  ;;  %6282 = vmatpush1.bf16.msra.mxu1 %v6281_v51  ;;  %v3424_v32 = vmax.f32 %v2205_v26, 0.0  ;;  %v9225_v51 = vld [vmem:[%s8048_s7 + $0x118] sm:$0xff]  ;;  %v9230_v52 = vld [vmem:[%s8048_s7 + $0x110] sm:$0xff] }
 0x41f   : > { %v3425_v21 = vmax.f32 %v2207_v1, 0.0  ;;  %v2210_v9 = vpop.f32.mrb[52].mxu1  ;;  %6284 = vmatprep.subr.bf16.mxu1 %v6283_v10 }
 0x420   : > { %v2211_v29 = vadd.f32 %v2210_v9, %v8996_v20  ;;  %v2212_v39 = vpop.f32.mrb[53].mxu1  ;;  %2657 = vmatmul.mubr.f32.gmra.mrb[158].mxu1 %v9210_v45 }
 0x421   : > { %v2213_v54 = vadd.f32 %v2212_v39, %v9002_v49  ;;  %4880 = vmatprep.mubr.f32.mxu0 %v3425_v21  ;;  %2662 = vmatprep.mubr.f32.mxu1 %v9215_v19 }
 0x422   : > { %4881 = vmatmul.mubr.f32.gmra.mrb[50].mxu0 %v3424_v32  ;;  %6286 = vmatpush1.bf16.msra.mxu1 %v6285_v62  ;;  %v3440_v14 = vmax.f32 %v2211_v29, 0.0  ;;  %v9240_v29 = vld [vmem:[%s8048_s7 + $0x120] sm:$0xff] }
 0x423   : > { %v3441_v0 = vmax.f32 %v2213_v54, 0.0  ;;  %v2216_v40 = vpop.f32.mrb[54].mxu1  ;;  %v9245_v54 = vld [vmem:[%s8048_s7 + $0x138] sm:$0xff] }
 0x424   : > { %v2217_v23 = vadd.f32 %v2216_v40, %v8996_v20  ;;  %v2218_v46 = vpop.f32.mrb[55].mxu1  ;;  %2663 = vmatmul.mubr.f32.gmra.mrb[160].mxu1 %v9220_v35 }
 0x425   : > { %v2219_v59 = vadd.f32 %v2218_v46, %v9002_v49  ;;  %4885 = vmatprep.mubr.f32.mxu0 %v3441_v0  ;;  %2668 = vmatprep.mubr.f32.mxu1 %v9225_v51 }
 0x426   : > { %4886 = vmatmul.mubr.f32.gmra.mrb[52].mxu0 %v3440_v14  ;;  %v3456_v10 = vmax.f32 %v2217_v23, 0.0 }
 0x427   : > { %v3457_v8 = vmax.f32 %v2219_v59, 0.0  ;;  %v2222_v33 = vpop.f32.mrb[56].mxu1  ;;  %v9250_v59 = vld [vmem:[%s8048_s7 + $0x130] sm:$0xff] }
 0x428   : > { %v2223_v13 = vadd.f32 %v2222_v33, %v8996_v20  ;;  %v2224_v2 = vpop.f32.mrb[57].mxu1  ;;  %2669 = vmatmul.mubr.f32.gmra.mrb[162].mxu1 %v9230_v52  ;;  %v9255_v33 = vld [vmem:[%s8048_s7 + $0x148] sm:$0xff] }
 0x429   : > { %v2225_v26 = vadd.f32 %v2224_v2, %v9002_v49  ;;  %4890 = vmatprep.mubr.f32.mxu0 %v3457_v8  ;;  %2674 = vmatprep.mubr.f32.mxu1 %v9235_v55 }
 0x42a   : > { %4891 = vmatmul.mubr.f32.gmra.mrb[54].mxu0 %v3456_v10  ;;  %v3472_v21 = vmax.f32 %v2223_v13, 0.0 }
 0x42b   : > { %v3473_v1 = vmax.f32 %v2225_v26, 0.0  ;;  %v2228_v62 = vpop.f32.mrb[58].mxu1 }
 0x42c   : > { %v2229_v9 = vadd.f32 %v2228_v62, %v8996_v20  ;;  %v2230_v32 = vpop.f32.mrb[59].mxu1  ;;  %2675 = vmatmul.mubr.f32.gmra.mrb[164].mxu1 %v9240_v29  ;;  %v9260_v62 = vld [vmem:[%s8048_s7 + $0x140] sm:$0xff] }
 0x42d   : > { %v2231_v39 = vadd.f32 %v2230_v32, %v9002_v49  ;;  %4895 = vmatprep.mubr.f32.mxu0 %v3473_v1  ;;  %2680 = vmatprep.mubr.f32.mxu1 %v9245_v54 }
 0x42e   : > { %4896 = vmatmul.mubr.f32.gmra.mrb[56].mxu0 %v3472_v21  ;;  %v3488_v14 = vmax.f32 %v2229_v9, 0.0  ;;  %v9263_v21 = vld [vmem:[#allocation7 + $0x8] sm:$0xff] }
 0x42f   : > { %v3489_v0 = vmax.f32 %v2231_v39, 0.0  ;;  %v2234_v40 = vpop.f32.mrb[60].mxu1  ;;  %v9268_v9 = vrot.slane %v9263_v21, %v890_v5  ;;  %v9272_v39 = vld [vmem:[%s8048_s7 + $0x158] sm:$0xff] }
 0x430   : > { %v2235_v23 = vadd.f32 %v2234_v40, %v8996_v20  ;;  %v2236_v46 = vpop.f32.mrb[61].mxu1  ;;  %2681 = vmatmul.mubr.f32.gmra.mrb[166].mxu1 %v9250_v59 }
 0x431   : > { %v2237_v8 = vadd.f32 %v2236_v46, %v9002_v49  ;;  %4900 = vmatprep.mubr.f32.mxu0 %v3489_v0  ;;  %2686 = vmatprep.mubr.f32.mxu1 %v9255_v33  ;;  %v3720_v46 = vld [vmem:[#allocation8 + $0x600] sm:$0xff] }
 0x432   : > { %4901 = vmatmul.mubr.f32.gmra.mrb[58].mxu0 %v3488_v14  ;;  %v3504_v2 = vmax.f32 %v2235_v23, 0.0 }
 0x433   : > { %v3505_v10 = vmax.f32 %v2237_v8, 0.0  ;;  %v2240_v13 = vpop.f32.mrb[62].mxu1  ;;  %v3721_v8 = vld [vmem:[#allocation8 + $0x608] sm:$0xff] }
 0x434   : > { %v2241_v26 = vadd.f32 %v2240_v13, %v8996_v20  ;;  %v2242_v1 = vpop.f32.mrb[63].mxu1  ;;  %2687 = vmatmul.mubr.f32.gmra.mrb[168].mxu1 %v9260_v62  ;;  %v9278_v20 = vrot.slane %v9263_v21, %v894_v41  ;;  %v9287_v41 = vld [vmem:[%s8048_s7 + $0x168] sm:$0xff] }
 0x435   : > { %v2243_v32 = vadd.f32 %v2242_v1, %v9002_v49  ;;  %4905 = vmatprep.mubr.f32.mxu0 %v3505_v10  ;;  %2692 = vmatprep.mubr.f32.mxu1 %v9272_v39  ;;  %v9282_v49 = vld [vmem:[%s8048_s7 + $0x150] sm:$0xff]  ;;  %9887 = vst [vmem:[#allocation16_spill] sm:$0xff] %v9287_v41 }
 0x436   : > { %4906 = vmatmul.mubr.f32.gmra.mrb[60].mxu0 %v3504_v2  ;;  %v3520_v14 = vmax.f32 %v2241_v26, 0.0  ;;  %v6576_v26 = vpack.c.bf16 %v3721_v8, %v3720_v46 }
 0x437   : > { %v3521_v0 = vmax.f32 %v2243_v32, 0.0  ;;  %v2311_v40 = vpop.f32.mrb[64].mxu1 }
 0x438   : > { %v2312_v5 = vadd.f32 %v2311_v40, %v9268_v9  ;;  %v2313_v23 = vpop.f32.mrb[65].mxu1  ;;  %2693 = vmatmul.mubr.f32.gmra.mrb[170].mxu1 %v9282_v49 }
 0x439   : > { %v2314_v10 = vadd.f32 %v2313_v23, %v9278_v20  ;;  %4910 = vmatprep.mubr.f32.mxu0 %v3521_v0  ;;  %2698 = vmatprep.mubr.f32.mxu1 %v9287_v41  ;;  %v3722_v23 = vld [vmem:[#allocation8 + $0x610] sm:$0xff]  ;;  %v3723_v0 = vld [vmem:[#allocation8 + $0x618] sm:$0xff] }
 0x43a   : > { %4911 = vmatmul.mubr.f32.gmra.mrb[62].mxu0 %v3520_v14  ;;  %v3026_v1 = vmax.f32 %v2312_v5, 0.0  ;;  %v6579_v46 = vpack.c.bf16 %v3723_v0, %v3722_v23  ;;  %v3743_v41 = vld [vmem:[#allocation8 + $0x6b8] sm:$0xff] }
 0x43b   : > { %v3027_v13 = vmax.f32 %v2314_v10, 0.0  ;;  %v2317_v2 = vpop.f32.mrb[66].mxu1 }
 0x43c   : > { %v2318_v32 = vadd.f32 %v2317_v2, %v9268_v9  ;;  %v2319_v40 = vpop.f32.mrb[67].mxu1  ;;  %2699 = vmatmul.mubr.f32.gmra.mrb[172].mxu1 %v9292_v42  ;;  %v3742_v42 = vld [vmem:[#allocation8 + $0x6b0] sm:$0xff] }
 0x43d   : > { %v2320_v27 = vadd.f32 %v2319_v40, %v9278_v20  ;;  %4980 = vmatprep.mubr.f32.mxu0 %v3027_v13  ;;  %2704 = vmatprep.mubr.f32.mxu1 %v9297_v17  ;;  %v3724_v13 = vld [vmem:[#allocation8 + $0x620] sm:$0xff]  ;;  %v3725_v40 = vld [vmem:[#allocation8 + $0x628] sm:$0xff] }
 0x43e   : > { %4981 = vmatmul.mubr.f32.vlgmr.msra.gmra.mrb[0].mxu0 %v3026_v1  ;;  %v3042_v8 = vmax.f32 %v2318_v32, 0.0  ;;  %v6582_v32 = vpack.c.bf16 %v3725_v40, %v3724_v13 }
 0x43f   : > { %v3043_v14 = vmax.f32 %v2320_v27, 0.0  ;;  %v2323_v5 = vpop.f32.mrb[68].mxu1  ;;  %6577 = vmatpush1.bf16.msra.mxu0 %v6576_v26  ;;  %v9308_v27 = vld [vmem:[%s8048_s7 + $0x188] sm:$0xff] }
 0x440   : > { %v2324_v10 = vadd.f32 %v2323_v5, %v9268_v9  ;;  %v2325_v2 = vpop.f32.mrb[69].mxu1  ;;  %2705 = vmatmul.mubr.f32.gmra.mrb[174].mxu1 %v9302_v34  ;;  %6578 = vmatprep.subr.bf16.mxu0 %v9870_v58  ;;  %9891 = vst [vmem:[#allocation20_spill] sm:$0xff] %v9308_v27  ;;  %v9313_v34 = vld [vmem:[%s8048_s7 + $0x180] sm:$0xff] }
 0x441   : > { %v2326_v17 = vadd.f32 %v2325_v2, %v9278_v20  ;;  %4985 = vmatprep.mubr.f32.mxu0 %v3043_v14  ;;  %2710 = vmatprep.mubr.f32.mxu1 %v9308_v27  ;;  %9892 = vst [vmem:[#allocation21_spill] sm:$0xff] %v9313_v34  ;;  %v3726_v14 = vld [vmem:[#allocation8 + $0x630] sm:$0xff]  ;;  %v3727_v2 = vld [vmem:[#allocation8 + $0x638] sm:$0xff] }
 0x442   : > { %4986 = vmatmul.mubr.f32.gmra.mrb[2].mxu0 %v3042_v8  ;;  %v3058_v23 = vmax.f32 %v2324_v10, 0.0  ;;  %v6585_v10 = vpack.c.bf16 %v3727_v2, %v3726_v14 }
 0x443   : > { %v3059_v26 = vmax.f32 %v2326_v17, 0.0  ;;  %v2329_v1 = vpop.f32.mrb[70].mxu1  ;;  %6580 = vmatpush1.bf16.msra.mxu0 %v6579_v46  ;;  %v9319_v17 = vld [vmem:[%s8048_s7 + $0x198] sm:$0xff] }
 0x444   : > { %v2330_v0 = vadd.f32 %v2329_v1, %v9268_v9  ;;  %v2331_v5 = vpop.f32.mrb[71].mxu1  ;;  %2711 = vmatmul.mubr.f32.gmra.mrb[176].mxu1 %v9313_v34  ;;  %6581 = vmatprep.subr.bf16.mxu0 %v9870_v58  ;;  %9893 = vst [vmem:[#allocation22_spill] sm:$0xff] %v9319_v17  ;;  %v9324_v34 = vld [vmem:[%s8048_s7 + $0x190] sm:$0xff] }
 0x445   : > { %v2332_v27 = vadd.f32 %v2331_v5, %v9278_v20  ;;  %4990 = vmatprep.mubr.f32.mxu0 %v3059_v26  ;;  %2716 = vmatprep.mubr.f32.mxu1 %v9319_v17  ;;  %9894 = vst [vmem:[#allocation23_spill] sm:$0xff] %v9324_v34  ;;  %v3728_v26 = vld [vmem:[#allocation8 + $0x640] sm:$0xff]  ;;  %v3729_v5 = vld [vmem:[#allocation8 + $0x648] sm:$0xff] }
 0x446   : > { %4991 = vmatmul.mubr.f32.gmra.mrb[4].mxu0 %v3058_v23  ;;  %v3074_v13 = vmax.f32 %v2330_v0, 0.0  ;;  %v6588_v0 = vpack.c.bf16 %v3729_v5, %v3728_v26 }
 0x447   : > { %v3075_v46 = vmax.f32 %v2332_v27, 0.0  ;;  %v2335_v8 = vpop.f32.mrb[72].mxu1  ;;  %6583 = vmatpush1.bf16.msra.mxu0 %v6582_v32  ;;  %v9330_v27 = vld [vmem:[%s8048_s7 + $0x1a8] sm:$0xff] }
 0x448   : > { %v2336_v40 = vadd.f32 %v2335_v8, %v9268_v9  ;;  %v2337_v1 = vpop.f32.mrb[73].mxu1  ;;  %2717 = vmatmul.mubr.f32.gmra.mrb[178].mxu1 %v9324_v34  ;;  %6584 = vmatprep.subr.bf16.mxu0 %v9870_v58  ;;  %9895 = vst [vmem:[#allocation24_spill] sm:$0xff] %v9330_v27  ;;  %v9335_v34 = vld [vmem:[%s8048_s7 + $0x1a0] sm:$0xff] }
 0x449   : > { %v2338_v17 = vadd.f32 %v2337_v1, %v9278_v20  ;;  %4995 = vmatprep.mubr.f32.mxu0 %v3075_v46  ;;  %2722 = vmatprep.mubr.f32.mxu1 %v9330_v27  ;;  %9896 = vst [vmem:[#allocation25_spill] sm:$0xff] %v9335_v34  ;;  %v3730_v46 = vld [vmem:[#allocation8 + $0x650] sm:$0xff]  ;;  %v3731_v1 = vld [vmem:[#allocation8 + $0x658] sm:$0xff] }
 0x44a   : > { %4996 = vmatmul.mubr.f32.gmra.mrb[6].mxu0 %v3074_v13  ;;  %v3090_v14 = vmax.f32 %v2336_v40, 0.0  ;;  %v6591_v40 = vpack.c.bf16 %v3731_v1, %v3730_v46 }
 0x44b   : > { %v3091_v32 = vmax.f32 %v2338_v17, 0.0  ;;  %v2341_v23 = vpop.f32.mrb[74].mxu1  ;;  %6586 = vmatpush1.bf16.msra.mxu0 %v6585_v10  ;;  %v9341_v17 = vld [vmem:[%s8048_s7 + $0x1b8] sm:$0xff] }
 0x44c   : > { %v2342_v2 = vadd.f32 %v2341_v23, %v9268_v9  ;;  %v2343_v8 = vpop.f32.mrb[75].mxu1  ;;  %2723 = vmatmul.mubr.f32.gmra.mrb[180].mxu1 %v9335_v34  ;;  %6587 = vmatprep.subr.bf16.mxu0 %v9870_v58  ;;  %9897 = vst [vmem:[#allocation26_spill] sm:$0xff] %v9341_v17  ;;  %v9346_v34 = vld [vmem:[%s8048_s7 + $0x1b0] sm:$0xff] }
 0x44d   : > { %v2344_v27 = vadd.f32 %v2343_v8, %v9278_v20  ;;  %5000 = vmatprep.mubr.f32.mxu0 %v3091_v32  ;;  %2728 = vmatprep.mubr.f32.mxu1 %v9341_v17  ;;  %9898 = vst [vmem:[#allocation27_spill] sm:$0xff] %v9346_v34  ;;  %v3732_v32 = vld [vmem:[#allocation8 + $0x660] sm:$0xff]  ;;  %v3733_v8 = vld [vmem:[#allocation8 + $0x668] sm:$0xff] }
 0x44e   : > { %5001 = vmatmul.mubr.f32.gmra.mrb[8].mxu0 %v3090_v14  ;;  %v3106_v26 = vmax.f32 %v2342_v2, 0.0  ;;  %v6594_v2 = vpack.c.bf16 %v3733_v8, %v3732_v32 }
 0x44f   : > { %v3107_v10 = vmax.f32 %v2344_v27, 0.0  ;;  %v2347_v13 = vpop.f32.mrb[76].mxu1  ;;  %6589 = vmatpush1.bf16.msra.mxu0 %v6588_v0  ;;  %v9352_v27 = vld [vmem:[%s8048_s7 + $0x1c8] sm:$0xff] }
 0x450   : > { %v2348_v5 = vadd.f32 %v2347_v13, %v9268_v9  ;;  %v2349_v23 = vpop.f32.mrb[77].mxu1  ;;  %2729 = vmatmul.mubr.f32.gmra.mrb[182].mxu1 %v9346_v34  ;;  %6590 = vmatprep.subr.bf16.mxu0 %v9870_v58  ;;  %9899 = vst [vmem:[#allocation28_spill] sm:$0xff] %v9352_v27  ;;  %v9357_v34 = vld [vmem:[%s8048_s7 + $0x1c0] sm:$0xff] }
 0x451   : > { %v2350_v17 = vadd.f32 %v2349_v23, %v9278_v20  ;;  %5005 = vmatprep.mubr.f32.mxu0 %v3107_v10  ;;  %2734 = vmatprep.mubr.f32.mxu1 %v9352_v27  ;;  %9900 = vst [vmem:[#allocation29_spill] sm:$0xff] %v9357_v34  ;;  %v3734_v10 = vld [vmem:[#allocation8 + $0x670] sm:$0xff]  ;;  %v3735_v23 = vld [vmem:[#allocation8 + $0x678] sm:$0xff] }
 0x452   : > { %5006 = vmatmul.mubr.f32.gmra.mrb[10].mxu0 %v3106_v26  ;;  %v3122_v46 = vmax.f32 %v2348_v5, 0.0  ;;  %v6597_v5 = vpack.c.bf16 %v3735_v23, %v3734_v10 }
 0x453   : > { %v3123_v0 = vmax.f32 %v2350_v17, 0.0  ;;  %v2353_v14 = vpop.f32.mrb[78].mxu1  ;;  %6592 = vmatpush1.bf16.msra.mxu0 %v6591_v40  ;;  %v9363_v17 = vld [vmem:[%s8048_s7 + $0x1d8] sm:$0xff] }
 0x454   : > { %v2354_v1 = vadd.f32 %v2353_v14, %v9268_v9  ;;  %v2355_v13 = vpop.f32.mrb[79].mxu1  ;;  %2735 = vmatmul.mubr.f32.gmra.mrb[184].mxu1 %v9357_v34  ;;  %6593 = vmatprep.subr.bf16.mxu0 %v9870_v58  ;;  %9901 = vst [vmem:[#allocation30_spill] sm:$0xff] %v9363_v17  ;;  %v9368_v34 = vld [vmem:[%s8048_s7 + $0x1d0] sm:$0xff] }
 0x455   : > { %v2356_v27 = vadd.f32 %v2355_v13, %v9278_v20  ;;  %5010 = vmatprep.mubr.f32.mxu0 %v3123_v0  ;;  %2740 = vmatprep.mubr.f32.mxu1 %v9363_v17  ;;  %9902 = vst [vmem:[#allocation31_spill] sm:$0xff] %v9368_v34  ;;  %v3736_v0 = vld [vmem:[#allocation8 + $0x680] sm:$0xff]  ;;  %v3737_v13 = vld [vmem:[#allocation8 + $0x688] sm:$0xff] }
 0x456   : > { %5011 = vmatmul.mubr.f32.gmra.mrb[12].mxu0 %v3122_v46  ;;  %v3138_v32 = vmax.f32 %v2354_v1, 0.0  ;;  %v6600_v1 = vpack.c.bf16 %v3737_v13, %v3736_v0 }
 0x457   : > { %v3139_v40 = vmax.f32 %v2356_v27, 0.0  ;;  %v2359_v26 = vpop.f32.mrb[80].mxu1  ;;  %6595 = vmatpush1.bf16.msra.mxu0 %v6594_v2  ;;  %v9374_v27 = vld [vmem:[%s8048_s7 + $0x1e8] sm:$0xff] }
 0x458   : > { %v2360_v8 = vadd.f32 %v2359_v26, %v9268_v9  ;;  %v2361_v14 = vpop.f32.mrb[81].mxu1  ;;  %2741 = vmatmul.mubr.f32.gmra.mrb[186].mxu1 %v9368_v34  ;;  %6596 = vmatprep.subr.bf16.mxu0 %v9870_v58  ;;  %9903 = vst [vmem:[#allocation32_spill] sm:$0xff] %v9374_v27  ;;  %v9379_v34 = vld [vmem:[%s8048_s7 + $0x1e0] sm:$0xff] }
 0x459   : > { %v2362_v17 = vadd.f32 %v2361_v14, %v9278_v20  ;;  %5015 = vmatprep.mubr.f32.mxu0 %v3139_v40  ;;  %2746 = vmatprep.mubr.f32.mxu1 %v9374_v27  ;;  %9904 = vst [vmem:[#allocation33_spill] sm:$0xff] %v9379_v34  ;;  %v3738_v40 = vld [vmem:[#allocation8 + $0x690] sm:$0xff]  ;;  %v3739_v14 = vld [vmem:[#allocation8 + $0x698] sm:$0xff] }
 0x45a   : > { %5016 = vmatmul.mubr.f32.gmra.mrb[14].mxu0 %v3138_v32  ;;  %v3154_v10 = vmax.f32 %v2360_v8, 0.0  ;;  %v6603_v8 = vpack.c.bf16 %v3739_v14, %v3738_v40 }
 0x45b   : > { %v3155_v2 = vmax.f32 %v2362_v17, 0.0  ;;  %v2365_v46 = vpop.f32.mrb[82].mxu1  ;;  %6598 = vmatpush1.bf16.msra.mxu0 %v6597_v5  ;;  %v9385_v17 = vld [vmem:[%s8048_s7 + $0x1f8] sm:$0xff] }
 0x45c   : > { %v2366_v23 = vadd.f32 %v2365_v46, %v9268_v9  ;;  %v2367_v26 = vpop.f32.mrb[83].mxu1  ;;  %2747 = vmatmul.mubr.f32.gmra.mrb[188].mxu1 %v9379_v34  ;;  %6599 = vmatprep.subr.bf16.mxu0 %v9870_v58  ;;  %9905 = vst [vmem:[#allocation34_spill] sm:$0xff] %v9385_v17  ;;  %v9390_v34 = vld [vmem:[%s8048_s7 + $0x1f0] sm:$0xff] }
 0x45d   : > { %v2368_v27 = vadd.f32 %v2367_v26, %v9278_v20  ;;  %5020 = vmatprep.mubr.f32.mxu0 %v3155_v2  ;;  %2752 = vmatprep.mubr.f32.mxu1 %v9385_v17  ;;  %9906 = vst [vmem:[#allocation35_spill] sm:$0xff] %v9390_v34  ;;  %v3740_v2 = vld [vmem:[#allocation8 + $0x6a0] sm:$0xff]  ;;  %v3741_v26 = vld [vmem:[#allocation8 + $0x6a8] sm:$0xff] }
 0x45e   : > { %5021 = vmatmul.mubr.f32.gmra.mrb[16].mxu0 %v3154_v10  ;;  %v3170_v0 = vmax.f32 %v2366_v23, 0.0  ;;  %v6606_v23 = vpack.c.bf16 %v3741_v26, %v3740_v2 }
 0x45f   : > { %v3171_v5 = vmax.f32 %v2368_v27, 0.0  ;;  %v2371_v32 = vpop.f32.mrb[84].mxu1  ;;  %6601 = vmatpush1.bf16.msra.mxu0 %v6600_v1  ;;  %v7570_v27 = vld [vmem:[%s8048_s7 + $0x8] sm:$0xff] }
 0x460   : > { %v2372_v13 = vadd.f32 %v2371_v32, %v9268_v9  ;;  %v2373_v46 = vpop.f32.mrb[85].mxu1  ;;  %2753 = vmatmul.mubr.f32.gmra.mrb[190].mxu1 %v9390_v34  ;;  %6602 = vmatprep.subr.bf16.mxu0 %v9870_v58  ;;  %v7571_v34 = vld [vmem:[%s8048_s7] sm:$0xff] }
 0x461   : > { %v2374_v17 = vadd.f32 %v2373_v46, %v9278_v20  ;;  %5025 = vmatprep.mubr.f32.mxu0 %v3171_v5  ;;  %2823 = vmatprep.mubr.f32.mxu1 %v7570_v27  ;;  %v7572_v46 = vld [vmem:[%s8048_s7 + $0x18] sm:$0xff] }
 0x462   : > { %5026 = vmatmul.mubr.f32.gmra.mrb[18].mxu0 %v3170_v0  ;;  %v3186_v40 = vmax.f32 %v2372_v13, 0.0  ;;  %v3745_v27 = vld [vmem:[#allocation8 + $0x6c8] sm:$0xff] }
 0x463   : > { %v3187_v1 = vmax.f32 %v2374_v17, 0.0  ;;  %v2377_v10 = vpop.f32.mrb[86].mxu1  ;;  %6604 = vmatpush1.bf16.msra.mxu0 %v6603_v8  ;;  %v6609_v8 = vpack.c.bf16 %v3743_v41, %v3742_v42 }
 0x464   : > { %v2378_v14 = vadd.f32 %v2377_v10, %v9268_v9  ;;  %v2379_v32 = vpop.f32.mrb[87].mxu1  ;;  %2824 = vmatmul.mubr.f32.vlgmr.msra.gmra.mrb[192].mxu1 %v7571_v34  ;;  %6605 = vmatprep.subr.bf16.mxu0 %v9870_v58  ;;  %v3744_v34 = vld [vmem:[#allocation8 + $0x6c0] sm:$0xff] }
 0x465   : > { %v2380_v5 = vadd.f32 %v2379_v32, %v9278_v20  ;;  %5030 = vmatprep.mubr.f32.mxu0 %v3187_v1  ;;  %2829 = vmatprep.mubr.f32.mxu1 %v7572_v46  ;;  %v6612_v42 = vpack.c.bf16 %v3745_v27, %v3744_v34  ;;  %v3747_v32 = vld [vmem:[#allocation8 + $0x6d8] sm:$0xff] }
 0x466   : > { %5031 = vmatmul.mubr.f32.gmra.mrb[20].mxu0 %v3186_v40  ;;  %v3202_v13 = vmax.f32 %v2378_v14, 0.0 }
 0x467   : > { %v3203_v17 = vmax.f32 %v2380_v5, 0.0  ;;  %v2383_v0 = vpop.f32.mrb[88].mxu1  ;;  %6607 = vmatpush1.bf16.msra.mxu0 %v6606_v23 }
 0x468   : > { %v2384_v2 = vadd.f32 %v2383_v0, %v9268_v9  ;;  %v2385_v26 = vpop.f32.mrb[89].mxu1  ;;  %2830 = vmatmul.mubr.f32.gmra.mrb[194].mxu1 %v9064_v60  ;;  %6608 = vmatprep.subr.bf16.mxu0 %v9870_v58  ;;  %v3746_v60 = vld [vmem:[#allocation8 + $0x6d0] sm:$0xff] }
 0x469   : > { %v2386_v10 = vadd.f32 %v2385_v26, %v9278_v20  ;;  %5035 = vmatprep.mubr.f32.mxu0 %v3203_v17  ;;  %2835 = vmatprep.mubr.f32.mxu1 %v9070_v15  ;;  %v6615_v17 = vpack.c.bf16 %v3747_v32, %v3746_v60 }
 0x46a   : > { %5036 = vmatmul.mubr.f32.gmra.mrb[22].mxu0 %v3202_v13  ;;  %v3218_v41 = vmax.f32 %v2384_v2, 0.0  ;;  %v3749_v2 = vld [vmem:[#allocation8 + $0x6e8] sm:$0xff] }
 0x46b   : > { %v3219_v1 = vmax.f32 %v2386_v10, 0.0  ;;  %v2389_v40 = vpop.f32.mrb[90].mxu1  ;;  %6610 = vmatpush1.bf16.msra.mxu0 %v6609_v8 }
 0x46c   : > { %v2390_v23 = vadd.f32 %v2389_v40, %v9268_v9  ;;  %v2391_v14 = vpop.f32.mrb[91].mxu1  ;;  %2836 = vmatmul.mubr.f32.gmra.mrb[196].mxu1 %v9075_v28  ;;  %6611 = vmatprep.subr.bf16.mxu0 %v9870_v58  ;;  %v3748_v28 = vld [vmem:[#allocation8 + $0x6e0] sm:$0xff] }
 0x46d   : > { %v2392_v5 = vadd.f32 %v2391_v14, %v9278_v20  ;;  %5040 = vmatprep.mubr.f32.mxu0 %v3219_v1  ;;  %2841 = vmatprep.mubr.f32.mxu1 %v9081_v37  ;;  %v6618_v27 = vpack.c.bf16 %v3749_v2, %v3748_v28 }
 0x46e   : > { %5041 = vmatmul.mubr.f32.gmra.mrb[24].mxu0 %v3218_v41  ;;  %v3234_v0 = vmax.f32 %v2390_v23, 0.0 }
 0x46f   : > { %v3235_v15 = vmax.f32 %v2392_v5, 0.0  ;;  %v2395_v46 = vpop.f32.mrb[92].mxu1  ;;  %6613 = vmatpush1.bf16.msra.mxu0 %v6612_v42  ;;  %v3751_v42 = vld [vmem:[#allocation8 + $0x6f8] sm:$0xff] }
 0x470   : > { %v2396_v8 = vadd.f32 %v2395_v46, %v9268_v9  ;;  %v2397_v13 = vpop.f32.mrb[93].mxu1  ;;  %2842 = vmatmul.mubr.f32.gmra.mrb[198].mxu1 %v9086_v4  ;;  %6614 = vmatprep.subr.bf16.mxu0 %v9870_v58  ;;  %v3750_v4 = vld [vmem:[#allocation8 + $0x6f0] sm:$0xff] }
 0x471   : > { %v2398_v26 = vadd.f32 %v2397_v13, %v9278_v20  ;;  %5045 = vmatprep.mubr.f32.mxu0 %v3235_v15  ;;  %2847 = vmatprep.mubr.f32.mxu1 %v9092_v30  ;;  %v6621_v14 = vpack.c.bf16 %v3751_v42, %v3750_v4 }
 0x472   : > { %5046 = vmatmul.mubr.f32.gmra.mrb[26].mxu0 %v3234_v0  ;;  %v3250_v10 = vmax.f32 %v2396_v8, 0.0 }
 0x473   : > { %v3251_v37 = vmax.f32 %v2398_v26, 0.0  ;;  %v2401_v34 = vpop.f32.mrb[94].mxu1  ;;  %6616 = vmatpush1.bf16.msra.mxu0 %v6615_v17 }
 0x474   : > { %v2402_v1 = vadd.f32 %v2401_v34, %v9268_v9  ;;  %v2403_v40 = vpop.f32.mrb[95].mxu1  ;;  %2848 = vmatmul.mubr.f32.gmra.mrb[200].mxu1 %v9097_v18  ;;  %6617 = vmatprep.subr.bf16.mxu0 %v9870_v58 }
 0x475   : > { %v2404_v41 = vadd.f32 %v2403_v40, %v9278_v20  ;;  %5050 = vmatprep.mubr.f32.mxu0 %v3251_v37  ;;  %2853 = vmatprep.mubr.f32.mxu1 %v9103_v12 }
 0x476   : > { %5051 = vmatmul.mubr.f32.gmra.mrb[28].mxu0 %v3250_v10  ;;  %v3266_v60 = vmax.f32 %v2402_v1, 0.0 }
 0x477   : > { %v3267_v30 = vmax.f32 %v2404_v41, 0.0  ;;  %v2407_v23 = vpop.f32.mrb[96].mxu1  ;;  %6619 = vmatpush1.bf16.msra.mxu0 %v6618_v27 }
 0x478   : > { %v2408_v32 = vadd.f32 %v2407_v23, %v9268_v9  ;;  %v2409_v5 = vpop.f32.mrb[97].mxu1  ;;  %2854 = vmatmul.mubr.f32.gmra.mrb[202].mxu1 %v9108_v22  ;;  %6620 = vmatprep.subr.bf16.mxu0 %v9870_v58 }
 0x479   : > { %v2410_v18 = vadd.f32 %v2409_v5, %v9278_v20  ;;  %5055 = vmatprep.mubr.f32.mxu0 %v3267_v30  ;;  %2859 = vmatprep.mubr.f32.mxu1 %v9114_v36 }
 0x47a   : > { %5056 = vmatmul.mubr.f32.gmra.mrb[30].mxu0 %v3266_v60  ;;  %v3282_v46 = vmax.f32 %v2408_v32, 0.0 }
 0x47b   : > { %v3283_v12 = vmax.f32 %v2410_v18, 0.0  ;;  %v2413_v15 = vpop.f32.mrb[98].mxu1  ;;  %6622 = vmatpush1.bf16.msra.mxu0 %v6621_v14 }
 0x47c   : > { %v2414_v17 = vadd.f32 %v2413_v15, %v9268_v9  ;;  %v2415_v0 = vpop.f32.mrb[99].mxu1  ;;  %2860 = vmatmul.mubr.f32.gmra.mrb[204].mxu1 %v9119_v6  ;;  %6623 = vmatprep.subr.bf16.mxu0 %v9870_v58 }
 0x47d   : > { %v2416_v22 = vadd.f32 %v2415_v0, %v9278_v20  ;;  %5060 = vmatprep.mubr.f32.mxu0 %v3283_v12  ;;  %2865 = vmatprep.mubr.f32.mxu1 %v9125_v3 }
 0x47e   : > { %5061 = vmatmul.mubr.f32.gmra.mrb[32].mxu0 %v3282_v46  ;;  %v3298_v13 = vmax.f32 %v2414_v17, 0.0 }
 0x47f   : > { %v3299_v8 = vmax.f32 %v2416_v22, 0.0  ;;  %v2419_v36 = vpop.f32.mrb[100].mxu1 }
 0x480   : > { %v2420_v28 = vadd.f32 %v2419_v36, %v9268_v9  ;;  %v2421_v2 = vpop.f32.mrb[101].mxu1  ;;  %2866 = vmatmul.mubr.f32.gmra.mrb[206].mxu1 %v9130_v48 }
 0x481   : > { %v2422_v26 = vadd.f32 %v2421_v2, %v9278_v20  ;;  %5065 = vmatprep.mubr.f32.mxu0 %v3299_v8  ;;  %2871 = vmatprep.mubr.f32.mxu1 %v9135_v56 }
 0x482   : > { %5066 = vmatmul.mubr.f32.gmra.mrb[34].mxu0 %v3298_v13  ;;  %v3314_v34 = vmax.f32 %v2420_v28, 0.0 }
 0x483   : > { %v3315_v6 = vmax.f32 %v2422_v26, 0.0  ;;  %v2425_v37 = vpop.f32.mrb[102].mxu1 }
 0x484   : > { %v2426_v3 = vadd.f32 %v2425_v37, %v9268_v9  ;;  %v2427_v27 = vpop.f32.mrb[103].mxu1  ;;  %2872 = vmatmul.mubr.f32.gmra.mrb[208].mxu1 %v9140_v25 }
 0x485   : > { %v2428_v10 = vadd.f32 %v2427_v27, %v9278_v20  ;;  %5070 = vmatprep.mubr.f32.mxu0 %v3315_v6  ;;  %2877 = vmatprep.mubr.f32.mxu1 %v9145_v44 }
 0x486   : > { %5071 = vmatmul.mubr.f32.gmra.mrb[36].mxu0 %v3314_v34  ;;  %v3330_v40 = vmax.f32 %v2426_v3, 0.0 }
 0x487   : > { %v3331_v48 = vmax.f32 %v2428_v10, 0.0  ;;  %v2431_v1 = vpop.f32.mrb[104].mxu1 }
 0x488   : > { %v2432_v56 = vadd.f32 %v2431_v1, %v9268_v9  ;;  %v2433_v4 = vpop.f32.mrb[105].mxu1  ;;  %2878 = vmatmul.mubr.f32.gmra.mrb[210].mxu1 %v9150_v47 }
 0x489   : > { %v2434_v42 = vadd.f32 %v2433_v4, %v9278_v20  ;;  %5075 = vmatprep.mubr.f32.mxu0 %v3331_v48  ;;  %2883 = vmatprep.mubr.f32.mxu1 %v9155_v53 }
 0x48a   : > { %5076 = vmatmul.mubr.f32.gmra.mrb[38].mxu0 %v3330_v40  ;;  %v3346_v30 = vmax.f32 %v2432_v56, 0.0 }
 0x48b   : > { %v3347_v25 = vmax.f32 %v2434_v42, 0.0  ;;  %v2437_v41 = vpop.f32.mrb[106].mxu1 }
 0x48c   : > { %v2438_v44 = vadd.f32 %v2437_v41, %v9268_v9  ;;  %v2439_v23 = vpop.f32.mrb[107].mxu1  ;;  %2884 = vmatmul.mubr.f32.gmra.mrb[212].mxu1 %v9160_v43 }
 0x48d   : > { %v2440_v14 = vadd.f32 %v2439_v23, %v9278_v20  ;;  %5080 = vmatprep.mubr.f32.mxu0 %v3347_v25  ;;  %2889 = vmatprep.mubr.f32.mxu1 %v9165_v61 }
 0x48e   : > { %5081 = vmatmul.mubr.f32.gmra.mrb[40].mxu0 %v3346_v30  ;;  %v3362_v32 = vmax.f32 %v2438_v44, 0.0 }
 0x48f   : > { %v3363_v47 = vmax.f32 %v2440_v14, 0.0  ;;  %v2443_v60 = vpop.f32.mrb[108].mxu1 }
 0x490   : > { %v2444_v53 = vadd.f32 %v2443_v60, %v9268_v9  ;;  %v2445_v5 = vpop.f32.mrb[109].mxu1  ;;  %2890 = vmatmul.mubr.f32.gmra.mrb[214].mxu1 %v9170_v38 }
 0x491   : > { %v2446_v18 = vadd.f32 %v2445_v5, %v9278_v20  ;;  %5085 = vmatprep.mubr.f32.mxu0 %v3363_v47  ;;  %2895 = vmatprep.mubr.f32.mxu1 %v9175_v57 }
 0x492   : > { %5086 = vmatmul.mubr.f32.gmra.mrb[42].mxu0 %v3362_v32  ;;  %v3378_v15 = vmax.f32 %v2444_v53, 0.0 }
 0x493   : > { %v3379_v43 = vmax.f32 %v2446_v18, 0.0  ;;  %v2449_v12 = vpop.f32.mrb[110].mxu1  ;;  %v9907_v18 = vsub.s32 4, %v8373_v7 }
 0x494   : > { %v2450_v61 = vadd.f32 %v2449_v12, %v9268_v9  ;;  %v2451_v46 = vpop.f32.mrb[111].mxu1  ;;  %2896 = vmatmul.mubr.f32.gmra.mrb[216].mxu1 %v9180_v16 }
 0x495   : > { %v2452_v17 = vadd.f32 %v2451_v46, %v9278_v20  ;;  %5090 = vmatprep.mubr.f32.mxu0 %v3379_v43  ;;  %2901 = vmatprep.mubr.f32.mxu1 %v9185_v11  ;;  %v9488_v43 = vrot.slane %v9263_v21, %v9907_v18 }
 0x496   : > { %5091 = vmatmul.mubr.f32.gmra.mrb[44].mxu0 %v3378_v15  ;;  %v3394_v22 = vmax.f32 %v2450_v61, 0.0 }
 0x497   : > { %v3395_v38 = vmax.f32 %v2452_v17, 0.0  ;;  %v2455_v0 = vpop.f32.mrb[112].mxu1  ;;  %v3752_v17 = vld [vmem:[#allocation8 + $0x700] sm:$0xff] }
 0x498   : > { %v2456_v57 = vadd.f32 %v2455_v0, %v9268_v9  ;;  %v2457_v8 = vpop.f32.mrb[113].mxu1  ;;  %2902 = vmatmul.mubr.f32.gmra.mrb[218].mxu1 %v9190_v31 }
 0x499   : > { %v2458_v36 = vadd.f32 %v2457_v8, %v9278_v20  ;;  %5095 = vmatprep.mubr.f32.mxu0 %v3395_v38  ;;  %2907 = vmatprep.mubr.f32.mxu1 %v9195_v24  ;;  %v3753_v38 = vld [vmem:[#allocation8 + $0x708] sm:$0xff] }
 0x49a   : > { %5096 = vmatmul.mubr.f32.gmra.mrb[46].mxu0 %v3394_v22  ;;  %v3410_v28 = vmax.f32 %v2456_v57, 0.0  ;;  %v6624_v22 = vpack.c.bf16 %v3753_v38, %v3752_v17 }
 0x49b   : > { %v3411_v16 = vmax.f32 %v2458_v36, 0.0  ;;  %v2461_v13 = vpop.f32.mrb[114].mxu1 }
 0x49c   : > { %v2462_v11 = vadd.f32 %v2461_v13, %v9268_v9  ;;  %v2463_v2 = vpop.f32.mrb[115].mxu1  ;;  %2908 = vmatmul.mubr.f32.gmra.mrb[220].mxu1 %v9200_v50  ;;  %v3754_v13 = vld [vmem:[#allocation8 + $0x710] sm:$0xff] }
 0x49d   : > { %v2464_v26 = vadd.f32 %v2463_v2, %v9278_v20  ;;  %5100 = vmatprep.mubr.f32.mxu0 %v3411_v16  ;;  %2913 = vmatprep.mubr.f32.mxu1 %v9205_v63  ;;  %v9910_v16 = vld [vmem:[#allocation17_spill] sm:$0xff] }
 0x49e   : > { %5101 = vmatmul.mubr.f32.gmra.mrb[48].mxu0 %v3410_v28  ;;  %v3426_v37 = vmax.f32 %v2462_v11, 0.0  ;;  %v3755_v28 = vld [vmem:[#allocation8 + $0x718] sm:$0xff] }
 0x49f   : > { %v3427_v31 = vmax.f32 %v2464_v26, 0.0  ;;  %v2467_v6 = vpop.f32.mrb[116].mxu1  ;;  %v9911_v11 = vld [vmem:[#allocation18_spill] sm:$0xff] }
 0x4a0   : > { %v2468_v24 = vadd.f32 %v2467_v6, %v9268_v9  ;;  %v2469_v34 = vpop.f32.mrb[117].mxu1  ;;  %2914 = vmatmul.mubr.f32.gmra.mrb[222].mxu1 %v9210_v45 }
 0x4a1   : > { %v2470_v3 = vadd.f32 %v2469_v34, %v9278_v20  ;;  %5105 = vmatprep.mubr.f32.mxu0 %v3427_v31  ;;  %2919 = vmatprep.mubr.f32.mxu1 %v9215_v19  ;;  %v6627_v31 = vpack.c.bf16 %v3755_v28, %v3754_v13  ;;  %v9912_v34 = vld [vmem:[#allocation19_spill] sm:$0xff] }
 0x4a2   : > { %5106 = vmatmul.mubr.f32.gmra.mrb[50].mxu0 %v3426_v37  ;;  %v3442_v10 = vmax.f32 %v2468_v24, 0.0 }
 0x4a3   : > { %v3443_v50 = vmax.f32 %v2470_v3, 0.0  ;;  %v2473_v27 = vpop.f32.mrb[118].mxu1  ;;  %v3756_v3 = vld [vmem:[#allocation8 + $0x720] sm:$0xff] }
 0x4a4   : > { %v2474_v63 = vadd.f32 %v2473_v27, %v9268_v9  ;;  %v2475_v48 = vpop.f32.mrb[119].mxu1  ;;  %2920 = vmatmul.mubr.f32.gmra.mrb[224].mxu1 %v9220_v35 }
 0x4a5   : > { %v2476_v1 = vadd.f32 %v2475_v48, %v9278_v20  ;;  %5110 = vmatprep.mubr.f32.mxu0 %v3443_v50  ;;  %2925 = vmatprep.mubr.f32.mxu1 %v9225_v51  ;;  %v3757_v50 = vld [vmem:[#allocation8 + $0x728] sm:$0xff] }
 0x4a6   : > { %5111 = vmatmul.mubr.f32.gmra.mrb[52].mxu0 %v3442_v10  ;;  %v3458_v56 = vmax.f32 %v2474_v63, 0.0  ;;  %v9913_v10 = vld [vmem:[#allocation20_spill] sm:$0xff] }
 0x4a7   : > { %v3459_v45 = vmax.f32 %v2476_v1, 0.0  ;;  %v2479_v40 = vpop.f32.mrb[120].mxu1  ;;  %v6630_v1 = vpack.c.bf16 %v3757_v50, %v3756_v3 }
 0x4a8   : > { %v2480_v19 = vadd.f32 %v2479_v40, %v9268_v9  ;;  %v2481_v4 = vpop.f32.mrb[121].mxu1  ;;  %2926 = vmatmul.mubr.f32.gmra.mrb[226].mxu1 %v9230_v52 }
 0x4a9   : > { %v2482_v42 = vadd.f32 %v2481_v4, %v9278_v20  ;;  %5115 = vmatprep.mubr.f32.mxu0 %v3459_v45  ;;  %2931 = vmatprep.mubr.f32.mxu1 %v9235_v55  ;;  %v3758_v4 = vld [vmem:[#allocation8 + $0x730] sm:$0xff] }
 0x4aa   : > { %5116 = vmatmul.mubr.f32.gmra.mrb[54].mxu0 %v3458_v56  ;;  %v3474_v41 = vmax.f32 %v2480_v19, 0.0  ;;  %v9914_v19 = vld [vmem:[#allocation21_spill] sm:$0xff] }
 0x4ab   : > { %v3475_v35 = vmax.f32 %v2482_v42, 0.0  ;;  %v2485_v25 = vpop.f32.mrb[122].mxu1  ;;  %v3759_v42 = vld [vmem:[#allocation8 + $0x738] sm:$0xff] }
 0x4ac   : > { %v2486_v51 = vadd.f32 %v2485_v25, %v9268_v9  ;;  %v2487_v30 = vpop.f32.mrb[123].mxu1  ;;  %2932 = vmatmul.mubr.f32.gmra.mrb[228].mxu1 %v9240_v29  ;;  %v9915_v25 = vld [vmem:[#allocation22_spill] sm:$0xff] }
 0x4ad   : > { %v2488_v44 = vadd.f32 %v2487_v30, %v9278_v20  ;;  %5120 = vmatprep.mubr.f32.mxu0 %v3475_v35  ;;  %2937 = vmatprep.mubr.f32.mxu1 %v9245_v54  ;;  %v6633_v30 = vpack.c.bf16 %v3759_v42, %v3758_v4 }
 0x4ae   : > { %5121 = vmatmul.mubr.f32.gmra.mrb[56].mxu0 %v3474_v41  ;;  %v3490_v14 = vmax.f32 %v2486_v51, 0.0 }
 0x4af   : > { %v3491_v52 = vmax.f32 %v2488_v44, 0.0  ;;  %v2491_v23 = vpop.f32.mrb[124].mxu1 }
 0x4b0   : > { %v2492_v55 = vadd.f32 %v2491_v23, %v9268_v9  ;;  %v2493_v47 = vpop.f32.mrb[125].mxu1  ;;  %2938 = vmatmul.mubr.f32.gmra.mrb[230].mxu1 %v9250_v59 }
 0x4b1   : > { %v2494_v60 = vadd.f32 %v2493_v47, %v9278_v20  ;;  %5125 = vmatprep.mubr.f32.mxu0 %v3491_v52  ;;  %2943 = vmatprep.mubr.f32.mxu1 %v9255_v33  ;;  %v9908_v33 = vsub.s32 5, %v8373_v7  ;;  %v3761_v47 = vld [vmem:[#allocation8 + $0x748] sm:$0xff] }
 0x4b2   : > { %5126 = vmatmul.mubr.f32.gmra.mrb[58].mxu0 %v3490_v14  ;;  %v3506_v53 = vmax.f32 %v2492_v55, 0.0  ;;  %v9916_v14 = vld [vmem:[#allocation23_spill] sm:$0xff] }
 0x4b3   : > { %v3507_v29 = vmax.f32 %v2494_v60, 0.0  ;;  %v2497_v32 = vpop.f32.mrb[126].mxu1  ;;  %v9495_v12 = vrot.slane %v9263_v21, %v9908_v33  ;;  %v3760_v55 = vld [vmem:[#allocation8 + $0x740] sm:$0xff]  ;;  %v9918_v33 = vld [vmem:[#allocation25_spill] sm:$0xff] }
 0x4b4   : > { %v2498_v54 = vadd.f32 %v2497_v32, %v9268_v9  ;;  %v2499_v5 = vpop.f32.mrb[127].mxu1  ;;  %2944 = vmatmul.mubr.f32.gmra.mrb[232].mxu1 %v9260_v62 }
 0x4b5   : > { %v2500_v59 = vadd.f32 %v2499_v5, %v9278_v20  ;;  %5130 = vmatprep.mubr.f32.mxu0 %v3507_v29  ;;  %2949 = vmatprep.mubr.f32.mxu1 %v9272_v39  ;;  %v9909_v39 = vld [vmem:[#allocation16_spill] sm:$0xff] }
 0x4b6   : > { %5131 = vmatmul.mubr.f32.gmra.mrb[60].mxu0 %v3506_v53  ;;  %v3522_v61 = vmax.f32 %v2498_v54, 0.0  ;;  %v9917_v29 = vld [vmem:[#allocation24_spill] sm:$0xff]  ;;  %v6636_v54 = vpack.c.bf16 %v3761_v47, %v3760_v55 }
 0x4b7   : > { %v3523_v9 = vmax.f32 %v2500_v59, 0.0  ;;  %v2568_v15 = vpop.f32.mrb[128].mxu1 }
 0x4b8   : > { %v2569_v62 = vadd.f32 %v2568_v15, %v9488_v43  ;;  %v2570_v46 = vpop.f32.mrb[129].mxu1  ;;  %2950 = vmatmul.mubr.f32.gmra.mrb[234].mxu1 %v9282_v49  ;;  %v3763_v15 = vld [vmem:[#allocation8 + $0x758] sm:$0xff] }
 0x4b9   : > { %v2571_v20 = vadd.f32 %v2570_v46, %v9495_v12  ;;  %5135 = vmatprep.mubr.f32.mxu0 %v3523_v9  ;;  %2955 = vmatprep.mubr.f32.mxu1 %v9909_v39  ;;  %v3762_v9 = vld [vmem:[#allocation8 + $0x750] sm:$0xff] }
 0x4ba   : > { %5136 = vmatmul.mubr.f32.gmra.mrb[62].mxu0 %v3522_v61  ;;  %v3028_v57 = vmax.f32 %v2569_v62, 0.0  ;;  %v9919_v62 = vld [vmem:[#allocation26_spill] sm:$0xff]  ;;  %v6639_v38 = vpack.c.bf16 %v3763_v15, %v3762_v9 }
 0x4bb   : > { %v3029_v0 = vmax.f32 %v2571_v20, 0.0  ;;  %v2574_v21 = vpop.f32.mrb[130].mxu1 }
 0x4bc   : > { %v2575_v8 = vadd.f32 %v2574_v21, %v9488_v43  ;;  %v2576_v36 = vpop.f32.mrb[131].mxu1  ;;  %2956 = vmatmul.mubr.f32.gmra.mrb[236].mxu1 %v9910_v16  ;;  %v9920_v21 = vld [vmem:[#allocation27_spill] sm:$0xff] }
 0x4bd   : > { %v2577_v49 = vadd.f32 %v2576_v36, %v9495_v12  ;;  %5205 = vmatprep.mubr.f32.mxu0 %v3029_v0  ;;  %2961 = vmatprep.mubr.f32.mxu1 %v9911_v11  ;;  %v9921_v36 = vld [vmem:[#allocation28_spill] sm:$0xff] }
 0x4be   : > { %5206 = vmatmul.mubr.f32.vlgmr.msra.gmra.mrb[0].mxu0 %v3028_v57  ;;  %v3044_v6 = vmax.f32 %v2575_v8, 0.0  ;;  %v3765_v57 = vld [vmem:[#allocation8 + $0x768] sm:$0xff] }
 0x4bf   : > { %v3045_v2 = vmax.f32 %v2577_v49, 0.0  ;;  %v2580_v26 = vpop.f32.mrb[132].mxu1  ;;  %6625 = vmatpush1.bf16.msra.mxu0 %v6624_v22  ;;  %v3764_v22 = vld [vmem:[#allocation8 + $0x760] sm:$0xff] }
 0x4c0   : > { %v2581_v37 = vadd.f32 %v2580_v26, %v9488_v43  ;;  %v2582_v24 = vpop.f32.mrb[133].mxu1  ;;  %2962 = vmatmul.mubr.f32.gmra.mrb[238].mxu1 %v9912_v34  ;;  %6626 = vmatprep.subr.bf16.mxu0 %v9870_v58  ;;  %v6642_v28 = vpack.c.bf16 %v3765_v57, %v3764_v22  ;;  %v9922_v26 = vld [vmem:[#allocation29_spill] sm:$0xff] }
 0x4c1   : > { %v2583_v27 = vadd.f32 %v2582_v24, %v9495_v12  ;;  %5210 = vmatprep.mubr.f32.mxu0 %v3045_v2  ;;  %2967 = vmatprep.mubr.f32.mxu1 %v9913_v10  ;;  %v9923_v24 = vld [vmem:[#allocation30_spill] sm:$0xff] }
 0x4c2   : > { %5211 = vmatmul.mubr.f32.gmra.mrb[2].mxu0 %v3044_v6  ;;  %v3060_v45 = vmax.f32 %v2581_v37, 0.0  ;;  %v3767_v6 = vld [vmem:[#allocation8 + $0x778] sm:$0xff] }
 0x4c3   : > { %v3061_v63 = vmax.f32 %v2583_v27, 0.0  ;;  %v2586_v48 = vpop.f32.mrb[134].mxu1  ;;  %6628 = vmatpush1.bf16.msra.mxu0 %v6627_v31  ;;  %v3766_v31 = vld [vmem:[#allocation8 + $0x770] sm:$0xff] }
 0x4c4   : > { %v2587_v40 = vadd.f32 %v2586_v48, %v9488_v43  ;;  %v2588_v56 = vpop.f32.mrb[135].mxu1  ;;  %2968 = vmatmul.mubr.f32.gmra.mrb[240].mxu1 %v9914_v19  ;;  %6629 = vmatprep.subr.bf16.mxu0 %v9870_v58  ;;  %v6645_v50 = vpack.c.bf16 %v3767_v6, %v3766_v31  ;;  %v9924_v48 = vld [vmem:[#allocation31_spill] sm:$0xff]  ;;  %v3778_v31 = vld [vmem:[#allocation8 + $0x7d0] sm:$0xff] }
 0x4c5   : > { %v2589_v35 = vadd.f32 %v2588_v56, %v9495_v12  ;;  %5215 = vmatprep.mubr.f32.mxu0 %v3061_v63  ;;  %2973 = vmatprep.mubr.f32.mxu1 %v9915_v25  ;;  %v9925_v56 = vld [vmem:[#allocation32_spill] sm:$0xff]  ;;  %v3779_v6 = vld [vmem:[#allocation8 + $0x7d8] sm:$0xff] }
 0x4c6   : > { %5216 = vmatmul.mubr.f32.gmra.mrb[4].mxu0 %v3060_v45  ;;  %v3076_v44 = vmax.f32 %v2587_v40, 0.0  ;;  %v3769_v45 = vld [vmem:[#allocation8 + $0x788] sm:$0xff] }
 0x4c7   : > { %v3077_v41 = vmax.f32 %v2589_v35, 0.0  ;;  %v2592_v51 = vpop.f32.mrb[136].mxu1  ;;  %6631 = vmatpush1.bf16.msra.mxu0 %v6630_v1  ;;  %v3768_v1 = vld [vmem:[#allocation8 + $0x780] sm:$0xff] }
 0x4c8   : > { %v2593_v52 = vadd.f32 %v2592_v51, %v9488_v43  ;;  %v2594_v23 = vpop.f32.mrb[137].mxu1  ;;  %2974 = vmatmul.mubr.f32.gmra.mrb[242].mxu1 %v9916_v14  ;;  %6632 = vmatprep.subr.bf16.mxu0 %v9870_v58  ;;  %v6648_v42 = vpack.c.bf16 %v3769_v45, %v3768_v1  ;;  %v9926_v51 = vld [vmem:[#allocation33_spill] sm:$0xff] }
 0x4c9   : > { %v2595_v60 = vadd.f32 %v2594_v23, %v9495_v12  ;;  %5220 = vmatprep.mubr.f32.mxu0 %v3077_v41  ;;  %2979 = vmatprep.mubr.f32.mxu1 %v9917_v29  ;;  %v9927_v23 = vld [vmem:[#allocation34_spill] sm:$0xff] }
 0x4ca   : > { %5221 = vmatmul.mubr.f32.gmra.mrb[6].mxu0 %v3076_v44  ;;  %v3092_v5 = vmax.f32 %v2593_v52, 0.0  ;;  %v3771_v44 = vld [vmem:[#allocation8 + $0x798] sm:$0xff] }
 0x4cb   : > { %v3093_v32 = vmax.f32 %v2595_v60, 0.0  ;;  %v2598_v53 = vpop.f32.mrb[138].mxu1  ;;  %6634 = vmatpush1.bf16.msra.mxu0 %v6633_v30  ;;  %v3770_v30 = vld [vmem:[#allocation8 + $0x790] sm:$0xff] }
 0x4cc   : > { %v2599_v18 = vadd.f32 %v2598_v53, %v9488_v43  ;;  %v2600_v59 = vpop.f32.mrb[139].mxu1  ;;  %2980 = vmatmul.mubr.f32.gmra.mrb[244].mxu1 %v9918_v33  ;;  %6635 = vmatprep.subr.bf16.mxu0 %v9870_v58  ;;  %v6651_v47 = vpack.c.bf16 %v3771_v44, %v3770_v30  ;;  %v9928_v53 = vld [vmem:[#allocation35_spill] sm:$0xff] }
 0x4cd   : > { %v2601_v61 = vadd.f32 %v2600_v59, %v9495_v12  ;;  %5225 = vmatprep.mubr.f32.mxu0 %v3093_v32  ;;  %2985 = vmatprep.mubr.f32.mxu1 %v9919_v62 }
 0x4ce   : > { %5226 = vmatmul.mubr.f32.gmra.mrb[8].mxu0 %v3092_v5  ;;  %v3108_v20 = vmax.f32 %v2599_v18, 0.0  ;;  %v3773_v5 = vld [vmem:[#allocation8 + $0x7a8] sm:$0xff] }
 0x4cf   : > { %v3109_v46 = vmax.f32 %v2601_v61, 0.0  ;;  %v2604_v17 = vpop.f32.mrb[140].mxu1  ;;  %6637 = vmatpush1.bf16.msra.mxu0 %v6636_v54  ;;  %v3772_v54 = vld [vmem:[#allocation8 + $0x7a0] sm:$0xff] }
 0x4d0   : > { %v2605_v39 = vadd.f32 %v2604_v17, %v9488_v43  ;;  %v2606_v0 = vpop.f32.mrb[141].mxu1  ;;  %2986 = vmatmul.mubr.f32.gmra.mrb[246].mxu1 %v9920_v21  ;;  %6638 = vmatprep.subr.bf16.mxu0 %v9870_v58  ;;  %v6654_v9 = vpack.c.bf16 %v3773_v5, %v3772_v54  ;;  %v3775_v17 = vld [vmem:[#allocation8 + $0x7b8] sm:$0xff] }
 0x4d1   : > { %v2607_v8 = vadd.f32 %v2606_v0, %v9495_v12  ;;  %5230 = vmatprep.mubr.f32.mxu0 %v3109_v46  ;;  %2991 = vmatprep.mubr.f32.mxu1 %v9921_v36  ;;  %v3774_v46 = vld [vmem:[#allocation8 + $0x7b0] sm:$0xff]  ;;  %v3777_v36 = vld [vmem:[#allocation8 + $0x7c8] sm:$0xff] }
 0x4d2   : > { %5231 = vmatmul.mubr.f32.gmra.mrb[10].mxu0 %v3108_v20  ;;  %v3124_v49 = vmax.f32 %v2605_v39, 0.0  ;;  %v6657_v0 = vpack.c.bf16 %v3775_v17, %v3774_v46 }
 0x4d3   : > { %v3125_v16 = vmax.f32 %v2607_v8, 0.0  ;;  %v2610_v13 = vpop.f32.mrb[142].mxu1  ;;  %6640 = vmatpush1.bf16.msra.mxu0 %v6639_v38  ;;  %v3776_v8 = vld [vmem:[#allocation8 + $0x7c0] sm:$0xff] }
 0x4d4   : > { %v2611_v11 = vadd.f32 %v2610_v13, %v9488_v43  ;;  %v2612_v2 = vpop.f32.mrb[143].mxu1  ;;  %2992 = vmatmul.mubr.f32.gmra.mrb[248].mxu1 %v9922_v26  ;;  %6641 = vmatprep.subr.bf16.mxu0 %v9870_v58 }
 0x4d5   : > { %v2613_v37 = vadd.f32 %v2612_v2, %v9495_v12  ;;  %5235 = vmatprep.mubr.f32.mxu0 %v3125_v16  ;;  %2997 = vmatprep.mubr.f32.mxu1 %v9923_v24 }
 0x4d6   : > { %5236 = vmatmul.mubr.f32.gmra.mrb[12].mxu0 %v3124_v49  ;;  %v3140_v27 = vmax.f32 %v2611_v11, 0.0  ;;  %v6660_v49 = vpack.c.bf16 %v3777_v36, %v3776_v8 }
 0x4d7   : > { %v3141_v34 = vmax.f32 %v2613_v37, 0.0  ;;  %v2616_v3 = vpop.f32.mrb[144].mxu1  ;;  %6643 = vmatpush1.bf16.msra.mxu0 %v6642_v28 }
 0x4d8   : > { %v2617_v10 = vadd.f32 %v2616_v3, %v9488_v43  ;;  %v2618_v63 = vpop.f32.mrb[145].mxu1  ;;  %2998 = vmatmul.mubr.f32.gmra.mrb[250].mxu1 %v9924_v48  ;;  %6644 = vmatprep.subr.bf16.mxu0 %v9870_v58  ;;  %v6663_v3 = vpack.c.bf16 %v3779_v6, %v3778_v31  ;;  %v3781_v48 = vld [vmem:[#allocation8 + $0x7e8] sm:$0xff] }
 0x4d9   : > { %v2619_v40 = vadd.f32 %v2618_v63, %v9495_v12  ;;  %5240 = vmatprep.mubr.f32.mxu0 %v3141_v34  ;;  %3003 = vmatprep.mubr.f32.mxu1 %v9925_v56  ;;  %v3780_v63 = vld [vmem:[#allocation8 + $0x7e0] sm:$0xff] }
 0x4da   : > { %5241 = vmatmul.mubr.f32.gmra.mrb[14].mxu0 %v3140_v27  ;;  %v3156_v35 = vmax.f32 %v2617_v10, 0.0  ;;  %v6666_v56 = vpack.c.bf16 %v3781_v48, %v3780_v63 }
 0x4db   : > { %v3157_v19 = vmax.f32 %v2619_v40, 0.0  ;;  %v2622_v4 = vpop.f32.mrb[146].mxu1  ;;  %6646 = vmatpush1.bf16.msra.mxu0 %v6645_v50 }
 0x4dc   : > { %v2623_v25 = vadd.f32 %v2622_v4, %v9488_v43  ;;  %v2624_v41 = vpop.f32.mrb[147].mxu1  ;;  %3004 = vmatmul.mubr.f32.gmra.mrb[252].mxu1 %v9926_v51  ;;  %6647 = vmatprep.subr.bf16.mxu0 %v9870_v58 }
 0x4dd   : > { %v2625_v52 = vadd.f32 %v2624_v41, %v9495_v12  ;;  %5245 = vmatprep.mubr.f32.mxu0 %v3157_v19  ;;  %3009 = vmatprep.mubr.f32.mxu1 %v9927_v23 }
 0x4de   : > { %5246 = vmatmul.mubr.f32.gmra.mrb[16].mxu0 %v3156_v35  ;;  %v3172_v60 = vmax.f32 %v2623_v25, 0.0  ;;  %v3782_v35 = vld [vmem:[#allocation8 + $0x7f0] sm:$0xff]  ;;  %v3783_v25 = vld [vmem:[#allocation8 + $0x7f8] sm:$0xff] }
 0x4df   : > { %v3173_v14 = vmax.f32 %v2625_v52, 0.0  ;;  %v2628_v55 = vpop.f32.mrb[148].mxu1  ;;  %6649 = vmatpush1.bf16.msra.mxu0 %v6648_v42  ;;  %v6669_v44 = vpack.c.bf16 %v3783_v25, %v3782_v35 }
 0x4e0   : > { %v2629_v29 = vadd.f32 %v2628_v55, %v9488_v43  ;;  %v2630_v32 = vpop.f32.mrb[149].mxu1  ;;  %3010 = vmatmul.mubr.f32.gmra.mrb[254].mxu1 %v9928_v53  ;;  %6650 = vmatprep.subr.bf16.mxu0 %v9870_v58 }
 0x4e1   : > { %v2631_v18 = vadd.f32 %v2630_v32, %v9495_v12  ;;  %5250 = vmatprep.mubr.f32.mxu0 %v3173_v14 }
 0x4e2   : > { %5251 = vmatmul.mubr.f32.gmra.mrb[18].mxu0 %v3172_v60  ;;  %v3188_v15 = vmax.f32 %v2629_v29, 0.0 }
 0x4e3   : > { %v3189_v59 = vmax.f32 %v2631_v18, 0.0  ;;  %v2634_v33 = vpop.f32.mrb[150].mxu1  ;;  %6652 = vmatpush1.bf16.msra.mxu0 %v6651_v47 }
 0x4e4   : > { %v2635_v61 = vadd.f32 %v2634_v33, %v9488_v43  ;;  %v2636_v62 = vpop.f32.mrb[151].mxu1  ;;  %6653 = vmatprep.subr.bf16.mxu0 %v9870_v58 }
 0x4e5   : > { %v2637_v38 = vadd.f32 %v2636_v62, %v9495_v12  ;;  %5255 = vmatprep.mubr.f32.mxu0 %v3189_v59 }
 0x4e6   : > { %5256 = vmatmul.mubr.f32.gmra.mrb[20].mxu0 %v3188_v15  ;;  %v3204_v21 = vmax.f32 %v2635_v61, 0.0 }
 0x4e7   : > { %v3205_v20 = vmax.f32 %v2637_v38, 0.0  ;;  %v2640_v39 = vpop.f32.mrb[152].mxu1  ;;  %6655 = vmatpush1.bf16.msra.mxu0 %v6654_v9 }
 0x4e8   : > { %v2641_v22 = vadd.f32 %v2640_v39, %v9488_v43  ;;  %v2642_v57 = vpop.f32.mrb[153].mxu1  ;;  %6656 = vmatprep.subr.bf16.mxu0 %v9870_v58 }
 0x4e9   : > { %v2643_v16 = vadd.f32 %v2642_v57, %v9495_v12  ;;  %5260 = vmatprep.mubr.f32.mxu0 %v3205_v20 }
 0x4ea   : > { %5261 = vmatmul.mubr.f32.gmra.mrb[22].mxu0 %v3204_v21  ;;  %v3220_v11 = vmax.f32 %v2641_v22, 0.0 }
 0x4eb   : > { %v3221_v13 = vmax.f32 %v2643_v16, 0.0  ;;  %v2646_v28 = vpop.f32.mrb[154].mxu1  ;;  %6658 = vmatpush1.bf16.msra.mxu0 %v6657_v0 }
 0x4ec   : > { %v2647_v2 = vadd.f32 %v2646_v28, %v9488_v43  ;;  %v2648_v26 = vpop.f32.mrb[155].mxu1  ;;  %6659 = vmatprep.subr.bf16.mxu0 %v9870_v58 }
 0x4ed   : > { %v2649_v37 = vadd.f32 %v2648_v26, %v9495_v12  ;;  %5265 = vmatprep.mubr.f32.mxu0 %v3221_v13 }
 0x4ee   : > { %5266 = vmatmul.mubr.f32.gmra.mrb[24].mxu0 %v3220_v11  ;;  %v3236_v50 = vmax.f32 %v2647_v2, 0.0 }
 0x4ef   : > { %v3237_v24 = vmax.f32 %v2649_v37, 0.0  ;;  %v2652_v34 = vpop.f32.mrb[156].mxu1  ;;  %6661 = vmatpush1.bf16.msra.mxu0 %v6660_v49 }
 0x4f0   : > { %v2653_v27 = vadd.f32 %v2652_v34, %v9488_v43  ;;  %v2654_v10 = vpop.f32.mrb[157].mxu1  ;;  %6662 = vmatprep.subr.bf16.mxu0 %v9870_v58 }
 0x4f1   : > { %v2655_v1 = vadd.f32 %v2654_v10, %v9495_v12  ;;  %5270 = vmatprep.mubr.f32.mxu0 %v3237_v24 }
 0x4f2   : > { %5271 = vmatmul.mubr.f32.gmra.mrb[26].mxu0 %v3236_v50  ;;  %v3252_v19 = vmax.f32 %v2653_v27, 0.0 }
 0x4f3   : > { %v3253_v45 = vmax.f32 %v2655_v1, 0.0  ;;  %v2658_v40 = vpop.f32.mrb[158].mxu1  ;;  %6664 = vmatpush1.bf16.msra.mxu0 %v6663_v3 }
 0x4f4   : > { %v2659_v4 = vadd.f32 %v2658_v40, %v9488_v43  ;;  %v2660_v42 = vpop.f32.mrb[159].mxu1  ;;  %6665 = vmatprep.subr.bf16.mxu0 %v9870_v58 }
 0x4f5   : > { %v2661_v41 = vadd.f32 %v2660_v42, %v9495_v12  ;;  %5275 = vmatprep.mubr.f32.mxu0 %v3253_v45 }
 0x4f6   : > { %5276 = vmatmul.mubr.f32.gmra.mrb[28].mxu0 %v3252_v19  ;;  %v3268_v52 = vmax.f32 %v2659_v4, 0.0 }
 0x4f7   : > { %v3269_v51 = vmax.f32 %v2661_v41, 0.0  ;;  %v2664_v30 = vpop.f32.mrb[160].mxu1  ;;  %6667 = vmatpush1.bf16.msra.mxu0 %v6666_v56 }
 0x4f8   : > { %v2665_v23 = vadd.f32 %v2664_v30, %v9488_v43  ;;  %v2666_v14 = vpop.f32.mrb[161].mxu1  ;;  %6668 = vmatprep.subr.bf16.mxu0 %v9870_v58 }
 0x4f9   : > { %v2667_v55 = vadd.f32 %v2666_v14, %v9495_v12  ;;  %5280 = vmatprep.mubr.f32.mxu0 %v3269_v51 }
 0x4fa   : > { %5281 = vmatmul.mubr.f32.gmra.mrb[30].mxu0 %v3268_v52  ;;  %v3284_v29 = vmax.f32 %v2665_v23, 0.0 }
 0x4fb   : > { %v3285_v47 = vmax.f32 %v2667_v55, 0.0  ;;  %v2670_v60 = vpop.f32.mrb[162].mxu1  ;;  %6670 = vmatpush1.bf16.msra.mxu0 %v6669_v44 }
 0x4fc   : > { %v2671_v32 = vadd.f32 %v2670_v60, %v9488_v43  ;;  %v2672_v53 = vpop.f32.mrb[163].mxu1 }
 0x4fd   : > { %v2673_v54 = vadd.f32 %v2672_v53, %v9495_v12  ;;  %5285 = vmatprep.mubr.f32.mxu0 %v3285_v47 }
 0x4fe   : > { %5286 = vmatmul.mubr.f32.gmra.mrb[32].mxu0 %v3284_v29  ;;  %v3300_v59 = vmax.f32 %v2671_v32, 0.0 }
 0x4ff   : > { %v3301_v5 = vmax.f32 %v2673_v54, 0.0  ;;  %v2676_v18 = vpop.f32.mrb[164].mxu1 }
 0x500   : > { %v2677_v58 = vadd.f32 %v2676_v18, %v9488_v43  ;;  %v2678_v33 = vpop.f32.mrb[165].mxu1 }
 0x501   : > { %v2679_v9 = vadd.f32 %v2678_v33, %v9495_v12  ;;  %5290 = vmatprep.mubr.f32.mxu0 %v3301_v5 }
 0x502   : > { %5291 = vmatmul.mubr.f32.gmra.mrb[34].mxu0 %v3300_v59  ;;  %v3316_v62 = vmax.f32 %v2677_v58, 0.0 }
 0x503   : > { %v3317_v15 = vmax.f32 %v2679_v9, 0.0  ;;  %v2682_v61 = vpop.f32.mrb[166].mxu1 }
 0x504   : > { %v2683_v46 = vadd.f32 %v2682_v61, %v9488_v43  ;;  %v2684_v17 = vpop.f32.mrb[167].mxu1 }
 0x505   : > { %v2685_v38 = vadd.f32 %v2684_v17, %v9495_v12  ;;  %5295 = vmatprep.mubr.f32.mxu0 %v3317_v15 }
 0x506   : > { %5296 = vmatmul.mubr.f32.gmra.mrb[36].mxu0 %v3316_v62  ;;  %v3332_v0 = vmax.f32 %v2683_v46, 0.0 }
 0x507   : > { %v3333_v20 = vmax.f32 %v2685_v38, 0.0  ;;  %v2688_v39 = vpop.f32.mrb[168].mxu1 }
 0x508   : > { %v2689_v21 = vadd.f32 %v2688_v39, %v9488_v43  ;;  %v2690_v22 = vpop.f32.mrb[169].mxu1 }
 0x509   : > { %v2691_v57 = vadd.f32 %v2690_v22, %v9495_v12  ;;  %5300 = vmatprep.mubr.f32.mxu0 %v3333_v20 }
 0x50a   : > { %5301 = vmatmul.mubr.f32.gmra.mrb[38].mxu0 %v3332_v0  ;;  %v3348_v16 = vmax.f32 %v2689_v21, 0.0 }
 0x50b   : > { %v3349_v8 = vmax.f32 %v2691_v57, 0.0  ;;  %v2694_v36 = vpop.f32.mrb[170].mxu1 }
 0x50c   : > { %v2695_v13 = vadd.f32 %v2694_v36, %v9488_v43  ;;  %v2696_v28 = vpop.f32.mrb[171].mxu1 }
 0x50d   : > { %v2697_v49 = vadd.f32 %v2696_v28, %v9495_v12  ;;  %5305 = vmatprep.mubr.f32.mxu0 %v3349_v8  ;;  %v7573_v28 = vld [vmem:[#allocation7 + $0x8] sm:$0xff] }
 0x50e   : > { %5306 = vmatmul.mubr.f32.gmra.mrb[40].mxu0 %v3348_v16  ;;  %v3364_v26 = vmax.f32 %v2695_v13, 0.0 }
 0x50f   : > { %v3365_v11 = vmax.f32 %v2697_v49, 0.0  ;;  %v2700_v2 = vpop.f32.mrb[172].mxu1  ;;  %v9929_v49 = vsub.s32 6, %v8373_v7 }
 0x510   : > { %v2701_v31 = vadd.f32 %v2700_v2, %v9488_v43  ;;  %v2702_v6 = vpop.f32.mrb[173].mxu1 }
 0x511   : > { %v2703_v37 = vadd.f32 %v2702_v6, %v9495_v12  ;;  %5310 = vmatprep.mubr.f32.mxu0 %v3365_v11  ;;  %v9598_v11 = vrot.slane %v7573_v28, %v9929_v49 }
 0x512   : > { %5311 = vmatmul.mubr.f32.gmra.mrb[42].mxu0 %v3364_v26  ;;  %v3380_v3 = vmax.f32 %v2701_v31, 0.0  ;;  %v9930_v26 = vsub.s32 7, %v8373_v7 }
 0x513   : > { %v3381_v24 = vmax.f32 %v2703_v37, 0.0  ;;  %v2706_v34 = vpop.f32.mrb[174].mxu1 }
 0x514   : > { %v2707_v50 = vadd.f32 %v2706_v34, %v9488_v43  ;;  %v2708_v27 = vpop.f32.mrb[175].mxu1  ;;  %v9603_v31 = vrot.slane %v7573_v28, %v9930_v26 }
 0x515   : > { %v2709_v10 = vadd.f32 %v2708_v27, %v9495_v12  ;;  %5315 = vmatprep.mubr.f32.mxu0 %v3381_v24 }
 0x516   : > { %5316 = vmatmul.mubr.f32.gmra.mrb[44].mxu0 %v3380_v3  ;;  %v3396_v1 = vmax.f32 %v2707_v50, 0.0 }
 0x517   : > { %v3397_v63 = vmax.f32 %v2709_v10, 0.0  ;;  %v2712_v48 = vpop.f32.mrb[176].mxu1 }
 0x518   : > { %v2713_v45 = vadd.f32 %v2712_v48, %v9488_v43  ;;  %v2714_v40 = vpop.f32.mrb[177].mxu1 }
 0x519   : > { %v2715_v56 = vadd.f32 %v2714_v40, %v9495_v12  ;;  %5320 = vmatprep.mubr.f32.mxu0 %v3397_v63 }
 0x51a   : > { %5321 = vmatmul.mubr.f32.gmra.mrb[46].mxu0 %v3396_v1  ;;  %v3412_v42 = vmax.f32 %v2713_v45, 0.0 }
 0x51b   : > { %v3413_v19 = vmax.f32 %v2715_v56, 0.0  ;;  %v2718_v4 = vpop.f32.mrb[178].mxu1 }
 0x51c   : > { %v2719_v35 = vadd.f32 %v2718_v4, %v9488_v43  ;;  %v2720_v25 = vpop.f32.mrb[179].mxu1 }
 0x51d   : > { %v2721_v41 = vadd.f32 %v2720_v25, %v9495_v12  ;;  %5325 = vmatprep.mubr.f32.mxu0 %v3413_v19 }
 0x51e   : > { %5326 = vmatmul.mubr.f32.gmra.mrb[48].mxu0 %v3412_v42  ;;  %v3428_v44 = vmax.f32 %v2719_v35, 0.0 }
 0x51f   : > { %v3429_v51 = vmax.f32 %v2721_v41, 0.0  ;;  %v2724_v30 = vpop.f32.mrb[180].mxu1 }
 0x520   : > { %v2725_v52 = vadd.f32 %v2724_v30, %v9488_v43  ;;  %v2726_v23 = vpop.f32.mrb[181].mxu1 }
 0x521   : > { %v2727_v14 = vadd.f32 %v2726_v23, %v9495_v12  ;;  %5330 = vmatprep.mubr.f32.mxu0 %v3429_v51 }
 0x522   : > { %5331 = vmatmul.mubr.f32.gmra.mrb[50].mxu0 %v3428_v44  ;;  %v3444_v60 = vmax.f32 %v2725_v52, 0.0 }
 0x523   : > { %v3445_v55 = vmax.f32 %v2727_v14, 0.0  ;;  %v2730_v47 = vpop.f32.mrb[182].mxu1 }
 0x524   : > { %v2731_v29 = vadd.f32 %v2730_v47, %v9488_v43  ;;  %v2732_v32 = vpop.f32.mrb[183].mxu1 }
 0x525   : > { %v2733_v53 = vadd.f32 %v2732_v32, %v9495_v12  ;;  %5335 = vmatprep.mubr.f32.mxu0 %v3445_v55 }
 0x526   : > { %5336 = vmatmul.mubr.f32.gmra.mrb[52].mxu0 %v3444_v60  ;;  %v3460_v18 = vmax.f32 %v2731_v29, 0.0 }
 0x527   : > { %v3461_v54 = vmax.f32 %v2733_v53, 0.0  ;;  %v2736_v5 = vpop.f32.mrb[184].mxu1 }
 0x528   : > { %v2737_v59 = vadd.f32 %v2736_v5, %v9488_v43  ;;  %v2738_v58 = vpop.f32.mrb[185].mxu1 }
 0x529   : > { %v2739_v33 = vadd.f32 %v2738_v58, %v9495_v12  ;;  %5340 = vmatprep.mubr.f32.mxu0 %v3461_v54 }
 0x52a   : > { %5341 = vmatmul.mubr.f32.gmra.mrb[54].mxu0 %v3460_v18  ;;  %v3476_v61 = vmax.f32 %v2737_v59, 0.0 }
 0x52b   : > { %v3477_v9 = vmax.f32 %v2739_v33, 0.0  ;;  %v2742_v15 = vpop.f32.mrb[186].mxu1 }
 0x52c   : > { %v2743_v62 = vadd.f32 %v2742_v15, %v9488_v43  ;;  %v2744_v46 = vpop.f32.mrb[187].mxu1 }
 0x52d   : > { %v2745_v17 = vadd.f32 %v2744_v46, %v9495_v12  ;;  %5345 = vmatprep.mubr.f32.mxu0 %v3477_v9 }
 0x52e   : > { %5346 = vmatmul.mubr.f32.gmra.mrb[56].mxu0 %v3476_v61  ;;  %v3492_v39 = vmax.f32 %v2743_v62, 0.0 }
 0x52f   : > { %v3493_v38 = vmax.f32 %v2745_v17, 0.0  ;;  %v2748_v20 = vpop.f32.mrb[188].mxu1 }
 0x530   : > { %v2749_v0 = vadd.f32 %v2748_v20, %v9488_v43  ;;  %v2750_v21 = vpop.f32.mrb[189].mxu1 }
 0x531   : > { %v2751_v22 = vadd.f32 %v2750_v21, %v9495_v12  ;;  %5350 = vmatprep.mubr.f32.mxu0 %v3493_v38 }
 0x532   : > { %5351 = vmatmul.mubr.f32.gmra.mrb[58].mxu0 %v3492_v39  ;;  %v3508_v36 = vmax.f32 %v2749_v0, 0.0 }
 0x533   : > { %v3509_v57 = vmax.f32 %v2751_v22, 0.0  ;;  %v2754_v8 = vpop.f32.mrb[190].mxu1 }
 0x534   : > { %v2755_v16 = vadd.f32 %v2754_v8, %v9488_v43  ;;  %v2756_v13 = vpop.f32.mrb[191].mxu1 }
 0x535   : > { %v2757_v2 = vadd.f32 %v2756_v13, %v9495_v12  ;;  %5355 = vmatprep.mubr.f32.mxu0 %v3509_v57 }
 0x536   : > { %5356 = vmatmul.mubr.f32.gmra.mrb[60].mxu0 %v3508_v36  ;;  %v3524_v24 = vmax.f32 %v2755_v16, 0.0 }
 0x537   : > { %v3525_v6 = vmax.f32 %v2757_v2, 0.0  ;;  %v2825_v37 = vpop.f32.mrb[192].mxu1 }
 0x538   : > { %v2826_v34 = vadd.f32 %v2825_v37, %v9598_v11  ;;  %v2827_v43 = vpop.f32.mrb[193].mxu1 }
 0x539   : > { %v2828_v3 = vadd.f32 %v2827_v43, %v9603_v31  ;;  %5360 = vmatprep.mubr.f32.mxu0 %v3525_v6 }
 0x53a   : > { %5361 = vmatmul.mubr.f32.gmra.mrb[62].mxu0 %v3524_v24  ;;  %v3030_v10 = vmax.f32 %v2826_v34, 0.0 }
 0x53b   : > { %v3031_v50 = vmax.f32 %v2828_v3, 0.0  ;;  %v2831_v27 = vpop.f32.mrb[194].mxu1 }
 0x53c   : > { %v2832_v12 = vadd.f32 %v2831_v27, %v9598_v11  ;;  %v2833_v63 = vpop.f32.mrb[195].mxu1 }
 0x53d   : > { %v2834_v7 = vadd.f32 %v2833_v63, %v9603_v31  ;;  %5430 = vmatprep.mubr.f32.mxu0 %v3031_v50 }
 0x53e   : > { %5431 = vmatmul.mubr.f32.vlgmr.msra.gmra.mrb[0].mxu0 %v3030_v10  ;;  %v3046_v45 = vmax.f32 %v2832_v12, 0.0 }
 0x53f   : > { %v3047_v48 = vmax.f32 %v2834_v7, 0.0  ;;  %v2837_v1 = vpop.f32.mrb[196].mxu1 }
 0x540   : > { %v2838_v40 = vadd.f32 %v2837_v1, %v9598_v11  ;;  %v2839_v56 = vpop.f32.mrb[197].mxu1 }
 0x541   : > { %v2840_v19 = vadd.f32 %v2839_v56, %v9603_v31  ;;  %5435 = vmatprep.mubr.f32.mxu0 %v3047_v48 }
 0x542   : > { %5436 = vmatmul.mubr.f32.gmra.mrb[2].mxu0 %v3046_v45  ;;  %v3062_v35 = vmax.f32 %v2838_v40, 0.0 }
 0x543   : > { %v3063_v4 = vmax.f32 %v2840_v19, 0.0  ;;  %v2843_v42 = vpop.f32.mrb[198].mxu1 }
 0x544   : > { %v2844_v25 = vadd.f32 %v2843_v42, %v9598_v11  ;;  %v2845_v41 = vpop.f32.mrb[199].mxu1 }
 0x545   : > { %v2846_v51 = vadd.f32 %v2845_v41, %v9603_v31  ;;  %5440 = vmatprep.mubr.f32.mxu0 %v3063_v4 }
 0x546   : > { %5441 = vmatmul.mubr.f32.gmra.mrb[4].mxu0 %v3062_v35  ;;  %v3078_v52 = vmax.f32 %v2844_v25, 0.0 }
 0x547   : > { %v3079_v30 = vmax.f32 %v2846_v51, 0.0  ;;  %v2849_v44 = vpop.f32.mrb[200].mxu1 }
 0x548   : > { %v2850_v23 = vadd.f32 %v2849_v44, %v9598_v11  ;;  %v2851_v14 = vpop.f32.mrb[201].mxu1 }
 0x549   : > { %v2852_v55 = vadd.f32 %v2851_v14, %v9603_v31  ;;  %5445 = vmatprep.mubr.f32.mxu0 %v3079_v30 }
 0x54a   : > { %5446 = vmatmul.mubr.f32.gmra.mrb[6].mxu0 %v3078_v52  ;;  %v3094_v29 = vmax.f32 %v2850_v23, 0.0 }
 0x54b   : > { %v3095_v47 = vmax.f32 %v2852_v55, 0.0  ;;  %v2855_v60 = vpop.f32.mrb[202].mxu1 }
 0x54c   : > { %v2856_v32 = vadd.f32 %v2855_v60, %v9598_v11  ;;  %v2857_v53 = vpop.f32.mrb[203].mxu1 }
 0x54d   : > { %v2858_v54 = vadd.f32 %v2857_v53, %v9603_v31  ;;  %5450 = vmatprep.mubr.f32.mxu0 %v3095_v47 }
 0x54e   : > { %5451 = vmatmul.mubr.f32.gmra.mrb[8].mxu0 %v3094_v29  ;;  %v3110_v59 = vmax.f32 %v2856_v32, 0.0 }
 0x54f   : > { %v3111_v5 = vmax.f32 %v2858_v54, 0.0  ;;  %v2861_v18 = vpop.f32.mrb[204].mxu1 }
 0x550   : > { %v2862_v58 = vadd.f32 %v2861_v18, %v9598_v11  ;;  %v2863_v33 = vpop.f32.mrb[205].mxu1 }
 0x551   : > { %v2864_v9 = vadd.f32 %v2863_v33, %v9603_v31  ;;  %5455 = vmatprep.mubr.f32.mxu0 %v3111_v5 }
 0x552   : > { %5456 = vmatmul.mubr.f32.gmra.mrb[10].mxu0 %v3110_v59  ;;  %v3126_v62 = vmax.f32 %v2862_v58, 0.0 }
 0x553   : > { %v3127_v15 = vmax.f32 %v2864_v9, 0.0  ;;  %v2867_v61 = vpop.f32.mrb[206].mxu1 }
 0x554   : > { %v2868_v46 = vadd.f32 %v2867_v61, %v9598_v11  ;;  %v2869_v17 = vpop.f32.mrb[207].mxu1 }
 0x555   : > { %v2870_v38 = vadd.f32 %v2869_v17, %v9603_v31  ;;  %5460 = vmatprep.mubr.f32.mxu0 %v3127_v15 }
 0x556   : > { %5461 = vmatmul.mubr.f32.gmra.mrb[12].mxu0 %v3126_v62  ;;  %v3142_v0 = vmax.f32 %v2868_v46, 0.0 }
 0x557   : > { %v3143_v20 = vmax.f32 %v2870_v38, 0.0  ;;  %v2873_v39 = vpop.f32.mrb[208].mxu1 }
 0x558   : > { %v2874_v21 = vadd.f32 %v2873_v39, %v9598_v11  ;;  %v2875_v22 = vpop.f32.mrb[209].mxu1 }
 0x559   : > { %v2876_v57 = vadd.f32 %v2875_v22, %v9603_v31  ;;  %5465 = vmatprep.mubr.f32.mxu0 %v3143_v20 }
 0x55a   : > { %5466 = vmatmul.mubr.f32.gmra.mrb[14].mxu0 %v3142_v0  ;;  %v3158_v16 = vmax.f32 %v2874_v21, 0.0 }
 0x55b   : > { %v3159_v8 = vmax.f32 %v2876_v57, 0.0  ;;  %v2879_v36 = vpop.f32.mrb[210].mxu1 }
 0x55c   : > { %v2880_v13 = vadd.f32 %v2879_v36, %v9598_v11  ;;  %v2881_v28 = vpop.f32.mrb[211].mxu1 }
 0x55d   : > { %v2882_v49 = vadd.f32 %v2881_v28, %v9603_v31  ;;  %5470 = vmatprep.mubr.f32.mxu0 %v3159_v8 }
 0x55e   : > { %5471 = vmatmul.mubr.f32.gmra.mrb[16].mxu0 %v3158_v16  ;;  %v3174_v6 = vmax.f32 %v2880_v13, 0.0 }
 0x55f   : > { %v3175_v2 = vmax.f32 %v2882_v49, 0.0  ;;  %v2885_v26 = vpop.f32.mrb[212].mxu1 }
 0x560   : > { %v2886_v37 = vadd.f32 %v2885_v26, %v9598_v11  ;;  %v2887_v24 = vpop.f32.mrb[213].mxu1 }
 0x561   : > { %v2888_v34 = vadd.f32 %v2887_v24, %v9603_v31  ;;  %5475 = vmatprep.mubr.f32.mxu0 %v3175_v2 }
 0x562   : > { %5476 = vmatmul.mubr.f32.gmra.mrb[18].mxu0 %v3174_v6  ;;  %v3190_v50 = vmax.f32 %v2886_v37, 0.0 }
 0x563   : > { %v3191_v43 = vmax.f32 %v2888_v34, 0.0  ;;  %v2891_v3 = vpop.f32.mrb[214].mxu1 }
 0x564   : > { %v2892_v27 = vadd.f32 %v2891_v3, %v9598_v11  ;;  %v2893_v10 = vpop.f32.mrb[215].mxu1 }
 0x565   : > { %v2894_v12 = vadd.f32 %v2893_v10, %v9603_v31  ;;  %5480 = vmatprep.mubr.f32.mxu0 %v3191_v43 }
 0x566   : > { %5481 = vmatmul.mubr.f32.gmra.mrb[20].mxu0 %v3190_v50  ;;  %v3206_v48 = vmax.f32 %v2892_v27, 0.0 }
 0x567   : > { %v3207_v63 = vmax.f32 %v2894_v12, 0.0  ;;  %v2897_v7 = vpop.f32.mrb[216].mxu1 }
 0x568   : > { %v2898_v1 = vadd.f32 %v2897_v7, %v9598_v11  ;;  %v2899_v45 = vpop.f32.mrb[217].mxu1 }
 0x569   : > { %v2900_v40 = vadd.f32 %v2899_v45, %v9603_v31  ;;  %5485 = vmatprep.mubr.f32.mxu0 %v3207_v63 }
 0x56a   : > { %5486 = vmatmul.mubr.f32.gmra.mrb[22].mxu0 %v3206_v48  ;;  %v3222_v4 = vmax.f32 %v2898_v1, 0.0 }
 0x56b   : > { %v3223_v56 = vmax.f32 %v2900_v40, 0.0  ;;  %v2903_v19 = vpop.f32.mrb[218].mxu1 }
 0x56c   : > { %v2904_v42 = vadd.f32 %v2903_v19, %v9598_v11  ;;  %v2905_v35 = vpop.f32.mrb[219].mxu1 }
 0x56d   : > { %v2906_v25 = vadd.f32 %v2905_v35, %v9603_v31  ;;  %5490 = vmatprep.mubr.f32.mxu0 %v3223_v56 }
 0x56e   : > { %5491 = vmatmul.mubr.f32.gmra.mrb[24].mxu0 %v3222_v4  ;;  %v3238_v30 = vmax.f32 %v2904_v42, 0.0 }
 0x56f   : > { %v3239_v41 = vmax.f32 %v2906_v25, 0.0  ;;  %v2909_v51 = vpop.f32.mrb[220].mxu1 }
 0x570   : > { %v2910_v44 = vadd.f32 %v2909_v51, %v9598_v11  ;;  %v2911_v52 = vpop.f32.mrb[221].mxu1 }
 0x571   : > { %v2912_v23 = vadd.f32 %v2911_v52, %v9603_v31  ;;  %5495 = vmatprep.mubr.f32.mxu0 %v3239_v41 }
 0x572   : > { %5496 = vmatmul.mubr.f32.gmra.mrb[26].mxu0 %v3238_v30  ;;  %v3254_v47 = vmax.f32 %v2910_v44, 0.0 }
 0x573   : > { %v3255_v14 = vmax.f32 %v2912_v23, 0.0  ;;  %v2915_v55 = vpop.f32.mrb[222].mxu1 }
 0x574   : > { %v2916_v60 = vadd.f32 %v2915_v55, %v9598_v11  ;;  %v2917_v29 = vpop.f32.mrb[223].mxu1 }
 0x575   : > { %v2918_v32 = vadd.f32 %v2917_v29, %v9603_v31  ;;  %5500 = vmatprep.mubr.f32.mxu0 %v3255_v14 }
 0x576   : > { %5501 = vmatmul.mubr.f32.gmra.mrb[28].mxu0 %v3254_v47  ;;  %v3270_v5 = vmax.f32 %v2916_v60, 0.0 }
 0x577   : > { %v3271_v53 = vmax.f32 %v2918_v32, 0.0  ;;  %v2921_v54 = vpop.f32.mrb[224].mxu1 }
 0x578   : > { %v2922_v18 = vadd.f32 %v2921_v54, %v9598_v11  ;;  %v2923_v59 = vpop.f32.mrb[225].mxu1 }
 0x579   : > { %v2924_v58 = vadd.f32 %v2923_v59, %v9603_v31  ;;  %5505 = vmatprep.mubr.f32.mxu0 %v3271_v53 }
 0x57a   : > { %5506 = vmatmul.mubr.f32.gmra.mrb[30].mxu0 %v3270_v5  ;;  %v3286_v15 = vmax.f32 %v2922_v18, 0.0 }
 0x57b   : > { %v3287_v33 = vmax.f32 %v2924_v58, 0.0  ;;  %v2927_v9 = vpop.f32.mrb[226].mxu1 }
 0x57c   : > { %v2928_v61 = vadd.f32 %v2927_v9, %v9598_v11  ;;  %v2929_v62 = vpop.f32.mrb[227].mxu1 }
 0x57d   : > { %v2930_v46 = vadd.f32 %v2929_v62, %v9603_v31  ;;  %5510 = vmatprep.mubr.f32.mxu0 %v3287_v33 }
 0x57e   : > { %5511 = vmatmul.mubr.f32.gmra.mrb[32].mxu0 %v3286_v15  ;;  %v3302_v20 = vmax.f32 %v2928_v61, 0.0 }
 0x57f   : > { %v3303_v17 = vmax.f32 %v2930_v46, 0.0  ;;  %v2933_v38 = vpop.f32.mrb[228].mxu1 }
 0x580   : > { %v2934_v39 = vadd.f32 %v2933_v38, %v9598_v11  ;;  %v2935_v0 = vpop.f32.mrb[229].mxu1 }
 0x581   : > { %v2936_v21 = vadd.f32 %v2935_v0, %v9603_v31  ;;  %5515 = vmatprep.mubr.f32.mxu0 %v3303_v17 }
 0x582   : > { %5516 = vmatmul.mubr.f32.gmra.mrb[34].mxu0 %v3302_v20  ;;  %v3318_v8 = vmax.f32 %v2934_v39, 0.0 }
 0x583   : > { %v3319_v22 = vmax.f32 %v2936_v21, 0.0  ;;  %v2939_v57 = vpop.f32.mrb[230].mxu1 }
 0x584   : > { %v2940_v36 = vadd.f32 %v2939_v57, %v9598_v11  ;;  %v2941_v16 = vpop.f32.mrb[231].mxu1 }
 0x585   : > { %v2942_v13 = vadd.f32 %v2941_v16, %v9603_v31  ;;  %5520 = vmatprep.mubr.f32.mxu0 %v3319_v22 }
 0x586   : > { %5521 = vmatmul.mubr.f32.gmra.mrb[36].mxu0 %v3318_v8  ;;  %v3334_v2 = vmax.f32 %v2940_v36, 0.0 }
 0x587   : > { %v3335_v28 = vmax.f32 %v2942_v13, 0.0  ;;  %v2945_v49 = vpop.f32.mrb[232].mxu1 }
 0x588   : > { %v2946_v26 = vadd.f32 %v2945_v49, %v9598_v11  ;;  %v2947_v6 = vpop.f32.mrb[233].mxu1 }
 0x589   : > { %v2948_v37 = vadd.f32 %v2947_v6, %v9603_v31  ;;  %5525 = vmatprep.mubr.f32.mxu0 %v3335_v28 }
 0x58a   : > { %5526 = vmatmul.mubr.f32.gmra.mrb[38].mxu0 %v3334_v2  ;;  %v3350_v43 = vmax.f32 %v2946_v26, 0.0 }
 0x58b   : > { %v3351_v24 = vmax.f32 %v2948_v37, 0.0  ;;  %v2951_v34 = vpop.f32.mrb[234].mxu1 }
 0x58c   : > { %v2952_v3 = vadd.f32 %v2951_v34, %v9598_v11  ;;  %v2953_v50 = vpop.f32.mrb[235].mxu1 }
 0x58d   : > { %v2954_v27 = vadd.f32 %v2953_v50, %v9603_v31  ;;  %5530 = vmatprep.mubr.f32.mxu0 %v3351_v24 }
 0x58e   : > { %5531 = vmatmul.mubr.f32.gmra.mrb[40].mxu0 %v3350_v43  ;;  %v3366_v63 = vmax.f32 %v2952_v3, 0.0 }
 0x58f   : > { %v3367_v10 = vmax.f32 %v2954_v27, 0.0  ;;  %v2957_v12 = vpop.f32.mrb[236].mxu1 }
 0x590   : > { %v2958_v7 = vadd.f32 %v2957_v12, %v9598_v11  ;;  %v2959_v48 = vpop.f32.mrb[237].mxu1 }
 0x591   : > { %v2960_v1 = vadd.f32 %v2959_v48, %v9603_v31  ;;  %5535 = vmatprep.mubr.f32.mxu0 %v3367_v10  ;;  %v9670_v10 = vld [vmem:[#allocation10] ss:$0 sm:$0xff] }
 0x592   : > { %5536 = vmatmul.mubr.f32.gmra.mrb[42].mxu0 %v3366_v63  ;;  %v3382_v56 = vmax.f32 %v2958_v7, 0.0 }
 0x593   : > { %v3383_v45 = vmax.f32 %v2960_v1, 0.0  ;;  %v2963_v40 = vpop.f32.mrb[238].mxu1 }
 0x594   : > { %v2964_v19 = vadd.f32 %v2963_v40, %v9598_v11  ;;  %v2965_v4 = vpop.f32.mrb[239].mxu1 }
 0x595   : > { %v2966_v42 = vadd.f32 %v2965_v4, %v9603_v31  ;;  %5540 = vmatprep.mubr.f32.mxu0 %v3383_v45 }
 0x596   : > { %5541 = vmatmul.mubr.f32.gmra.mrb[44].mxu0 %v3382_v56  ;;  %v3398_v41 = vmax.f32 %v2964_v19, 0.0 }
 0x597   : > { %v3399_v35 = vmax.f32 %v2966_v42, 0.0  ;;  %v2969_v25 = vpop.f32.mrb[240].mxu1 }
 0x598   : > { %v2970_v51 = vadd.f32 %v2969_v25, %v9598_v11  ;;  %v2971_v30 = vpop.f32.mrb[241].mxu1 }
 0x599   : > { %v2972_v44 = vadd.f32 %v2971_v30, %v9603_v31  ;;  %5545 = vmatprep.mubr.f32.mxu0 %v3399_v35 }
 0x59a   : > { %5546 = vmatmul.mubr.f32.gmra.mrb[46].mxu0 %v3398_v41  ;;  %v3414_v14 = vmax.f32 %v2970_v51, 0.0 }
 0x59b   : > { %v3415_v52 = vmax.f32 %v2972_v44, 0.0  ;;  %v2975_v23 = vpop.f32.mrb[242].mxu1 }
 0x59c   : > { %v2976_v55 = vadd.f32 %v2975_v23, %v9598_v11  ;;  %v2977_v47 = vpop.f32.mrb[243].mxu1 }
 0x59d   : > { %v2978_v60 = vadd.f32 %v2977_v47, %v9603_v31  ;;  %5550 = vmatprep.mubr.f32.mxu0 %v3415_v52 }
 0x59e   : > { %5551 = vmatmul.mubr.f32.gmra.mrb[48].mxu0 %v3414_v14  ;;  %v3430_v53 = vmax.f32 %v2976_v55, 0.0 }
 0x59f   : > { %v3431_v29 = vmax.f32 %v2978_v60, 0.0  ;;  %v2981_v32 = vpop.f32.mrb[244].mxu1 }
 0x5a0   : > { %v2982_v54 = vadd.f32 %v2981_v32, %v9598_v11  ;;  %v2983_v5 = vpop.f32.mrb[245].mxu1 }
 0x5a1   : > { %v2984_v18 = vadd.f32 %v2983_v5, %v9603_v31  ;;  %5555 = vmatprep.mubr.f32.mxu0 %v3431_v29 }
 0x5a2   : > { %5556 = vmatmul.mubr.f32.gmra.mrb[50].mxu0 %v3430_v53  ;;  %v3446_v33 = vmax.f32 %v2982_v54, 0.0 }
 0x5a3   : > { %v3447_v59 = vmax.f32 %v2984_v18, 0.0  ;;  %v2987_v58 = vpop.f32.mrb[246].mxu1 }
 0x5a4   : > { %v2988_v9 = vadd.f32 %v2987_v58, %v9598_v11  ;;  %v2989_v15 = vpop.f32.mrb[247].mxu1 }
 0x5a5   : > { %v2990_v61 = vadd.f32 %v2989_v15, %v9603_v31  ;;  %5560 = vmatprep.mubr.f32.mxu0 %v3447_v59 }
 0x5a6   : > { %5561 = vmatmul.mubr.f32.gmra.mrb[52].mxu0 %v3446_v33  ;;  %v3462_v17 = vmax.f32 %v2988_v9, 0.0 }
 0x5a7   : > { %v3463_v62 = vmax.f32 %v2990_v61, 0.0  ;;  %v2993_v46 = vpop.f32.mrb[248].mxu1 }
 0x5a8   : > { %v2994_v38 = vadd.f32 %v2993_v46, %v9598_v11  ;;  %v2995_v20 = vpop.f32.mrb[249].mxu1 }
 0x5a9   : > { %v2996_v39 = vadd.f32 %v2995_v20, %v9603_v31  ;;  %5565 = vmatprep.mubr.f32.mxu0 %v3463_v62 }
 0x5aa   : > { %5566 = vmatmul.mubr.f32.gmra.mrb[54].mxu0 %v3462_v17  ;;  %v3478_v22 = vmax.f32 %v2994_v38, 0.0 }
 0x5ab   : > { %v3479_v0 = vmax.f32 %v2996_v39, 0.0  ;;  %v2999_v21 = vpop.f32.mrb[250].mxu1 }
 0x5ac   : > { %v3000_v57 = vadd.f32 %v2999_v21, %v9598_v11  ;;  %v3001_v8 = vpop.f32.mrb[251].mxu1 }
 0x5ad   : > { %v3002_v36 = vadd.f32 %v3001_v8, %v9603_v31  ;;  %5570 = vmatprep.mubr.f32.mxu0 %v3479_v0 }
 0x5ae   : > { %5571 = vmatmul.mubr.f32.gmra.mrb[56].mxu0 %v3478_v22  ;;  %v3494_v28 = vmax.f32 %v3000_v57, 0.0 }
 0x5af   : > { %v3495_v16 = vmax.f32 %v3002_v36, 0.0  ;;  %v3005_v13 = vpop.f32.mrb[252].mxu1 }
 0x5b0   : > { %v3006_v49 = vadd.f32 %v3005_v13, %v9598_v11  ;;  %v3007_v2 = vpop.f32.mrb[253].mxu1 }
 0x5b1   : > { %v3008_v26 = vadd.f32 %v3007_v2, %v9603_v31  ;;  %5575 = vmatprep.mubr.f32.mxu0 %v3495_v16 }
 0x5b2   : > { %5576 = vmatmul.mubr.f32.gmra.mrb[58].mxu0 %v3494_v28  ;;  %v3510_v24 = vmax.f32 %v3006_v49, 0.0 }
 0x5b3   : > { %v3511_v6 = vmax.f32 %v3008_v26, 0.0  ;;  %v3011_v37 = vpop.f32.mrb[254].mxu1 }
 0x5b4   : > { %v3012_v34 = vadd.f32 %v3011_v37, %v9598_v11  ;;  %v3013_v43 = vpop.f32.mrb[255].mxu1 }
 0x5b5   : > { %v3014_v3 = vadd.f32 %v3013_v43, %v9603_v31  ;;  %5580 = vmatprep.mubr.f32.mxu0 %v3511_v6 }
 0x5b6   : > { %5581 = vmatmul.mubr.f32.gmra.mrb[60].mxu0 %v3510_v24  ;;  %v3526_v27 = vmax.f32 %v3012_v34, 0.0 }
 0x5b7   : > { %v3527_v50 = vmax.f32 %v3014_v3, 0.0 }
 0x5b9   : > { %5585 = vmatprep.mubr.f32.mxu0 %v3527_v50 }
 0x5ba   : > { %5586 = vmatmul.mubr.f32.gmra.mrb[62].mxu0 %v3526_v27 }
 0x611   : > { %v5432_v12 = vpop.f32.mrb[0].mxu0 }
 0x612   : > { %v6671_v63 = vadd.f32 %v9670_v10, %v5432_v12  ;;  %v5434_v7 = vpop.f32.mrb[1].mxu0 }
 0x614   : > { %5591 = vst [vmem:[%s9673_s26] sm:$0xff] %v6671_v63 }
 0x615   : > { %v5437_v11 = vpop.f32.mrb[2].mxu0 }
 0x616   : > { %v6672_v31 = vadd.f32 %v9670_v10, %v5437_v11  ;;  %v5439_v48 = vpop.f32.mrb[3].mxu0 }
 0x618   : > { %5592 = vst [vmem:[%s9673_s26 + $0x8] sm:$0xff] %v6672_v31 }
 0x619   : > { %v5442_v1 = vpop.f32.mrb[4].mxu0 }
 0x61a   : > { %v6673_v45 = vadd.f32 %v9670_v10, %v5442_v1  ;;  %v5444_v40 = vpop.f32.mrb[5].mxu0 }
 0x61c   : > { %5593 = vst [vmem:[%s9673_s26 + $0x10] sm:$0xff] %v6673_v45 }
 0x61d   : > { %v5447_v56 = vpop.f32.mrb[6].mxu0 }
 0x61e   : > { %v6674_v19 = vadd.f32 %v9670_v10, %v5447_v56  ;;  %v5449_v4 = vpop.f32.mrb[7].mxu0 }
 0x620   : > { %5594 = vst [vmem:[%s9673_s26 + $0x18] sm:$0xff] %v6674_v19 }
 0x621   : > { %v5452_v42 = vpop.f32.mrb[8].mxu0 }
 0x622   : > { %v6675_v35 = vadd.f32 %v9670_v10, %v5452_v42  ;;  %v5454_v25 = vpop.f32.mrb[9].mxu0 }
 0x624   : > { %5595 = vst [vmem:[%s9673_s26 + $0x20] sm:$0xff] %v6675_v35 }
 0x625   : > { %v5457_v41 = vpop.f32.mrb[10].mxu0 }
 0x626   : > { %v6676_v51 = vadd.f32 %v9670_v10, %v5457_v41  ;;  %v5459_v30 = vpop.f32.mrb[11].mxu0 }
 0x628   : > { %5596 = vst [vmem:[%s9673_s26 + $0x28] sm:$0xff] %v6676_v51 }
 0x629   : > { %v5462_v44 = vpop.f32.mrb[12].mxu0 }
 0x62a   : > { %v6677_v52 = vadd.f32 %v9670_v10, %v5462_v44  ;;  %v5464_v23 = vpop.f32.mrb[13].mxu0 }
 0x62c   : > { %5597 = vst [vmem:[%s9673_s26 + $0x30] sm:$0xff] %v6677_v52 }
 0x62d   : > { %v5467_v14 = vpop.f32.mrb[14].mxu0 }
 0x62e   : > { %v6678_v55 = vadd.f32 %v9670_v10, %v5467_v14  ;;  %v5469_v47 = vpop.f32.mrb[15].mxu0 }
 0x630   : > { %5598 = vst [vmem:[%s9673_s26 + $0x38] sm:$0xff] %v6678_v55 }
 0x631   : > { %v5472_v60 = vpop.f32.mrb[16].mxu0 }
 0x632   : > { %v6679_v29 = vadd.f32 %v9670_v10, %v5472_v60  ;;  %v5474_v32 = vpop.f32.mrb[17].mxu0 }
 0x634   : > { %5599 = vst [vmem:[%s9673_s26 + $0x40] sm:$0xff] %v6679_v29 }
 0x635   : > { %v5477_v53 = vpop.f32.mrb[18].mxu0 }
 0x636   : > { %v6680_v54 = vadd.f32 %v9670_v10, %v5477_v53  ;;  %v5479_v5 = vpop.f32.mrb[19].mxu0 }
 0x638   : > { %5600 = vst [vmem:[%s9673_s26 + $0x48] sm:$0xff] %v6680_v54 }
 0x639   : > { %v5482_v18 = vpop.f32.mrb[20].mxu0 }
 0x63a   : > { %v6681_v59 = vadd.f32 %v9670_v10, %v5482_v18  ;;  %v5484_v58 = vpop.f32.mrb[21].mxu0 }
 0x63c   : > { %5601 = vst [vmem:[%s9673_s26 + $0x50] sm:$0xff] %v6681_v59 }
 0x63d   : > { %v5487_v33 = vpop.f32.mrb[22].mxu0 }
 0x63e   : > { %v6682_v9 = vadd.f32 %v9670_v10, %v5487_v33  ;;  %v5489_v15 = vpop.f32.mrb[23].mxu0 }
 0x640   : > { %5602 = vst [vmem:[%s9673_s26 + $0x58] sm:$0xff] %v6682_v9 }
 0x641   : > { %v5492_v61 = vpop.f32.mrb[24].mxu0 }
 0x642   : > { %v6683_v62 = vadd.f32 %v9670_v10, %v5492_v61  ;;  %v5494_v46 = vpop.f32.mrb[25].mxu0 }
 0x644   : > { %5603 = vst [vmem:[%s9673_s26 + $0x60] sm:$0xff] %v6683_v62 }
 0x645   : > { %v5497_v17 = vpop.f32.mrb[26].mxu0 }
 0x646   : > { %v6684_v38 = vadd.f32 %v9670_v10, %v5497_v17  ;;  %v5499_v20 = vpop.f32.mrb[27].mxu0 }
 0x648   : > { %5604 = vst [vmem:[%s9673_s26 + $0x68] sm:$0xff] %v6684_v38 }
 0x649   : > { %v5502_v39 = vpop.f32.mrb[28].mxu0 }
 0x64a   : > { %v6685_v0 = vadd.f32 %v9670_v10, %v5502_v39  ;;  %v5504_v21 = vpop.f32.mrb[29].mxu0 }
 0x64c   : > { %5605 = vst [vmem:[%s9673_s26 + $0x70] sm:$0xff] %v6685_v0 }
 0x64d   : > { %v5507_v22 = vpop.f32.mrb[30].mxu0 }
 0x64e   : > { %v6686_v57 = vadd.f32 %v9670_v10, %v5507_v22  ;;  %v5509_v8 = vpop.f32.mrb[31].mxu0 }
 0x650   : > { %5606 = vst [vmem:[%s9673_s26 + $0x78] sm:$0xff] %v6686_v57 }
 0x651   : > { %v5512_v36 = vpop.f32.mrb[32].mxu0 }
 0x652   : > { %v6687_v16 = vadd.f32 %v9670_v10, %v5512_v36  ;;  %v5514_v13 = vpop.f32.mrb[33].mxu0 }
 0x654   : > { %5607 = vst [vmem:[%s9673_s26 + $0x80] sm:$0xff] %v6687_v16 }
 0x655   : > { %v5517_v28 = vpop.f32.mrb[34].mxu0 }
 0x656   : > { %v6688_v49 = vadd.f32 %v9670_v10, %v5517_v28  ;;  %v5519_v2 = vpop.f32.mrb[35].mxu0 }
 0x658   : > { %5608 = vst [vmem:[%s9673_s26 + $0x88] sm:$0xff] %v6688_v49 }
 0x659   : > { %v5522_v26 = vpop.f32.mrb[36].mxu0 }
 0x65a   : > { %v6689_v6 = vadd.f32 %v9670_v10, %v5522_v26  ;;  %v5524_v37 = vpop.f32.mrb[37].mxu0 }
 0x65c   : > { %5609 = vst [vmem:[%s9673_s26 + $0x90] sm:$0xff] %v6689_v6 }
 0x65d   : > { %v5527_v24 = vpop.f32.mrb[38].mxu0 }
 0x65e   : > { %v6690_v34 = vadd.f32 %v9670_v10, %v5527_v24  ;;  %v5529_v43 = vpop.f32.mrb[39].mxu0 }
 0x660   : > { %5610 = vst [vmem:[%s9673_s26 + $0x98] sm:$0xff] %v6690_v34 }
 0x661   : > { %v5532_v3 = vpop.f32.mrb[40].mxu0 }
 0x662   : > { %v6691_v50 = vadd.f32 %v9670_v10, %v5532_v3  ;;  %v5534_v27 = vpop.f32.mrb[41].mxu0 }
 0x664   : > { %5611 = vst [vmem:[%s9673_s26 + $0xa0] sm:$0xff] %v6691_v50 }
 0x665   : > { %v5537_v12 = vpop.f32.mrb[42].mxu0 }
 0x666   : > { %v6692_v63 = vadd.f32 %v9670_v10, %v5537_v12  ;;  %v5539_v7 = vpop.f32.mrb[43].mxu0 }
 0x668   : > { %5612 = vst [vmem:[%s9673_s26 + $0xa8] sm:$0xff] %v6692_v63 }
 0x669   : > { %v5542_v11 = vpop.f32.mrb[44].mxu0 }
 0x66a   : > { %v6693_v31 = vadd.f32 %v9670_v10, %v5542_v11  ;;  %v5544_v48 = vpop.f32.mrb[45].mxu0 }
 0x66c   : > { %5613 = vst [vmem:[%s9673_s26 + $0xb0] sm:$0xff] %v6693_v31 }
 0x66d   : > { %v5547_v1 = vpop.f32.mrb[46].mxu0 }
 0x66e   : > { %v6694_v45 = vadd.f32 %v9670_v10, %v5547_v1  ;;  %v5549_v40 = vpop.f32.mrb[47].mxu0 }
 0x670   : > { %5614 = vst [vmem:[%s9673_s26 + $0xb8] sm:$0xff] %v6694_v45 }
 0x671   : > { %v5552_v56 = vpop.f32.mrb[48].mxu0 }
 0x672   : > { %v6695_v19 = vadd.f32 %v9670_v10, %v5552_v56  ;;  %v5554_v4 = vpop.f32.mrb[49].mxu0 }
 0x674   : > { %5615 = vst [vmem:[%s9673_s26 + $0xc0] sm:$0xff] %v6695_v19 }
 0x675   : > { %v5557_v42 = vpop.f32.mrb[50].mxu0 }
 0x676   : > { %v6696_v35 = vadd.f32 %v9670_v10, %v5557_v42  ;;  %v5559_v25 = vpop.f32.mrb[51].mxu0 }
 0x678   : > { %5616 = vst [vmem:[%s9673_s26 + $0xc8] sm:$0xff] %v6696_v35 }
 0x679   : > { %v5562_v41 = vpop.f32.mrb[52].mxu0 }
 0x67a   : > { %v6697_v51 = vadd.f32 %v9670_v10, %v5562_v41  ;;  %v5564_v30 = vpop.f32.mrb[53].mxu0 }
 0x67c   : > { %5617 = vst [vmem:[%s9673_s26 + $0xd0] sm:$0xff] %v6697_v51 }
 0x67d   : > { %v5567_v44 = vpop.f32.mrb[54].mxu0 }
 0x67e   : > { %v6698_v52 = vadd.f32 %v9670_v10, %v5567_v44  ;;  %v5569_v23 = vpop.f32.mrb[55].mxu0 }
 0x680   : > { %5618 = vst [vmem:[%s9673_s26 + $0xd8] sm:$0xff] %v6698_v52 }
 0x681   : > { %v5572_v14 = vpop.f32.mrb[56].mxu0 }
 0x682   : > { %v6699_v55 = vadd.f32 %v9670_v10, %v5572_v14  ;;  %v5574_v47 = vpop.f32.mrb[57].mxu0 }
 0x684   : > { %5619 = vst [vmem:[%s9673_s26 + $0xe0] sm:$0xff] %v6699_v55 }
 0x685   : > { %v5577_v60 = vpop.f32.mrb[58].mxu0 }
 0x686   : > { %v6700_v29 = vadd.f32 %v9670_v10, %v5577_v60  ;;  %v5579_v32 = vpop.f32.mrb[59].mxu0 }
 0x688   : > { %5620 = vst [vmem:[%s9673_s26 + $0xe8] sm:$0xff] %v6700_v29 }
 0x689   : > { %v5582_v53 = vpop.f32.mrb[60].mxu0 }
 0x68a   : > { %v6701_v54 = vadd.f32 %v9670_v10, %v5582_v53  ;;  %v5584_v5 = vpop.f32.mrb[61].mxu0 }
 0x68c   : > { %5621 = vst [vmem:[%s9673_s26 + $0xf0] sm:$0xff] %v6701_v54 }
 0x68d   : > { %v5587_v18 = vpop.f32.mrb[62].mxu0 }
 0x68e   : > { %v6702_v59 = vadd.f32 %v9670_v10, %v5587_v18  ;;  %v5589_v58 = vpop.f32.mrb[63].mxu0 }
 0x690   : > { %5622 = vst [vmem:[%s9673_s26 + $0xf8] sm:$0xff] %v6702_v59 }
 0x691   : > { %7729 = shalt.err (!%p7726_p13)
}
 0x692   : > { %s7730_s15 = scalar_lea.hbm %s9741_s16, 4096  ;;  %s7734_s7 = scalar_lea.hbm %s9794_s5, 8192 }
 0x693   : > { %p7731_p9 = scmp.ne.s32.totalorder %s9741_s16, %s7730_s15  ;;  %p7735_p6 = scmp.lt.u32.totalorder %s9741_s16, %s9794_s5 }
 0x694   : > { %p7736_p10 = scmp.lt.u32.totalorder %s7734_s7, %s7730_s15  ;;  %p7738_p8 = scmp.lt.u32.totalorder %s7730_s15, %s9741_s16 }
 0x695   : > { %p7732_p0 = pnand %p7731_p9, %p7996_p5 }
 0x696   : > { %p7737_p4 = por %p7736_p10, %p7735_p6 }
 0x697   : > { %p7733_p11 = pneg %p7732_p0 }
 0x698   : > { %p7739_p3 = por %p7738_p8, %p7737_p4 }
 0x69a   : > { %p7740_p7 = pnand %p7739_p3, %p7733_p11 }
 0x69c   : > { %7743 = shalt.err (!%p7740_p7)
}
 0x69d   : > { %s7804_s9 = smov 128   ;;  %s7805_s13 = smov 8  }
 0x69e   : > { %7169 = dma.vmem_to_hbm [thread:$0]  (%p7996_p5), %s9743_s11, 4096, %s9741_s16, %s5624_s30, %s7804_s9, %s7804_s9, %s7805_s13  }
 0x69f PF: > { %s5652_s27 = sand.u32 1, %s7778_s18   ;;  %p9931_p12 = scmp.ne.s32.totalorder %s9841_s25, 0 }
 0x6a0   : > { %p9932_p2 = scmp.ge.s32.totalorder %s7790_s21, 2  ;;  %s5653_s8 = scalar_lea.sflag [#allocation4], %s5652_s27 }
 0x6a2   : > { %p7189_p1 = pnand %p9932_p2, %p9931_p12 }
 0x6a4   : > { %7773 = dma.done.wait (!%p7189_p1), %s5653_s8, 4096  }
 0x6a5   : > { %7775 = vsyncadd (!%p7189_p1), %s5653_s8, 4294963200  ;;  %p20_p13 = scmp.ge.s32.totalorder %s7982_s12, 4   ;;  %s9933_s18 = smov %s7782_s19 }
 0x6a6   : > { %s9934_s19 = smov %s7786_s20  ;;  %s9935_s20 = smov %s7992_s17 }
 0x6a7   : > { %s9936_s21 = smov %s7982_s12  ;;  %22 = sbr.rel (!%p20_p13) target bundleno = 7 (0x7), region = 101 }
 0x6ae   :  { %5658 = vsyncpa [#allocation3], 1 }
 0x6af   :  { %5660 = vsyncpa [#allocation3 + $0x1], 1 }
 0x6b0   :  { %5661 = vsyncpa [#allocation6], 1 }
 0x6b1   :  { %5662 = vsyncpa [#allocation9], 1 }
 0x6b2   :  { %5663 = vsyncpa [#allocation4], 1 }
 0x6b3   :  { %5665 = vsyncpa [#allocation4 + $0x1], 1 }

</bundles_post_ra>
